<compile_context>
chip_gen: v5e
topology: v5e:2x2
jax: 0.10.0
libtpu: 0.0.40
codegen_flags: <defaults>
</compile_context>

<pallas_src>
import functools

import jax
import jax.numpy as jnp
from jax import lax
from jax.experimental import pallas as pl
from jax.experimental.pallas import tpu as pltpu


# --------------------------------- helpers -----------------------------------
def _round_up(x, m):
    return ((x + m - 1) // m) * m


def _vmem_limit_bytes(L, Lr, Tc, Bp, Dp, Hp, Op, mxu_dtype):
    """Explicit VMEM budget: resident weights (single-buffered), streamed x/out
    (double-buffered) and all scratch, with headroom for compiler temporaries."""
    w = jnp.dtype(mxu_dtype).itemsize
    weights = ((Dp * 4 * Hp + Lr * Hp * 4 * Hp + L * Hp * 4 * Hp + Hp * Op) * w
               + (L * 4 * Hp + Op) * 4)
    streamed = 2 * Tc * Bp * Dp * w + 2 * Bp * Op * 4
    scratch = (2 * L * Bp * Hp * 4            # h / c state (f32)
               + Tc * Bp * Hp * w             # inter-layer chunk buffer
               + Tc * Bp * 4 * Hp * 4)        # gate slab (f32)
    need = weights + streamed + scratch
    # 1.5x headroom; keep under v7x's 64 MiB physical VMEM.
    return int(min(max(need + need // 2 + (2 << 20), 32 << 20), 64 << 20))


# ------------------------------ fused LSTM kernel -----------------------------
def _fused_lstm_kernel(seq_len,              # static (bound via functools.partial)
                       x_ref, wih0_ref, wih_ref, whh_ref, b_ref, wfc_ref, bfc_ref,
                       out_ref,
                       h_scr, c_scr, buf_scr, gx_scr):
    """One grid step = one chunk of Tc timesteps through ALL LSTM layers.

    x_ref    : (Tc, Bp, Dp)       time-major, padded, MXU-dtype input chunk
    wih0_ref : (Dp, 4*Hp)         layer-0 W_ih^T (per-gate zero padded)
    wih_ref  : (max(L-1,1), Hp, 4*Hp)  W_ih^T for layers >= 1
    whh_ref  : (L, Hp, 4*Hp)      W_hh^T stack
    b_ref    : (L, 1, 4*Hp)       fused b_ih + b_hh, f32
    wfc_ref  : (Hp, Op)           FC weight^T (padded)
    bfc_ref  : (1, Op)            FC bias, f32
    out_ref  : (Bp, Op)           written only on the last chunk (lane-dense)
    h_scr,c_scr : (L, Bp, Hp) f32 recurrent state, persists across chunks
    buf_scr  : (Tc, Bp, Hp)       inter-layer activation chunk (VMEM only)
    gx_scr   : (Tc, Bp, 4*Hp) f32 hoisted gate slab for the current layer/chunk
    """
    chunk = pl.program_id(0)
    L, Bp, Hp = h_scr.shape
    Tc = gx_scr.shape[0]
    mxu_dtype = whh_ref.dtype
    needs_mask = (seq_len % Tc) != 0          # static: last chunk has padded steps

    @pl.when(chunk == 0)
    def _init():
        # Zero init is what keeps the padded hidden lanes exactly 0 for the whole
        # run (gates = 0 -> i=f=o=0.5, g=0 -> c stays 0 -> h stays 0).  This
        # relies on bias padding being zero in pack_params; do not change either
        # side independently.
        h_scr[...] = jnp.zeros_like(h_scr)
        c_scr[...] = jnp.zeros_like(c_scr)

    h_last = None
    for l in range(L):                        # L is small & static
        # ---- hoisted input projection: one (Tc*Bp, K) x (K, 4Hp) MXU matmul per
        #      chunk/layer, streamed straight into the gx scratch (f32 slab).
        if l == 0:
            src = x_ref[...]                  # (Tc, Bp, Dp), already MXU dtype
            w_in = wih0_ref[...]              # (Dp, 4Hp)
        else:
            src = buf_scr[...]                # (Tc, Bp, Hp), MXU dtype
            w_in = wih_ref[l - 1]             # (Hp, 4Hp)
        K = src.shape[-1]
        gx = jnp.dot(src.reshape(Tc * Bp, K), w_in,
                     preferred_element_type=jnp.float32)
        gx_scr[...] = gx.reshape(Tc, Bp, 4 * Hp) + b_ref[l]

        w_hh = whh_ref[l]                     # (Hp, 4Hp), loop-invariant load
        write_next = (l < L - 1)

        def step(t, carry):
            h, c = carry
            gates = gx_scr[t] + jnp.dot(h.astype(mxu_dtype), w_hh,
                                        preferred_element_type=jnp.float32)
            # lane-aligned (Hp % 128 == 0) gate slices: i, f, g, o
            i_g = jax.nn.sigmoid(gates[:, 0 * Hp:1 * Hp])
            f_g = jax.nn.sigmoid(gates[:, 1 * Hp:2 * Hp])
            g_g = jnp.tanh(gates[:, 2 * Hp:3 * Hp])
            o_g = jax.nn.sigmoid(gates[:, 3 * Hp:4 * Hp])
            c_new = f_g * c + i_g * g_g
            h_new = o_g * jnp.tanh(c_new)
            if needs_mask:
                # Skip the state update for padded timesteps of the last chunk.
                valid = (chunk * Tc + t) < seq_len
                h_new = jnp.where(valid, h_new, h)
                c_new = jnp.where(valid, c_new, c)
            if write_next:                    # feed the next layer via VMEM only
                buf_scr[t] = h_new.astype(buf_scr.dtype)
            return (h_new, c_new)

        h_last, c_last = lax.fori_loop(0, Tc, step, (h_scr[l], c_scr[l]),
                                       unroll=True if Tc <= 8 else False)
        h_scr[l] = h_last
        c_scr[l] = c_last

    # ---- fused FC head: fc(out[:, -1, :]) on the last chunk only
    @pl.when(chunk == pl.num_programs(0) - 1)
    def _fc():
        out_ref[...] = (jnp.dot(h_last.astype(mxu_dtype), wfc_ref[...],
                                preferred_element_type=jnp.float32)
                        + bfc_ref[...])


# ------------------------------- parameters -----------------------------------
def init_params(key, input_dim, hidden_dim, layer_dim, output_dim):
    """Same parameterization as torch.nn.LSTM + nn.Linear."""
    params = {"lstm": []}
    k = 1.0 / float(hidden_dim) ** 0.5
    for layer in range(layer_dim):
        d_in = input_dim if layer == 0 else hidden_dim
        key, k1, k2, k3, k4 = jax.random.split(key, 5)
        params["lstm"].append({
            "w_ih": jax.random.uniform(k1, (4 * hidden_dim, d_in), jnp.float32, -k, k),
            "w_hh": jax.random.uniform(k2, (4 * hidden_dim, hidden_dim), jnp.float32, -k, k),
            "b_ih": jax.random.uniform(k3, (4 * hidden_dim,), jnp.float32, -k, k),
            "b_hh": jax.random.uniform(k4, (4 * hidden_dim,), jnp.float32, -k, k),
        })
    key, k1, k2 = jax.random.split(key, 3)
    params["fc_w"] = jax.random.uniform(k1, (output_dim, hidden_dim), jnp.float32, -k, k)
    params["fc_b"] = jax.random.uniform(k2, (output_dim,), jnp.float32, -k, k)
    return params


def pack_params(params, mxu_dtype=jnp.bfloat16):
    """One-time weight prep: transpose, fuse biases, pad per-gate to TPU tiles,
    cast MXU operands.  bf16 weights are safe on v5e/v6e/v7x (MXU takes bf16 on
    all of them); gate/state math stays f32 inside the kernel."""
    D = params["lstm"][0]["w_ih"].shape[1]
    H = params["lstm"][0]["w_hh"].shape[1]
    L = len(params["lstm"])
    O = params["fc_w"].shape[0]
    Hp = _round_up(H, 128)
    Dp = _round_up(D, 128)
    Op = _round_up(O, 128)

    def pad_gates(w, in_dim, in_pad):
        # (4H, in) PyTorch layout -> (in_pad, 4*Hp) with [i|f|g|o] gate blocks.
        # Padding is ZERO (required for the padded-lane invariance in the kernel).
        w4 = w.reshape(4, H, in_dim)
        w4 = jnp.pad(w4, ((0, 0), (0, Hp - H), (0, in_pad - in_dim)))
        return jnp.transpose(w4, (2, 0, 1)).reshape(in_pad, 4 * Hp)

    wih0 = pad_gates(params["lstm"][0]["w_ih"], D, Dp)       # x padded only to Dp
    wih_rest, whh, bias = [], [], []
    for li, layer in enumerate(params["lstm"]):
        whh.append(pad_gates(layer["w_hh"], H, Hp))
        b = (layer["b_ih"] + layer["b_hh"]).reshape(4, H)
        bias.append(jnp.pad(b, ((0, 0), (0, Hp - H))).reshape(1, 4 * Hp))
        if li >= 1:
            wih_rest.append(pad_gates(layer["w_ih"], H, Hp))
    if not wih_rest:                                         # L == 1: dummy, never read
        wih_rest.append(jnp.zeros((Hp, 4 * Hp), jnp.float32))

    wfc = jnp.pad(jnp.transpose(params["fc_w"]), ((0, Hp - H), (0, Op - O)))
    bfc = jnp.pad(params["fc_b"], (0, Op - O)).reshape(1, Op)

    return {
        "wih0": wih0.astype(mxu_dtype),                      # (Dp, 4Hp)
        "wih": jnp.stack(wih_rest).astype(mxu_dtype),        # (max(L-1,1), Hp, 4Hp)
        "whh": jnp.stack(whh).astype(mxu_dtype),             # (L, Hp, 4Hp)
        "b":   jnp.stack(bias).astype(jnp.float32),          # (L, 1, 4Hp)
        "wfc": wfc.astype(mxu_dtype),                        # (Hp, Op)
        "bfc": bfc.astype(jnp.float32),                      # (1, Op)
        "dims": (D, H, L, O, Dp, Hp, Op),
    }


# -------------------------------- forward pass --------------------------------
def lstm_forward(packed, x_btd, *, max_time_chunk=32):
    """x_btd: (B, T, D) exactly as the PyTorch batch_first=True input."""
    D, H, L, O, Dp, Hp, Op = packed["dims"]
    B, T, _ = x_btd.shape
    Bp = _round_up(B, 8)
    Tc = min(max_time_chunk, T)
    T_pad = _round_up(T, Tc)                  # padded steps are masked in-kernel
    n_chunks = T_pad // Tc
    Lr = max(L - 1, 1)
    mxu_dtype = packed["whh"].dtype

    # Pad batch->sublane / features->lane / time->chunk multiple, cast to the MXU
    # dtype (halves the only streamed HBM operand on the bf16 path) and go
    # time-major.  pad + cast + transpose fuse into one XLA relayout; with all
    # layers + FC fused in one kernel this is the only HBM relayout of the
    # whole forward.
    x = jnp.pad(x_btd.astype(mxu_dtype),
                ((0, Bp - B), (0, T_pad - T), (0, Dp - D)))
    x = jnp.transpose(x, (1, 0, 2))           # (T_pad, Bp, Dp)

    # Constant-index operands: never re-fetched -> single pipeline buffer.
    def _const_spec(shape):
        return pl.BlockSpec(shape, lambda c, _s=shape: (0,) * len(_s),
                            pipeline_mode=pl.Buffered(1))

    kernel = functools.partial(_fused_lstm_kernel, T)
    vmem_limit = _vmem_limit_bytes(L, Lr, Tc, Bp, Dp, Hp, Op, mxu_dtype)

    out_p = pl.pallas_call(
        kernel,
        out_shape=jax.ShapeDtypeStruct((Bp, Op), jnp.float32),
        grid=(n_chunks,),
        in_specs=[
            pl.BlockSpec((Tc, Bp, Dp), lambda c: (c, 0, 0)),   # streamed x chunk
            _const_spec((Dp, 4 * Hp)),                         # layer-0 W_ih^T
            _const_spec((Lr, Hp, 4 * Hp)),                     # W_ih^T layers >= 1
            _const_spec((L, Hp, 4 * Hp)),                      # W_hh^T stack
            _const_spec((L, 1, 4 * Hp)),                       # fused bias
            _const_spec((Hp, Op)),                             # FC weight^T
            _const_spec((1, Op)),                              # FC bias
        ],
        out_specs=pl.BlockSpec((Bp, Op), lambda c: (0, 0)),    # lane-dense store
        scratch_shapes=[
            pltpu.VMEM((L, Bp, Hp), jnp.float32),      # h state (all layers)
            pltpu.VMEM((L, Bp, Hp), jnp.float32),      # c state (all layers)
            pltpu.VMEM((Tc, Bp, Hp), mxu_dtype),       # inter-layer chunk buffer
            pltpu.VMEM((Tc, Bp, 4 * Hp), jnp.float32), # hoisted gate slab
        ],
        compiler_params=pltpu.CompilerParams(
            dimension_semantics=("arbitrary",),        # recurrence -> sequential
            vmem_limit_bytes=vmem_limit,
        ),
    )(x, packed["wih0"], packed["wih"], packed["whh"], packed["b"],
      packed["wfc"], packed["bfc"])

    return out_p[:B, :O]


# ------------------------------ pure-JAX reference -----------------------------
def lstm_forward_ref(params, x_btd):
    B = x_btd.shape[0]
    x = x_btd
    for layer in params["lstm"]:
        H = layer["w_hh"].shape[1]
        h = jnp.zeros((B, H), jnp.float32)
        c = jnp.zeros((B, H), jnp.float32)
        outs = []
        for t in range(x.shape[1]):
            gates = (x[:, t, :] @ layer["w_ih"].T + layer["b_ih"]
                     + h @ layer["w_hh"].T + layer["b_hh"])
            i = jax.nn.sigmoid(gates[:, 0 * H:1 * H])
            f = jax.nn.sigmoid(gates[:, 1 * H:2 * H])
            g = jnp.tanh(gates[:, 2 * H:3 * H])
            o = jax.nn.sigmoid(gates[:, 3 * H:4 * H])
            c = f * c + i * g
            h = o * jnp.tanh(c)
            outs.append(h)
        x = jnp.stack(outs, axis=1)
    return x[:, -1, :] @ params["fc_w"].T + params["fc_b"]


if __name__ == "__main__":
    B, T, D, H, L, O = 2, 8, 16, 32, 2, 4

    key = jax.random.PRNGKey(0)
    kx, kp = jax.random.split(key)
    x = jax.random.normal(kx, (B, T, D), jnp.float32)
    params = init_params(kp, D, H, L, O)

    ref = lstm_forward_ref(params, x)

    # f32 MXU path (matches reference tightly)
    out_f32 = lstm_forward(pack_params(params, jnp.float32), x)
    jax.block_until_ready(out_f32)
    assert out_f32.shape == (B, O)
    assert jnp.allclose(out_f32, ref, atol=2e-3, rtol=2e-3)

    # bf16 weight/activation-matmul path (valid on v5e/v6e/v7x); state + all
    # elementwise gate math stay f32.
    out_bf16 = lstm_forward(pack_params(params, jnp.bfloat16), x)
    jax.block_until_ready(out_bf16)
    assert jnp.allclose(out_bf16, ref, atol=5e-2, rtol=5e-2)

    # Non-dividing T exercises the padded-time / masked-update multi-chunk path
    # (Tc=4 -> 3 chunks, last chunk has one masked step).
    T2 = 11
    x2 = jax.random.normal(jax.random.PRNGKey(1), (B, T2, D), jnp.float32)
    ref2 = lstm_forward_ref(params, x2)
    out2 = lstm_forward(pack_params(params, jnp.float32), x2, max_time_chunk=4)
    jax.block_until_ready(out2)
    assert jnp.allclose(out2, ref2, atol=2e-3, rtol=2e-3)

    print("KERNEL_OK")
</pallas_src>

<mosaic_0001>
module attributes {stable_mosaic.version = 11 : i64} {
  func.func @_fused_lstm_kernel(%arg0: i32, %arg1: memref<8x8x128xf32, #tpu.memory_space<vmem>>, %arg2: memref<128x512xf32, #tpu.memory_space<vmem>>, %arg3: memref<1x128x512xf32, #tpu.memory_space<vmem>>, %arg4: memref<2x128x512xf32, #tpu.memory_space<vmem>>, %arg5: memref<2x1x512xf32, #tpu.memory_space<vmem>>, %arg6: memref<128x128xf32, #tpu.memory_space<vmem>>, %arg7: memref<1x128xf32, #tpu.memory_space<vmem>>, %arg8: memref<8x128xf32, #tpu.memory_space<vmem>>, %arg9: memref<2x8x128xf32, #tpu.memory_space<vmem>>, %arg10: memref<2x8x128xf32, #tpu.memory_space<vmem>>, %arg11: memref<8x8x128xf32, #tpu.memory_space<vmem>>, %arg12: memref<8x8x512xf32, #tpu.memory_space<vmem>>) attributes {dimension_semantics = [#tpu.dimension_semantics<arbitrary>], iteration_bounds = array<i64: 1>, scalar_prefetch = 0 : i64, scratch_operands = 4 : i64, tpu.core_type = #tpu.core_type<tc>, window_params = [{transform_indices = @transform_0, window_bounds = array<i64: 8, 8, 128>}, {pipeline_mode = #tpu.pipeline_mode<synchronous>, transform_indices = @transform_1, window_bounds = array<i64: 128, 512>}, {pipeline_mode = #tpu.pipeline_mode<synchronous>, transform_indices = @transform_2, window_bounds = array<i64: 1, 128, 512>}, {pipeline_mode = #tpu.pipeline_mode<synchronous>, transform_indices = @transform_3, window_bounds = array<i64: 2, 128, 512>}, {pipeline_mode = #tpu.pipeline_mode<synchronous>, transform_indices = @transform_4, window_bounds = array<i64: 2, 1, 512>}, {pipeline_mode = #tpu.pipeline_mode<synchronous>, transform_indices = @transform_5, window_bounds = array<i64: 128, 128>}, {pipeline_mode = #tpu.pipeline_mode<synchronous>, transform_indices = @transform_6, window_bounds = array<i64: 1, 128>}, {pipeline_mode = #tpu.pipeline_mode<synchronous>, transform_indices = @transform_7, window_bounds = array<i64: 8, 128>}]} {
    %c0_i32 = arith.constant 0 : i32
    %0 = arith.cmpi eq, %arg0, %c0_i32 : i32
    %1 = arith.extui %0 : i1 to i32
    %c0_i32_0 = arith.constant 0 : i32
    %2 = arith.cmpi ne, %1, %c0_i32_0 : i32
    scf.if %2 {
      %cst_177 = arith.constant 0.000000e+00 : f32
      %565 = vector.broadcast %cst_177 : f32 to vector<2x8x128xf32>
      %c0_178 = arith.constant 0 : index
      %c0_179 = arith.constant 0 : index
      %c0_180 = arith.constant 0 : index
      %566 = vector.load %arg9[%c0_178, %c0_179, %c0_180] : memref<2x8x128xf32, #tpu.memory_space<vmem>>, vector<2x8x128xf32>
      tpu.vector_store %arg9[%c0_178, %c0_179, %c0_180], %565 {strides = array<i32>} : memref<2x8x128xf32, #tpu.memory_space<vmem>>, vector<2x8x128xf32>,
      %cst_181 = arith.constant 0.000000e+00 : f32
      %567 = vector.broadcast %cst_181 : f32 to vector<2x8x128xf32>
      %c0_182 = arith.constant 0 : index
      %c0_183 = arith.constant 0 : index
      %c0_184 = arith.constant 0 : index
      %568 = vector.load %arg10[%c0_182, %c0_183, %c0_184] : memref<2x8x128xf32, #tpu.memory_space<vmem>>, vector<2x8x128xf32>
      tpu.vector_store %arg10[%c0_182, %c0_183, %c0_184], %567 {strides = array<i32>} : memref<2x8x128xf32, #tpu.memory_space<vmem>>, vector<2x8x128xf32>,
    } else {
    }
    %c0 = arith.constant 0 : index
    %c0_1 = arith.constant 0 : index
    %c0_2 = arith.constant 0 : index
    %3 = vector.load %arg1[%c0, %c0_1, %c0_2] : memref<8x8x128xf32, #tpu.memory_space<vmem>>, vector<8x8x128xf32>
    %c0_3 = arith.constant 0 : index
    %c0_4 = arith.constant 0 : index
    %4 = vector.load %arg2[%c0_3, %c0_4] : memref<128x512xf32, #tpu.memory_space<vmem>>, vector<128x512xf32>
    %5 = vector.shape_cast %3 : vector<8x8x128xf32> to vector<64x128xf32>
    %cst = arith.constant dense<0.000000e+00> : vector<64x512xf32>
    %6 = tpu.matmul %5, %4, %cst {dimension_numbers = #tpu.dot_dimension_numbers<[1], [0], [0], [1], [0, 0, 1, 1], [], []>} : vector<64x128xf32>, vector<128x512xf32>, vector<64x512xf32> -> vector<64x512xf32>
    %7 = vector.shape_cast %6 : vector<64x512xf32> to vector<8x8x512xf32>
    %c0_5 = arith.constant 0 : index
    %c0_6 = arith.constant 0 : index
    %c0_7 = arith.constant 0 : index
    %8 = vector.load %arg5[%c0_5, %c0_6, %c0_7] : memref<2x1x512xf32, #tpu.memory_space<vmem>>, vector<1x1x512xf32>
    %9 = vector.shape_cast %8 : vector<1x1x512xf32> to vector<1x512xf32>
    %10 = vector.shape_cast %9 : vector<1x512xf32> to vector<1x1x512xf32>
    %11 = vector.broadcast %10 : vector<1x1x512xf32> to vector<8x8x512xf32>
    %12 = arith.addf %7, %11 : vector<8x8x512xf32>
    %c0_8 = arith.constant 0 : index
    %c0_9 = arith.constant 0 : index
    %c0_10 = arith.constant 0 : index
    %13 = vector.load %arg12[%c0_8, %c0_9, %c0_10] : memref<8x8x512xf32, #tpu.memory_space<vmem>>, vector<8x8x512xf32>
    tpu.vector_store %arg12[%c0_8, %c0_9, %c0_10], %12 {strides = array<i32>} : memref<8x8x512xf32, #tpu.memory_space<vmem>>, vector<8x8x512xf32>,
    %c0_11 = arith.constant 0 : index
    %c0_12 = arith.constant 0 : index
    %c0_13 = arith.constant 0 : index
    %14 = vector.load %arg4[%c0_11, %c0_12, %c0_13] : memref<2x128x512xf32, #tpu.memory_space<vmem>>, vector<1x128x512xf32>
    %15 = vector.shape_cast %14 : vector<1x128x512xf32> to vector<128x512xf32>
    %c0_14 = arith.constant 0 : index
    %c0_15 = arith.constant 0 : index
    %c0_16 = arith.constant 0 : index
    %16 = vector.load %arg9[%c0_14, %c0_15, %c0_16] : memref<2x8x128xf32, #tpu.memory_space<vmem>>, vector<1x8x128xf32>
    %17 = vector.shape_cast %16 : vector<1x8x128xf32> to vector<8x128xf32>
    %c0_17 = arith.constant 0 : index
    %c0_18 = arith.constant 0 : index
    %c0_19 = arith.constant 0 : index
    %18 = vector.load %arg10[%c0_17, %c0_18, %c0_19] : memref<2x8x128xf32, #tpu.memory_space<vmem>>, vector<1x8x128xf32>
    %19 = vector.shape_cast %18 : vector<1x8x128xf32> to vector<8x128xf32>
    %c0_i32_20 = arith.constant 0 : i32
    %20 = arith.index_cast %c0_i32_20 : i32 to index
    %c0_21 = arith.constant 0 : index
    %c0_22 = arith.constant 0 : index
    %21 = vector.load %arg12[%20, %c0_21, %c0_22] : memref<8x8x512xf32, #tpu.memory_space<vmem>>, vector<1x8x512xf32>
    %22 = vector.shape_cast %21 : vector<1x8x512xf32> to vector<8x512xf32>
    %cst_23 = arith.constant dense<0.000000e+00> : vector<8x512xf32>
    %23 = tpu.matmul %17, %15, %cst_23 {dimension_numbers = #tpu.dot_dimension_numbers<[1], [0], [0], [1], [0, 0, 1, 1], [], []>} : vector<8x128xf32>, vector<128x512xf32>, vector<8x512xf32> -> vector<8x512xf32>
    %24 = arith.addf %22, %23 : vector<8x512xf32>
    %25 = vector.extract_strided_slice %24 {offsets = [0, 0], sizes = [8, 128], strides = [1, 1]} : vector<8x512xf32> to vector<8x128xf32>
    %26 = arith.negf %25 : vector<8x128xf32>
    %27 = math.exp %26 : vector<8x128xf32>
    %cst_24 = arith.constant 1.000000e+00 : f32
    %28 = vector.broadcast %cst_24 : f32 to vector<8x128xf32>
    %29 = arith.addf %28, %27 : vector<8x128xf32>
    %30 = arith.divf %28, %29 : vector<8x128xf32>
    %31 = vector.extract_strided_slice %24 {offsets = [0, 128], sizes = [8, 128], strides = [1, 1]} : vector<8x512xf32> to vector<8x128xf32>
    %32 = arith.negf %31 : vector<8x128xf32>
    %33 = math.exp %32 : vector<8x128xf32>
    %cst_25 = arith.constant 1.000000e+00 : f32
    %34 = vector.broadcast %cst_25 : f32 to vector<8x128xf32>
    %35 = arith.addf %34, %33 : vector<8x128xf32>
    %36 = arith.divf %34, %35 : vector<8x128xf32>
    %37 = vector.extract_strided_slice %24 {offsets = [0, 256], sizes = [8, 128], strides = [1, 1]} : vector<8x512xf32> to vector<8x128xf32>
    %38 = math.tanh %37 : vector<8x128xf32>
    %39 = vector.extract_strided_slice %24 {offsets = [0, 384], sizes = [8, 128], strides = [1, 1]} : vector<8x512xf32> to vector<8x128xf32>
    %40 = arith.negf %39 : vector<8x128xf32>
    %41 = math.exp %40 : vector<8x128xf32>
    %cst_26 = arith.constant 1.000000e+00 : f32
    %42 = vector.broadcast %cst_26 : f32 to vector<8x128xf32>
    %43 = arith.addf %42, %41 : vector<8x128xf32>
    %44 = arith.divf %42, %43 : vector<8x128xf32>
    %45 = arith.mulf %36, %19 : vector<8x128xf32>
    %46 = arith.mulf %30, %38 : vector<8x128xf32>
    %47 = arith.addf %45, %46 : vector<8x128xf32>
    %48 = math.tanh %47 : vector<8x128xf32>
    %49 = arith.mulf %44, %48 : vector<8x128xf32>
    %50 = arith.index_cast %c0_i32_20 : i32 to index
    %c0_27 = arith.constant 0 : index
    %c0_28 = arith.constant 0 : index
    %51 = vector.load %arg11[%50, %c0_27, %c0_28] : memref<8x8x128xf32, #tpu.memory_space<vmem>>, vector<1x8x128xf32>
    %52 = vector.shape_cast %51 : vector<1x8x128xf32> to vector<8x128xf32>
    %53 = vector.shape_cast %49 : vector<8x128xf32> to vector<1x8x128xf32>
    tpu.vector_store %arg11[%50, %c0_27, %c0_28], %53 {strides = array<i32>} : memref<8x8x128xf32, #tpu.memory_space<vmem>>, vector<1x8x128xf32>,
    %c1_i32 = arith.constant 1 : i32
    %54 = arith.index_cast %c1_i32 : i32 to index
    %c0_29 = arith.constant 0 : index
    %c0_30 = arith.constant 0 : index
    %55 = vector.load %arg12[%54, %c0_29, %c0_30] : memref<8x8x512xf32, #tpu.memory_space<vmem>>, vector<1x8x512xf32>
    %56 = vector.shape_cast %55 : vector<1x8x512xf32> to vector<8x512xf32>
    %cst_31 = arith.constant dense<0.000000e+00> : vector<8x512xf32>
    %57 = tpu.matmul %49, %15, %cst_31 {dimension_numbers = #tpu.dot_dimension_numbers<[1], [0], [0], [1], [0, 0, 1, 1], [], []>} : vector<8x128xf32>, vector<128x512xf32>, vector<8x512xf32> -> vector<8x512xf32>
    %58 = arith.addf %56, %57 : vector<8x512xf32>
    %59 = vector.extract_strided_slice %58 {offsets = [0, 0], sizes = [8, 128], strides = [1, 1]} : vector<8x512xf32> to vector<8x128xf32>
    %60 = arith.negf %59 : vector<8x128xf32>
    %61 = math.exp %60 : vector<8x128xf32>
    %cst_32 = arith.constant 1.000000e+00 : f32
    %62 = vector.broadcast %cst_32 : f32 to vector<8x128xf32>
    %63 = arith.addf %62, %61 : vector<8x128xf32>
    %64 = arith.divf %62, %63 : vector<8x128xf32>
    %65 = vector.extract_strided_slice %58 {offsets = [0, 128], sizes = [8, 128], strides = [1, 1]} : vector<8x512xf32> to vector<8x128xf32>
    %66 = arith.negf %65 : vector<8x128xf32>
    %67 = math.exp %66 : vector<8x128xf32>
    %cst_33 = arith.constant 1.000000e+00 : f32
    %68 = vector.broadcast %cst_33 : f32 to vector<8x128xf32>
    %69 = arith.addf %68, %67 : vector<8x128xf32>
    %70 = arith.divf %68, %69 : vector<8x128xf32>
    %71 = vector.extract_strided_slice %58 {offsets = [0, 256], sizes = [8, 128], strides = [1, 1]} : vector<8x512xf32> to vector<8x128xf32>
    %72 = math.tanh %71 : vector<8x128xf32>
    %73 = vector.extract_strided_slice %58 {offsets = [0, 384], sizes = [8, 128], strides = [1, 1]} : vector<8x512xf32> to vector<8x128xf32>
    %74 = arith.negf %73 : vector<8x128xf32>
    %75 = math.exp %74 : vector<8x128xf32>
    %cst_34 = arith.constant 1.000000e+00 : f32
    %76 = vector.broadcast %cst_34 : f32 to vector<8x128xf32>
    %77 = arith.addf %76, %75 : vector<8x128xf32>
    %78 = arith.divf %76, %77 : vector<8x128xf32>
    %79 = arith.mulf %70, %47 : vector<8x128xf32>
    %80 = arith.mulf %64, %72 : vector<8x128xf32>
    %81 = arith.addf %79, %80 : vector<8x128xf32>
    %82 = math.tanh %81 : vector<8x128xf32>
    %83 = arith.mulf %78, %82 : vector<8x128xf32>
    %84 = arith.index_cast %c1_i32 : i32 to index
    %c0_35 = arith.constant 0 : index
    %c0_36 = arith.constant 0 : index
    %85 = vector.load %arg11[%84, %c0_35, %c0_36] : memref<8x8x128xf32, #tpu.memory_space<vmem>>, vector<1x8x128xf32>
    %86 = vector.shape_cast %85 : vector<1x8x128xf32> to vector<8x128xf32>
    %87 = vector.shape_cast %83 : vector<8x128xf32> to vector<1x8x128xf32>
    tpu.vector_store %arg11[%84, %c0_35, %c0_36], %87 {strides = array<i32>} : memref<8x8x128xf32, #tpu.memory_space<vmem>>, vector<1x8x128xf32>,
    %c2_i32 = arith.constant 2 : i32
    %88 = arith.index_cast %c2_i32 : i32 to index
    %c0_37 = arith.constant 0 : index
    %c0_38 = arith.constant 0 : index
    %89 = vector.load %arg12[%88, %c0_37, %c0_38] : memref<8x8x512xf32, #tpu.memory_space<vmem>>, vector<1x8x512xf32>
    %90 = vector.shape_cast %89 : vector<1x8x512xf32> to vector<8x512xf32>
    %cst_39 = arith.constant dense<0.000000e+00> : vector<8x512xf32>
    %91 = tpu.matmul %83, %15, %cst_39 {dimension_numbers = #tpu.dot_dimension_numbers<[1], [0], [0], [1], [0, 0, 1, 1], [], []>} : vector<8x128xf32>, vector<128x512xf32>, vector<8x512xf32> -> vector<8x512xf32>
    %92 = arith.addf %90, %91 : vector<8x512xf32>
    %93 = vector.extract_strided_slice %92 {offsets = [0, 0], sizes = [8, 128], strides = [1, 1]} : vector<8x512xf32> to vector<8x128xf32>
    %94 = arith.negf %93 : vector<8x128xf32>
    %95 = math.exp %94 : vector<8x128xf32>
    %cst_40 = arith.constant 1.000000e+00 : f32
    %96 = vector.broadcast %cst_40 : f32 to vector<8x128xf32>
    %97 = arith.addf %96, %95 : vector<8x128xf32>
    %98 = arith.divf %96, %97 : vector<8x128xf32>
    %99 = vector.extract_strided_slice %92 {offsets = [0, 128], sizes = [8, 128], strides = [1, 1]} : vector<8x512xf32> to vector<8x128xf32>
    %100 = arith.negf %99 : vector<8x128xf32>
    %101 = math.exp %100 : vector<8x128xf32>
    %cst_41 = arith.constant 1.000000e+00 : f32
    %102 = vector.broadcast %cst_41 : f32 to vector<8x128xf32>
    %103 = arith.addf %102, %101 : vector<8x128xf32>
    %104 = arith.divf %102, %103 : vector<8x128xf32>
    %105 = vector.extract_strided_slice %92 {offsets = [0, 256], sizes = [8, 128], strides = [1, 1]} : vector<8x512xf32> to vector<8x128xf32>
    %106 = math.tanh %105 : vector<8x128xf32>
    %107 = vector.extract_strided_slice %92 {offsets = [0, 384], sizes = [8, 128], strides = [1, 1]} : vector<8x512xf32> to vector<8x128xf32>
    %108 = arith.negf %107 : vector<8x128xf32>
    %109 = math.exp %108 : vector<8x128xf32>
    %cst_42 = arith.constant 1.000000e+00 : f32
    %110 = vector.broadcast %cst_42 : f32 to vector<8x128xf32>
    %111 = arith.addf %110, %109 : vector<8x128xf32>
    %112 = arith.divf %110, %111 : vector<8x128xf32>
    %113 = arith.mulf %104, %81 : vector<8x128xf32>
    %114 = arith.mulf %98, %106 : vector<8x128xf32>
    %115 = arith.addf %113, %114 : vector<8x128xf32>
    %116 = math.tanh %115 : vector<8x128xf32>
    %117 = arith.mulf %112, %116 : vector<8x128xf32>
    %118 = arith.index_cast %c2_i32 : i32 to index
    %c0_43 = arith.constant 0 : index
    %c0_44 = arith.constant 0 : index
    %119 = vector.load %arg11[%118, %c0_43, %c0_44] : memref<8x8x128xf32, #tpu.memory_space<vmem>>, vector<1x8x128xf32>
    %120 = vector.shape_cast %119 : vector<1x8x128xf32> to vector<8x128xf32>
    %121 = vector.shape_cast %117 : vector<8x128xf32> to vector<1x8x128xf32>
    tpu.vector_store %arg11[%118, %c0_43, %c0_44], %121 {strides = array<i32>} : memref<8x8x128xf32, #tpu.memory_space<vmem>>, vector<1x8x128xf32>,
    %c3_i32 = arith.constant 3 : i32
    %122 = arith.index_cast %c3_i32 : i32 to index
    %c0_45 = arith.constant 0 : index
    %c0_46 = arith.constant 0 : index
    %123 = vector.load %arg12[%122, %c0_45, %c0_46] : memref<8x8x512xf32, #tpu.memory_space<vmem>>, vector<1x8x512xf32>
    %124 = vector.shape_cast %123 : vector<1x8x512xf32> to vector<8x512xf32>
    %cst_47 = arith.constant dense<0.000000e+00> : vector<8x512xf32>
    %125 = tpu.matmul %117, %15, %cst_47 {dimension_numbers = #tpu.dot_dimension_numbers<[1], [0], [0], [1], [0, 0, 1, 1], [], []>} : vector<8x128xf32>, vector<128x512xf32>, vector<8x512xf32> -> vector<8x512xf32>
    %126 = arith.addf %124, %125 : vector<8x512xf32>
    %127 = vector.extract_strided_slice %126 {offsets = [0, 0], sizes = [8, 128], strides = [1, 1]} : vector<8x512xf32> to vector<8x128xf32>
    %128 = arith.negf %127 : vector<8x128xf32>
    %129 = math.exp %128 : vector<8x128xf32>
    %cst_48 = arith.constant 1.000000e+00 : f32
    %130 = vector.broadcast %cst_48 : f32 to vector<8x128xf32>
    %131 = arith.addf %130, %129 : vector<8x128xf32>
    %132 = arith.divf %130, %131 : vector<8x128xf32>
    %133 = vector.extract_strided_slice %126 {offsets = [0, 128], sizes = [8, 128], strides = [1, 1]} : vector<8x512xf32> to vector<8x128xf32>
    %134 = arith.negf %133 : vector<8x128xf32>
    %135 = math.exp %134 : vector<8x128xf32>
    %cst_49 = arith.constant 1.000000e+00 : f32
    %136 = vector.broadcast %cst_49 : f32 to vector<8x128xf32>
    %137 = arith.addf %136, %135 : vector<8x128xf32>
    %138 = arith.divf %136, %137 : vector<8x128xf32>
    %139 = vector.extract_strided_slice %126 {offsets = [0, 256], sizes = [8, 128], strides = [1, 1]} : vector<8x512xf32> to vector<8x128xf32>
    %140 = math.tanh %139 : vector<8x128xf32>
    %141 = vector.extract_strided_slice %126 {offsets = [0, 384], sizes = [8, 128], strides = [1, 1]} : vector<8x512xf32> to vector<8x128xf32>
    %142 = arith.negf %141 : vector<8x128xf32>
    %143 = math.exp %142 : vector<8x128xf32>
    %cst_50 = arith.constant 1.000000e+00 : f32
    %144 = vector.broadcast %cst_50 : f32 to vector<8x128xf32>
    %145 = arith.addf %144, %143 : vector<8x128xf32>
    %146 = arith.divf %144, %145 : vector<8x128xf32>
    %147 = arith.mulf %138, %115 : vector<8x128xf32>
    %148 = arith.mulf %132, %140 : vector<8x128xf32>
    %149 = arith.addf %147, %148 : vector<8x128xf32>
    %150 = math.tanh %149 : vector<8x128xf32>
    %151 = arith.mulf %146, %150 : vector<8x128xf32>
    %152 = arith.index_cast %c3_i32 : i32 to index
    %c0_51 = arith.constant 0 : index
    %c0_52 = arith.constant 0 : index
    %153 = vector.load %arg11[%152, %c0_51, %c0_52] : memref<8x8x128xf32, #tpu.memory_space<vmem>>, vector<1x8x128xf32>
    %154 = vector.shape_cast %153 : vector<1x8x128xf32> to vector<8x128xf32>
    %155 = vector.shape_cast %151 : vector<8x128xf32> to vector<1x8x128xf32>
    tpu.vector_store %arg11[%152, %c0_51, %c0_52], %155 {strides = array<i32>} : memref<8x8x128xf32, #tpu.memory_space<vmem>>, vector<1x8x128xf32>,
    %c4_i32 = arith.constant 4 : i32
    %156 = arith.index_cast %c4_i32 : i32 to index
    %c0_53 = arith.constant 0 : index
    %c0_54 = arith.constant 0 : index
    %157 = vector.load %arg12[%156, %c0_53, %c0_54] : memref<8x8x512xf32, #tpu.memory_space<vmem>>, vector<1x8x512xf32>
    %158 = vector.shape_cast %157 : vector<1x8x512xf32> to vector<8x512xf32>
    %cst_55 = arith.constant dense<0.000000e+00> : vector<8x512xf32>
    %159 = tpu.matmul %151, %15, %cst_55 {dimension_numbers = #tpu.dot_dimension_numbers<[1], [0], [0], [1], [0, 0, 1, 1], [], []>} : vector<8x128xf32>, vector<128x512xf32>, vector<8x512xf32> -> vector<8x512xf32>
    %160 = arith.addf %158, %159 : vector<8x512xf32>
    %161 = vector.extract_strided_slice %160 {offsets = [0, 0], sizes = [8, 128], strides = [1, 1]} : vector<8x512xf32> to vector<8x128xf32>
    %162 = arith.negf %161 : vector<8x128xf32>
    %163 = math.exp %162 : vector<8x128xf32>
    %cst_56 = arith.constant 1.000000e+00 : f32
    %164 = vector.broadcast %cst_56 : f32 to vector<8x128xf32>
    %165 = arith.addf %164, %163 : vector<8x128xf32>
    %166 = arith.divf %164, %165 : vector<8x128xf32>
    %167 = vector.extract_strided_slice %160 {offsets = [0, 128], sizes = [8, 128], strides = [1, 1]} : vector<8x512xf32> to vector<8x128xf32>
    %168 = arith.negf %167 : vector<8x128xf32>
    %169 = math.exp %168 : vector<8x128xf32>
    %cst_57 = arith.constant 1.000000e+00 : f32
    %170 = vector.broadcast %cst_57 : f32 to vector<8x128xf32>
    %171 = arith.addf %170, %169 : vector<8x128xf32>
    %172 = arith.divf %170, %171 : vector<8x128xf32>
    %173 = vector.extract_strided_slice %160 {offsets = [0, 256], sizes = [8, 128], strides = [1, 1]} : vector<8x512xf32> to vector<8x128xf32>
    %174 = math.tanh %173 : vector<8x128xf32>
    %175 = vector.extract_strided_slice %160 {offsets = [0, 384], sizes = [8, 128], strides = [1, 1]} : vector<8x512xf32> to vector<8x128xf32>
    %176 = arith.negf %175 : vector<8x128xf32>
    %177 = math.exp %176 : vector<8x128xf32>
    %cst_58 = arith.constant 1.000000e+00 : f32
    %178 = vector.broadcast %cst_58 : f32 to vector<8x128xf32>
    %179 = arith.addf %178, %177 : vector<8x128xf32>
    %180 = arith.divf %178, %179 : vector<8x128xf32>
    %181 = arith.mulf %172, %149 : vector<8x128xf32>
    %182 = arith.mulf %166, %174 : vector<8x128xf32>
    %183 = arith.addf %181, %182 : vector<8x128xf32>
    %184 = math.tanh %183 : vector<8x128xf32>
    %185 = arith.mulf %180, %184 : vector<8x128xf32>
    %186 = arith.index_cast %c4_i32 : i32 to index
    %c0_59 = arith.constant 0 : index
    %c0_60 = arith.constant 0 : index
    %187 = vector.load %arg11[%186, %c0_59, %c0_60] : memref<8x8x128xf32, #tpu.memory_space<vmem>>, vector<1x8x128xf32>
    %188 = vector.shape_cast %187 : vector<1x8x128xf32> to vector<8x128xf32>
    %189 = vector.shape_cast %185 : vector<8x128xf32> to vector<1x8x128xf32>
    tpu.vector_store %arg11[%186, %c0_59, %c0_60], %189 {strides = array<i32>} : memref<8x8x128xf32, #tpu.memory_space<vmem>>, vector<1x8x128xf32>,
    %c5_i32 = arith.constant 5 : i32
    %190 = arith.index_cast %c5_i32 : i32 to index
    %c0_61 = arith.constant 0 : index
    %c0_62 = arith.constant 0 : index
    %191 = vector.load %arg12[%190, %c0_61, %c0_62] : memref<8x8x512xf32, #tpu.memory_space<vmem>>, vector<1x8x512xf32>
    %192 = vector.shape_cast %191 : vector<1x8x512xf32> to vector<8x512xf32>
    %cst_63 = arith.constant dense<0.000000e+00> : vector<8x512xf32>
    %193 = tpu.matmul %185, %15, %cst_63 {dimension_numbers = #tpu.dot_dimension_numbers<[1], [0], [0], [1], [0, 0, 1, 1], [], []>} : vector<8x128xf32>, vector<128x512xf32>, vector<8x512xf32> -> vector<8x512xf32>
    %194 = arith.addf %192, %193 : vector<8x512xf32>
    %195 = vector.extract_strided_slice %194 {offsets = [0, 0], sizes = [8, 128], strides = [1, 1]} : vector<8x512xf32> to vector<8x128xf32>
    %196 = arith.negf %195 : vector<8x128xf32>
    %197 = math.exp %196 : vector<8x128xf32>
    %cst_64 = arith.constant 1.000000e+00 : f32
    %198 = vector.broadcast %cst_64 : f32 to vector<8x128xf32>
    %199 = arith.addf %198, %197 : vector<8x128xf32>
    %200 = arith.divf %198, %199 : vector<8x128xf32>
    %201 = vector.extract_strided_slice %194 {offsets = [0, 128], sizes = [8, 128], strides = [1, 1]} : vector<8x512xf32> to vector<8x128xf32>
    %202 = arith.negf %201 : vector<8x128xf32>
    %203 = math.exp %202 : vector<8x128xf32>
    %cst_65 = arith.constant 1.000000e+00 : f32
    %204 = vector.broadcast %cst_65 : f32 to vector<8x128xf32>
    %205 = arith.addf %204, %203 : vector<8x128xf32>
    %206 = arith.divf %204, %205 : vector<8x128xf32>
    %207 = vector.extract_strided_slice %194 {offsets = [0, 256], sizes = [8, 128], strides = [1, 1]} : vector<8x512xf32> to vector<8x128xf32>
    %208 = math.tanh %207 : vector<8x128xf32>
    %209 = vector.extract_strided_slice %194 {offsets = [0, 384], sizes = [8, 128], strides = [1, 1]} : vector<8x512xf32> to vector<8x128xf32>
    %210 = arith.negf %209 : vector<8x128xf32>
    %211 = math.exp %210 : vector<8x128xf32>
    %cst_66 = arith.constant 1.000000e+00 : f32
    %212 = vector.broadcast %cst_66 : f32 to vector<8x128xf32>
    %213 = arith.addf %212, %211 : vector<8x128xf32>
    %214 = arith.divf %212, %213 : vector<8x128xf32>
    %215 = arith.mulf %206, %183 : vector<8x128xf32>
    %216 = arith.mulf %200, %208 : vector<8x128xf32>
    %217 = arith.addf %215, %216 : vector<8x128xf32>
    %218 = math.tanh %217 : vector<8x128xf32>
    %219 = arith.mulf %214, %218 : vector<8x128xf32>
    %220 = arith.index_cast %c5_i32 : i32 to index
    %c0_67 = arith.constant 0 : index
    %c0_68 = arith.constant 0 : index
    %221 = vector.load %arg11[%220, %c0_67, %c0_68] : memref<8x8x128xf32, #tpu.memory_space<vmem>>, vector<1x8x128xf32>
    %222 = vector.shape_cast %221 : vector<1x8x128xf32> to vector<8x128xf32>
    %223 = vector.shape_cast %219 : vector<8x128xf32> to vector<1x8x128xf32>
    tpu.vector_store %arg11[%220, %c0_67, %c0_68], %223 {strides = array<i32>} : memref<8x8x128xf32, #tpu.memory_space<vmem>>, vector<1x8x128xf32>,
    %c6_i32 = arith.constant 6 : i32
    %224 = arith.index_cast %c6_i32 : i32 to index
    %c0_69 = arith.constant 0 : index
    %c0_70 = arith.constant 0 : index
    %225 = vector.load %arg12[%224, %c0_69, %c0_70] : memref<8x8x512xf32, #tpu.memory_space<vmem>>, vector<1x8x512xf32>
    %226 = vector.shape_cast %225 : vector<1x8x512xf32> to vector<8x512xf32>
    %cst_71 = arith.constant dense<0.000000e+00> : vector<8x512xf32>
    %227 = tpu.matmul %219, %15, %cst_71 {dimension_numbers = #tpu.dot_dimension_numbers<[1], [0], [0], [1], [0, 0, 1, 1], [], []>} : vector<8x128xf32>, vector<128x512xf32>, vector<8x512xf32> -> vector<8x512xf32>
    %228 = arith.addf %226, %227 : vector<8x512xf32>
    %229 = vector.extract_strided_slice %228 {offsets = [0, 0], sizes = [8, 128], strides = [1, 1]} : vector<8x512xf32> to vector<8x128xf32>
    %230 = arith.negf %229 : vector<8x128xf32>
    %231 = math.exp %230 : vector<8x128xf32>
    %cst_72 = arith.constant 1.000000e+00 : f32
    %232 = vector.broadcast %cst_72 : f32 to vector<8x128xf32>
    %233 = arith.addf %232, %231 : vector<8x128xf32>
    %234 = arith.divf %232, %233 : vector<8x128xf32>
    %235 = vector.extract_strided_slice %228 {offsets = [0, 128], sizes = [8, 128], strides = [1, 1]} : vector<8x512xf32> to vector<8x128xf32>
    %236 = arith.negf %235 : vector<8x128xf32>
    %237 = math.exp %236 : vector<8x128xf32>
    %cst_73 = arith.constant 1.000000e+00 : f32
    %238 = vector.broadcast %cst_73 : f32 to vector<8x128xf32>
    %239 = arith.addf %238, %237 : vector<8x128xf32>
    %240 = arith.divf %238, %239 : vector<8x128xf32>
    %241 = vector.extract_strided_slice %228 {offsets = [0, 256], sizes = [8, 128], strides = [1, 1]} : vector<8x512xf32> to vector<8x128xf32>
    %242 = math.tanh %241 : vector<8x128xf32>
    %243 = vector.extract_strided_slice %228 {offsets = [0, 384], sizes = [8, 128], strides = [1, 1]} : vector<8x512xf32> to vector<8x128xf32>
    %244 = arith.negf %243 : vector<8x128xf32>
    %245 = math.exp %244 : vector<8x128xf32>
    %cst_74 = arith.constant 1.000000e+00 : f32
    %246 = vector.broadcast %cst_74 : f32 to vector<8x128xf32>
    %247 = arith.addf %246, %245 : vector<8x128xf32>
    %248 = arith.divf %246, %247 : vector<8x128xf32>
    %249 = arith.mulf %240, %217 : vector<8x128xf32>
    %250 = arith.mulf %234, %242 : vector<8x128xf32>
    %251 = arith.addf %249, %250 : vector<8x128xf32>
    %252 = math.tanh %251 : vector<8x128xf32>
    %253 = arith.mulf %248, %252 : vector<8x128xf32>
    %254 = arith.index_cast %c6_i32 : i32 to index
    %c0_75 = arith.constant 0 : index
    %c0_76 = arith.constant 0 : index
    %255 = vector.load %arg11[%254, %c0_75, %c0_76] : memref<8x8x128xf32, #tpu.memory_space<vmem>>, vector<1x8x128xf32>
    %256 = vector.shape_cast %255 : vector<1x8x128xf32> to vector<8x128xf32>
    %257 = vector.shape_cast %253 : vector<8x128xf32> to vector<1x8x128xf32>
    tpu.vector_store %arg11[%254, %c0_75, %c0_76], %257 {strides = array<i32>} : memref<8x8x128xf32, #tpu.memory_space<vmem>>, vector<1x8x128xf32>,
    %c7_i32 = arith.constant 7 : i32
    %258 = arith.index_cast %c7_i32 : i32 to index
    %c0_77 = arith.constant 0 : index
    %c0_78 = arith.constant 0 : index
    %259 = vector.load %arg12[%258, %c0_77, %c0_78] : memref<8x8x512xf32, #tpu.memory_space<vmem>>, vector<1x8x512xf32>
    %260 = vector.shape_cast %259 : vector<1x8x512xf32> to vector<8x512xf32>
    %cst_79 = arith.constant dense<0.000000e+00> : vector<8x512xf32>
    %261 = tpu.matmul %253, %15, %cst_79 {dimension_numbers = #tpu.dot_dimension_numbers<[1], [0], [0], [1], [0, 0, 1, 1], [], []>} : vector<8x128xf32>, vector<128x512xf32>, vector<8x512xf32> -> vector<8x512xf32>
    %262 = arith.addf %260, %261 : vector<8x512xf32>
    %263 = vector.extract_strided_slice %262 {offsets = [0, 0], sizes = [8, 128], strides = [1, 1]} : vector<8x512xf32> to vector<8x128xf32>
    %264 = arith.negf %263 : vector<8x128xf32>
    %265 = math.exp %264 : vector<8x128xf32>
    %cst_80 = arith.constant 1.000000e+00 : f32
    %266 = vector.broadcast %cst_80 : f32 to vector<8x128xf32>
    %267 = arith.addf %266, %265 : vector<8x128xf32>
    %268 = arith.divf %266, %267 : vector<8x128xf32>
    %269 = vector.extract_strided_slice %262 {offsets = [0, 128], sizes = [8, 128], strides = [1, 1]} : vector<8x512xf32> to vector<8x128xf32>
    %270 = arith.negf %269 : vector<8x128xf32>
    %271 = math.exp %270 : vector<8x128xf32>
    %cst_81 = arith.constant 1.000000e+00 : f32
    %272 = vector.broadcast %cst_81 : f32 to vector<8x128xf32>
    %273 = arith.addf %272, %271 : vector<8x128xf32>
    %274 = arith.divf %272, %273 : vector<8x128xf32>
    %275 = vector.extract_strided_slice %262 {offsets = [0, 256], sizes = [8, 128], strides = [1, 1]} : vector<8x512xf32> to vector<8x128xf32>
    %276 = math.tanh %275 : vector<8x128xf32>
    %277 = vector.extract_strided_slice %262 {offsets = [0, 384], sizes = [8, 128], strides = [1, 1]} : vector<8x512xf32> to vector<8x128xf32>
    %278 = arith.negf %277 : vector<8x128xf32>
    %279 = math.exp %278 : vector<8x128xf32>
    %cst_82 = arith.constant 1.000000e+00 : f32
    %280 = vector.broadcast %cst_82 : f32 to vector<8x128xf32>
    %281 = arith.addf %280, %279 : vector<8x128xf32>
    %282 = arith.divf %280, %281 : vector<8x128xf32>
    %283 = arith.mulf %274, %251 : vector<8x128xf32>
    %284 = arith.mulf %268, %276 : vector<8x128xf32>
    %285 = arith.addf %283, %284 : vector<8x128xf32>
    %286 = math.tanh %285 : vector<8x128xf32>
    %287 = arith.mulf %282, %286 : vector<8x128xf32>
    %288 = arith.index_cast %c7_i32 : i32 to index
    %c0_83 = arith.constant 0 : index
    %c0_84 = arith.constant 0 : index
    %289 = vector.load %arg11[%288, %c0_83, %c0_84] : memref<8x8x128xf32, #tpu.memory_space<vmem>>, vector<1x8x128xf32>
    %290 = vector.shape_cast %289 : vector<1x8x128xf32> to vector<8x128xf32>
    %291 = vector.shape_cast %287 : vector<8x128xf32> to vector<1x8x128xf32>
    tpu.vector_store %arg11[%288, %c0_83, %c0_84], %291 {strides = array<i32>} : memref<8x8x128xf32, #tpu.memory_space<vmem>>, vector<1x8x128xf32>,
    %c8_i32 = arith.constant 8 : i32
    %c0_85 = arith.constant 0 : index
    %c0_86 = arith.constant 0 : index
    %c0_87 = arith.constant 0 : index
    %292 = vector.load %arg9[%c0_85, %c0_86, %c0_87] : memref<2x8x128xf32, #tpu.memory_space<vmem>>, vector<1x8x128xf32>
    %293 = vector.shape_cast %292 : vector<1x8x128xf32> to vector<8x128xf32>
    %294 = vector.shape_cast %287 : vector<8x128xf32> to vector<1x8x128xf32>
    tpu.vector_store %arg9[%c0_85, %c0_86, %c0_87], %294 {strides = array<i32>} : memref<2x8x128xf32, #tpu.memory_space<vmem>>, vector<1x8x128xf32>,
    %c0_88 = arith.constant 0 : index
    %c0_89 = arith.constant 0 : index
    %c0_90 = arith.constant 0 : index
    %295 = vector.load %arg10[%c0_88, %c0_89, %c0_90] : memref<2x8x128xf32, #tpu.memory_space<vmem>>, vector<1x8x128xf32>
    %296 = vector.shape_cast %295 : vector<1x8x128xf32> to vector<8x128xf32>
    %297 = vector.shape_cast %285 : vector<8x128xf32> to vector<1x8x128xf32>
    tpu.vector_store %arg10[%c0_88, %c0_89, %c0_90], %297 {strides = array<i32>} : memref<2x8x128xf32, #tpu.memory_space<vmem>>, vector<1x8x128xf32>,
    %c0_91 = arith.constant 0 : index
    %c0_92 = arith.constant 0 : index
    %c0_93 = arith.constant 0 : index
    %298 = vector.load %arg11[%c0_91, %c0_92, %c0_93] : memref<8x8x128xf32, #tpu.memory_space<vmem>>, vector<8x8x128xf32>
    %c0_94 = arith.constant 0 : index
    %c0_95 = arith.constant 0 : index
    %c0_96 = arith.constant 0 : index
    %299 = vector.load %arg3[%c0_94, %c0_95, %c0_96] : memref<1x128x512xf32, #tpu.memory_space<vmem>>, vector<1x128x512xf32>
    %300 = vector.shape_cast %299 : vector<1x128x512xf32> to vector<128x512xf32>
    %301 = vector.shape_cast %298 : vector<8x8x128xf32> to vector<64x128xf32>
    %cst_97 = arith.constant dense<0.000000e+00> : vector<64x512xf32>
    %302 = tpu.matmul %301, %300, %cst_97 {dimension_numbers = #tpu.dot_dimension_numbers<[1], [0], [0], [1], [0, 0, 1, 1], [], []>} : vector<64x128xf32>, vector<128x512xf32>, vector<64x512xf32> -> vector<64x512xf32>
    %303 = vector.shape_cast %302 : vector<64x512xf32> to vector<8x8x512xf32>
    %c1 = arith.constant 1 : index
    %c0_98 = arith.constant 0 : index
    %c0_99 = arith.constant 0 : index
    %304 = vector.load %arg5[%c1, %c0_98, %c0_99] : memref<2x1x512xf32, #tpu.memory_space<vmem>>, vector<1x1x512xf32>
    %305 = vector.shape_cast %304 : vector<1x1x512xf32> to vector<1x512xf32>
    %306 = vector.shape_cast %305 : vector<1x512xf32> to vector<1x1x512xf32>
    %307 = vector.broadcast %306 : vector<1x1x512xf32> to vector<8x8x512xf32>
    %308 = arith.addf %303, %307 : vector<8x8x512xf32>
    %c0_100 = arith.constant 0 : index
    %c0_101 = arith.constant 0 : index
    %c0_102 = arith.constant 0 : index
    %309 = vector.load %arg12[%c0_100, %c0_101, %c0_102] : memref<8x8x512xf32, #tpu.memory_space<vmem>>, vector<8x8x512xf32>
    tpu.vector_store %arg12[%c0_100, %c0_101, %c0_102], %308 {strides = array<i32>} : memref<8x8x512xf32, #tpu.memory_space<vmem>>, vector<8x8x512xf32>,
    %c1_103 = arith.constant 1 : index
    %c0_104 = arith.constant 0 : index
    %c0_105 = arith.constant 0 : index
    %310 = vector.load %arg4[%c1_103, %c0_104, %c0_105] : memref<2x128x512xf32, #tpu.memory_space<vmem>>, vector<1x128x512xf32>
    %311 = vector.shape_cast %310 : vector<1x128x512xf32> to vector<128x512xf32>
    %c1_106 = arith.constant 1 : index
    %c0_107 = arith.constant 0 : index
    %c0_108 = arith.constant 0 : index
    %312 = vector.load %arg9[%c1_106, %c0_107, %c0_108] : memref<2x8x128xf32, #tpu.memory_space<vmem>>, vector<1x8x128xf32>
    %313 = vector.shape_cast %312 : vector<1x8x128xf32> to vector<8x128xf32>
    %c1_109 = arith.constant 1 : index
    %c0_110 = arith.constant 0 : index
    %c0_111 = arith.constant 0 : index
    %314 = vector.load %arg10[%c1_109, %c0_110, %c0_111] : memref<2x8x128xf32, #tpu.memory_space<vmem>>, vector<1x8x128xf32>
    %315 = vector.shape_cast %314 : vector<1x8x128xf32> to vector<8x128xf32>
    %c0_i32_112 = arith.constant 0 : i32
    %316 = arith.index_cast %c0_i32_112 : i32 to index
    %c0_113 = arith.constant 0 : index
    %c0_114 = arith.constant 0 : index
    %317 = vector.load %arg12[%316, %c0_113, %c0_114] : memref<8x8x512xf32, #tpu.memory_space<vmem>>, vector<1x8x512xf32>
    %318 = vector.shape_cast %317 : vector<1x8x512xf32> to vector<8x512xf32>
    %cst_115 = arith.constant dense<0.000000e+00> : vector<8x512xf32>
    %319 = tpu.matmul %313, %311, %cst_115 {dimension_numbers = #tpu.dot_dimension_numbers<[1], [0], [0], [1], [0, 0, 1, 1], [], []>} : vector<8x128xf32>, vector<128x512xf32>, vector<8x512xf32> -> vector<8x512xf32>
    %320 = arith.addf %318, %319 : vector<8x512xf32>
    %321 = vector.extract_strided_slice %320 {offsets = [0, 0], sizes = [8, 128], strides = [1, 1]} : vector<8x512xf32> to vector<8x128xf32>
    %322 = arith.negf %321 : vector<8x128xf32>
    %323 = math.exp %322 : vector<8x128xf32>
    %cst_116 = arith.constant 1.000000e+00 : f32
    %324 = vector.broadcast %cst_116 : f32 to vector<8x128xf32>
    %325 = arith.addf %324, %323 : vector<8x128xf32>
    %326 = arith.divf %324, %325 : vector<8x128xf32>
    %327 = vector.extract_strided_slice %320 {offsets = [0, 128], sizes = [8, 128], strides = [1, 1]} : vector<8x512xf32> to vector<8x128xf32>
    %328 = arith.negf %327 : vector<8x128xf32>
    %329 = math.exp %328 : vector<8x128xf32>
    %cst_117 = arith.constant 1.000000e+00 : f32
    %330 = vector.broadcast %cst_117 : f32 to vector<8x128xf32>
    %331 = arith.addf %330, %329 : vector<8x128xf32>
    %332 = arith.divf %330, %331 : vector<8x128xf32>
    %333 = vector.extract_strided_slice %320 {offsets = [0, 256], sizes = [8, 128], strides = [1, 1]} : vector<8x512xf32> to vector<8x128xf32>
    %334 = math.tanh %333 : vector<8x128xf32>
    %335 = vector.extract_strided_slice %320 {offsets = [0, 384], sizes = [8, 128], strides = [1, 1]} : vector<8x512xf32> to vector<8x128xf32>
    %336 = arith.negf %335 : vector<8x128xf32>
    %337 = math.exp %336 : vector<8x128xf32>
    %cst_118 = arith.constant 1.000000e+00 : f32
    %338 = vector.broadcast %cst_118 : f32 to vector<8x128xf32>
    %339 = arith.addf %338, %337 : vector<8x128xf32>
    %340 = arith.divf %338, %339 : vector<8x128xf32>
    %341 = arith.mulf %332, %315 : vector<8x128xf32>
    %342 = arith.mulf %326, %334 : vector<8x128xf32>
    %343 = arith.addf %341, %342 : vector<8x128xf32>
    %344 = math.tanh %343 : vector<8x128xf32>
    %345 = arith.mulf %340, %344 : vector<8x128xf32>
    %c1_i32_119 = arith.constant 1 : i32
    %346 = arith.index_cast %c1_i32_119 : i32 to index
    %c0_120 = arith.constant 0 : index
    %c0_121 = arith.constant 0 : index
    %347 = vector.load %arg12[%346, %c0_120, %c0_121] : memref<8x8x512xf32, #tpu.memory_space<vmem>>, vector<1x8x512xf32>
    %348 = vector.shape_cast %347 : vector<1x8x512xf32> to vector<8x512xf32>
    %cst_122 = arith.constant dense<0.000000e+00> : vector<8x512xf32>
    %349 = tpu.matmul %345, %311, %cst_122 {dimension_numbers = #tpu.dot_dimension_numbers<[1], [0], [0], [1], [0, 0, 1, 1], [], []>} : vector<8x128xf32>, vector<128x512xf32>, vector<8x512xf32> -> vector<8x512xf32>
    %350 = arith.addf %348, %349 : vector<8x512xf32>
    %351 = vector.extract_strided_slice %350 {offsets = [0, 0], sizes = [8, 128], strides = [1, 1]} : vector<8x512xf32> to vector<8x128xf32>
    %352 = arith.negf %351 : vector<8x128xf32>
    %353 = math.exp %352 : vector<8x128xf32>
    %cst_123 = arith.constant 1.000000e+00 : f32
    %354 = vector.broadcast %cst_123 : f32 to vector<8x128xf32>
    %355 = arith.addf %354, %353 : vector<8x128xf32>
    %356 = arith.divf %354, %355 : vector<8x128xf32>
    %357 = vector.extract_strided_slice %350 {offsets = [0, 128], sizes = [8, 128], strides = [1, 1]} : vector<8x512xf32> to vector<8x128xf32>
    %358 = arith.negf %357 : vector<8x128xf32>
    %359 = math.exp %358 : vector<8x128xf32>
    %cst_124 = arith.constant 1.000000e+00 : f32
    %360 = vector.broadcast %cst_124 : f32 to vector<8x128xf32>
    %361 = arith.addf %360, %359 : vector<8x128xf32>
    %362 = arith.divf %360, %361 : vector<8x128xf32>
    %363 = vector.extract_strided_slice %350 {offsets = [0, 256], sizes = [8, 128], strides = [1, 1]} : vector<8x512xf32> to vector<8x128xf32>
    %364 = math.tanh %363 : vector<8x128xf32>
    %365 = vector.extract_strided_slice %350 {offsets = [0, 384], sizes = [8, 128], strides = [1, 1]} : vector<8x512xf32> to vector<8x128xf32>
    %366 = arith.negf %365 : vector<8x128xf32>
    %367 = math.exp %366 : vector<8x128xf32>
    %cst_125 = arith.constant 1.000000e+00 : f32
    %368 = vector.broadcast %cst_125 : f32 to vector<8x128xf32>
    %369 = arith.addf %368, %367 : vector<8x128xf32>
    %370 = arith.divf %368, %369 : vector<8x128xf32>
    %371 = arith.mulf %362, %343 : vector<8x128xf32>
    %372 = arith.mulf %356, %364 : vector<8x128xf32>
    %373 = arith.addf %371, %372 : vector<8x128xf32>
    %374 = math.tanh %373 : vector<8x128xf32>
    %375 = arith.mulf %370, %374 : vector<8x128xf32>
    %c2_i32_126 = arith.constant 2 : i32
    %376 = arith.index_cast %c2_i32_126 : i32 to index
    %c0_127 = arith.constant 0 : index
    %c0_128 = arith.constant 0 : index
    %377 = vector.load %arg12[%376, %c0_127, %c0_128] : memref<8x8x512xf32, #tpu.memory_space<vmem>>, vector<1x8x512xf32>
    %378 = vector.shape_cast %377 : vector<1x8x512xf32> to vector<8x512xf32>
    %cst_129 = arith.constant dense<0.000000e+00> : vector<8x512xf32>
    %379 = tpu.matmul %375, %311, %cst_129 {dimension_numbers = #tpu.dot_dimension_numbers<[1], [0], [0], [1], [0, 0, 1, 1], [], []>} : vector<8x128xf32>, vector<128x512xf32>, vector<8x512xf32> -> vector<8x512xf32>
    %380 = arith.addf %378, %379 : vector<8x512xf32>
    %381 = vector.extract_strided_slice %380 {offsets = [0, 0], sizes = [8, 128], strides = [1, 1]} : vector<8x512xf32> to vector<8x128xf32>
    %382 = arith.negf %381 : vector<8x128xf32>
    %383 = math.exp %382 : vector<8x128xf32>
    %cst_130 = arith.constant 1.000000e+00 : f32
    %384 = vector.broadcast %cst_130 : f32 to vector<8x128xf32>
    %385 = arith.addf %384, %383 : vector<8x128xf32>
    %386 = arith.divf %384, %385 : vector<8x128xf32>
    %387 = vector.extract_strided_slice %380 {offsets = [0, 128], sizes = [8, 128], strides = [1, 1]} : vector<8x512xf32> to vector<8x128xf32>
    %388 = arith.negf %387 : vector<8x128xf32>
    %389 = math.exp %388 : vector<8x128xf32>
    %cst_131 = arith.constant 1.000000e+00 : f32
    %390 = vector.broadcast %cst_131 : f32 to vector<8x128xf32>
    %391 = arith.addf %390, %389 : vector<8x128xf32>
    %392 = arith.divf %390, %391 : vector<8x128xf32>
    %393 = vector.extract_strided_slice %380 {offsets = [0, 256], sizes = [8, 128], strides = [1, 1]} : vector<8x512xf32> to vector<8x128xf32>
    %394 = math.tanh %393 : vector<8x128xf32>
    %395 = vector.extract_strided_slice %380 {offsets = [0, 384], sizes = [8, 128], strides = [1, 1]} : vector<8x512xf32> to vector<8x128xf32>
    %396 = arith.negf %395 : vector<8x128xf32>
    %397 = math.exp %396 : vector<8x128xf32>
    %cst_132 = arith.constant 1.000000e+00 : f32
    %398 = vector.broadcast %cst_132 : f32 to vector<8x128xf32>
    %399 = arith.addf %398, %397 : vector<8x128xf32>
    %400 = arith.divf %398, %399 : vector<8x128xf32>
    %401 = arith.mulf %392, %373 : vector<8x128xf32>
    %402 = arith.mulf %386, %394 : vector<8x128xf32>
    %403 = arith.addf %401, %402 : vector<8x128xf32>
    %404 = math.tanh %403 : vector<8x128xf32>
    %405 = arith.mulf %400, %404 : vector<8x128xf32>
    %c3_i32_133 = arith.constant 3 : i32
    %406 = arith.index_cast %c3_i32_133 : i32 to index
    %c0_134 = arith.constant 0 : index
    %c0_135 = arith.constant 0 : index
    %407 = vector.load %arg12[%406, %c0_134, %c0_135] : memref<8x8x512xf32, #tpu.memory_space<vmem>>, vector<1x8x512xf32>
    %408 = vector.shape_cast %407 : vector<1x8x512xf32> to vector<8x512xf32>
    %cst_136 = arith.constant dense<0.000000e+00> : vector<8x512xf32>
    %409 = tpu.matmul %405, %311, %cst_136 {dimension_numbers = #tpu.dot_dimension_numbers<[1], [0], [0], [1], [0, 0, 1, 1], [], []>} : vector<8x128xf32>, vector<128x512xf32>, vector<8x512xf32> -> vector<8x512xf32>
    %410 = arith.addf %408, %409 : vector<8x512xf32>
    %411 = vector.extract_strided_slice %410 {offsets = [0, 0], sizes = [8, 128], strides = [1, 1]} : vector<8x512xf32> to vector<8x128xf32>
    %412 = arith.negf %411 : vector<8x128xf32>
    %413 = math.exp %412 : vector<8x128xf32>
    %cst_137 = arith.constant 1.000000e+00 : f32
    %414 = vector.broadcast %cst_137 : f32 to vector<8x128xf32>
    %415 = arith.addf %414, %413 : vector<8x128xf32>
    %416 = arith.divf %414, %415 : vector<8x128xf32>
    %417 = vector.extract_strided_slice %410 {offsets = [0, 128], sizes = [8, 128], strides = [1, 1]} : vector<8x512xf32> to vector<8x128xf32>
    %418 = arith.negf %417 : vector<8x128xf32>
    %419 = math.exp %418 : vector<8x128xf32>
    %cst_138 = arith.constant 1.000000e+00 : f32
    %420 = vector.broadcast %cst_138 : f32 to vector<8x128xf32>
    %421 = arith.addf %420, %419 : vector<8x128xf32>
    %422 = arith.divf %420, %421 : vector<8x128xf32>
    %423 = vector.extract_strided_slice %410 {offsets = [0, 256], sizes = [8, 128], strides = [1, 1]} : vector<8x512xf32> to vector<8x128xf32>
    %424 = math.tanh %423 : vector<8x128xf32>
    %425 = vector.extract_strided_slice %410 {offsets = [0, 384], sizes = [8, 128], strides = [1, 1]} : vector<8x512xf32> to vector<8x128xf32>
    %426 = arith.negf %425 : vector<8x128xf32>
    %427 = math.exp %426 : vector<8x128xf32>
    %cst_139 = arith.constant 1.000000e+00 : f32
    %428 = vector.broadcast %cst_139 : f32 to vector<8x128xf32>
    %429 = arith.addf %428, %427 : vector<8x128xf32>
    %430 = arith.divf %428, %429 : vector<8x128xf32>
    %431 = arith.mulf %422, %403 : vector<8x128xf32>
    %432 = arith.mulf %416, %424 : vector<8x128xf32>
    %433 = arith.addf %431, %432 : vector<8x128xf32>
    %434 = math.tanh %433 : vector<8x128xf32>
    %435 = arith.mulf %430, %434 : vector<8x128xf32>
    %c4_i32_140 = arith.constant 4 : i32
    %436 = arith.index_cast %c4_i32_140 : i32 to index
    %c0_141 = arith.constant 0 : index
    %c0_142 = arith.constant 0 : index
    %437 = vector.load %arg12[%436, %c0_141, %c0_142] : memref<8x8x512xf32, #tpu.memory_space<vmem>>, vector<1x8x512xf32>
    %438 = vector.shape_cast %437 : vector<1x8x512xf32> to vector<8x512xf32>
    %cst_143 = arith.constant dense<0.000000e+00> : vector<8x512xf32>
    %439 = tpu.matmul %435, %311, %cst_143 {dimension_numbers = #tpu.dot_dimension_numbers<[1], [0], [0], [1], [0, 0, 1, 1], [], []>} : vector<8x128xf32>, vector<128x512xf32>, vector<8x512xf32> -> vector<8x512xf32>
    %440 = arith.addf %438, %439 : vector<8x512xf32>
    %441 = vector.extract_strided_slice %440 {offsets = [0, 0], sizes = [8, 128], strides = [1, 1]} : vector<8x512xf32> to vector<8x128xf32>
    %442 = arith.negf %441 : vector<8x128xf32>
    %443 = math.exp %442 : vector<8x128xf32>
    %cst_144 = arith.constant 1.000000e+00 : f32
    %444 = vector.broadcast %cst_144 : f32 to vector<8x128xf32>
    %445 = arith.addf %444, %443 : vector<8x128xf32>
    %446 = arith.divf %444, %445 : vector<8x128xf32>
    %447 = vector.extract_strided_slice %440 {offsets = [0, 128], sizes = [8, 128], strides = [1, 1]} : vector<8x512xf32> to vector<8x128xf32>
    %448 = arith.negf %447 : vector<8x128xf32>
    %449 = math.exp %448 : vector<8x128xf32>
    %cst_145 = arith.constant 1.000000e+00 : f32
    %450 = vector.broadcast %cst_145 : f32 to vector<8x128xf32>
    %451 = arith.addf %450, %449 : vector<8x128xf32>
    %452 = arith.divf %450, %451 : vector<8x128xf32>
    %453 = vector.extract_strided_slice %440 {offsets = [0, 256], sizes = [8, 128], strides = [1, 1]} : vector<8x512xf32> to vector<8x128xf32>
    %454 = math.tanh %453 : vector<8x128xf32>
    %455 = vector.extract_strided_slice %440 {offsets = [0, 384], sizes = [8, 128], strides = [1, 1]} : vector<8x512xf32> to vector<8x128xf32>
    %456 = arith.negf %455 : vector<8x128xf32>
    %457 = math.exp %456 : vector<8x128xf32>
    %cst_146 = arith.constant 1.000000e+00 : f32
    %458 = vector.broadcast %cst_146 : f32 to vector<8x128xf32>
    %459 = arith.addf %458, %457 : vector<8x128xf32>
    %460 = arith.divf %458, %459 : vector<8x128xf32>
    %461 = arith.mulf %452, %433 : vector<8x128xf32>
    %462 = arith.mulf %446, %454 : vector<8x128xf32>
    %463 = arith.addf %461, %462 : vector<8x128xf32>
    %464 = math.tanh %463 : vector<8x128xf32>
    %465 = arith.mulf %460, %464 : vector<8x128xf32>
    %c5_i32_147 = arith.constant 5 : i32
    %466 = arith.index_cast %c5_i32_147 : i32 to index
    %c0_148 = arith.constant 0 : index
    %c0_149 = arith.constant 0 : index
    %467 = vector.load %arg12[%466, %c0_148, %c0_149] : memref<8x8x512xf32, #tpu.memory_space<vmem>>, vector<1x8x512xf32>
    %468 = vector.shape_cast %467 : vector<1x8x512xf32> to vector<8x512xf32>
    %cst_150 = arith.constant dense<0.000000e+00> : vector<8x512xf32>
    %469 = tpu.matmul %465, %311, %cst_150 {dimension_numbers = #tpu.dot_dimension_numbers<[1], [0], [0], [1], [0, 0, 1, 1], [], []>} : vector<8x128xf32>, vector<128x512xf32>, vector<8x512xf32> -> vector<8x512xf32>
    %470 = arith.addf %468, %469 : vector<8x512xf32>
    %471 = vector.extract_strided_slice %470 {offsets = [0, 0], sizes = [8, 128], strides = [1, 1]} : vector<8x512xf32> to vector<8x128xf32>
    %472 = arith.negf %471 : vector<8x128xf32>
    %473 = math.exp %472 : vector<8x128xf32>
    %cst_151 = arith.constant 1.000000e+00 : f32
    %474 = vector.broadcast %cst_151 : f32 to vector<8x128xf32>
    %475 = arith.addf %474, %473 : vector<8x128xf32>
    %476 = arith.divf %474, %475 : vector<8x128xf32>
    %477 = vector.extract_strided_slice %470 {offsets = [0, 128], sizes = [8, 128], strides = [1, 1]} : vector<8x512xf32> to vector<8x128xf32>
    %478 = arith.negf %477 : vector<8x128xf32>
    %479 = math.exp %478 : vector<8x128xf32>
    %cst_152 = arith.constant 1.000000e+00 : f32
    %480 = vector.broadcast %cst_152 : f32 to vector<8x128xf32>
    %481 = arith.addf %480, %479 : vector<8x128xf32>
    %482 = arith.divf %480, %481 : vector<8x128xf32>
    %483 = vector.extract_strided_slice %470 {offsets = [0, 256], sizes = [8, 128], strides = [1, 1]} : vector<8x512xf32> to vector<8x128xf32>
    %484 = math.tanh %483 : vector<8x128xf32>
    %485 = vector.extract_strided_slice %470 {offsets = [0, 384], sizes = [8, 128], strides = [1, 1]} : vector<8x512xf32> to vector<8x128xf32>
    %486 = arith.negf %485 : vector<8x128xf32>
    %487 = math.exp %486 : vector<8x128xf32>
    %cst_153 = arith.constant 1.000000e+00 : f32
    %488 = vector.broadcast %cst_153 : f32 to vector<8x128xf32>
    %489 = arith.addf %488, %487 : vector<8x128xf32>
    %490 = arith.divf %488, %489 : vector<8x128xf32>
    %491 = arith.mulf %482, %463 : vector<8x128xf32>
    %492 = arith.mulf %476, %484 : vector<8x128xf32>
    %493 = arith.addf %491, %492 : vector<8x128xf32>
    %494 = math.tanh %493 : vector<8x128xf32>
    %495 = arith.mulf %490, %494 : vector<8x128xf32>
    %c6_i32_154 = arith.constant 6 : i32
    %496 = arith.index_cast %c6_i32_154 : i32 to index
    %c0_155 = arith.constant 0 : index
    %c0_156 = arith.constant 0 : index
    %497 = vector.load %arg12[%496, %c0_155, %c0_156] : memref<8x8x512xf32, #tpu.memory_space<vmem>>, vector<1x8x512xf32>
    %498 = vector.shape_cast %497 : vector<1x8x512xf32> to vector<8x512xf32>
    %cst_157 = arith.constant dense<0.000000e+00> : vector<8x512xf32>
    %499 = tpu.matmul %495, %311, %cst_157 {dimension_numbers = #tpu.dot_dimension_numbers<[1], [0], [0], [1], [0, 0, 1, 1], [], []>} : vector<8x128xf32>, vector<128x512xf32>, vector<8x512xf32> -> vector<8x512xf32>
    %500 = arith.addf %498, %499 : vector<8x512xf32>
    %501 = vector.extract_strided_slice %500 {offsets = [0, 0], sizes = [8, 128], strides = [1, 1]} : vector<8x512xf32> to vector<8x128xf32>
    %502 = arith.negf %501 : vector<8x128xf32>
    %503 = math.exp %502 : vector<8x128xf32>
    %cst_158 = arith.constant 1.000000e+00 : f32
    %504 = vector.broadcast %cst_158 : f32 to vector<8x128xf32>
    %505 = arith.addf %504, %503 : vector<8x128xf32>
    %506 = arith.divf %504, %505 : vector<8x128xf32>
    %507 = vector.extract_strided_slice %500 {offsets = [0, 128], sizes = [8, 128], strides = [1, 1]} : vector<8x512xf32> to vector<8x128xf32>
    %508 = arith.negf %507 : vector<8x128xf32>
    %509 = math.exp %508 : vector<8x128xf32>
    %cst_159 = arith.constant 1.000000e+00 : f32
    %510 = vector.broadcast %cst_159 : f32 to vector<8x128xf32>
    %511 = arith.addf %510, %509 : vector<8x128xf32>
    %512 = arith.divf %510, %511 : vector<8x128xf32>
    %513 = vector.extract_strided_slice %500 {offsets = [0, 256], sizes = [8, 128], strides = [1, 1]} : vector<8x512xf32> to vector<8x128xf32>
    %514 = math.tanh %513 : vector<8x128xf32>
    %515 = vector.extract_strided_slice %500 {offsets = [0, 384], sizes = [8, 128], strides = [1, 1]} : vector<8x512xf32> to vector<8x128xf32>
    %516 = arith.negf %515 : vector<8x128xf32>
    %517 = math.exp %516 : vector<8x128xf32>
    %cst_160 = arith.constant 1.000000e+00 : f32
    %518 = vector.broadcast %cst_160 : f32 to vector<8x128xf32>
    %519 = arith.addf %518, %517 : vector<8x128xf32>
    %520 = arith.divf %518, %519 : vector<8x128xf32>
    %521 = arith.mulf %512, %493 : vector<8x128xf32>
    %522 = arith.mulf %506, %514 : vector<8x128xf32>
    %523 = arith.addf %521, %522 : vector<8x128xf32>
    %524 = math.tanh %523 : vector<8x128xf32>
    %525 = arith.mulf %520, %524 : vector<8x128xf32>
    %c7_i32_161 = arith.constant 7 : i32
    %526 = arith.index_cast %c7_i32_161 : i32 to index
    %c0_162 = arith.constant 0 : index
    %c0_163 = arith.constant 0 : index
    %527 = vector.load %arg12[%526, %c0_162, %c0_163] : memref<8x8x512xf32, #tpu.memory_space<vmem>>, vector<1x8x512xf32>
    %528 = vector.shape_cast %527 : vector<1x8x512xf32> to vector<8x512xf32>
    %cst_164 = arith.constant dense<0.000000e+00> : vector<8x512xf32>
    %529 = tpu.matmul %525, %311, %cst_164 {dimension_numbers = #tpu.dot_dimension_numbers<[1], [0], [0], [1], [0, 0, 1, 1], [], []>} : vector<8x128xf32>, vector<128x512xf32>, vector<8x512xf32> -> vector<8x512xf32>
    %530 = arith.addf %528, %529 : vector<8x512xf32>
    %531 = vector.extract_strided_slice %530 {offsets = [0, 0], sizes = [8, 128], strides = [1, 1]} : vector<8x512xf32> to vector<8x128xf32>
    %532 = arith.negf %531 : vector<8x128xf32>
    %533 = math.exp %532 : vector<8x128xf32>
    %cst_165 = arith.constant 1.000000e+00 : f32
    %534 = vector.broadcast %cst_165 : f32 to vector<8x128xf32>
    %535 = arith.addf %534, %533 : vector<8x128xf32>
    %536 = arith.divf %534, %535 : vector<8x128xf32>
    %537 = vector.extract_strided_slice %530 {offsets = [0, 128], sizes = [8, 128], strides = [1, 1]} : vector<8x512xf32> to vector<8x128xf32>
    %538 = arith.negf %537 : vector<8x128xf32>
    %539 = math.exp %538 : vector<8x128xf32>
    %cst_166 = arith.constant 1.000000e+00 : f32
    %540 = vector.broadcast %cst_166 : f32 to vector<8x128xf32>
    %541 = arith.addf %540, %539 : vector<8x128xf32>
    %542 = arith.divf %540, %541 : vector<8x128xf32>
    %543 = vector.extract_strided_slice %530 {offsets = [0, 256], sizes = [8, 128], strides = [1, 1]} : vector<8x512xf32> to vector<8x128xf32>
    %544 = math.tanh %543 : vector<8x128xf32>
    %545 = vector.extract_strided_slice %530 {offsets = [0, 384], sizes = [8, 128], strides = [1, 1]} : vector<8x512xf32> to vector<8x128xf32>
    %546 = arith.negf %545 : vector<8x128xf32>
    %547 = math.exp %546 : vector<8x128xf32>
    %cst_167 = arith.constant 1.000000e+00 : f32
    %548 = vector.broadcast %cst_167 : f32 to vector<8x128xf32>
    %549 = arith.addf %548, %547 : vector<8x128xf32>
    %550 = arith.divf %548, %549 : vector<8x128xf32>
    %551 = arith.mulf %542, %523 : vector<8x128xf32>
    %552 = arith.mulf %536, %544 : vector<8x128xf32>
    %553 = arith.addf %551, %552 : vector<8x128xf32>
    %554 = math.tanh %553 : vector<8x128xf32>
    %555 = arith.mulf %550, %554 : vector<8x128xf32>
    %c8_i32_168 = arith.constant 8 : i32
    %c1_169 = arith.constant 1 : index
    %c0_170 = arith.constant 0 : index
    %c0_171 = arith.constant 0 : index
    %556 = vector.load %arg9[%c1_169, %c0_170, %c0_171] : memref<2x8x128xf32, #tpu.memory_space<vmem>>, vector<1x8x128xf32>
    %557 = vector.shape_cast %556 : vector<1x8x128xf32> to vector<8x128xf32>
    %558 = vector.shape_cast %555 : vector<8x128xf32> to vector<1x8x128xf32>
    tpu.vector_store %arg9[%c1_169, %c0_170, %c0_171], %558 {strides = array<i32>} : memref<2x8x128xf32, #tpu.memory_space<vmem>>, vector<1x8x128xf32>,
    %c1_172 = arith.constant 1 : index
    %c0_173 = arith.constant 0 : index
    %c0_174 = arith.constant 0 : index
    %559 = vector.load %arg10[%c1_172, %c0_173, %c0_174] : memref<2x8x128xf32, #tpu.memory_space<vmem>>, vector<1x8x128xf32>
    %560 = vector.shape_cast %559 : vector<1x8x128xf32> to vector<8x128xf32>
    %561 = vector.shape_cast %553 : vector<8x128xf32> to vector<1x8x128xf32>
    tpu.vector_store %arg10[%c1_172, %c0_173, %c0_174], %561 {strides = array<i32>} : memref<2x8x128xf32, #tpu.memory_space<vmem>>, vector<1x8x128xf32>,
    %c0_i32_175 = arith.constant 0 : i32
    %562 = arith.cmpi eq, %arg0, %c0_i32_175 : i32
    %563 = arith.extui %562 : i1 to i32
    %c0_i32_176 = arith.constant 0 : i32
    %564 = arith.cmpi ne, %563, %c0_i32_176 : i32
    scf.if %564 {
      %c0_177 = arith.constant 0 : index
      %c0_178 = arith.constant 0 : index
      %565 = vector.load %arg6[%c0_177, %c0_178] : memref<128x128xf32, #tpu.memory_space<vmem>>, vector<128x128xf32>
      %cst_179 = arith.constant dense<0.000000e+00> : vector<8x128xf32>
      %566 = tpu.matmul %555, %565, %cst_179 {dimension_numbers = #tpu.dot_dimension_numbers<[1], [0], [0], [1], [0, 0, 1, 1], [], []>} : vector<8x128xf32>, vector<128x128xf32>, vector<8x128xf32> -> vector<8x128xf32>
      %c0_180 = arith.constant 0 : index
      %c0_181 = arith.constant 0 : index
      %567 = vector.load %arg7[%c0_180, %c0_181] : memref<1x128xf32, #tpu.memory_space<vmem>>, vector<1x128xf32>
      %568 = vector.broadcast %567 : vector<1x128xf32> to vector<8x128xf32>
      %569 = arith.addf %566, %568 : vector<8x128xf32>
      %c0_182 = arith.constant 0 : index
      %c0_183 = arith.constant 0 : index
      %570 = vector.load %arg8[%c0_182, %c0_183] : memref<8x128xf32, #tpu.memory_space<vmem>>, vector<8x128xf32>
      tpu.vector_store %arg8[%c0_182, %c0_183], %569 {strides = array<i32>} : memref<8x128xf32, #tpu.memory_space<vmem>>, vector<8x128xf32>,
    } else {
    }
    return
  }
  func.func @transform_0(%arg0: i32) -> (i32, i32, i32) {
    %c0_i32 = arith.constant 0 : i32
    %c0_i32_0 = arith.constant 0 : i32
    %c0_i32_1 = arith.constant 0 : i32
    return %arg0, %c0_i32, %c0_i32_0 : i32, i32, i32
  }
  func.func @transform_1(%arg0: i32) -> (i32, i32) {
    %c0_i32 = arith.constant 0 : i32
    %c0_i32_0 = arith.constant 0 : i32
    %c0_i32_1 = arith.constant 0 : i32
    return %c0_i32, %c0_i32_0 : i32, i32
  }
  func.func @transform_2(%arg0: i32) -> (i32, i32, i32) {
    %c0_i32 = arith.constant 0 : i32
    %c0_i32_0 = arith.constant 0 : i32
    %c0_i32_1 = arith.constant 0 : i32
    %c0_i32_2 = arith.constant 0 : i32
    return %c0_i32, %c0_i32_0, %c0_i32_1 : i32, i32, i32
  }
  func.func @transform_3(%arg0: i32) -> (i32, i32, i32) {
    %c0_i32 = arith.constant 0 : i32
    %c0_i32_0 = arith.constant 0 : i32
    %c0_i32_1 = arith.constant 0 : i32
    %c0_i32_2 = arith.constant 0 : i32
    return %c0_i32, %c0_i32_0, %c0_i32_1 : i32, i32, i32
  }
  func.func @transform_4(%arg0: i32) -> (i32, i32, i32) {
    %c0_i32 = arith.constant 0 : i32
    %c0_i32_0 = arith.constant 0 : i32
    %c0_i32_1 = arith.constant 0 : i32
    %c0_i32_2 = arith.constant 0 : i32
    return %c0_i32, %c0_i32_0, %c0_i32_1 : i32, i32, i32
  }
  func.func @transform_5(%arg0: i32) -> (i32, i32) {
    %c0_i32 = arith.constant 0 : i32
    %c0_i32_0 = arith.constant 0 : i32
    %c0_i32_1 = arith.constant 0 : i32
    return %c0_i32, %c0_i32_0 : i32, i32
  }
  func.func @transform_6(%arg0: i32) -> (i32, i32) {
    %c0_i32 = arith.constant 0 : i32
    %c0_i32_0 = arith.constant 0 : i32
    %c0_i32_1 = arith.constant 0 : i32
    return %c0_i32, %c0_i32_0 : i32, i32
  }
  func.func @transform_7(%arg0: i32) -> (i32, i32) {
    %c0_i32 = arith.constant 0 : i32
    %c0_i32_0 = arith.constant 0 : i32
    %c0_i32_1 = arith.constant 0 : i32
    return %c0_i32, %c0_i32_0 : i32, i32
  }
}

</mosaic_0001>

<bundles_post_ra>
// kernel: tpu_custom_call.1
= control target key start
LH: loop header
LB: loop body
LE: loop exit
PB: predicated region body
PF: predicated region fallthrough
CT: control target
= control target key end

     0   :  { %12 = vsyncpa [#allocation7], 0  ;;  %s6046_s0 = inlined_call_operand.hbm [shape: f32[8,8,128], index: 0, kind: input, shape index: {}]   ;;  %s6047_s1 = inlined_call_operand.hbm [shape: f32[128,512], index: 1, kind: input, shape index: {}]   ;;  %s6048_s2 = inlined_call_operand.hbm [shape: f32[1,128,512], index: 2, kind: input, shape index: {}]   ;;  %s6049_s3 = inlined_call_operand.hbm [shape: f32[2,128,512], index: 3, kind: input, shape index: {}]   ;;  %s6050_s4 = inlined_call_operand.hbm [shape: f32[2,1,512], index: 4, kind: input, shape index: {}]   ;;  %s6051_s5 = inlined_call_operand.hbm [shape: f32[128,128], index: 5, kind: input, shape index: {}]   ;;  %s6052_s6 = inlined_call_operand.vmem [shape: f32[1,128], index: 6, kind: input, shape index: {}]   ;;  %s6053_s7 = inlined_call_operand.hbm [shape: f32[8,128], index: 7, kind: output, shape index: {}]  }
   0x1   :  { %13 = vsyncpa [#allocation10], 0 }
   0x2   :  { %14 = vsyncpa [#allocation13], 0 }
   0x3   :  { %15 = vsyncpa [#allocation16], 0  ;;  %s34_s26 = sshll.u32 %s6047_s1, 4  ;;  %s35_s26 = int_to_ptr.hbm [resolvable:$true] %s34_s26 }
   0x4   :  { %16 = vsyncpa [#allocation8], 0  ;;  %s4016_s27 = smov [#allocation9]   ;;  %s60_s8 = sshll.u32 %s6049_s3, 4  ;;  %s61_s8 = int_to_ptr.hbm [resolvable:$true] %s60_s8 }
   0x5   :  { %s36_s28 = sshll.u32 %s4016_s27, 4  ;;  %s4017_s9 = smov 512   ;;  %s37_s28 = int_to_ptr.vmem [resolvable:$true] %s36_s28 }
   0x6   :  { %s4018_s10 = smov 32   ;;  %s4019_s11 = smov [#allocation12]  }
   0x7   :  { %42 = dma.hbm_to_vmem [thread:$0]  %s35_s26, 8192, %s37_s28, [#allocation10], %s4017_s9, %s4017_s9, %s4018_s10  }
   0x8   :  { %s62_s12 = sshll.u32 %s4019_s11, 4  ;;  %s21_s15 = sshll.u32 %s6046_s0, 4  ;;  %s63_s12 = int_to_ptr.vmem [resolvable:$true] %s62_s12  ;;  %s22_s15 = int_to_ptr.hbm [resolvable:$true] %s21_s15 }
   0x9   :  { %68 = dma.hbm_to_vmem [thread:$0]  %s61_s8, 16384, %s63_s12, [#allocation13], %s4017_s9, %s4017_s9, %s4018_s10  }
   0xa   :  { %s4020_s1 = smov [#allocation6]   ;;  %s47_s3 = sshll.u32 %s6048_s2, 4  ;;  %s48_s3 = int_to_ptr.hbm [resolvable:$true] %s47_s3 }
   0xb   :  { %s23_s16 = sshll.u32 %s4020_s1, 4  ;;  %s4021_s19 = smov 128   ;;  %s24_s16 = int_to_ptr.vmem [resolvable:$true] %s23_s16 }
   0xc   :  { %s4022_s20 = smov 8   ;;  %s4023_s21 = smov [#allocation11]  }
   0xd   :  { %29 = dma.hbm_to_vmem [thread:$0]  %s22_s15, 1024, %s24_s16, [#allocation7], %s4021_s19, %s4021_s19, %s4022_s20  }
   0xe   :  { %s49_s22 = sshll.u32 %s4023_s21, 4  ;;  %s73_s0 = sshll.u32 %s6050_s4, 4  ;;  %s50_s22 = int_to_ptr.vmem [resolvable:$true] %s49_s22  ;;  %s74_s0 = int_to_ptr.hbm [resolvable:$true] %s73_s0 }
   0xf   :  { %55 = dma.hbm_to_vmem [thread:$0]  %s48_s3, 8192, %s50_s22, [#allocation10], %s4017_s9, %s4017_s9, %s4018_s10  }
  0x10   :  { %s4024_s25 = smov [#allocation14]   ;;  %s86_s2 = sshll.u32 %s6051_s5, 4  ;;  %s87_s2 = int_to_ptr.hbm [resolvable:$true] %s86_s2 }
  0x11   :  { %s75_s26 = sshll.u32 %s4024_s25, 4  ;;  %s4025_s29 = smov 64   ;;  %s76_s26 = int_to_ptr.vmem [resolvable:$true] %s75_s26 }
  0x12   :  { %s4026_s30 = smov 4   ;;  %s4027_s8 = smov [#allocation15]  }
  0x13   :  { %81 = dma.hbm_to_vmem [thread:$0]  %s74_s0, 128, %s76_s26, [#allocation13], %s4025_s29, %s4025_s29, %s4026_s30  }
  0x14   :  { %s88_s11 = sshll.u32 %s4027_s8, 4  ;;  %s89_s11 = int_to_ptr.vmem [resolvable:$true] %s88_s11 }
  0x15   :  { %94 = dma.hbm_to_vmem [thread:$0]  %s87_s2, 2048, %s89_s11, [#allocation16], %s4021_s19, %s4021_s19, %s4022_s20  }
  0x16   :  { %4006 = dma.done.wait [#allocation7], 1024  }
  0x17   :  { %4007 = vsyncadd [#allocation7], 4294966272 }
  0x18   :  { %4008 = dma.done.wait [#allocation10], 16384  }
  0x19   :  { %4009 = vsyncadd [#allocation10], 4294950912 }
  0x1a   :  { %4010 = dma.done.wait [#allocation13], 16512  }
  0x1b   :  { %4011 = vsyncadd [#allocation13], 4294950784 }
  0x1c   :  { %4012 = dma.done.wait [#allocation16], 2048  }
  0x1d   :  { %4013 = vsyncadd [#allocation16], 4294965248  ;;  %v197_v0 = vld [vmem:[#allocation9 + $0x1e0] sm:$0xff]  ;;  %v198_v1 = vld [vmem:[#allocation9 + $0x1e8] sm:$0xff]  ;;  %s4029_s9 = smov [#allocation17]   ;;  %s3378_s14 = sshll.u32 %s6053_s7, 4  ;;  %s3379_s14 = int_to_ptr.hbm [resolvable:$true] %s3378_s14 }
  0x1e   :  { %v199_v2 = vld [vmem:[#allocation9 + $0x1f0] sm:$0xff]  ;;  %201 = vmatpush.msra.mxu0 %v197_v0  ;;  %242 = vmatpush.msra.mxu1 %v198_v1  ;;  %v200_v3 = vld [vmem:[#allocation9 + $0x1f8] sm:$0xff]  ;;  %v193_v4 = vld [vmem:[#allocation9 + $0x1c0] sm:$0xff]  ;;  %s3376_s10 = sshll.u32 %s4029_s9, 4  ;;  %s3377_s10 = int_to_ptr.vmem [resolvable:$true] %s3376_s10 }
  0x1f   :  { %v194_v5 = vld [vmem:[#allocation9 + $0x1c8] sm:$0xff]  ;;  %283 = vmatpush.msra.mxu2 %v199_v2  ;;  %324 = vmatpush.msra.mxu3 %v200_v3  ;;  %v195_v6 = vld [vmem:[#allocation9 + $0x1d0] sm:$0xff]  ;;  %v196_v7 = vld [vmem:[#allocation9 + $0x1d8] sm:$0xff] }
  0x20   :  { %v189_v8 = vld [vmem:[#allocation9 + $0x1a0] sm:$0xff]  ;;  %202 = vmatpush.msra.mxu0 %v193_v4  ;;  %243 = vmatpush.msra.mxu1 %v194_v5  ;;  %v190_v9 = vld [vmem:[#allocation9 + $0x1a8] sm:$0xff]  ;;  %v191_v10 = vld [vmem:[#allocation9 + $0x1b0] sm:$0xff] }
  0x21   :  { %v192_v11 = vld [vmem:[#allocation9 + $0x1b8] sm:$0xff]  ;;  %284 = vmatpush.msra.mxu2 %v195_v6  ;;  %325 = vmatpush.msra.mxu3 %v196_v7  ;;  %v185_v12 = vld [vmem:[#allocation9 + $0x180] sm:$0xff]  ;;  %v186_v13 = vld [vmem:[#allocation9 + $0x188] sm:$0xff] }
  0x22   :  { %203 = vmatpush.msra.mxu0 %v189_v8  ;;  %244 = vmatpush.msra.mxu1 %v190_v9  ;;  %v187_v14 = vld [vmem:[#allocation9 + $0x190] sm:$0xff]  ;;  %v188_v15 = vld [vmem:[#allocation9 + $0x198] sm:$0xff]  ;;  %v181_v16 = vld [vmem:[#allocation9 + $0x160] sm:$0xff] }
  0x23   :  { %285 = vmatpush.msra.mxu2 %v191_v10  ;;  %326 = vmatpush.msra.mxu3 %v192_v11  ;;  %v182_v17 = vld [vmem:[#allocation9 + $0x168] sm:$0xff]  ;;  %v183_v18 = vld [vmem:[#allocation9 + $0x170] sm:$0xff]  ;;  %v184_v19 = vld [vmem:[#allocation9 + $0x178] sm:$0xff] }
  0x24   :  { %204 = vmatpush.msra.mxu0 %v185_v12  ;;  %245 = vmatpush.msra.mxu1 %v186_v13  ;;  %v177_v20 = vld [vmem:[#allocation9 + $0x140] sm:$0xff]  ;;  %v178_v21 = vld [vmem:[#allocation9 + $0x148] sm:$0xff]  ;;  %v179_v22 = vld [vmem:[#allocation9 + $0x150] sm:$0xff] }
  0x25   :  { %286 = vmatpush.msra.mxu2 %v187_v14  ;;  %327 = vmatpush.msra.mxu3 %v188_v15  ;;  %v180_v23 = vld [vmem:[#allocation9 + $0x158] sm:$0xff]  ;;  %v173_v24 = vld [vmem:[#allocation9 + $0x120] sm:$0xff]  ;;  %v174_v25 = vld [vmem:[#allocation9 + $0x128] sm:$0xff] }
  0x26   :  { %205 = vmatpush.msra.mxu0 %v181_v16  ;;  %246 = vmatpush.msra.mxu1 %v182_v17  ;;  %v175_v26 = vld [vmem:[#allocation9 + $0x130] sm:$0xff]  ;;  %v176_v27 = vld [vmem:[#allocation9 + $0x138] sm:$0xff]  ;;  %v169_v28 = vld [vmem:[#allocation9 + $0x100] sm:$0xff] }
  0x27   :  { %287 = vmatpush.msra.mxu2 %v183_v18  ;;  %328 = vmatpush.msra.mxu3 %v184_v19  ;;  %v170_v29 = vld [vmem:[#allocation9 + $0x108] sm:$0xff]  ;;  %v171_v30 = vld [vmem:[#allocation9 + $0x110] sm:$0xff]  ;;  %v172_v31 = vld [vmem:[#allocation9 + $0x118] sm:$0xff] }
  0x28   :  { %206 = vmatpush.msra.mxu0 %v177_v20  ;;  %247 = vmatpush.msra.mxu1 %v178_v21  ;;  %v165_v32 = vld [vmem:[#allocation9 + $0xe0] sm:$0xff]  ;;  %v166_v33 = vld [vmem:[#allocation9 + $0xe8] sm:$0xff]  ;;  %v167_v34 = vld [vmem:[#allocation9 + $0xf0] sm:$0xff] }
  0x29   :  { %288 = vmatpush.msra.mxu2 %v179_v22  ;;  %329 = vmatpush.msra.mxu3 %v180_v23  ;;  %v168_v35 = vld [vmem:[#allocation9 + $0xf8] sm:$0xff]  ;;  %v161_v36 = vld [vmem:[#allocation9 + $0xc0] sm:$0xff]  ;;  %v162_v37 = vld [vmem:[#allocation9 + $0xc8] sm:$0xff] }
  0x2a   :  { %207 = vmatpush.msra.mxu0 %v173_v24  ;;  %248 = vmatpush.msra.mxu1 %v174_v25  ;;  %v163_v38 = vld [vmem:[#allocation9 + $0xd0] sm:$0xff]  ;;  %v164_v39 = vld [vmem:[#allocation9 + $0xd8] sm:$0xff]  ;;  %v157_v40 = vld [vmem:[#allocation9 + $0xa0] sm:$0xff] }
  0x2b   :  { %289 = vmatpush.msra.mxu2 %v175_v26  ;;  %330 = vmatpush.msra.mxu3 %v176_v27  ;;  %v158_v41 = vld [vmem:[#allocation9 + $0xa8] sm:$0xff]  ;;  %v159_v42 = vld [vmem:[#allocation9 + $0xb0] sm:$0xff]  ;;  %v160_v43 = vld [vmem:[#allocation9 + $0xb8] sm:$0xff] }
  0x2c   :  { %208 = vmatpush.msra.mxu0 %v169_v28  ;;  %249 = vmatpush.msra.mxu1 %v170_v29  ;;  %v153_v44 = vld [vmem:[#allocation9 + $0x80] sm:$0xff]  ;;  %v154_v45 = vld [vmem:[#allocation9 + $0x88] sm:$0xff]  ;;  %v155_v46 = vld [vmem:[#allocation9 + $0x90] sm:$0xff] }
  0x2d   :  { %290 = vmatpush.msra.mxu2 %v171_v30  ;;  %331 = vmatpush.msra.mxu3 %v172_v31  ;;  %v156_v47 = vld [vmem:[#allocation9 + $0x98] sm:$0xff]  ;;  %v149_v48 = vld [vmem:[#allocation9 + $0x60] sm:$0xff]  ;;  %v150_v49 = vld [vmem:[#allocation9 + $0x68] sm:$0xff] }
  0x2e   :  { %209 = vmatpush.msra.mxu0 %v165_v32  ;;  %250 = vmatpush.msra.mxu1 %v166_v33  ;;  %v151_v50 = vld [vmem:[#allocation9 + $0x70] sm:$0xff]  ;;  %v152_v51 = vld [vmem:[#allocation9 + $0x78] sm:$0xff]  ;;  %v145_v52 = vld [vmem:[#allocation9 + $0x40] sm:$0xff] }
  0x2f   :  { %291 = vmatpush.msra.mxu2 %v167_v34  ;;  %332 = vmatpush.msra.mxu3 %v168_v35  ;;  %v146_v53 = vld [vmem:[#allocation9 + $0x48] sm:$0xff]  ;;  %v147_v54 = vld [vmem:[#allocation9 + $0x50] sm:$0xff]  ;;  %v148_v55 = vld [vmem:[#allocation9 + $0x58] sm:$0xff] }
  0x30   :  { %210 = vmatpush.msra.mxu0 %v161_v36  ;;  %251 = vmatpush.msra.mxu1 %v162_v37  ;;  %v141_v56 = vld [vmem:[#allocation9 + $0x20] sm:$0xff]  ;;  %v142_v57 = vld [vmem:[#allocation9 + $0x28] sm:$0xff]  ;;  %v143_v58 = vld [vmem:[#allocation9 + $0x30] sm:$0xff] }
  0x31   :  { %292 = vmatpush.msra.mxu2 %v163_v38  ;;  %333 = vmatpush.msra.mxu3 %v164_v39  ;;  %v144_v59 = vld [vmem:[#allocation9 + $0x38] sm:$0xff]  ;;  %v137_v60 = vld [vmem:[#allocation9] sm:$0xff]  ;;  %v138_v61 = vld [vmem:[#allocation9 + $0x8] sm:$0xff] }
  0x32   :  { %211 = vmatpush.msra.mxu0 %v157_v40  ;;  %252 = vmatpush.msra.mxu1 %v158_v41  ;;  %v139_v62 = vld [vmem:[#allocation9 + $0x10] sm:$0xff]  ;;  %v140_v63 = vld [vmem:[#allocation9 + $0x18] sm:$0xff]  ;;  %v129_v0 = vld [vmem:[#allocation6] sm:$0xff] }
  0x33   :  { %293 = vmatpush.msra.mxu2 %v159_v42  ;;  %334 = vmatpush.msra.mxu3 %v160_v43  ;;  %v4088_v1 = vld [vmem:[#allocation12 + $0x1e0] sm:$0xff]  ;;  %v4090_v2 = vld [vmem:[#allocation12 + $0x1e8] sm:$0xff]  ;;  %v4092_v3 = vld [vmem:[#allocation12 + $0x1f8] sm:$0xff] }
  0x34   :  { %212 = vmatpush.msra.mxu0 %v153_v44  ;;  %253 = vmatpush.msra.mxu1 %v154_v45  ;;  %v4094_v4 = vld [vmem:[#allocation12 + $0x1f0] sm:$0xff]  ;;  %v4096_v5 = vld [vmem:[#allocation12 + $0x1c0] sm:$0xff]  ;;  %v4098_v6 = vld [vmem:[#allocation12 + $0x1c8] sm:$0xff] }
  0x35   :  { %294 = vmatpush.msra.mxu2 %v155_v46  ;;  %335 = vmatpush.msra.mxu3 %v156_v47  ;;  %v4102_v7 = vld [vmem:[#allocation12 + $0x1d8] sm:$0xff]  ;;  %v4104_v8 = vld [vmem:[#allocation12 + $0x1d0] sm:$0xff]  ;;  %v4107_v9 = vld [vmem:[#allocation12 + $0x1a0] sm:$0xff] }
  0x36   :  { %213 = vmatpush.msra.mxu0 %v149_v48  ;;  %254 = vmatpush.msra.mxu1 %v150_v49  ;;  %v4109_v10 = vld [vmem:[#allocation12 + $0x1a8] sm:$0xff]  ;;  %v4114_v11 = vld [vmem:[#allocation12 + $0x1b8] sm:$0xff]  ;;  %v4116_v12 = vld [vmem:[#allocation12 + $0x1b0] sm:$0xff] }
  0x37   :  { %295 = vmatpush.msra.mxu2 %v151_v50  ;;  %336 = vmatpush.msra.mxu3 %v152_v51  ;;  %v130_v13 = vld [vmem:[#allocation6 + $0x8] sm:$0xff]  ;;  %v4122_v14 = vld [vmem:[#allocation12 + $0x180] sm:$0xff]  ;;  %v4128_v16 = vld [vmem:[#allocation12 + $0x198] sm:$0xff] }
  0x38   :  { %214 = vmatpush.msra.mxu0 %v145_v52  ;;  %255 = vmatpush.msra.mxu1 %v146_v53  ;;  %v4124_v15 = vld [vmem:[#allocation12 + $0x188] sm:$0xff]  ;;  %v4130_v17 = vld [vmem:[#allocation12 + $0x190] sm:$0xff]  ;;  %v4132_v18 = vld [vmem:[#allocation12 + $0x160] sm:$0xff] }
  0x39   :  { %296 = vmatpush.msra.mxu2 %v147_v54  ;;  %337 = vmatpush.msra.mxu3 %v148_v55  ;;  %v4134_v19 = vld [vmem:[#allocation12 + $0x168] sm:$0xff]  ;;  %v4138_v20 = vld [vmem:[#allocation12 + $0x178] sm:$0xff]  ;;  %v4140_v21 = vld [vmem:[#allocation12 + $0x170] sm:$0xff] }
  0x3a   :  { %215 = vmatpush.msra.mxu0 %v141_v56  ;;  %256 = vmatpush.msra.mxu1 %v142_v57  ;;  %v4143_v22 = vld [vmem:[#allocation12 + $0x140] sm:$0xff]  ;;  %v4145_v23 = vld [vmem:[#allocation12 + $0x148] sm:$0xff]  ;;  %v4150_v24 = vld [vmem:[#allocation12 + $0x158] sm:$0xff] }
  0x3b   :  { %297 = vmatpush.msra.mxu2 %v143_v58  ;;  %338 = vmatpush.msra.mxu3 %v144_v59  ;;  %v4152_v25 = vld [vmem:[#allocation12 + $0x150] sm:$0xff]  ;;  %v4158_v27 = vld [vmem:[#allocation12 + $0x120] sm:$0xff]  ;;  %v4160_v28 = vld [vmem:[#allocation12 + $0x128] sm:$0xff] }
  0x3c   :  { %216 = vmatpush.msra.mxu0 %v137_v60  ;;  %257 = vmatpush.msra.mxu1 %v138_v61  ;;  %v131_v26 = vld [vmem:[#allocation6 + $0x10] sm:$0xff]  ;;  %v4164_v29 = vld [vmem:[#allocation12 + $0x138] sm:$0xff]  ;;  %v4168_v31 = vld [vmem:[#allocation12 + $0x100] sm:$0xff] }
  0x3d   :  { %298 = vmatpush.msra.mxu2 %v139_v62  ;;  %339 = vmatpush.msra.mxu3 %v140_v63  ;;  %v4166_v30 = vld [vmem:[#allocation12 + $0x130] sm:$0xff]  ;;  %v4170_v32 = vld [vmem:[#allocation12 + $0x108] sm:$0xff]  ;;  %v4174_v33 = vld [vmem:[#allocation12 + $0x118] sm:$0xff] }
  0x3e   :  { %217 = vmatmul.f32.vlgmr.msra.gmra.mxu0 %v129_v0  ;;  %258 = vmatmul.f32.vlgmr.msra.gmra.mxu1 %v129_v0  ;;  %v4176_v34 = vld [vmem:[#allocation12 + $0x110] sm:$0xff]  ;;  %v4179_v35 = vld [vmem:[#allocation12 + $0xe0] sm:$0xff]  ;;  %v4181_v36 = vld [vmem:[#allocation12 + $0xe8] sm:$0xff] }
  0x3f   :  { %299 = vmatmul.f32.vlgmr.msra.gmra.mxu2 %v129_v0  ;;  %340 = vmatmul.f32.vlgmr.msra.gmra.mxu3 %v129_v0  ;;  %v4186_v37 = vld [vmem:[#allocation12 + $0xf8] sm:$0xff]  ;;  %v4188_v38 = vld [vmem:[#allocation12 + $0xf0] sm:$0xff]  ;;  %v4194_v40 = vld [vmem:[#allocation12 + $0xc0] sm:$0xff] }
  0x40   :  { %509 = vmatpush.msrb.mxu0 %v4088_v1  ;;  %529 = vmatpush.msrb.mxu1 %v4090_v2  ;;  %v132_v39 = vld [vmem:[#allocation6 + $0x18] sm:$0xff]  ;;  %v4196_v41 = vld [vmem:[#allocation12 + $0xc8] sm:$0xff]  ;;  %v4202_v43 = vld [vmem:[#allocation12 + $0xd0] sm:$0xff] }
  0x41   :  { %569 = vmatpush.msrb.mxu3 %v4092_v3  ;;  %549 = vmatpush.msrb.mxu2 %v4094_v4  ;;  %v4200_v42 = vld [vmem:[#allocation12 + $0xd8] sm:$0xff]  ;;  %6324 = vst [vmem:[#allocation24_spill] sm:$0xff] %v4202_v43  ;;  %v4204_v44 = vld [vmem:[#allocation12 + $0xa0] sm:$0xff]  ;;  %v4206_v45 = vld [vmem:[#allocation12 + $0xa8] sm:$0xff] }
  0x42   :  { %510 = vmatpush.msrb.mxu0 %v4096_v5  ;;  %530 = vmatpush.msrb.mxu1 %v4098_v6  ;;  %6323 = vst [vmem:[#allocation23_spill] sm:$0xff] %v4200_v42  ;;  %v4210_v46 = vld [vmem:[#allocation12 + $0xb8] sm:$0xff]  ;;  %v4212_v47 = vld [vmem:[#allocation12 + $0xb0] sm:$0xff]  ;;  %v4215_v48 = vld [vmem:[#allocation12 + $0x80] sm:$0xff] }
  0x43   :  { %570 = vmatpush.msrb.mxu3 %v4102_v7  ;;  %550 = vmatpush.msrb.mxu2 %v4104_v8  ;;  %6325 = vst [vmem:[#allocation25_spill] sm:$0xff] %v4204_v44  ;;  %v4217_v49 = vld [vmem:[#allocation12 + $0x88] sm:$0xff]  ;;  %v4222_v50 = vld [vmem:[#allocation12 + $0x98] sm:$0xff]  ;;  %v4224_v51 = vld [vmem:[#allocation12 + $0x90] sm:$0xff] }
  0x44   :  { %511 = vmatpush.msrb.mxu0 %v4107_v9  ;;  %531 = vmatpush.msrb.mxu1 %v4109_v10  ;;  %6326 = vst [vmem:[#allocation26_spill] sm:$0xff] %v4206_v45  ;;  %v133_v52 = vld [vmem:[#allocation6 + $0x20] sm:$0xff]  ;;  %v4232_v54 = vld [vmem:[#allocation12 + $0x68] sm:$0xff]  ;;  %v4236_v55 = vld [vmem:[#allocation12 + $0x78] sm:$0xff] }
  0x45   :  { %571 = vmatpush.msrb.mxu3 %v4114_v11  ;;  %551 = vmatpush.msrb.mxu2 %v4116_v12  ;;  %6327 = vst [vmem:[#allocation27_spill] sm:$0xff] %v4210_v46  ;;  %v4230_v53 = vld [vmem:[#allocation12 + $0x60] sm:$0xff]  ;;  %v4238_v56 = vld [vmem:[#allocation12 + $0x70] sm:$0xff]  ;;  %v4242_v58 = vld [vmem:[#allocation12 + $0x48] sm:$0xff] }
  0x46   :  { %220 = vmatmul.f32.gmra.mxu0 %v130_v13  ;;  %261 = vmatmul.f32.gmra.mxu1 %v130_v13  ;;  %6328 = vst [vmem:[#allocation28_spill] sm:$0xff] %v4212_v47  ;;  %v4240_v57 = vld [vmem:[#allocation12 + $0x40] sm:$0xff]  ;;  %v4246_v59 = vld [vmem:[#allocation12 + $0x58] sm:$0xff]  ;;  %v4248_v60 = vld [vmem:[#allocation12 + $0x50] sm:$0xff] }
  0x47   :  { %302 = vmatmul.f32.gmra.mxu2 %v130_v13  ;;  %343 = vmatmul.f32.gmra.mxu3 %v130_v13  ;;  %6329 = vst [vmem:[#allocation29_spill] sm:$0xff] %v4215_v48  ;;  %v4251_v61 = vld [vmem:[#allocation12 + $0x20] sm:$0xff]  ;;  %v4253_v62 = vld [vmem:[#allocation12 + $0x28] sm:$0xff]  ;;  %v4258_v63 = vld [vmem:[#allocation12 + $0x30] sm:$0xff] }
  0x48   :  { %512 = vmatpush.msrb.mxu0 %v4122_v14  ;;  %532 = vmatpush.msrb.mxu1 %v4124_v15  ;;  %6330 = vst [vmem:[#allocation30_spill] sm:$0xff] %v4217_v49  ;;  %v4260_v0 = vld [vmem:[#allocation12 + $0x38] sm:$0xff]  ;;  %v134_v13 = vld [vmem:[#allocation6 + $0x28] sm:$0xff] }
  0x49   :  { %572 = vmatpush.msrb.mxu3 %v4128_v16  ;;  %552 = vmatpush.msrb.mxu2 %v4130_v17  ;;  %6331 = vst [vmem:[#allocation31_spill] sm:$0xff] %v4222_v50 }
  0x4a   :  { %513 = vmatpush.msrb.mxu0 %v4132_v18  ;;  %533 = vmatpush.msrb.mxu1 %v4134_v19  ;;  %6332 = vst [vmem:[#allocation32_spill] sm:$0xff] %v4224_v51 }
  0x4b   :  { %573 = vmatpush.msrb.mxu3 %v4138_v20  ;;  %553 = vmatpush.msrb.mxu2 %v4140_v21  ;;  %6333 = vst [vmem:[#allocation33_spill] sm:$0xff] %v4230_v53 }
  0x4c   :  { %514 = vmatpush.msrb.mxu0 %v4143_v22  ;;  %534 = vmatpush.msrb.mxu1 %v4145_v23  ;;  %6334 = vst [vmem:[#allocation34_spill] sm:$0xff] %v4232_v54 }
  0x4d   :  { %574 = vmatpush.msrb.mxu3 %v4150_v24  ;;  %554 = vmatpush.msrb.mxu2 %v4152_v25  ;;  %6335 = vst [vmem:[#allocation35_spill] sm:$0xff] %v4236_v55 }
  0x4e   :  { %223 = vmatmul.f32.gmra.mxu0 %v131_v26  ;;  %264 = vmatmul.f32.gmra.mxu1 %v131_v26  ;;  %6336 = vst [vmem:[#allocation36_spill] sm:$0xff] %v4238_v56 }
  0x4f   :  { %305 = vmatmul.f32.gmra.mxu2 %v131_v26  ;;  %346 = vmatmul.f32.gmra.mxu3 %v131_v26  ;;  %6337 = vst [vmem:[#allocation37_spill] sm:$0xff] %v4240_v57  ;;  %v4266_v26 = vld [vmem:[#allocation12] sm:$0xff] }
  0x50   :  { %515 = vmatpush.msrb.mxu0 %v4158_v27  ;;  %535 = vmatpush.msrb.mxu1 %v4160_v28  ;;  %6338 = vst [vmem:[#allocation38_spill] sm:$0xff] %v4242_v58 }
  0x51   :  { %575 = vmatpush.msrb.mxu3 %v4164_v29  ;;  %555 = vmatpush.msrb.mxu2 %v4166_v30  ;;  %6339 = vst [vmem:[#allocation39_spill] sm:$0xff] %v4246_v59 }
  0x52   :  { %516 = vmatpush.msrb.mxu0 %v4168_v31  ;;  %536 = vmatpush.msrb.mxu1 %v4170_v32  ;;  %6340 = vst [vmem:[#allocation40_spill] sm:$0xff] %v4248_v60 }
  0x53   :  { %576 = vmatpush.msrb.mxu3 %v4174_v33  ;;  %556 = vmatpush.msrb.mxu2 %v4176_v34  ;;  %6341 = vst [vmem:[#allocation41_spill] sm:$0xff] %v4251_v61 }
  0x54   :  { %517 = vmatpush.msrb.mxu0 %v4179_v35  ;;  %537 = vmatpush.msrb.mxu1 %v4181_v36  ;;  %6342 = vst [vmem:[#allocation42_spill] sm:$0xff] %v4253_v62 }
  0x55   :  { %577 = vmatpush.msrb.mxu3 %v4186_v37  ;;  %557 = vmatpush.msrb.mxu2 %v4188_v38  ;;  %6343 = vst [vmem:[#allocation43_spill] sm:$0xff] %v4258_v63 }
  0x56   :  { %226 = vmatmul.f32.gmra.mxu0 %v132_v39  ;;  %267 = vmatmul.f32.gmra.mxu1 %v132_v39  ;;  %6344 = vst [vmem:[#allocation44_spill] sm:$0xff] %v4260_v0 }
  0x57   :  { %308 = vmatmul.f32.gmra.mxu2 %v132_v39  ;;  %349 = vmatmul.f32.gmra.mxu3 %v132_v39  ;;  %6345 = vst [vmem:[#allocation45_spill] sm:$0xff] %v4266_v26  ;;  %v4268_v39 = vld [vmem:[#allocation12 + $0x8] sm:$0xff] }
  0x58   :  { %518 = vmatpush.msrb.mxu0 %v4194_v40  ;;  %538 = vmatpush.msrb.mxu1 %v4196_v41  ;;  %6346 = vst [vmem:[#allocation46_spill] sm:$0xff] %v4268_v39 }
  0x59   :  { %578 = vmatpush.msrb.mxu3 %v4200_v42  ;;  %558 = vmatpush.msrb.mxu2 %v4202_v43 }
  0x5a   :  { %519 = vmatpush.msrb.mxu0 %v4204_v44  ;;  %539 = vmatpush.msrb.mxu1 %v4206_v45 }
  0x5b   :  { %579 = vmatpush.msrb.mxu3 %v4210_v46  ;;  %559 = vmatpush.msrb.mxu2 %v4212_v47 }
  0x5c   :  { %520 = vmatpush.msrb.mxu0 %v4215_v48  ;;  %540 = vmatpush.msrb.mxu1 %v4217_v49 }
  0x5d   :  { %580 = vmatpush.msrb.mxu3 %v4222_v50  ;;  %560 = vmatpush.msrb.mxu2 %v4224_v51 }
  0x5e   :  { %229 = vmatmul.f32.gmra.mxu0 %v133_v52  ;;  %270 = vmatmul.f32.gmra.mxu1 %v133_v52 }
  0x5f   :  { %311 = vmatmul.f32.gmra.mxu2 %v133_v52  ;;  %352 = vmatmul.f32.gmra.mxu3 %v133_v52  ;;  %v4272_v52 = vld [vmem:[#allocation12 + $0x10] sm:$0xff] }
  0x60   :  { %521 = vmatpush.msrb.mxu0 %v4230_v53  ;;  %541 = vmatpush.msrb.mxu1 %v4232_v54  ;;  %6347 = vst [vmem:[#allocation47_spill] sm:$0xff] %v4272_v52 }
  0x61   :  { %581 = vmatpush.msrb.mxu3 %v4236_v55  ;;  %561 = vmatpush.msrb.mxu2 %v4238_v56 }
  0x62   :  { %522 = vmatpush.msrb.mxu0 %v4240_v57  ;;  %542 = vmatpush.msrb.mxu1 %v4242_v58  ;;  %v4274_v58 = vld [vmem:[#allocation12 + $0x18] sm:$0xff] }
  0x63   :  { %582 = vmatpush.msrb.mxu3 %v4246_v59  ;;  %562 = vmatpush.msrb.mxu2 %v4248_v60  ;;  %6348 = vst [vmem:[#allocation48_spill] sm:$0xff] %v4274_v58 }
  0x64   :  { %523 = vmatpush.msrb.mxu0 %v4251_v61  ;;  %543 = vmatpush.msrb.mxu1 %v4253_v62 }
  0x65   :  { %563 = vmatpush.msrb.mxu2 %v4258_v63  ;;  %583 = vmatpush.msrb.mxu3 %v4260_v0  ;;  %v135_v0 = vld [vmem:[#allocation6 + $0x30] sm:$0xff] }
  0x66   :  { %232 = vmatmul.f32.gmra.mxu0 %v134_v13  ;;  %273 = vmatmul.f32.gmra.mxu1 %v134_v13 }
  0x67   :  { %314 = vmatmul.f32.gmra.mxu2 %v134_v13  ;;  %355 = vmatmul.f32.gmra.mxu3 %v134_v13  ;;  %v136_v13 = vld [vmem:[#allocation6 + $0x38] sm:$0xff] }
  0x68   :  { %524 = vmatpush.msrb.mxu0 %v4266_v26  ;;  %544 = vmatpush.msrb.mxu1 %v4268_v39 }
  0x69   :  { %564 = vmatpush.msrb.mxu2 %v4272_v52  ;;  %584 = vmatpush.msrb.mxu3 %v4274_v58 }
  0x6a   :  { %662 = vmatpush.msra.mxu0 %v4088_v1  ;;  %682 = vmatpush.msra.mxu1 %v4090_v2 }
  0x6b   :  { %702 = vmatpush.msra.mxu2 %v4094_v4  ;;  %722 = vmatpush.msra.mxu3 %v4092_v3 }
  0x6c   :  { %663 = vmatpush.msra.mxu0 %v4096_v5  ;;  %683 = vmatpush.msra.mxu1 %v4098_v6 }
  0x6d   :  { %703 = vmatpush.msra.mxu2 %v4104_v8  ;;  %723 = vmatpush.msra.mxu3 %v4102_v7 }
  0x6e   :  { %235 = vmatmul.f32.gmra.mxu0 %v135_v0  ;;  %276 = vmatmul.f32.gmra.mxu1 %v135_v0 }
  0x6f   :  { %317 = vmatmul.f32.gmra.mxu2 %v135_v0  ;;  %358 = vmatmul.f32.gmra.mxu3 %v135_v0  ;;  %v6058_v0 = vmov 0.0  }
  0x70   :  { %664 = vmatpush.msra.mxu0 %v4107_v9  ;;  %684 = vmatpush.msra.mxu1 %v4109_v10 }
  0x71   :  { %704 = vmatpush.msra.mxu2 %v4116_v12  ;;  %724 = vmatpush.msra.mxu3 %v4114_v11 }
  0x72   :  { %665 = vmatpush.msra.mxu0 %v4122_v14  ;;  %685 = vmatpush.msra.mxu1 %v4124_v15 }
  0x73   :  { %705 = vmatpush.msra.mxu2 %v4130_v17  ;;  %725 = vmatpush.msra.mxu3 %v4128_v16 }
  0x74   :  { %666 = vmatpush.msra.mxu0 %v4132_v18  ;;  %686 = vmatpush.msra.mxu1 %v4134_v19 }
  0x75   :  { %706 = vmatpush.msra.mxu2 %v4140_v21  ;;  %726 = vmatpush.msra.mxu3 %v4138_v20 }
  0x76   :  { %238 = vmatmul.f32.gmra.mxu0 %v136_v13  ;;  %279 = vmatmul.f32.gmra.mxu1 %v136_v13 }
  0x77   :  { %320 = vmatmul.f32.gmra.mxu2 %v136_v13  ;;  %361 = vmatmul.f32.gmra.mxu3 %v136_v13  ;;  %v6349_v13 = vld [vmem:[#allocation38_spill] sm:$0xff] }
  0x78   :  { %667 = vmatpush.msra.mxu0 %v4143_v22  ;;  %687 = vmatpush.msra.mxu1 %v4145_v23 }
  0x79   :  { %707 = vmatpush.msra.mxu2 %v4152_v25  ;;  %727 = vmatpush.msra.mxu3 %v4150_v24 }
  0x7a   :  { %668 = vmatpush.msra.mxu0 %v4158_v27  ;;  %688 = vmatpush.msra.mxu1 %v4160_v28 }
  0x7b   :  { %708 = vmatpush.msra.mxu2 %v4166_v30  ;;  %728 = vmatpush.msra.mxu3 %v4164_v29 }
  0x7c   :  { %669 = vmatpush.msra.mxu0 %v4168_v31  ;;  %689 = vmatpush.msra.mxu1 %v4170_v32 }
  0x7d   :  { %709 = vmatpush.msra.mxu2 %v4176_v34  ;;  %729 = vmatpush.msra.mxu3 %v4174_v33 }
  0x7e   :  { %525 = vmatmul.f32.vlgmr.msrb.gmra.mxu0 %v6058_v0  ;;  %545 = vmatmul.f32.vlgmr.msrb.gmra.mxu1 %v6058_v0 }
  0x7f   :  { %565 = vmatmul.f32.vlgmr.msrb.gmra.mxu2 %v6058_v0  ;;  %585 = vmatmul.f32.vlgmr.msrb.gmra.mxu3 %v6058_v0  ;;  %v6350_v0 = vld [vmem:[#allocation44_spill] sm:$0xff] }
  0x80   :  { %670 = vmatpush.msra.mxu0 %v4179_v35  ;;  %690 = vmatpush.msra.mxu1 %v4181_v36 }
  0x81   :  { %710 = vmatpush.msra.mxu2 %v4188_v38  ;;  %730 = vmatpush.msra.mxu3 %v4186_v37 }
  0x82   :  { %671 = vmatpush.msra.mxu0 %v4194_v40  ;;  %691 = vmatpush.msra.mxu1 %v4196_v41 }
  0x83   :  { %711 = vmatpush.msra.mxu2 %v4202_v43  ;;  %731 = vmatpush.msra.mxu3 %v4200_v42 }
  0x84   :  { %672 = vmatpush.msra.mxu0 %v4204_v44  ;;  %692 = vmatpush.msra.mxu1 %v4206_v45 }
  0x85   :  { %712 = vmatpush.msra.mxu2 %v4212_v47  ;;  %732 = vmatpush.msra.mxu3 %v4210_v46 }
  0x86   :  { %673 = vmatpush.msra.mxu0 %v4215_v48  ;;  %693 = vmatpush.msra.mxu1 %v4217_v49 }
  0x87   :  { %713 = vmatpush.msra.mxu2 %v4224_v51  ;;  %733 = vmatpush.msra.mxu3 %v4222_v50 }
  0x88   :  { %674 = vmatpush.msra.mxu0 %v4230_v53  ;;  %694 = vmatpush.msra.mxu1 %v4232_v54 }
  0x89   :  { %714 = vmatpush.msra.mxu2 %v4238_v56  ;;  %734 = vmatpush.msra.mxu3 %v4236_v55 }
  0x8a   :  { %675 = vmatpush.msra.mxu0 %v4240_v57  ;;  %695 = vmatpush.msra.mxu1 %v6349_v13 }
  0x8b   :  { %715 = vmatpush.msra.mxu2 %v4248_v60  ;;  %735 = vmatpush.msra.mxu3 %v4246_v59 }
  0x8c   :  { %676 = vmatpush.msra.mxu0 %v4251_v61  ;;  %696 = vmatpush.msra.mxu1 %v4253_v62 }
  0x8d   :  { %716 = vmatpush.msra.mxu2 %v4258_v63  ;;  %736 = vmatpush.msra.mxu3 %v6350_v0 }
  0x8e   :  { %677 = vmatpush.msra.mxu0 %v4266_v26  ;;  %697 = vmatpush.msra.mxu1 %v4268_v39 }
  0x8f   :  { %717 = vmatpush.msra.mxu2 %v4272_v52  ;;  %737 = vmatpush.msra.mxu3 %v4274_v58 }
  0x90   :  { %816 = vmatpush.msrb.mxu0 %v4088_v1  ;;  %836 = vmatpush.msrb.mxu1 %v4090_v2 }
  0x91   :  { %856 = vmatpush.msrb.mxu2 %v4094_v4  ;;  %876 = vmatpush.msrb.mxu3 %v4092_v3 }
  0x92   :  { %817 = vmatpush.msrb.mxu0 %v4096_v5  ;;  %837 = vmatpush.msrb.mxu1 %v4098_v6 }
  0x93   :  { %857 = vmatpush.msrb.mxu2 %v4104_v8  ;;  %877 = vmatpush.msrb.mxu3 %v4102_v7 }
  0x94   :  { %818 = vmatpush.msrb.mxu0 %v4107_v9  ;;  %838 = vmatpush.msrb.mxu1 %v4109_v10 }
  0x95   :  { %858 = vmatpush.msrb.mxu2 %v4116_v12  ;;  %878 = vmatpush.msrb.mxu3 %v4114_v11 }
  0x96   :  { %819 = vmatpush.msrb.mxu0 %v4122_v14  ;;  %839 = vmatpush.msrb.mxu1 %v4124_v15 }
  0x97   :  { %859 = vmatpush.msrb.mxu2 %v4130_v17  ;;  %879 = vmatpush.msrb.mxu3 %v4128_v16 }
  0x98   :  { %820 = vmatpush.msrb.mxu0 %v4132_v18  ;;  %840 = vmatpush.msrb.mxu1 %v4134_v19 }
  0x99   :  { %860 = vmatpush.msrb.mxu2 %v4140_v21  ;;  %880 = vmatpush.msrb.mxu3 %v4138_v20 }
  0x9a   :  { %821 = vmatpush.msrb.mxu0 %v4143_v22  ;;  %841 = vmatpush.msrb.mxu1 %v4145_v23 }
  0x9b   :  { %861 = vmatpush.msrb.mxu2 %v4152_v25  ;;  %881 = vmatpush.msrb.mxu3 %v4150_v24 }
  0x9c   :  { %822 = vmatpush.msrb.mxu0 %v4158_v27  ;;  %842 = vmatpush.msrb.mxu1 %v4160_v28 }
  0x9d   :  { %862 = vmatpush.msrb.mxu2 %v4166_v30  ;;  %882 = vmatpush.msrb.mxu3 %v4164_v29 }
  0x9e   :  { %823 = vmatpush.msrb.mxu0 %v4168_v31  ;;  %843 = vmatpush.msrb.mxu1 %v4170_v32 }
  0x9f   :  { %863 = vmatpush.msrb.mxu2 %v4176_v34  ;;  %883 = vmatpush.msrb.mxu3 %v4174_v33 }
  0xa0   :  { %824 = vmatpush.msrb.mxu0 %v4179_v35  ;;  %844 = vmatpush.msrb.mxu1 %v4181_v36 }
  0xa1   :  { %864 = vmatpush.msrb.mxu2 %v4188_v38  ;;  %884 = vmatpush.msrb.mxu3 %v4186_v37 }
  0xa2   :  { %825 = vmatpush.msrb.mxu0 %v4194_v40  ;;  %845 = vmatpush.msrb.mxu1 %v4196_v41 }
  0xa3   :  { %865 = vmatpush.msrb.mxu2 %v4202_v43  ;;  %885 = vmatpush.msrb.mxu3 %v4200_v42 }
  0xa4   :  { %826 = vmatpush.msrb.mxu0 %v4204_v44  ;;  %846 = vmatpush.msrb.mxu1 %v4206_v45 }
  0xa5   :  { %866 = vmatpush.msrb.mxu2 %v4212_v47  ;;  %886 = vmatpush.msrb.mxu3 %v4210_v46 }
  0xa6   :  { %827 = vmatpush.msrb.mxu0 %v4215_v48  ;;  %847 = vmatpush.msrb.mxu1 %v4217_v49 }
  0xa7   :  { %867 = vmatpush.msrb.mxu2 %v4224_v51  ;;  %887 = vmatpush.msrb.mxu3 %v4222_v50 }
  0xa8   :  { %828 = vmatpush.msrb.mxu0 %v4230_v53  ;;  %848 = vmatpush.msrb.mxu1 %v4232_v54 }
  0xa9   :  { %868 = vmatpush.msrb.mxu2 %v4238_v56  ;;  %888 = vmatpush.msrb.mxu3 %v4236_v55 }
  0xaa   :  { %829 = vmatpush.msrb.mxu0 %v4240_v57  ;;  %849 = vmatpush.msrb.mxu1 %v6349_v13 }
  0xab   :  { %869 = vmatpush.msrb.mxu2 %v4248_v60  ;;  %889 = vmatpush.msrb.mxu3 %v4246_v59 }
  0xac   :  { %830 = vmatpush.msrb.mxu0 %v4251_v61  ;;  %850 = vmatpush.msrb.mxu1 %v4253_v62 }
  0xad   :  { %870 = vmatpush.msrb.mxu2 %v4258_v63  ;;  %890 = vmatpush.msrb.mxu3 %v6350_v0 }
  0xae   :  { %831 = vmatpush.msrb.mxu0 %v4266_v26  ;;  %851 = vmatpush.msrb.mxu1 %v4268_v39 }
  0xaf   :  { %871 = vmatpush.msrb.mxu2 %v4272_v52  ;;  %891 = vmatpush.msrb.mxu3 %v4274_v58 }
  0xbb   :  { %v218_v13 = vpop.f32.mrf.mxu0  ;;  %v259_v60 = vpop.f32.mrf.mxu1 }
  0xc2   :  { %v300_v57 = vpop.f32.mrf.mxu2  ;;  %v341_v59 = vpop.f32.mrf.mxu3 }
  0xc3   :  { %v4412_v55 = vpop.f32.mrf.mxu0  ;;  %v4414_v61 = vpop.f32.mrf.mxu1 }
  0xc4   :  { %6351 = vst [vmem:[#allocation49_spill] sm:$0xff] %v4412_v55 }
  0xc5   :  { %6352 = vst [vmem:[#allocation50_spill] sm:$0xff] %v4414_v61 }
  0xca   :  { %v4416_v62 = vpop.f32.mrf.mxu2  ;;  %v4418_v63 = vpop.f32.mrf.mxu3 }
  0xcb   :  { %6353 = vst [vmem:[#allocation51_spill] sm:$0xff] %v4416_v62  ;;  %v4420_v0 = vpop.f32.mrf.mxu0  ;;  %v4422_v26 = vpop.f32.mrf.mxu1 }
  0xcc   :  { %6354 = vst [vmem:[#allocation52_spill] sm:$0xff] %v4418_v63 }
  0xcd   :  { %6355 = vst [vmem:[#allocation53_spill] sm:$0xff] %v4420_v0 }
  0xce   :  { %6356 = vst [vmem:[#allocation54_spill] sm:$0xff] %v4422_v26 }
  0xd2   :  { %v4424_v39 = vpop.f32.mrf.mxu2  ;;  %v4426_v52 = vpop.f32.mrf.mxu3 }
  0xd3   :  { %6357 = vst [vmem:[#allocation55_spill] sm:$0xff] %v4424_v39  ;;  %v4428_v58 = vpop.f32.mrf.mxu0  ;;  %v4430_v56 = vpop.f32.mrf.mxu1 }
  0xd4   :  { %6358 = vst [vmem:[#allocation56_spill] sm:$0xff] %v4426_v52 }
  0xd5   :  { %6359 = vst [vmem:[#allocation57_spill] sm:$0xff] %v4428_v58 }
  0xd6   :  { %6360 = vst [vmem:[#allocation58_spill] sm:$0xff] %v4430_v56 }
  0xda   :  { %v4432_v54 = vpop.f32.mrf.mxu2  ;;  %v4434_v55 = vpop.f32.mrf.mxu3 }
  0xdb   :  { %6361 = vst [vmem:[#allocation59_spill] sm:$0xff] %v4432_v54  ;;  %v4436_v61 = vpop.f32.mrf.mxu0  ;;  %v4438_v62 = vpop.f32.mrf.mxu1 }
  0xdc   :  { %6362 = vst [vmem:[#allocation60_spill] sm:$0xff] %v4434_v55 }
  0xdd   :  { %6363 = vst [vmem:[#allocation61_spill] sm:$0xff] %v4436_v61  ;;  %v365_v61 = vld [vmem:[#allocation14] sm:$0xf] }
  0xde   :  { %6364 = vst [vmem:[#allocation62_spill] sm:$0xff] %v4438_v62  ;;  %v4472_v51 = vperm.slane %v365_v61, 3 }
  0xe0   :  { %6380 = vst [vmem:[#allocation78_spill] sm:$0xff] %v4472_v51  ;;  %v378_v49 = vadd.f32 %v4472_v51, %v341_v59 }
  0xe2   :  { %v4440_v63 = vpop.f32.mrf.mxu3  ;;  %v4446_v39 = vpop.f32.mrf.mxu2 }
  0xe3   :  { %6365 = vst [vmem:[#allocation63_spill] sm:$0xff] %v4440_v63  ;;  %v4442_v0 = vpop.f32.mrf.mxu0  ;;  %v4444_v26 = vpop.f32.mrf.mxu1 }
  0xe4   :  { %6366 = vst [vmem:[#allocation64_spill] sm:$0xff] %v4442_v0  ;;  %v4462_v0 = vperm.slane %v365_v61, 0 }
  0xe5   :  { %6367 = vst [vmem:[#allocation65_spill] sm:$0xff] %v4444_v26  ;;  %v4464_v26 = vperm.slane %v365_v61, 1 }
  0xe6   :  { %6368 = vst [vmem:[#allocation66_spill] sm:$0xff] %v4446_v39 }
  0xe7   :  { %6376 = vst [vmem:[#allocation74_spill] sm:$0xff] %v4462_v0 }
  0xe8   :  { %6377 = vst [vmem:[#allocation75_spill] sm:$0xff] %v4464_v26 }
  0xea   :  { %v4448_v52 = vpop.f32.mrf.mxu3  ;;  %v4454_v54 = vpop.f32.mrf.mxu2 }
  0xeb   :  { %6369 = vst [vmem:[#allocation67_spill] sm:$0xff] %v4448_v52  ;;  %v4450_v58 = vpop.f32.mrf.mxu0  ;;  %v4452_v56 = vpop.f32.mrf.mxu1  ;;  %v375_v52 = vadd.f32 %v4462_v0, %v218_v13 }
  0xec   :  { %6370 = vst [vmem:[#allocation68_spill] sm:$0xff] %v4450_v58  ;;  %v376_v58 = vadd.f32 %v4464_v26, %v259_v60 }
  0xed   :  { %6371 = vst [vmem:[#allocation69_spill] sm:$0xff] %v4452_v56 }
  0xee   :  { %6372 = vst [vmem:[#allocation70_spill] sm:$0xff] %v4454_v54 }
  0xf2   :  { %v4456_v55 = vpop.f32.mrf.mxu3  ;;  %v4466_v39 = vpop.f32.mrf.mxu2 }
  0xf3   :  { %6373 = vst [vmem:[#allocation71_spill] sm:$0xff] %v4456_v55  ;;  %v4458_v62 = vpop.f32.mrf.mxu0  ;;  %v4460_v63 = vpop.f32.mrf.mxu1 }
  0xf4   :  { %6374 = vst [vmem:[#allocation72_spill] sm:$0xff] %v4458_v62 }
  0xf5   :  { %6375 = vst [vmem:[#allocation73_spill] sm:$0xff] %v4460_v63 }
  0xf6   :  { %6378 = vst [vmem:[#allocation76_spill] sm:$0xff] %v4466_v39 }
  0xfa   :  { %v4470_v56 = vpop.f32.mrf.mxu3  ;;  %v4475_v48 = vpop.f32.mrf.mxu2 }
  0xfb   :  { %6379 = vst [vmem:[#allocation77_spill] sm:$0xff] %v4470_v56  ;;  %v526_v54 = vpop.f32.mrf.mxu0  ;;  %v546_v53 = vpop.f32.mrf.mxu1 }
  0xfc   :  { %v589_v55 = vadd.f32 %v526_v54, %v375_v52  ;;  %v590_v50 = vadd.f32 %v546_v53, %v376_v58  ;;  %6381 = vst [vmem:[#allocation79_spill] sm:$0xff] %v4475_v48  ;;  %v4477_v54 = vperm.slane %v365_v61, 2 }
  0xfe   :  { %v3391_v62 = vmul.f32 -1.442695, %v589_v55  ;;  %v3392_v63 = vmul.f32 -1.442695, %v590_v50  ;;  %6382 = vst [vmem:[#allocation80_spill] sm:$0xff] %v4477_v54  ;;  %v377_v55 = vadd.f32 %v4477_v54, %v300_v57 }
 0x100   :  { %3454 = vpow2.f32 %v3391_v62 }
 0x101   :  { %3456 = vpow2.f32 %v3392_v63 }
 0x102   :  { %v586_v39 = vpop.f32.mrf.mxu3  ;;  %v566_v53 = vpop.f32.mrf.mxu2 }
 0x103   :  { %v592_v13 = vadd.f32 %v586_v39, %v378_v49  ;;  %v591_v62 = vadd.f32 %v566_v53, %v377_v55 }
 0x105   :  { %v3393_v0 = vmul.f32 -1.442695, %v592_v13 }
 0x106   :  { %v3455_v60 = vpop.eup %3454 }
 0x107   :  { %v3457_v26 = vpop.eup %3456  ;;  %v596_v56 = vadd.f32 1.0, %v3455_v60  ;;  %3458 = vpow2.f32 %v3393_v0 }
 0x108   :  { %v615_v46 = vadd.f32 1.0, %v3457_v26 }
 0x109   :  { %3460 = vrcp.f32 %v596_v56  ;;  %v608_v60 = vand.u32 2147483648, %v596_v56  ;;  %v606_v0 = vand.u32 2147483647, %v596_v56  ;;  %vm602_vm2 = vweird.f32 %v596_v56 }
 0x10a   :  { %3462 = vrcp.f32 %v615_v46  ;;  %v627_v26 = vand.u32 2147483648, %v615_v46  ;;  %v625_v51 = vand.u32 2147483647, %v615_v46  ;;  %vm621_vm3 = vweird.f32 %v615_v46 }
 0x10b   :  { %v609_v53 = vor.u32 1.1754944e-38, %v608_v60  ;;  %vm607_vm5 = vcmp.eq.f32.partialorder %v606_v0, 8.507059e+37 }
 0x10c   :  { %v628_v54 = vor.u32 1.1754944e-38, %v627_v26  ;;  %vm626_vm7 = vcmp.eq.f32.partialorder %v625_v51, 8.507059e+37 }
 0x10d   :  { %v3459_v50 = vpop.eup %3458 }
 0x10e   :  { %v635_v58 = vadd.f32 1.0, %v3459_v50 }
 0x10f   :  { %v3461_v59 = vpop.eup %3460 }
 0x110   :  { %v3463_v63 = vpop.eup %3462  ;;  %v598_v52 = vmul.f32 %v3461_v59, %v596_v56  ;;  %3464 = vrcp.f32 %v635_v58  ;;  %vm603_vm0 = vweird.f32 %v3461_v59  ;;  %vm641_vm9 = vweird.f32 %v635_v58 }
 0x111   :  { %v617_v49 = vmul.f32 %v3463_v63, %v615_v46  ;;  %3466 = vtanh.f32 %v591_v62  ;;  %vm622_vm1 = vweird.f32 %v3463_v63  ;;  %vm604_vm4 = vmor %vm602_vm2, %vm603_vm0  ;;  %v645_v56 = vand.u32 2147483647, %v635_v58 }
 0x112   :  { %v599_v39 = vsub.f32 1.0, %v598_v52  ;;  %vm623_vm6 = vmor %vm621_vm3, %vm622_vm1 }
 0x113   :  { %v618_v13 = vsub.f32 1.0, %v617_v49  ;;  %vm646_vm11 = vcmp.eq.f32.partialorder %v645_v56, 8.507059e+37 }
 0x114   :  { %v600_v61 = vmul.f32 %v3461_v59, %v599_v39 }
 0x115   :  { %v619_v48 = vmul.f32 %v3463_v63, %v618_v13 }
 0x116   :  { %v3465_v47 = vpop.eup %3464  ;;  %v601_v57 = vadd.f32 %v3461_v59, %v600_v61 }
 0x117   :  { %v620_v50 = vadd.f32 %v3463_v63, %v619_v48  ;;  %v637_v55 = vmul.f32 %v3465_v47, %v635_v58  ;;  %v3467_v62 = vpop.eup %3466  ;;  %vm642_vm8 = vweird.f32 %v3465_v47  ;;  %v647_v48 = vand.u32 2147483648, %v635_v58 }
 0x118   :  { %v605_v52 = vsel %vm604_vm4, %v3461_v59, %v601_v57  ;;  %vm643_vm10 = vmor %vm641_vm9, %vm642_vm8 }
 0x119   :  { %v610_v49 = vsel %vm607_vm5, %v609_v53, %v605_v52  ;;  %v624_v39 = vsel %vm623_vm6, %v3463_v63, %v620_v50  ;;  %v638_v45 = vsub.f32 1.0, %v637_v55  ;;  %v648_v60 = vor.u32 1.1754944e-38, %v647_v48  ;;  %v6416_v52 = vld [vmem:[#allocation51_spill] sm:$0xff] }
 0x11a   :  { %v629_v13 = vsel %vm626_vm7, %v628_v54, %v624_v39  ;;  %v652_v44 = vmul.f32 %v3467_v62, %v610_v49  ;;  %v6417_v62 = vld [vmem:[#allocation80_spill] sm:$0xff] }
 0x11b   :  { %v651_v42 = vmul.f32 0.0, %v629_v13  ;;  %v639_v43 = vmul.f32 %v3465_v47, %v638_v45  ;;  %v381_v49 = vadd.f32 %v6417_v62, %v6416_v52 }
 0x11d   :  { %v4480_v61 = vadd.f32 %v652_v44, %v651_v42  ;;  %v640_v46 = vadd.f32 %v3465_v47, %v639_v43  ;;  %v6414_v42 = vld [vmem:[#allocation52_spill] sm:$0xff]  ;;  %v6415_v43 = vld [vmem:[#allocation78_spill] sm:$0xff] }
 0x11e   :  { %v382_v44 = vadd.f32 %v6415_v43, %v6414_v42 }
 0x11f   :  { %3468 = vtanh.f32 %v4480_v61  ;;  %v644_v59 = vsel %vm643_vm10, %v3465_v47, %v640_v46 }
 0x120   :  { %v649_v51 = vsel %vm646_vm11, %v648_v60, %v644_v59 }
 0x125   :  { %v3469_v63 = vpop.eup %3468 }
 0x126   :  { %v4483_v26 = vmul.f32 %v3469_v63, %v649_v51 }
 0x128   :  { %6383 = vst [vmem:[#allocation81_spill] sm:$0xff] %v4483_v26  ;;  %678 = vmatmul.f32.vlgmr.msra.gmra.mxu0 %v4483_v26  ;;  %698 = vmatmul.f32.vlgmr.msra.gmra.mxu1 %v4483_v26 }
 0x129   :  { %718 = vmatmul.f32.vlgmr.msra.gmra.mxu2 %v4483_v26  ;;  %738 = vmatmul.f32.vlgmr.msra.gmra.mxu3 %v4483_v26  ;;  %v4667_v26 = vld [vmem:[#allocation12 + $0xe0] sm:$0xff] }
 0x12a   :  { %970 = vmatpush.msra.mxu0 %v4088_v1  ;;  %990 = vmatpush.msra.mxu1 %v4090_v2  ;;  %v6384_v1 = vld [vmem:[#allocation24_spill] sm:$0xff]  ;;  %v6385_v2 = vld [vmem:[#allocation23_spill] sm:$0xff] }
 0x12b   :  { %1010 = vmatpush.msra.mxu2 %v4094_v4  ;;  %1030 = vmatpush.msra.mxu3 %v4092_v3  ;;  %v6386_v3 = vld [vmem:[#allocation25_spill] sm:$0xff]  ;;  %v6387_v4 = vld [vmem:[#allocation26_spill] sm:$0xff] }
 0x12c   :  { %971 = vmatpush.msra.mxu0 %v4096_v5  ;;  %991 = vmatpush.msra.mxu1 %v4098_v6  ;;  %v6388_v5 = vld [vmem:[#allocation28_spill] sm:$0xff]  ;;  %v6389_v6 = vld [vmem:[#allocation27_spill] sm:$0xff] }
 0x12d   :  { %1011 = vmatpush.msra.mxu2 %v4104_v8  ;;  %1031 = vmatpush.msra.mxu3 %v4102_v7  ;;  %v6390_v7 = vld [vmem:[#allocation29_spill] sm:$0xff]  ;;  %v6391_v8 = vld [vmem:[#allocation30_spill] sm:$0xff] }
 0x12e   :  { %972 = vmatpush.msra.mxu0 %v4107_v9  ;;  %992 = vmatpush.msra.mxu1 %v4109_v10  ;;  %v6392_v9 = vld [vmem:[#allocation32_spill] sm:$0xff]  ;;  %v6393_v10 = vld [vmem:[#allocation31_spill] sm:$0xff] }
 0x12f   :  { %1012 = vmatpush.msra.mxu2 %v4116_v12  ;;  %1032 = vmatpush.msra.mxu3 %v4114_v11  ;;  %v6394_v11 = vld [vmem:[#allocation33_spill] sm:$0xff]  ;;  %v6395_v12 = vld [vmem:[#allocation34_spill] sm:$0xff] }
 0x130   :  { %973 = vmatpush.msra.mxu0 %v4122_v14  ;;  %993 = vmatpush.msra.mxu1 %v4124_v15  ;;  %v6396_v14 = vld [vmem:[#allocation36_spill] sm:$0xff]  ;;  %v6397_v15 = vld [vmem:[#allocation35_spill] sm:$0xff] }
 0x131   :  { %1013 = vmatpush.msra.mxu2 %v4130_v17  ;;  %1033 = vmatpush.msra.mxu3 %v4128_v16  ;;  %v6398_v16 = vld [vmem:[#allocation37_spill] sm:$0xff]  ;;  %v6399_v17 = vld [vmem:[#allocation38_spill] sm:$0xff] }
 0x132   :  { %974 = vmatpush.msra.mxu0 %v4132_v18  ;;  %994 = vmatpush.msra.mxu1 %v4134_v19  ;;  %v6400_v18 = vld [vmem:[#allocation40_spill] sm:$0xff]  ;;  %v6401_v19 = vld [vmem:[#allocation39_spill] sm:$0xff] }
 0x133   :  { %1014 = vmatpush.msra.mxu2 %v4140_v21  ;;  %1034 = vmatpush.msra.mxu3 %v4138_v20  ;;  %v6402_v20 = vld [vmem:[#allocation41_spill] sm:$0xff]  ;;  %v6403_v21 = vld [vmem:[#allocation42_spill] sm:$0xff] }
 0x134   :  { %975 = vmatpush.msra.mxu0 %v4143_v22  ;;  %995 = vmatpush.msra.mxu1 %v4145_v23  ;;  %v6404_v22 = vld [vmem:[#allocation43_spill] sm:$0xff]  ;;  %v6405_v23 = vld [vmem:[#allocation44_spill] sm:$0xff] }
 0x135   :  { %1015 = vmatpush.msra.mxu2 %v4152_v25  ;;  %1035 = vmatpush.msra.mxu3 %v4150_v24  ;;  %v6406_v24 = vld [vmem:[#allocation45_spill] sm:$0xff]  ;;  %v6407_v25 = vld [vmem:[#allocation46_spill] sm:$0xff] }
 0x136   :  { %976 = vmatpush.msra.mxu0 %v4158_v27  ;;  %996 = vmatpush.msra.mxu1 %v4160_v28  ;;  %v6408_v27 = vld [vmem:[#allocation47_spill] sm:$0xff]  ;;  %v6409_v28 = vld [vmem:[#allocation48_spill] sm:$0xff] }
 0x137   :  { %1016 = vmatpush.msra.mxu2 %v4166_v30  ;;  %1036 = vmatpush.msra.mxu3 %v4164_v29  ;;  %v6410_v29 = vld [vmem:[#allocation49_spill] sm:$0xff]  ;;  %v6411_v30 = vld [vmem:[#allocation74_spill] sm:$0xff] }
 0x138   :  { %977 = vmatpush.msra.mxu0 %v4168_v31  ;;  %997 = vmatpush.msra.mxu1 %v4170_v32  ;;  %v379_v31 = vadd.f32 %v6411_v30, %v6410_v29  ;;  %v6412_v32 = vld [vmem:[#allocation50_spill] sm:$0xff] }
 0x139   :  { %1017 = vmatpush.msra.mxu2 %v4176_v34  ;;  %1037 = vmatpush.msra.mxu3 %v4174_v33  ;;  %v6413_v33 = vld [vmem:[#allocation75_spill] sm:$0xff] }
 0x13a   :  { %978 = vmatpush.msra.mxu0 %v4179_v35  ;;  %998 = vmatpush.msra.mxu1 %v4181_v36  ;;  %v380_v34 = vadd.f32 %v6413_v33, %v6412_v32 }
 0x13b   :  { %1018 = vmatpush.msra.mxu2 %v4188_v38  ;;  %1038 = vmatpush.msra.mxu3 %v4186_v37 }
 0x13c   :  { %979 = vmatpush.msra.mxu0 %v4194_v40  ;;  %999 = vmatpush.msra.mxu1 %v4196_v41 }
 0x13d   :  { %1019 = vmatpush.msra.mxu2 %v6384_v1  ;;  %1039 = vmatpush.msra.mxu3 %v6385_v2 }
 0x13e   :  { %980 = vmatpush.msra.mxu0 %v6386_v3  ;;  %1000 = vmatpush.msra.mxu1 %v6387_v4 }
 0x13f   :  { %1020 = vmatpush.msra.mxu2 %v6388_v5  ;;  %1040 = vmatpush.msra.mxu3 %v6389_v6 }
 0x140   :  { %981 = vmatpush.msra.mxu0 %v6390_v7  ;;  %1001 = vmatpush.msra.mxu1 %v6391_v8 }
 0x141   :  { %1021 = vmatpush.msra.mxu2 %v6392_v9  ;;  %1041 = vmatpush.msra.mxu3 %v6393_v10 }
 0x142   :  { %982 = vmatpush.msra.mxu0 %v6394_v11  ;;  %1002 = vmatpush.msra.mxu1 %v6395_v12 }
 0x143   :  { %1022 = vmatpush.msra.mxu2 %v6396_v14  ;;  %1042 = vmatpush.msra.mxu3 %v6397_v15 }
 0x144   :  { %983 = vmatpush.msra.mxu0 %v6398_v16  ;;  %1003 = vmatpush.msra.mxu1 %v6399_v17 }
 0x145   :  { %1023 = vmatpush.msra.mxu2 %v6400_v18  ;;  %1043 = vmatpush.msra.mxu3 %v6401_v19 }
 0x146   :  { %984 = vmatpush.msra.mxu0 %v6402_v20  ;;  %1004 = vmatpush.msra.mxu1 %v6403_v21 }
 0x147   :  { %1024 = vmatpush.msra.mxu2 %v6404_v22  ;;  %1044 = vmatpush.msra.mxu3 %v6405_v23 }
 0x148   :  { %985 = vmatpush.msra.mxu0 %v6406_v24  ;;  %1005 = vmatpush.msra.mxu1 %v6407_v25 }
 0x149   :  { %1025 = vmatpush.msra.mxu2 %v6408_v27  ;;  %1045 = vmatpush.msra.mxu3 %v6409_v28 }
 0x1a5   :  { %v679_v35 = vpop.f32.mrf.mxu0  ;;  %v699_v36 = vpop.f32.mrf.mxu1 }
 0x1a6   :  { %v742_v37 = vadd.f32 %v679_v35, %v379_v31  ;;  %v743_v38 = vadd.f32 %v699_v36, %v380_v34 }
 0x1a8   :  { %v3394_v40 = vmul.f32 -1.442695, %v742_v37  ;;  %v3395_v41 = vmul.f32 -1.442695, %v743_v38 }
 0x1aa   :  { %3470 = vpow2.f32 %v3394_v40 }
 0x1ab   :  { %3472 = vpow2.f32 %v3395_v41 }
 0x1ac   :  { %v739_v45 = vpop.f32.mrf.mxu3  ;;  %v719_v50 = vpop.f32.mrf.mxu2 }
 0x1ad   :  { %v745_v47 = vadd.f32 %v739_v45, %v382_v44  ;;  %v744_v46 = vadd.f32 %v719_v50, %v381_v49 }
 0x1af   :  { %v3396_v54 = vmul.f32 -1.442695, %v745_v47 }
 0x1b0   :  { %v3471_v58 = vpop.eup %3470 }
 0x1b1   :  { %v3473_v0 = vpop.eup %3472  ;;  %v749_v57 = vadd.f32 1.0, %v3471_v58  ;;  %3474 = vpow2.f32 %v3396_v54 }
 0x1b2   :  { %v768_v53 = vadd.f32 1.0, %v3473_v0 }
 0x1b3   :  { %3476 = vrcp.f32 %v749_v57  ;;  %v761_v51 = vand.u32 2147483648, %v749_v57  ;;  %v759_v32 = vand.u32 2147483647, %v749_v57  ;;  %vm755_vm14 = vweird.f32 %v749_v57 }
 0x1b4   :  { %3478 = vrcp.f32 %v768_v53  ;;  %v780_v29 = vand.u32 2147483648, %v768_v53  ;;  %v778_v35 = vand.u32 2147483647, %v768_v53  ;;  %vm774_vm15 = vweird.f32 %v768_v53 }
 0x1b5   :  { %v762_v38 = vor.u32 1.1754944e-38, %v761_v51  ;;  %vm760_vm2 = vcmp.eq.f32.partialorder %v759_v32, 8.507059e+37  ;;  %v4580_v51 = vld [vmem:[#allocation12 + $0x1f8] sm:$0xff]  ;;  %v4589_v32 = vld [vmem:[#allocation12 + $0x1d0] sm:$0xff] }
 0x1b6   :  { %v781_v42 = vor.u32 1.1754944e-38, %v780_v29  ;;  %vm779_vm3 = vcmp.eq.f32.partialorder %v778_v35, 8.507059e+37  ;;  %v4583_v29 = vld [vmem:[#allocation12 + $0x1c0] sm:$0xff] }
 0x1b7   :  { %v3475_v55 = vpop.eup %3474  ;;  %v4595_v35 = vld [vmem:[#allocation12 + $0x1a0] sm:$0xff] }
 0x1b8   :  { %v788_v39 = vadd.f32 1.0, %v3475_v55 }
 0x1b9   :  { %v3477_v13 = vpop.eup %3476 }
 0x1ba   :  { %v3479_v48 = vpop.eup %3478  ;;  %v751_v56 = vmul.f32 %v3477_v13, %v749_v57  ;;  %3480 = vrcp.f32 %v788_v39  ;;  %vm756_vm12 = vweird.f32 %v3477_v13  ;;  %v800_v49 = vand.u32 2147483648, %v788_v39 }
 0x1bb   :  { %v770_v59 = vmul.f32 %v3479_v48, %v768_v53  ;;  %3482 = vtanh.f32 %v744_v46  ;;  %vm775_vm13 = vweird.f32 %v3479_v48  ;;  %vm757_vm0 = vmor %vm755_vm14, %vm756_vm12  ;;  %vm794_vm5 = vweird.f32 %v788_v39 }
 0x1bc   :  { %v752_v60 = vsub.f32 1.0, %v751_v56  ;;  %vm776_vm1 = vmor %vm774_vm15, %vm775_vm13  ;;  %v801_v56 = vor.u32 1.1754944e-38, %v800_v49  ;;  %v4646_v49 = vld [vmem:[#allocation12 + $0x128] sm:$0xff] }
 0x1bd   :  { %v771_v63 = vsub.f32 1.0, %v770_v59 }
 0x1be   :  { %v753_v31 = vmul.f32 %v3477_v13, %v752_v60 }
 0x1bf   :  { %v772_v34 = vmul.f32 %v3479_v48, %v771_v63  ;;  %v4577_v63 = vld [vmem:[#allocation12 + $0x1f0] sm:$0xff] }
 0x1c0   :  { %v3481_v36 = vpop.eup %3480  ;;  %v754_v37 = vadd.f32 %v3477_v13, %v753_v31  ;;  %v4586_v31 = vld [vmem:[#allocation12 + $0x1c8] sm:$0xff] }
 0x1c1   :  { %v773_v40 = vadd.f32 %v3479_v48, %v772_v34  ;;  %v790_v41 = vmul.f32 %v3481_v36, %v788_v39  ;;  %v3483_v45 = vpop.eup %3482  ;;  %vm795_vm4 = vweird.f32 %v3481_v36  ;;  %v4592_v34 = vld [vmem:[#allocation12 + $0x1d8] sm:$0xff] }
 0x1c2   :  { %v758_v44 = vsel %vm757_vm0, %v3477_v13, %v754_v37  ;;  %v798_v13 = vand.u32 2147483647, %v788_v39  ;;  %vm796_vm6 = vmor %vm794_vm5, %vm795_vm4  ;;  %v4574_v39 = vld [vmem:[#allocation12 + $0x1e8] sm:$0xff]  ;;  %v4601_v37 = vld [vmem:[#allocation12 + $0x1b0] sm:$0xff] }
 0x1c3   :  { %v763_v47 = vsel %vm760_vm2, %v762_v38, %v758_v44  ;;  %v777_v54 = vsel %vm776_vm1, %v3479_v48, %v773_v40  ;;  %v791_v58 = vsub.f32 1.0, %v790_v41  ;;  %v4604_v38 = vld [vmem:[#allocation12 + $0x1b8] sm:$0xff]  ;;  %v4607_v40 = vld [vmem:[#allocation12 + $0x180] sm:$0xff]  ;;  %v4610_v41 = vld [vmem:[#allocation12 + $0x188] sm:$0xff] }
 0x1c4   :  { %v782_v0 = vsel %vm779_vm3, %v781_v42, %v777_v54  ;;  %v805_v50 = vmul.f32 %v3483_v45, %v763_v47  ;;  %vm799_vm7 = vcmp.eq.f32.partialorder %v798_v13, 8.507059e+37  ;;  %v4613_v42 = vld [vmem:[#allocation12 + $0x190] sm:$0xff]  ;;  %v4616_v44 = vld [vmem:[#allocation12 + $0x198] sm:$0xff]  ;;  %v4619_v45 = vld [vmem:[#allocation12 + $0x160] sm:$0xff] }
 0x1c5   :  { %v804_v55 = vmul.f32 %v782_v0, %v4480_v61  ;;  %v792_v52 = vmul.f32 %v3481_v36, %v791_v58  ;;  %v4571_v61 = vld [vmem:[#allocation12 + $0x1e0] sm:$0xff]  ;;  %v4622_v47 = vld [vmem:[#allocation12 + $0x168] sm:$0xff]  ;;  %v4625_v54 = vld [vmem:[#allocation12 + $0x170] sm:$0xff] }
 0x1c6   :  { %v4628_v58 = vld [vmem:[#allocation12 + $0x178] sm:$0xff]  ;;  %v4631_v0 = vld [vmem:[#allocation12 + $0x140] sm:$0xff]  ;;  %v4649_v13 = vld [vmem:[#allocation12 + $0x130] sm:$0xff] }
 0x1c7   :  { %v4562_v57 = vadd.f32 %v805_v50, %v804_v55  ;;  %v793_v53 = vadd.f32 %v3481_v36, %v792_v52  ;;  %v4634_v50 = vld [vmem:[#allocation12 + $0x148] sm:$0xff]  ;;  %v4637_v55 = vld [vmem:[#allocation12 + $0x150] sm:$0xff]  ;;  %v4640_v52 = vld [vmem:[#allocation12 + $0x158] sm:$0xff] }
 0x1c9   :  { %3484 = vtanh.f32 %v4562_v57  ;;  %v797_v46 = vsel %vm796_vm6, %v3481_v36, %v793_v53  ;;  %v4598_v36 = vld [vmem:[#allocation12 + $0x1a8] sm:$0xff]  ;;  %v4643_v53 = vld [vmem:[#allocation12 + $0x120] sm:$0xff] }
 0x1ca   :  { %v802_v59 = vsel %vm799_vm7, %v801_v56, %v797_v46  ;;  %v4652_v46 = vld [vmem:[#allocation12 + $0x138] sm:$0xff]  ;;  %v4655_v56 = vld [vmem:[#allocation12 + $0x100] sm:$0xff] }
 0x1cb   :  { %6419 = vst [vmem:[#allocation23_spill] sm:$0xff] %v4652_v46 }
 0x1cc   :  { %6420 = vst [vmem:[#allocation25_spill] sm:$0xff] %v4655_v56 }
 0x1cf   :  { %v3485_v48 = vpop.eup %3484 }
 0x1d0   :  { %v4565_v60 = vmul.f32 %v3485_v48, %v802_v59  ;;  %v4658_v48 = vld [vmem:[#allocation12 + $0x108] sm:$0xff]  ;;  %v4661_v59 = vld [vmem:[#allocation12 + $0x110] sm:$0xff] }
 0x1d1   :  { %6421 = vst [vmem:[#allocation26_spill] sm:$0xff] %v4658_v48 }
 0x1d2   :  { %6418 = vst [vmem:[#allocation24_spill] sm:$0xff] %v4565_v60  ;;  %832 = vmatmul.f32.vlgmr.msrb.gmra.mxu0 %v4565_v60  ;;  %852 = vmatmul.f32.vlgmr.msrb.gmra.mxu1 %v4565_v60 }
 0x1d3   :  { %872 = vmatmul.f32.vlgmr.msrb.gmra.mxu2 %v4565_v60  ;;  %892 = vmatmul.f32.vlgmr.msrb.gmra.mxu3 %v4565_v60  ;;  %6422 = vst [vmem:[#allocation28_spill] sm:$0xff] %v4661_v59  ;;  %v4664_v60 = vld [vmem:[#allocation12 + $0x118] sm:$0xff] }
 0x1d4   :  { %1124 = vmatpush.msrb.mxu0 %v4571_v61  ;;  %1144 = vmatpush.msrb.mxu1 %v4574_v39  ;;  %6423 = vst [vmem:[#allocation27_spill] sm:$0xff] %v4664_v60 }
 0x1d5   :  { %1164 = vmatpush.msrb.mxu2 %v4577_v63  ;;  %1184 = vmatpush.msrb.mxu3 %v4580_v51 }
 0x1d6   :  { %1125 = vmatpush.msrb.mxu0 %v4583_v29  ;;  %1145 = vmatpush.msrb.mxu1 %v4586_v31 }
 0x1d7   :  { %1165 = vmatpush.msrb.mxu2 %v4589_v32  ;;  %1185 = vmatpush.msrb.mxu3 %v4592_v34 }
 0x1d8   :  { %1126 = vmatpush.msrb.mxu0 %v4595_v35  ;;  %1146 = vmatpush.msrb.mxu1 %v4598_v36 }
 0x1d9   :  { %1166 = vmatpush.msrb.mxu2 %v4601_v37  ;;  %1186 = vmatpush.msrb.mxu3 %v4604_v38 }
 0x1da   :  { %1127 = vmatpush.msrb.mxu0 %v4607_v40  ;;  %1147 = vmatpush.msrb.mxu1 %v4610_v41 }
 0x1db   :  { %1167 = vmatpush.msrb.mxu2 %v4613_v42  ;;  %1187 = vmatpush.msrb.mxu3 %v4616_v44 }
 0x1dc   :  { %1128 = vmatpush.msrb.mxu0 %v4619_v45  ;;  %1148 = vmatpush.msrb.mxu1 %v4622_v47 }
 0x1dd   :  { %1168 = vmatpush.msrb.mxu2 %v4625_v54  ;;  %1188 = vmatpush.msrb.mxu3 %v4628_v58 }
 0x1de   :  { %1129 = vmatpush.msrb.mxu0 %v4631_v0  ;;  %1149 = vmatpush.msrb.mxu1 %v4634_v50 }
 0x1df   :  { %1169 = vmatpush.msrb.mxu2 %v4637_v55  ;;  %1189 = vmatpush.msrb.mxu3 %v4640_v52 }
 0x1e0   :  { %1130 = vmatpush.msrb.mxu0 %v4643_v53  ;;  %1150 = vmatpush.msrb.mxu1 %v4646_v49 }
 0x1e1   :  { %1170 = vmatpush.msrb.mxu2 %v4649_v13  ;;  %1190 = vmatpush.msrb.mxu3 %v4652_v46  ;;  %v4670_v46 = vld [vmem:[#allocation12 + $0xe8] sm:$0xff] }
 0x1e2   :  { %1131 = vmatpush.msrb.mxu0 %v4655_v56  ;;  %1151 = vmatpush.msrb.mxu1 %v4658_v48  ;;  %v4673_v56 = vld [vmem:[#allocation12 + $0xf0] sm:$0xff]  ;;  %v4676_v48 = vld [vmem:[#allocation12 + $0xf8] sm:$0xff] }
 0x1e3   :  { %1171 = vmatpush.msrb.mxu2 %v4661_v59  ;;  %1191 = vmatpush.msrb.mxu3 %v4664_v60  ;;  %v4679_v59 = vld [vmem:[#allocation12 + $0xc0] sm:$0xff]  ;;  %v4682_v60 = vld [vmem:[#allocation12 + $0xc8] sm:$0xff] }
 0x1e4   :  { %1132 = vmatpush.msrb.mxu0 %v4667_v26  ;;  %1152 = vmatpush.msrb.mxu1 %v4670_v46 }
 0x1e5   :  { %1172 = vmatpush.msrb.mxu2 %v4673_v56  ;;  %1192 = vmatpush.msrb.mxu3 %v4676_v48 }
 0x1e6   :  { %1133 = vmatpush.msrb.mxu0 %v4679_v59  ;;  %1153 = vmatpush.msrb.mxu1 %v4682_v60 }
 0x1e7   :  { %1173 = vmatpush.msrb.mxu2 %v6384_v1  ;;  %1193 = vmatpush.msrb.mxu3 %v6385_v2  ;;  %v6424_v1 = vld [vmem:[#allocation53_spill] sm:$0xff] }
 0x1e8   :  { %1134 = vmatpush.msrb.mxu0 %v6386_v3  ;;  %1154 = vmatpush.msrb.mxu1 %v6387_v4  ;;  %v383_v2 = vadd.f32 %v6411_v30, %v6424_v1  ;;  %v6425_v3 = vld [vmem:[#allocation54_spill] sm:$0xff] }
 0x1e9   :  { %1174 = vmatpush.msrb.mxu2 %v6388_v5  ;;  %1194 = vmatpush.msrb.mxu3 %v6389_v6  ;;  %v384_v4 = vadd.f32 %v6413_v33, %v6425_v3 }
 0x1ea   :  { %1135 = vmatpush.msrb.mxu0 %v6390_v7  ;;  %1155 = vmatpush.msrb.mxu1 %v6391_v8 }
 0x1eb   :  { %1175 = vmatpush.msrb.mxu2 %v6392_v9  ;;  %1195 = vmatpush.msrb.mxu3 %v6393_v10 }
 0x1ec   :  { %1136 = vmatpush.msrb.mxu0 %v6394_v11  ;;  %1156 = vmatpush.msrb.mxu1 %v6395_v12  ;;  %v6426_v11 = vld [vmem:[#allocation56_spill] sm:$0xff] }
 0x1ed   :  { %1176 = vmatpush.msrb.mxu2 %v6396_v14  ;;  %1196 = vmatpush.msrb.mxu3 %v6397_v15  ;;  %v386_v12 = vadd.f32 %v6415_v43, %v6426_v11 }
 0x1ee   :  { %1137 = vmatpush.msrb.mxu0 %v6398_v16  ;;  %1157 = vmatpush.msrb.mxu1 %v6399_v17 }
 0x1ef   :  { %1177 = vmatpush.msrb.mxu2 %v6400_v18  ;;  %1197 = vmatpush.msrb.mxu3 %v6401_v19 }
 0x1f0   :  { %1138 = vmatpush.msrb.mxu0 %v6402_v20  ;;  %1158 = vmatpush.msrb.mxu1 %v6403_v21 }
 0x1f1   :  { %1178 = vmatpush.msrb.mxu2 %v6404_v22  ;;  %1198 = vmatpush.msrb.mxu3 %v6405_v23  ;;  %v6427_v23 = vld [vmem:[#allocation55_spill] sm:$0xff] }
 0x1f2   :  { %1139 = vmatpush.msrb.mxu0 %v6406_v24  ;;  %1159 = vmatpush.msrb.mxu1 %v6407_v25  ;;  %v385_v24 = vadd.f32 %v6417_v62, %v6427_v23 }
 0x1f3   :  { %1179 = vmatpush.msrb.mxu2 %v6408_v27  ;;  %1199 = vmatpush.msrb.mxu3 %v6409_v28 }
 0x24f   :  { %v833_v5 = vpop.f32.mrf.mxu0  ;;  %v853_v6 = vpop.f32.mrf.mxu1 }
 0x250   :  { %v896_v7 = vadd.f32 %v833_v5, %v383_v2  ;;  %v897_v8 = vadd.f32 %v853_v6, %v384_v4 }
 0x252   :  { %v3397_v9 = vmul.f32 -1.442695, %v896_v7  ;;  %v3398_v10 = vmul.f32 -1.442695, %v897_v8 }
 0x254   :  { %3486 = vpow2.f32 %v3397_v9 }
 0x255   :  { %3488 = vpow2.f32 %v3398_v10 }
 0x256   :  { %v893_v14 = vpop.f32.mrf.mxu3  ;;  %v873_v21 = vpop.f32.mrf.mxu2 }
 0x257   :  { %v899_v15 = vadd.f32 %v893_v14, %v386_v12  ;;  %v898_v28 = vadd.f32 %v873_v21, %v385_v24 }
 0x259   :  { %v3399_v16 = vmul.f32 -1.442695, %v899_v15 }
 0x25a   :  { %v3487_v17 = vpop.eup %3486 }
 0x25b   :  { %v3489_v18 = vpop.eup %3488  ;;  %v903_v19 = vadd.f32 1.0, %v3487_v17  ;;  %3490 = vpow2.f32 %v3399_v16 }
 0x25c   :  { %v922_v20 = vadd.f32 1.0, %v3489_v18 }
 0x25d   :  { %3492 = vrcp.f32 %v903_v19  ;;  %v915_v6 = vand.u32 2147483648, %v903_v19  ;;  %v913_v9 = vand.u32 2147483647, %v903_v19  ;;  %vm909_vm10 = vweird.f32 %v903_v19 }
 0x25e   :  { %3494 = vrcp.f32 %v922_v20  ;;  %v934_v7 = vand.u32 2147483648, %v922_v20  ;;  %v932_v11 = vand.u32 2147483647, %v922_v20  ;;  %vm928_vm11 = vweird.f32 %v922_v20 }
 0x25f   :  { %v916_v15 = vor.u32 1.1754944e-38, %v915_v6  ;;  %vm914_vm14 = vcmp.eq.f32.partialorder %v913_v9, 8.507059e+37 }
 0x260   :  { %v935_v18 = vor.u32 1.1754944e-38, %v934_v7  ;;  %vm933_vm15 = vcmp.eq.f32.partialorder %v932_v11, 8.507059e+37  ;;  %v6431_v11 = vld [vmem:[#allocation26_spill] sm:$0xff] }
 0x261   :  { %v3491_v22 = vpop.eup %3490 }
 0x262   :  { %v942_v25 = vadd.f32 1.0, %v3491_v22 }
 0x263   :  { %v3493_v27 = vpop.eup %3492 }
 0x264   :  { %v3495_v1 = vpop.eup %3494  ;;  %v905_v2 = vmul.f32 %v3493_v27, %v903_v19  ;;  %3496 = vrcp.f32 %v942_v25  ;;  %vm910_vm8 = vweird.f32 %v3493_v27  ;;  %v954_v6 = vand.u32 2147483648, %v942_v25 }
 0x265   :  { %v924_v3 = vmul.f32 %v3495_v1, %v922_v20  ;;  %3498 = vtanh.f32 %v898_v28  ;;  %vm929_vm9 = vweird.f32 %v3495_v1  ;;  %vm911_vm12 = vmor %vm909_vm10, %vm910_vm8  ;;  %vm948_vm1 = vweird.f32 %v942_v25 }
 0x266   :  { %v906_v4 = vsub.f32 1.0, %v905_v2  ;;  %vm930_vm13 = vmor %vm928_vm11, %vm929_vm9 }
 0x267   :  { %v925_v5 = vsub.f32 1.0, %v924_v3 }
 0x268   :  { %v907_v8 = vmul.f32 %v3493_v27, %v906_v4 }
 0x269   :  { %v926_v10 = vmul.f32 %v3495_v1, %v925_v5 }
 0x26a   :  { %v3497_v12 = vpop.eup %3496  ;;  %v908_v14 = vadd.f32 %v3493_v27, %v907_v8  ;;  %v955_v8 = vor.u32 1.1754944e-38, %v954_v6  ;;  %v4809_v6 = vld [vmem:[#allocation12 + $0x40] sm:$0xff] }
 0x26b   :  { %v927_v16 = vadd.f32 %v3495_v1, %v926_v10  ;;  %v944_v17 = vmul.f32 %v3497_v12, %v942_v25  ;;  %v3499_v22 = vpop.eup %3498  ;;  %vm949_vm0 = vweird.f32 %v3497_v12  ;;  %6448 = vst [vmem:[#allocation44_spill] sm:$0xff] %v4809_v6 }
 0x26c   :  { %v912_v21 = vsel %vm911_vm12, %v3493_v27, %v908_v14  ;;  %v952_v27 = vand.u32 2147483647, %v942_v25  ;;  %vm950_vm2 = vmor %vm948_vm1, %vm949_vm0  ;;  %v6430_v25 = vld [vmem:[#allocation25_spill] sm:$0xff]  ;;  %v6433_v14 = vld [vmem:[#allocation27_spill] sm:$0xff] }
 0x26d   :  { %v917_v23 = vsel %vm914_vm14, %v916_v15, %v912_v21  ;;  %v931_v24 = vsel %vm930_vm13, %v3495_v1, %v927_v16  ;;  %v945_v28 = vsub.f32 1.0, %v944_v17  ;;  %v4767_v15 = vld [vmem:[#allocation12 + $0xd0] sm:$0xff]  ;;  %v4770_v16 = vld [vmem:[#allocation12 + $0xd8] sm:$0xff]  ;;  %v4773_v17 = vld [vmem:[#allocation12 + $0xa0] sm:$0xff] }
 0x26e   :  { %v936_v2 = vsel %vm933_vm15, %v935_v18, %v931_v24  ;;  %v959_v3 = vmul.f32 %v3499_v22, %v917_v23  ;;  %vm953_vm3 = vcmp.eq.f32.partialorder %v952_v27, 8.507059e+37  ;;  %6434 = vst [vmem:[#allocation30_spill] sm:$0xff] %v4767_v15  ;;  %v4776_v18 = vld [vmem:[#allocation12 + $0xa8] sm:$0xff]  ;;  %v4779_v21 = vld [vmem:[#allocation12 + $0xb0] sm:$0xff]  ;;  %v4782_v22 = vld [vmem:[#allocation12 + $0xb8] sm:$0xff] }
 0x26f   :  { %v958_v4 = vmul.f32 %v936_v2, %v4562_v57  ;;  %v946_v5 = vmul.f32 %v3497_v12, %v945_v28  ;;  %v6429_v57 = vld [vmem:[#allocation23_spill] sm:$0xff]  ;;  %6435 = vst [vmem:[#allocation32_spill] sm:$0xff] %v4770_v16  ;;  %v4785_v23 = vld [vmem:[#allocation12 + $0x80] sm:$0xff]  ;;  %v4788_v24 = vld [vmem:[#allocation12 + $0x88] sm:$0xff] }
 0x270   :  { %6436 = vst [vmem:[#allocation31_spill] sm:$0xff] %v4773_v17  ;;  %v4791_v28 = vld [vmem:[#allocation12 + $0x90] sm:$0xff]  ;;  %v4794_v2 = vld [vmem:[#allocation12 + $0x98] sm:$0xff]  ;;  %v4812_v27 = vld [vmem:[#allocation12 + $0x48] sm:$0xff] }
 0x271   :  { %v4720_v19 = vadd.f32 %v959_v3, %v958_v4  ;;  %v947_v20 = vadd.f32 %v3497_v12, %v946_v5  ;;  %6437 = vst [vmem:[#allocation33_spill] sm:$0xff] %v4776_v18  ;;  %v4797_v3 = vld [vmem:[#allocation12 + $0x60] sm:$0xff]  ;;  %v4800_v4 = vld [vmem:[#allocation12 + $0x68] sm:$0xff]  ;;  %v4803_v5 = vld [vmem:[#allocation12 + $0x70] sm:$0xff] }
 0x272   :  { %6438 = vst [vmem:[#allocation34_spill] sm:$0xff] %v4779_v21 }
 0x273   :  { %3500 = vtanh.f32 %v4720_v19  ;;  %v951_v7 = vsel %vm950_vm2, %v3497_v12, %v947_v20  ;;  %v6432_v12 = vld [vmem:[#allocation28_spill] sm:$0xff]  ;;  %6439 = vst [vmem:[#allocation36_spill] sm:$0xff] %v4782_v22 }
 0x274   :  { %v956_v9 = vsel %vm953_vm3, %v955_v8, %v951_v7  ;;  %6440 = vst [vmem:[#allocation35_spill] sm:$0xff] %v4785_v23  ;;  %v4806_v20 = vld [vmem:[#allocation12 + $0x78] sm:$0xff]  ;;  %v4815_v7 = vld [vmem:[#allocation12 + $0x50] sm:$0xff] }
 0x275   :  { %6441 = vst [vmem:[#allocation37_spill] sm:$0xff] %v4788_v24  ;;  %v4818_v8 = vld [vmem:[#allocation12 + $0x58] sm:$0xff] }
 0x276   :  { %6442 = vst [vmem:[#allocation38_spill] sm:$0xff] %v4791_v28 }
 0x277   :  { %6443 = vst [vmem:[#allocation40_spill] sm:$0xff] %v4794_v2 }
 0x278   :  { %6444 = vst [vmem:[#allocation39_spill] sm:$0xff] %v4797_v3 }
 0x279   :  { %v3501_v1 = vpop.eup %3500  ;;  %6445 = vst [vmem:[#allocation41_spill] sm:$0xff] %v4800_v4 }
 0x27a   :  { %v4723_v10 = vmul.f32 %v3501_v1, %v956_v9  ;;  %6446 = vst [vmem:[#allocation42_spill] sm:$0xff] %v4803_v5  ;;  %v4821_v1 = vld [vmem:[#allocation12 + $0x20] sm:$0xff]  ;;  %v4824_v9 = vld [vmem:[#allocation12 + $0x28] sm:$0xff] }
 0x27b   :  { %6447 = vst [vmem:[#allocation43_spill] sm:$0xff] %v4806_v20 }
 0x27c   :  { %6428 = vst [vmem:[#allocation29_spill] sm:$0xff] %v4723_v10  ;;  %986 = vmatmul.f32.vlgmr.msra.gmra.mxu0 %v4723_v10  ;;  %1006 = vmatmul.f32.vlgmr.msra.gmra.mxu1 %v4723_v10 }
 0x27d   :  { %1026 = vmatmul.f32.vlgmr.msra.gmra.mxu2 %v4723_v10  ;;  %1046 = vmatmul.f32.vlgmr.msra.gmra.mxu3 %v4723_v10  ;;  %6449 = vst [vmem:[#allocation45_spill] sm:$0xff] %v4812_v27  ;;  %v4827_v10 = vld [vmem:[#allocation12 + $0x30] sm:$0xff] }
 0x27e   :  { %1278 = vmatpush.msra.mxu0 %v4571_v61  ;;  %1298 = vmatpush.msra.mxu1 %v4574_v39  ;;  %6450 = vst [vmem:[#allocation46_spill] sm:$0xff] %v4815_v7 }
 0x27f   :  { %1318 = vmatpush.msra.mxu2 %v4577_v63  ;;  %1338 = vmatpush.msra.mxu3 %v4580_v51  ;;  %6451 = vst [vmem:[#allocation47_spill] sm:$0xff] %v4818_v8 }
 0x280   :  { %1279 = vmatpush.msra.mxu0 %v4583_v29  ;;  %1299 = vmatpush.msra.mxu1 %v4586_v31  ;;  %6452 = vst [vmem:[#allocation48_spill] sm:$0xff] %v4821_v1 }
 0x281   :  { %1319 = vmatpush.msra.mxu2 %v4589_v32  ;;  %1339 = vmatpush.msra.mxu3 %v4592_v34  ;;  %6453 = vst [vmem:[#allocation49_spill] sm:$0xff] %v4824_v9 }
 0x282   :  { %1280 = vmatpush.msra.mxu0 %v4595_v35  ;;  %1300 = vmatpush.msra.mxu1 %v4598_v36  ;;  %6454 = vst [vmem:[#allocation50_spill] sm:$0xff] %v4827_v10 }
 0x283   :  { %1320 = vmatpush.msra.mxu2 %v4601_v37  ;;  %1340 = vmatpush.msra.mxu3 %v4604_v38 }
 0x284   :  { %1281 = vmatpush.msra.mxu0 %v4607_v40  ;;  %1301 = vmatpush.msra.mxu1 %v4610_v41 }
 0x285   :  { %1321 = vmatpush.msra.mxu2 %v4613_v42  ;;  %1341 = vmatpush.msra.mxu3 %v4616_v44 }
 0x286   :  { %1282 = vmatpush.msra.mxu0 %v4619_v45  ;;  %1302 = vmatpush.msra.mxu1 %v4622_v47 }
 0x287   :  { %1322 = vmatpush.msra.mxu2 %v4625_v54  ;;  %1342 = vmatpush.msra.mxu3 %v4628_v58 }
 0x288   :  { %1283 = vmatpush.msra.mxu0 %v4631_v0  ;;  %1303 = vmatpush.msra.mxu1 %v4634_v50 }
 0x289   :  { %1323 = vmatpush.msra.mxu2 %v4637_v55  ;;  %1343 = vmatpush.msra.mxu3 %v4640_v52 }
 0x28a   :  { %1284 = vmatpush.msra.mxu0 %v4643_v53  ;;  %1304 = vmatpush.msra.mxu1 %v4646_v49 }
 0x28b   :  { %1324 = vmatpush.msra.mxu2 %v4649_v13  ;;  %1344 = vmatpush.msra.mxu3 %v6429_v57 }
 0x28c   :  { %1285 = vmatpush.msra.mxu0 %v6430_v25  ;;  %1305 = vmatpush.msra.mxu1 %v6431_v11 }
 0x28d   :  { %1325 = vmatpush.msra.mxu2 %v6432_v12  ;;  %1345 = vmatpush.msra.mxu3 %v6433_v14 }
 0x28e   :  { %1286 = vmatpush.msra.mxu0 %v4667_v26  ;;  %1306 = vmatpush.msra.mxu1 %v4670_v46 }
 0x28f   :  { %1326 = vmatpush.msra.mxu2 %v4673_v56  ;;  %1346 = vmatpush.msra.mxu3 %v4676_v48 }
 0x290   :  { %1287 = vmatpush.msra.mxu0 %v4679_v59  ;;  %1307 = vmatpush.msra.mxu1 %v4682_v60 }
 0x291   :  { %1327 = vmatpush.msra.mxu2 %v4767_v15  ;;  %1347 = vmatpush.msra.mxu3 %v4770_v16 }
 0x292   :  { %1288 = vmatpush.msra.mxu0 %v4773_v17  ;;  %1308 = vmatpush.msra.mxu1 %v4776_v18 }
 0x293   :  { %1328 = vmatpush.msra.mxu2 %v4779_v21  ;;  %1348 = vmatpush.msra.mxu3 %v4782_v22 }
 0x294   :  { %1289 = vmatpush.msra.mxu0 %v4785_v23  ;;  %1309 = vmatpush.msra.mxu1 %v4788_v24 }
 0x295   :  { %1329 = vmatpush.msra.mxu2 %v4791_v28  ;;  %1349 = vmatpush.msra.mxu3 %v4794_v2  ;;  %v6462_v28 = vld [vmem:[#allocation60_spill] sm:$0xff] }
 0x296   :  { %1290 = vmatpush.msra.mxu0 %v4797_v3  ;;  %1310 = vmatpush.msra.mxu1 %v4800_v4 }
 0x297   :  { %1330 = vmatpush.msra.mxu2 %v4803_v5  ;;  %1350 = vmatpush.msra.mxu3 %v4806_v20 }
 0x298   :  { %1291 = vmatpush.msra.mxu0 %v4809_v6  ;;  %1311 = vmatpush.msra.mxu1 %v4812_v27  ;;  %v4830_v27 = vld [vmem:[#allocation12 + $0x38] sm:$0xff] }
 0x299   :  { %1331 = vmatpush.msra.mxu2 %v4815_v7  ;;  %1351 = vmatpush.msra.mxu3 %v4818_v8  ;;  %6455 = vst [vmem:[#allocation52_spill] sm:$0xff] %v4830_v27  ;;  %v4833_v7 = vld [vmem:[#allocation12] sm:$0xff]  ;;  %v4836_v8 = vld [vmem:[#allocation12 + $0x8] sm:$0xff] }
 0x29a   :  { %1292 = vmatpush.msra.mxu0 %v4821_v1  ;;  %1312 = vmatpush.msra.mxu1 %v4824_v9  ;;  %6456 = vst [vmem:[#allocation51_spill] sm:$0xff] %v4833_v7  ;;  %v4839_v1 = vld [vmem:[#allocation12 + $0x10] sm:$0xff]  ;;  %v4842_v9 = vld [vmem:[#allocation12 + $0x18] sm:$0xff] }
 0x29b   :  { %1332 = vmatpush.msra.mxu2 %v4827_v10  ;;  %1352 = vmatpush.msra.mxu3 %v4830_v27  ;;  %6457 = vst [vmem:[#allocation53_spill] sm:$0xff] %v4836_v8  ;;  %v6460_v10 = vld [vmem:[#allocation57_spill] sm:$0xff]  ;;  %v6461_v27 = vld [vmem:[#allocation58_spill] sm:$0xff] }
 0x29c   :  { %1293 = vmatpush.msra.mxu0 %v4833_v7  ;;  %1313 = vmatpush.msra.mxu1 %v4836_v8  ;;  %6458 = vst [vmem:[#allocation54_spill] sm:$0xff] %v4839_v1  ;;  %v387_v6 = vadd.f32 %v6411_v30, %v6460_v10  ;;  %v388_v20 = vadd.f32 %v6413_v33, %v6461_v27 }
 0x29d   :  { %1333 = vmatpush.msra.mxu2 %v4839_v1  ;;  %6459 = vst [vmem:[#allocation56_spill] sm:$0xff] %v4842_v9  ;;  %1353 = vmatpush.msra.mxu3 %v4842_v9  ;;  %v390_v1 = vadd.f32 %v6415_v43, %v6462_v28 }
 0x2f9   :  { %v987_v5 = vpop.f32.mrf.mxu0  ;;  %v1007_v7 = vpop.f32.mrf.mxu1 }
 0x2fa   :  { %v1050_v4 = vadd.f32 %v987_v5, %v387_v6  ;;  %v1051_v3 = vadd.f32 %v1007_v7, %v388_v20  ;;  %v6463_v20 = vld [vmem:[#allocation59_spill] sm:$0xff] }
 0x2fc   :  { %v3400_v2 = vmul.f32 -1.442695, %v1050_v4  ;;  %v3401_v8 = vmul.f32 -1.442695, %v1051_v3  ;;  %v389_v3 = vadd.f32 %v6417_v62, %v6463_v20 }
 0x2fe   :  { %3502 = vpow2.f32 %v3400_v2 }
 0x2ff   :  { %3504 = vpow2.f32 %v3401_v8 }
 0x300   :  { %v1047_v24 = vpop.f32.mrf.mxu3  ;;  %v1027_v27 = vpop.f32.mrf.mxu2 }
 0x301   :  { %v1053_v23 = vadd.f32 %v1047_v24, %v390_v1  ;;  %v1052_v6 = vadd.f32 %v1027_v27, %v389_v3 }
 0x303   :  { %v3402_v9 = vmul.f32 -1.442695, %v1053_v23 }
 0x304   :  { %v3503_v22 = vpop.eup %3502 }
 0x305   :  { %v3505_v21 = vpop.eup %3504  ;;  %v1057_v10 = vadd.f32 1.0, %v3503_v22  ;;  %3506 = vpow2.f32 %v3402_v9 }
 0x306   :  { %v1076_v30 = vadd.f32 1.0, %v3505_v21 }
 0x307   :  { %3508 = vrcp.f32 %v1057_v10  ;;  %v1069_v1 = vand.u32 2147483648, %v1057_v10  ;;  %v1067_v9 = vand.u32 2147483647, %v1057_v10  ;;  %vm1063_vm6 = vweird.f32 %v1057_v10 }
 0x308   :  { %3510 = vrcp.f32 %v1076_v30  ;;  %v1088_v22 = vand.u32 2147483648, %v1076_v30  ;;  %v1086_v33 = vand.u32 2147483647, %v1076_v30  ;;  %vm1082_vm7 = vweird.f32 %v1076_v30 }
 0x309   :  { %v1070_v27 = vor.u32 1.1754944e-38, %v1069_v1  ;;  %vm1068_vm10 = vcmp.eq.f32.partialorder %v1067_v9, 8.507059e+37 }
 0x30a   :  { %vm1087_vm11 = vcmp.eq.f32.partialorder %v1086_v33, 8.507059e+37 }
 0x30b   :  { %v3507_v5 = vpop.eup %3506 }
 0x30c   :  { %v1096_v2 = vadd.f32 1.0, %v3507_v5 }
 0x30d   :  { %v3509_v4 = vpop.eup %3508 }
 0x30e   :  { %v3511_v28 = vpop.eup %3510  ;;  %v1059_v7 = vmul.f32 %v3509_v4, %v1057_v10  ;;  %3512 = vrcp.f32 %v1096_v2  ;;  %vm1064_vm4 = vweird.f32 %v3509_v4  ;;  %vm1102_vm13 = vweird.f32 %v1096_v2 }
 0x30f   :  { %v1078_v24 = vmul.f32 %v3511_v28, %v1076_v30  ;;  %3514 = vtanh.f32 %v1052_v6  ;;  %vm1083_vm5 = vweird.f32 %v3511_v28  ;;  %vm1065_vm8 = vmor %vm1063_vm6, %vm1064_vm4 }
 0x310   :  { %v1060_v23 = vsub.f32 1.0, %v1059_v7  ;;  %vm1084_vm9 = vmor %vm1082_vm7, %vm1083_vm5  ;;  %v1089_v7 = vor.u32 1.1754944e-38, %v1088_v22 }
 0x311   :  { %v1079_v8 = vsub.f32 1.0, %v1078_v24 }
 0x312   :  { %v1061_v21 = vmul.f32 %v3509_v4, %v1060_v23 }
 0x313   :  { %v1080_v43 = vmul.f32 %v3511_v28, %v1079_v8 }
 0x314   :  { %v3513_v18 = vpop.eup %3512  ;;  %v1062_v20 = vadd.f32 %v3509_v4, %v1061_v21 }
 0x315   :  { %v1081_v5 = vadd.f32 %v3511_v28, %v1080_v43  ;;  %v1098_v3 = vmul.f32 %v3513_v18, %v1096_v2  ;;  %v3515_v6 = vpop.eup %3514  ;;  %vm1103_vm12 = vweird.f32 %v3513_v18  ;;  %v1108_v43 = vand.u32 2147483648, %v1096_v2 }
 0x316   :  { %v1066_v24 = vsel %vm1065_vm8, %v3509_v4, %v1062_v20  ;;  %v1106_v4 = vand.u32 2147483647, %v1096_v2  ;;  %vm1104_vm14 = vmor %vm1102_vm13, %vm1103_vm12  ;;  %v6471_v2 = vld [vmem:[#allocation35_spill] sm:$0xff]  ;;  %v6472_v20 = vld [vmem:[#allocation37_spill] sm:$0xff] }
 0x317   :  { %v1071_v62 = vsel %vm1068_vm10, %v1070_v27, %v1066_v24  ;;  %v1085_v23 = vsel %vm1084_vm9, %v3511_v28, %v1081_v5  ;;  %v1099_v17 = vsub.f32 1.0, %v1098_v3  ;;  %v1109_v22 = vor.u32 1.1754944e-38, %v1108_v43  ;;  %v6473_v27 = vld [vmem:[#allocation38_spill] sm:$0xff]  ;;  %v6474_v5 = vld [vmem:[#allocation40_spill] sm:$0xff]  ;;  %v6475_v3 = vld [vmem:[#allocation39_spill] sm:$0xff] }
 0x318   :  { %v1090_v8 = vsel %vm1087_vm11, %v1089_v7, %v1085_v23  ;;  %v1113_v16 = vmul.f32 %v3515_v6, %v1071_v62  ;;  %vm1107_vm15 = vcmp.eq.f32.partialorder %v1106_v4, 8.507059e+37  ;;  %v6465_v62 = vld [vmem:[#allocation30_spill] sm:$0xff]  ;;  %v6476_v7 = vld [vmem:[#allocation41_spill] sm:$0xff]  ;;  %v6478_v6 = vld [vmem:[#allocation43_spill] sm:$0xff] }
 0x319   :  { %v1112_v15 = vmul.f32 %v1090_v8, %v4720_v19  ;;  %v1100_v21 = vmul.f32 %v3513_v18, %v1099_v17  ;;  %v6466_v19 = vld [vmem:[#allocation32_spill] sm:$0xff]  ;;  %v6469_v17 = vld [vmem:[#allocation34_spill] sm:$0xff]  ;;  %v6480_v8 = vld [vmem:[#allocation45_spill] sm:$0xff] }
 0x31a   :  { %v6477_v24 = vld [vmem:[#allocation42_spill] sm:$0xff]  ;;  %v6479_v23 = vld [vmem:[#allocation44_spill] sm:$0xff]  ;;  %v6484_v4 = vld [vmem:[#allocation49_spill] sm:$0xff] }
 0x31b   :  { %v4854_v10 = vadd.f32 %v1113_v16, %v1112_v15  ;;  %v1101_v30 = vadd.f32 %v3513_v18, %v1100_v21  ;;  %v6467_v15 = vld [vmem:[#allocation31_spill] sm:$0xff]  ;;  %v6468_v16 = vld [vmem:[#allocation33_spill] sm:$0xff]  ;;  %v6481_v21 = vld [vmem:[#allocation46_spill] sm:$0xff] }
 0x31c   :  { %v6483_v43 = vld [vmem:[#allocation48_spill] sm:$0xff] }
 0x31d   :  { %3516 = vtanh.f32 %v4854_v10  ;;  %v1105_v1 = vsel %vm1104_vm14, %v3513_v18, %v1101_v30  ;;  %v6470_v18 = vld [vmem:[#allocation36_spill] sm:$0xff]  ;;  %v6482_v30 = vld [vmem:[#allocation47_spill] sm:$0xff] }
 0x31e   :  { %v1110_v28 = vsel %vm1107_vm15, %v1109_v22, %v1105_v1  ;;  %v6485_v1 = vld [vmem:[#allocation50_spill] sm:$0xff]  ;;  %v6486_v22 = vld [vmem:[#allocation52_spill] sm:$0xff] }
 0x323   :  { %v3517_v33 = vpop.eup %3516 }
 0x324   :  { %v4857_v9 = vmul.f32 %v3517_v33, %v1110_v28  ;;  %v6487_v33 = vld [vmem:[#allocation51_spill] sm:$0xff]  ;;  %v6488_v28 = vld [vmem:[#allocation53_spill] sm:$0xff] }
 0x326   :  { %6464 = vst [vmem:[#allocation55_spill] sm:$0xff] %v4857_v9  ;;  %1140 = vmatmul.f32.vlgmr.msrb.gmra.mxu0 %v4857_v9  ;;  %1160 = vmatmul.f32.vlgmr.msrb.gmra.mxu1 %v4857_v9 }
 0x327   :  { %1180 = vmatmul.f32.vlgmr.msrb.gmra.mxu2 %v4857_v9  ;;  %1200 = vmatmul.f32.vlgmr.msrb.gmra.mxu3 %v4857_v9  ;;  %v6489_v9 = vld [vmem:[#allocation54_spill] sm:$0xff] }
 0x328   :  { %1432 = vmatpush.msrb.mxu0 %v4571_v61  ;;  %1452 = vmatpush.msrb.mxu1 %v4574_v39 }
 0x329   :  { %1472 = vmatpush.msrb.mxu2 %v4577_v63  ;;  %1492 = vmatpush.msrb.mxu3 %v4580_v51 }
 0x32a   :  { %1433 = vmatpush.msrb.mxu0 %v4583_v29  ;;  %1453 = vmatpush.msrb.mxu1 %v4586_v31 }
 0x32b   :  { %1473 = vmatpush.msrb.mxu2 %v4589_v32  ;;  %1493 = vmatpush.msrb.mxu3 %v4592_v34 }
 0x32c   :  { %1434 = vmatpush.msrb.mxu0 %v4595_v35  ;;  %1454 = vmatpush.msrb.mxu1 %v4598_v36 }
 0x32d   :  { %1474 = vmatpush.msrb.mxu2 %v4601_v37  ;;  %1494 = vmatpush.msrb.mxu3 %v4604_v38 }
 0x32e   :  { %1435 = vmatpush.msrb.mxu0 %v4607_v40  ;;  %1455 = vmatpush.msrb.mxu1 %v4610_v41 }
 0x32f   :  { %1475 = vmatpush.msrb.mxu2 %v4613_v42  ;;  %1495 = vmatpush.msrb.mxu3 %v4616_v44 }
 0x330   :  { %1436 = vmatpush.msrb.mxu0 %v4619_v45  ;;  %1456 = vmatpush.msrb.mxu1 %v4622_v47 }
 0x331   :  { %1476 = vmatpush.msrb.mxu2 %v4625_v54  ;;  %1496 = vmatpush.msrb.mxu3 %v4628_v58 }
 0x332   :  { %1437 = vmatpush.msrb.mxu0 %v4631_v0  ;;  %1457 = vmatpush.msrb.mxu1 %v4634_v50 }
 0x333   :  { %1477 = vmatpush.msrb.mxu2 %v4637_v55  ;;  %1497 = vmatpush.msrb.mxu3 %v4640_v52 }
 0x334   :  { %1438 = vmatpush.msrb.mxu0 %v4643_v53  ;;  %1458 = vmatpush.msrb.mxu1 %v4646_v49 }
 0x335   :  { %1478 = vmatpush.msrb.mxu2 %v4649_v13  ;;  %1498 = vmatpush.msrb.mxu3 %v6429_v57 }
 0x336   :  { %1439 = vmatpush.msrb.mxu0 %v6430_v25  ;;  %1459 = vmatpush.msrb.mxu1 %v6431_v11 }
 0x337   :  { %1479 = vmatpush.msrb.mxu2 %v6432_v12  ;;  %1499 = vmatpush.msrb.mxu3 %v6433_v14 }
 0x338   :  { %1440 = vmatpush.msrb.mxu0 %v4667_v26  ;;  %1460 = vmatpush.msrb.mxu1 %v4670_v46 }
 0x339   :  { %1480 = vmatpush.msrb.mxu2 %v4673_v56  ;;  %1500 = vmatpush.msrb.mxu3 %v4676_v48 }
 0x33a   :  { %1441 = vmatpush.msrb.mxu0 %v4679_v59  ;;  %1461 = vmatpush.msrb.mxu1 %v4682_v60 }
 0x33b   :  { %1481 = vmatpush.msrb.mxu2 %v6465_v62  ;;  %1501 = vmatpush.msrb.mxu3 %v6466_v19 }
 0x33c   :  { %1442 = vmatpush.msrb.mxu0 %v6467_v15  ;;  %1462 = vmatpush.msrb.mxu1 %v6468_v16 }
 0x33d   :  { %1482 = vmatpush.msrb.mxu2 %v6469_v17  ;;  %1502 = vmatpush.msrb.mxu3 %v6470_v18 }
 0x33e   :  { %1443 = vmatpush.msrb.mxu0 %v6471_v2  ;;  %1463 = vmatpush.msrb.mxu1 %v6472_v20 }
 0x33f   :  { %1483 = vmatpush.msrb.mxu2 %v6473_v27  ;;  %1503 = vmatpush.msrb.mxu3 %v6474_v5  ;;  %v6496_v27 = vld [vmem:[#allocation78_spill] sm:$0xff] }
 0x340   :  { %1444 = vmatpush.msrb.mxu0 %v6475_v3  ;;  %1464 = vmatpush.msrb.mxu1 %v6476_v7 }
 0x341   :  { %1484 = vmatpush.msrb.mxu2 %v6477_v24  ;;  %1504 = vmatpush.msrb.mxu3 %v6478_v6  ;;  %v6494_v24 = vld [vmem:[#allocation75_spill] sm:$0xff] }
 0x342   :  { %1445 = vmatpush.msrb.mxu0 %v6479_v23  ;;  %1465 = vmatpush.msrb.mxu1 %v6480_v8  ;;  %v6490_v23 = vld [vmem:[#allocation56_spill] sm:$0xff]  ;;  %v6491_v8 = vld [vmem:[#allocation61_spill] sm:$0xff] }
 0x343   :  { %1485 = vmatpush.msrb.mxu2 %v6481_v21  ;;  %1505 = vmatpush.msrb.mxu3 %v6482_v30  ;;  %v6492_v21 = vld [vmem:[#allocation74_spill] sm:$0xff] }
 0x344   :  { %1446 = vmatpush.msrb.mxu0 %v6483_v43  ;;  %1466 = vmatpush.msrb.mxu1 %v6484_v4  ;;  %v391_v6 = vadd.f32 %v6492_v21, %v6491_v8  ;;  %v6493_v30 = vld [vmem:[#allocation62_spill] sm:$0xff] }
 0x345   :  { %1486 = vmatpush.msrb.mxu2 %v6485_v1  ;;  %1506 = vmatpush.msrb.mxu3 %v6486_v22  ;;  %v392_v43 = vadd.f32 %v6494_v24, %v6493_v30 }
 0x346   :  { %1447 = vmatpush.msrb.mxu0 %v6487_v33  ;;  %1467 = vmatpush.msrb.mxu1 %v6488_v28  ;;  %v6495_v33 = vld [vmem:[#allocation63_spill] sm:$0xff] }
 0x347   :  { %1487 = vmatpush.msrb.mxu2 %v6489_v9  ;;  %1507 = vmatpush.msrb.mxu3 %v6490_v23  ;;  %v394_v28 = vadd.f32 %v6496_v27, %v6495_v33 }
 0x3a3   :  { %v1141_v7 = vpop.f32.mrf.mxu0  ;;  %v1161_v4 = vpop.f32.mrf.mxu1 }
 0x3a4   :  { %v1204_v3 = vadd.f32 %v1141_v7, %v391_v6  ;;  %v1205_v1 = vadd.f32 %v1161_v4, %v392_v43  ;;  %v6497_v6 = vld [vmem:[#allocation66_spill] sm:$0xff] }
 0x3a6   :  { %v3403_v5 = vmul.f32 -1.442695, %v1204_v3  ;;  %v3404_v22 = vmul.f32 -1.442695, %v1205_v1  ;;  %v6498_v3 = vld [vmem:[#allocation80_spill] sm:$0xff] }
 0x3a7   :  { %v393_v43 = vadd.f32 %v6498_v3, %v6497_v6 }
 0x3a8   :  { %3518 = vpow2.f32 %v3403_v5 }
 0x3a9   :  { %3520 = vpow2.f32 %v3404_v22 }
 0x3aa   :  { %v1201_v9 = vpop.f32.mrf.mxu3  ;;  %v1181_v30 = vpop.f32.mrf.mxu2 }
 0x3ab   :  { %v1207_v20 = vadd.f32 %v1201_v9, %v394_v28  ;;  %v1206_v1 = vadd.f32 %v1181_v30, %v393_v43 }
 0x3ad   :  { %v3405_v23 = vmul.f32 -1.442695, %v1207_v20 }
 0x3ae   :  { %v3519_v2 = vpop.eup %3518 }
 0x3af   :  { %v3521_v18 = vpop.eup %3520  ;;  %v1211_v8 = vadd.f32 1.0, %v3519_v2  ;;  %3522 = vpow2.f32 %v3405_v23 }
 0x3b0   :  { %v1230_v21 = vadd.f32 1.0, %v3521_v18 }
 0x3b1   :  { %3524 = vrcp.f32 %v1211_v8  ;;  %v1223_v27 = vand.u32 2147483648, %v1211_v8  ;;  %v1221_v23 = vand.u32 2147483647, %v1211_v8  ;;  %vm1217_vm2 = vweird.f32 %v1211_v8 }
 0x3b2   :  { %3526 = vrcp.f32 %v1230_v21  ;;  %v1242_v2 = vand.u32 2147483648, %v1230_v21  ;;  %v1240_v17 = vand.u32 2147483647, %v1230_v21  ;;  %vm1236_vm3 = vweird.f32 %v1230_v21 }
 0x3b3   :  { %v1224_v30 = vor.u32 1.1754944e-38, %v1223_v27  ;;  %vm1222_vm6 = vcmp.eq.f32.partialorder %v1221_v23, 8.507059e+37 }
 0x3b4   :  { %vm1241_vm7 = vcmp.eq.f32.partialorder %v1240_v17, 8.507059e+37 }
 0x3b5   :  { %v3523_v7 = vpop.eup %3522 }
 0x3b6   :  { %v1250_v5 = vadd.f32 1.0, %v3523_v7 }
 0x3b7   :  { %v3525_v4 = vpop.eup %3524 }
 0x3b8   :  { %v3527_v33 = vpop.eup %3526  ;;  %v1213_v22 = vmul.f32 %v3525_v4, %v1211_v8  ;;  %3528 = vrcp.f32 %v1250_v5  ;;  %vm1218_vm0 = vweird.f32 %v3525_v4  ;;  %v1262_v27 = vand.u32 2147483648, %v1250_v5 }
 0x3b9   :  { %v1232_v9 = vmul.f32 %v3527_v33, %v1230_v21  ;;  %3530 = vtanh.f32 %v1206_v1  ;;  %vm1237_vm1 = vweird.f32 %v3527_v33  ;;  %vm1219_vm4 = vmor %vm1217_vm2, %vm1218_vm0  ;;  %vm1256_vm9 = vweird.f32 %v1250_v5 }
 0x3ba   :  { %v1214_v20 = vsub.f32 1.0, %v1213_v22  ;;  %vm1238_vm5 = vmor %vm1236_vm3, %vm1237_vm1  ;;  %v1243_v22 = vor.u32 1.1754944e-38, %v1242_v2  ;;  %v1263_v2 = vor.u32 1.1754944e-38, %v1262_v27 }
 0x3bb   :  { %v1233_v28 = vsub.f32 1.0, %v1232_v9 }
 0x3bc   :  { %v1215_v18 = vmul.f32 %v3525_v4, %v1214_v20 }
 0x3bd   :  { %v1234_v24 = vmul.f32 %v3527_v33, %v1233_v28 }
 0x3be   :  { %v3529_v16 = vpop.eup %3528  ;;  %v1216_v6 = vadd.f32 %v3525_v4, %v1215_v18 }
 0x3bf   :  { %v1235_v7 = vadd.f32 %v3527_v33, %v1234_v24  ;;  %v1252_v43 = vmul.f32 %v3529_v16, %v1250_v5  ;;  %v3531_v1 = vpop.eup %3530  ;;  %vm1257_vm8 = vweird.f32 %v3529_v16  ;;  %v1260_v24 = vand.u32 2147483647, %v1250_v5 }
 0x3c0   :  { %v1220_v9 = vsel %vm1219_vm4, %v3525_v4, %v1216_v6  ;;  %vm1258_vm10 = vmor %vm1256_vm9, %vm1257_vm8 }
 0x3c1   :  { %v1225_v3 = vsel %vm1222_vm6, %v1224_v30, %v1220_v9  ;;  %v1239_v20 = vsel %vm1238_vm5, %v3527_v33, %v1235_v7  ;;  %v1253_v15 = vsub.f32 1.0, %v1252_v43  ;;  %vm1261_vm11 = vcmp.eq.f32.partialorder %v1260_v24, 8.507059e+37  ;;  %v6531_v9 = vld [vmem:[#allocation70_spill] sm:$0xff] }
 0x3c2   :  { %v1244_v28 = vsel %vm1241_vm7, %v1243_v22, %v1239_v20  ;;  %v1267_v19 = vmul.f32 %v3531_v1, %v1225_v3  ;;  %v6532_v1 = vld [vmem:[#allocation80_spill] sm:$0xff] }
 0x3c3   :  { %v1266_v62 = vmul.f32 %v1244_v28, %v4854_v10  ;;  %v1254_v18 = vmul.f32 %v3529_v16, %v1253_v15  ;;  %v6529_v10 = vld [vmem:[#allocation67_spill] sm:$0xff]  ;;  %v397_v20 = vadd.f32 %v6532_v1, %v6531_v9  ;;  %v6533_v9 = vld [vmem:[#allocation68_spill] sm:$0xff] }
 0x3c5   :  { %v4936_v8 = vadd.f32 %v1267_v19, %v1266_v62  ;;  %v1255_v21 = vadd.f32 %v3529_v16, %v1254_v18  ;;  %v6530_v62 = vld [vmem:[#allocation78_spill] sm:$0xff] }
 0x3c6   :  { %v398_v19 = vadd.f32 %v6530_v62, %v6529_v10  ;;  %v1797_v10 = vld [vmem:[#allocation11 + $0x1a0] sm:$0xff] }
 0x3c7   :  { %3532 = vtanh.f32 %v4936_v8  ;;  %v1259_v4 = vsel %vm1258_vm10, %v3529_v16, %v1255_v21 }
 0x3c8   :  { %v1264_v33 = vsel %vm1261_vm11, %v1263_v2, %v1259_v4 }
 0x3cd   :  { %v3533_v17 = vpop.eup %3532 }
 0x3ce   :  { %v4939_v23 = vmul.f32 %v3533_v17, %v1264_v33 }
 0x3d0   :  { %1294 = vmatmul.f32.vlgmr.msra.gmra.mxu0 %v4939_v23  ;;  %1314 = vmatmul.f32.vlgmr.msra.gmra.mxu1 %v4939_v23 }
 0x3d1   :  { %1334 = vmatmul.f32.vlgmr.msra.gmra.mxu2 %v4939_v23  ;;  %1354 = vmatmul.f32.vlgmr.msra.gmra.mxu3 %v4939_v23 }
 0x3d2   :  { %1586 = vmatpush.msra.mxu0 %v4571_v61  ;;  %1606 = vmatpush.msra.mxu1 %v4574_v39  ;;  %v6499_v61 = vld [vmem:[#allocation30_spill] sm:$0xff]  ;;  %v6500_v39 = vld [vmem:[#allocation32_spill] sm:$0xff] }
 0x3d3   :  { %1626 = vmatpush.msra.mxu2 %v4577_v63  ;;  %1646 = vmatpush.msra.mxu3 %v4580_v51  ;;  %v6501_v63 = vld [vmem:[#allocation31_spill] sm:$0xff]  ;;  %v6502_v51 = vld [vmem:[#allocation33_spill] sm:$0xff] }
 0x3d4   :  { %1587 = vmatpush.msra.mxu0 %v4583_v29  ;;  %1607 = vmatpush.msra.mxu1 %v4586_v31  ;;  %v6503_v29 = vld [vmem:[#allocation34_spill] sm:$0xff]  ;;  %v6505_v31 = vld [vmem:[#allocation35_spill] sm:$0xff] }
 0x3d5   :  { %1627 = vmatpush.msra.mxu2 %v4589_v32  ;;  %1647 = vmatpush.msra.mxu3 %v4592_v34  ;;  %v6506_v32 = vld [vmem:[#allocation37_spill] sm:$0xff]  ;;  %v6507_v34 = vld [vmem:[#allocation38_spill] sm:$0xff] }
 0x3d6   :  { %1588 = vmatpush.msra.mxu0 %v4595_v35  ;;  %1608 = vmatpush.msra.mxu1 %v4598_v36  ;;  %v6508_v35 = vld [vmem:[#allocation40_spill] sm:$0xff]  ;;  %v6510_v36 = vld [vmem:[#allocation41_spill] sm:$0xff] }
 0x3d7   :  { %1628 = vmatpush.msra.mxu2 %v4601_v37  ;;  %1648 = vmatpush.msra.mxu3 %v4604_v38  ;;  %v6511_v37 = vld [vmem:[#allocation42_spill] sm:$0xff]  ;;  %v6512_v38 = vld [vmem:[#allocation43_spill] sm:$0xff] }
 0x3d8   :  { %1589 = vmatpush.msra.mxu0 %v4607_v40  ;;  %1609 = vmatpush.msra.mxu1 %v4610_v41  ;;  %v6513_v40 = vld [vmem:[#allocation44_spill] sm:$0xff]  ;;  %v6514_v41 = vld [vmem:[#allocation45_spill] sm:$0xff] }
 0x3d9   :  { %1629 = vmatpush.msra.mxu2 %v4613_v42  ;;  %1649 = vmatpush.msra.mxu3 %v4616_v44  ;;  %v6515_v42 = vld [vmem:[#allocation46_spill] sm:$0xff]  ;;  %v6516_v44 = vld [vmem:[#allocation47_spill] sm:$0xff] }
 0x3da   :  { %1590 = vmatpush.msra.mxu0 %v4619_v45  ;;  %1610 = vmatpush.msra.mxu1 %v4622_v47  ;;  %v6517_v45 = vld [vmem:[#allocation48_spill] sm:$0xff]  ;;  %v6518_v47 = vld [vmem:[#allocation49_spill] sm:$0xff] }
 0x3db   :  { %1630 = vmatpush.msra.mxu2 %v4625_v54  ;;  %1650 = vmatpush.msra.mxu3 %v4628_v58  ;;  %v6519_v54 = vld [vmem:[#allocation50_spill] sm:$0xff]  ;;  %v6520_v58 = vld [vmem:[#allocation52_spill] sm:$0xff] }
 0x3dc   :  { %1591 = vmatpush.msra.mxu0 %v4631_v0  ;;  %1611 = vmatpush.msra.mxu1 %v4634_v50  ;;  %v6521_v0 = vld [vmem:[#allocation51_spill] sm:$0xff]  ;;  %v6522_v50 = vld [vmem:[#allocation53_spill] sm:$0xff] }
 0x3dd   :  { %1631 = vmatpush.msra.mxu2 %v4637_v55  ;;  %1651 = vmatpush.msra.mxu3 %v4640_v52  ;;  %v6523_v55 = vld [vmem:[#allocation54_spill] sm:$0xff]  ;;  %v6524_v52 = vld [vmem:[#allocation56_spill] sm:$0xff] }
 0x3de   :  { %1592 = vmatpush.msra.mxu0 %v4643_v53  ;;  %1612 = vmatpush.msra.mxu1 %v4646_v49  ;;  %v6525_v53 = vld [vmem:[#allocation64_spill] sm:$0xff]  ;;  %v6526_v49 = vld [vmem:[#allocation74_spill] sm:$0xff] }
 0x3df   :  { %1632 = vmatpush.msra.mxu2 %v4649_v13  ;;  %1652 = vmatpush.msra.mxu3 %v6429_v57  ;;  %v395_v13 = vadd.f32 %v6526_v49, %v6525_v53 }
 0x3e0   :  { %1593 = vmatpush.msra.mxu0 %v6430_v25  ;;  %1613 = vmatpush.msra.mxu1 %v6431_v11 }
 0x3e1   :  { %1633 = vmatpush.msra.mxu2 %v6432_v12  ;;  %1653 = vmatpush.msra.mxu3 %v6433_v14 }
 0x3e2   :  { %1594 = vmatpush.msra.mxu0 %v4667_v26  ;;  %1614 = vmatpush.msra.mxu1 %v4670_v46  ;;  %v6504_v26 = vld [vmem:[#allocation36_spill] sm:$0xff]  ;;  %v6527_v46 = vld [vmem:[#allocation65_spill] sm:$0xff] }
 0x3e3   :  { %1634 = vmatpush.msra.mxu2 %v4673_v56  ;;  %1654 = vmatpush.msra.mxu3 %v4676_v48  ;;  %v6528_v56 = vld [vmem:[#allocation75_spill] sm:$0xff] }
 0x3e4   :  { %1595 = vmatpush.msra.mxu0 %v4679_v59  ;;  %1615 = vmatpush.msra.mxu1 %v4682_v60  ;;  %v6509_v60 = vld [vmem:[#allocation39_spill] sm:$0xff]  ;;  %v396_v48 = vadd.f32 %v6528_v56, %v6527_v46 }
 0x3e5   :  { %1635 = vmatpush.msra.mxu2 %v6499_v61  ;;  %1655 = vmatpush.msra.mxu3 %v6500_v39 }
 0x3e6   :  { %1596 = vmatpush.msra.mxu0 %v6501_v63  ;;  %1616 = vmatpush.msra.mxu1 %v6502_v51 }
 0x3e7   :  { %1636 = vmatpush.msra.mxu2 %v6503_v29  ;;  %1656 = vmatpush.msra.mxu3 %v6504_v26 }
 0x3e8   :  { %1597 = vmatpush.msra.mxu0 %v6505_v31  ;;  %1617 = vmatpush.msra.mxu1 %v6506_v32 }
 0x3e9   :  { %1637 = vmatpush.msra.mxu2 %v6507_v34  ;;  %1657 = vmatpush.msra.mxu3 %v6508_v35 }
 0x3ea   :  { %1598 = vmatpush.msra.mxu0 %v6509_v60  ;;  %1618 = vmatpush.msra.mxu1 %v6510_v36 }
 0x3eb   :  { %1638 = vmatpush.msra.mxu2 %v6511_v37  ;;  %1658 = vmatpush.msra.mxu3 %v6512_v38 }
 0x3ec   :  { %1599 = vmatpush.msra.mxu0 %v6513_v40  ;;  %1619 = vmatpush.msra.mxu1 %v6514_v41 }
 0x3ed   :  { %1639 = vmatpush.msra.mxu2 %v6515_v42  ;;  %1659 = vmatpush.msra.mxu3 %v6516_v44 }
 0x3ee   :  { %1600 = vmatpush.msra.mxu0 %v6517_v45  ;;  %1620 = vmatpush.msra.mxu1 %v6518_v47 }
 0x3ef   :  { %1640 = vmatpush.msra.mxu2 %v6519_v54  ;;  %1660 = vmatpush.msra.mxu3 %v6520_v58 }
 0x3f0   :  { %1601 = vmatpush.msra.mxu0 %v6521_v0  ;;  %1621 = vmatpush.msra.mxu1 %v6522_v50 }
 0x3f1   :  { %1641 = vmatpush.msra.mxu2 %v6523_v55  ;;  %1661 = vmatpush.msra.mxu3 %v6524_v52 }
 0x44d   :  { %v1295_v59 = vpop.f32.mrf.mxu0  ;;  %v1315_v57 = vpop.f32.mrf.mxu1 }
 0x44e   :  { %v1358_v25 = vadd.f32 %v1295_v59, %v395_v13  ;;  %v1359_v11 = vadd.f32 %v1315_v57, %v396_v48  ;;  %v1806_v48 = vld [vmem:[#allocation11 + $0x1e8] sm:$0xff]  ;;  %v1807_v59 = vld [vmem:[#allocation11 + $0x1f0] sm:$0xff]  ;;  %v1808_v57 = vld [vmem:[#allocation11 + $0x1f8] sm:$0xff] }
 0x450   :  { %v3406_v12 = vmul.f32 -1.442695, %v1358_v25  ;;  %v3407_v14 = vmul.f32 -1.442695, %v1359_v11  ;;  %v1801_v25 = vld [vmem:[#allocation11 + $0x1c0] sm:$0xff]  ;;  %v1802_v11 = vld [vmem:[#allocation11 + $0x1c8] sm:$0xff] }
 0x452   :  { %3534 = vpow2.f32 %v3406_v12  ;;  %v1803_v12 = vld [vmem:[#allocation11 + $0x1d0] sm:$0xff] }
 0x453   :  { %3536 = vpow2.f32 %v3407_v14  ;;  %v1804_v14 = vld [vmem:[#allocation11 + $0x1d8] sm:$0xff] }
 0x454   :  { %v1355_v15 = vpop.f32.mrf.mxu3  ;;  %v1335_v43 = vpop.f32.mrf.mxu2 }
 0x455   :  { %v1361_v16 = vadd.f32 %v1355_v15, %v398_v19  ;;  %v1360_v21 = vadd.f32 %v1335_v43, %v397_v20  ;;  %v1798_v19 = vld [vmem:[#allocation11 + $0x1a8] sm:$0xff]  ;;  %v1799_v15 = vld [vmem:[#allocation11 + $0x1b0] sm:$0xff]  ;;  %v399_v20 = vadd.f32 %v6526_v49, %v6533_v9 }
 0x456   :  { %v1790_v43 = vld [vmem:[#allocation11 + $0x168] sm:$0xff] }
 0x457   :  { %v3408_v3 = vmul.f32 -1.442695, %v1361_v16  ;;  %v1800_v16 = vld [vmem:[#allocation11 + $0x1b8] sm:$0xff] }
 0x458   :  { %v3535_v5 = vpop.eup %3534 }
 0x459   :  { %v3537_v6 = vpop.eup %3536  ;;  %v1365_v30 = vadd.f32 1.0, %v3535_v5  ;;  %3538 = vpow2.f32 %v3408_v3  ;;  %v1793_v3 = vld [vmem:[#allocation11 + $0x180] sm:$0xff]  ;;  %v1794_v5 = vld [vmem:[#allocation11 + $0x188] sm:$0xff] }
 0x45a   :  { %v1384_v7 = vadd.f32 1.0, %v3537_v6  ;;  %v1795_v6 = vld [vmem:[#allocation11 + $0x190] sm:$0xff] }
 0x45b   :  { %3540 = vrcp.f32 %v1365_v30  ;;  %v1377_v33 = vand.u32 2147483648, %v1365_v30  ;;  %v1375_v63 = vand.u32 2147483647, %v1365_v30  ;;  %vm1371_vm14 = vweird.f32 %v1365_v30 }
 0x45c   :  { %3542 = vrcp.f32 %v1384_v7  ;;  %v1396_v61 = vand.u32 2147483648, %v1384_v7  ;;  %v1394_v29 = vand.u32 2147483647, %v1384_v7  ;;  %vm1390_vm15 = vweird.f32 %v1384_v7 }
 0x45d   :  { %v1378_v32 = vor.u32 1.1754944e-38, %v1377_v33  ;;  %vm1376_vm2 = vcmp.eq.f32.partialorder %v1375_v63, 8.507059e+37  ;;  %v1781_v63 = vld [vmem:[#allocation11 + $0x120] sm:$0xff] }
 0x45e   :  { %v1397_v60 = vor.u32 1.1754944e-38, %v1396_v61  ;;  %vm1395_vm3 = vcmp.eq.f32.partialorder %v1394_v29, 8.507059e+37  ;;  %v1783_v29 = vld [vmem:[#allocation11 + $0x130] sm:$0xff] }
 0x45f   :  { %v3539_v22 = vpop.eup %3538 }
 0x460   :  { %v1404_v28 = vadd.f32 1.0, %v3539_v22  ;;  %v1791_v22 = vld [vmem:[#allocation11 + $0x170] sm:$0xff] }
 0x461   :  { %v3541_v18 = vpop.eup %3540 }
 0x462   :  { %v3543_v27 = vpop.eup %3542  ;;  %v1367_v24 = vmul.f32 %v3541_v18, %v1365_v30  ;;  %3544 = vrcp.f32 %v1404_v28  ;;  %vm1372_vm12 = vweird.f32 %v3541_v18  ;;  %v1416_v0 = vand.u32 2147483648, %v1404_v28  ;;  %v1796_v30 = vld [vmem:[#allocation11 + $0x198] sm:$0xff] }
 0x463   :  { %v1386_v4 = vmul.f32 %v3543_v27, %v1384_v7  ;;  %3546 = vtanh.f32 %v1360_v21  ;;  %vm1391_vm13 = vweird.f32 %v3543_v27  ;;  %vm1373_vm0 = vmor %vm1371_vm14, %vm1372_vm12  ;;  %vm1410_vm5 = vweird.f32 %v1404_v28  ;;  %v1789_v7 = vld [vmem:[#allocation11 + $0x160] sm:$0xff]  ;;  %v1792_v21 = vld [vmem:[#allocation11 + $0x178] sm:$0xff] }
 0x464   :  { %v1368_v2 = vsub.f32 1.0, %v1367_v24  ;;  %vm1392_vm1 = vmor %vm1390_vm15, %vm1391_vm13  ;;  %v1414_v50 = vand.u32 2147483647, %v1404_v28  ;;  %v1417_v52 = vor.u32 1.1754944e-38, %v1416_v0  ;;  %v1770_v0 = vld [vmem:[#allocation11 + $0xc8] sm:$0xff] }
 0x465   :  { %v1387_v17 = vsub.f32 1.0, %v1386_v4  ;;  %v1785_v4 = vld [vmem:[#allocation11 + $0x140] sm:$0xff] }
 0x466   :  { %v1369_v39 = vmul.f32 %v3541_v18, %v1368_v2  ;;  %vm1415_vm7 = vcmp.eq.f32.partialorder %v1414_v50, 8.507059e+37  ;;  %v1786_v2 = vld [vmem:[#allocation11 + $0x148] sm:$0xff]  ;;  %v1771_v50 = vld [vmem:[#allocation11 + $0xd0] sm:$0xff] }
 0x467   :  { %v1388_v51 = vmul.f32 %v3543_v27, %v1387_v17  ;;  %v1787_v17 = vld [vmem:[#allocation11 + $0x150] sm:$0xff] }
 0x468   :  { %v3545_v26 = vpop.eup %3544  ;;  %v1370_v31 = vadd.f32 %v3541_v18, %v1369_v39  ;;  %v1788_v39 = vld [vmem:[#allocation11 + $0x158] sm:$0xff] }
 0x469   :  { %v1389_v34 = vadd.f32 %v3543_v27, %v1388_v51  ;;  %v1406_v35 = vmul.f32 %v3545_v26, %v1404_v28  ;;  %v3547_v37 = vpop.eup %3546  ;;  %vm1411_vm4 = vweird.f32 %v3545_v26  ;;  %v6534_v28 = vld [vmem:[#allocation69_spill] sm:$0xff]  ;;  %v1782_v51 = vld [vmem:[#allocation11 + $0x128] sm:$0xff] }
 0x46a   :  { %v1374_v36 = vsel %vm1373_vm0, %v3541_v18, %v1370_v31  ;;  %vm1412_vm6 = vmor %vm1410_vm5, %vm1411_vm4  ;;  %v400_v18 = vadd.f32 %v6528_v56, %v6534_v28  ;;  %v1751_v28 = vld [vmem:[#allocation11 + $0x30] sm:$0xff] }
 0x46b   :  { %v1379_v38 = vsel %vm1376_vm2, %v1378_v32, %v1374_v36  ;;  %v1393_v40 = vsel %vm1392_vm1, %v3543_v27, %v1389_v34  ;;  %v1407_v41 = vsub.f32 1.0, %v1406_v35  ;;  %v1784_v32 = vld [vmem:[#allocation11 + $0x138] sm:$0xff]  ;;  %v1777_v34 = vld [vmem:[#allocation11 + $0x100] sm:$0xff]  ;;  %v1778_v35 = vld [vmem:[#allocation11 + $0x108] sm:$0xff] }
 0x46c   :  { %v1398_v42 = vsel %vm1395_vm3, %v1397_v60, %v1393_v40  ;;  %v1421_v44 = vmul.f32 %v3547_v37, %v1379_v38  ;;  %v1779_v60 = vld [vmem:[#allocation11 + $0x110] sm:$0xff]  ;;  %v1780_v36 = vld [vmem:[#allocation11 + $0x118] sm:$0xff]  ;;  %v1773_v40 = vld [vmem:[#allocation11 + $0xe0] sm:$0xff] }
 0x46d   :  { %v1420_v45 = vmul.f32 %v1398_v42, %v4936_v8  ;;  %v1408_v47 = vmul.f32 %v3545_v26, %v1407_v41  ;;  %v1805_v8 = vld [vmem:[#allocation11 + $0x1e0] sm:$0xff]  ;;  %v6535_v37 = vld [vmem:[#allocation71_spill] sm:$0xff]  ;;  %v1774_v41 = vld [vmem:[#allocation11 + $0xe8] sm:$0xff] }
 0x46e   :  { %v402_v38 = vadd.f32 %v6530_v62, %v6535_v37  ;;  %v1775_v42 = vld [vmem:[#allocation11 + $0xf0] sm:$0xff] }
 0x46f   :  { %v5018_v54 = vadd.f32 %v1421_v44, %v1420_v45  ;;  %v1409_v58 = vadd.f32 %v3545_v26, %v1408_v47  ;;  %v1776_v45 = vld [vmem:[#allocation11 + $0xf8] sm:$0xff] }
 0x471   :  { %3548 = vtanh.f32 %v5018_v54  ;;  %v1413_v55 = vsel %vm1412_vm6, %v3545_v26, %v1409_v58  ;;  %v1769_v58 = vld [vmem:[#allocation11 + $0xc0] sm:$0xff] }
 0x472   :  { %v1418_v13 = vsel %vm1415_vm7, %v1417_v52, %v1413_v55  ;;  %v1772_v55 = vld [vmem:[#allocation11 + $0xd8] sm:$0xff] }
 0x477   :  { %v3549_v53 = vpop.eup %3548 }
 0x478   :  { %v5021_v46 = vmul.f32 %v3549_v53, %v1418_v13  ;;  %v1765_v53 = vld [vmem:[#allocation11 + $0xa0] sm:$0xff]  ;;  %v1766_v13 = vld [vmem:[#allocation11 + $0xa8] sm:$0xff] }
 0x47a   :  { %1448 = vmatmul.f32.vlgmr.msrb.gmra.mxu0 %v5021_v46  ;;  %1468 = vmatmul.f32.vlgmr.msrb.gmra.mxu1 %v5021_v46 }
 0x47b   :  { %1488 = vmatmul.f32.vlgmr.msrb.gmra.mxu2 %v5021_v46  ;;  %1508 = vmatmul.f32.vlgmr.msrb.gmra.mxu3 %v5021_v46 }
 0x47c   :  { %1809 = vmatpush.msrb.mxu0 %v1805_v8  ;;  %1850 = vmatpush.msrb.mxu1 %v1806_v48  ;;  %v1767_v8 = vld [vmem:[#allocation11 + $0xb0] sm:$0xff] }
 0x47d   :  { %1891 = vmatpush.msrb.mxu2 %v1807_v59  ;;  %1932 = vmatpush.msrb.mxu3 %v1808_v57  ;;  %v1768_v59 = vld [vmem:[#allocation11 + $0xb8] sm:$0xff]  ;;  %v1761_v57 = vld [vmem:[#allocation11 + $0x80] sm:$0xff] }
 0x47e   :  { %1810 = vmatpush.msrb.mxu0 %v1801_v25  ;;  %1851 = vmatpush.msrb.mxu1 %v1802_v11  ;;  %v1762_v25 = vld [vmem:[#allocation11 + $0x88] sm:$0xff] }
 0x47f   :  { %1892 = vmatpush.msrb.mxu2 %v1803_v12  ;;  %1933 = vmatpush.msrb.mxu3 %v1804_v14  ;;  %v1763_v14 = vld [vmem:[#allocation11 + $0x90] sm:$0xff] }
 0x480   :  { %1811 = vmatpush.msrb.mxu0 %v1797_v10  ;;  %1852 = vmatpush.msrb.mxu1 %v1798_v19  ;;  %v1764_v10 = vld [vmem:[#allocation11 + $0x98] sm:$0xff] }
 0x481   :  { %1893 = vmatpush.msrb.mxu2 %v1799_v15  ;;  %1934 = vmatpush.msrb.mxu3 %v1800_v16  ;;  %v1757_v15 = vld [vmem:[#allocation11 + $0x60] sm:$0xff]  ;;  %v1758_v16 = vld [vmem:[#allocation11 + $0x68] sm:$0xff] }
 0x482   :  { %1812 = vmatpush.msrb.mxu0 %v1793_v3  ;;  %1853 = vmatpush.msrb.mxu1 %v1794_v5  ;;  %v1759_v3 = vld [vmem:[#allocation11 + $0x70] sm:$0xff]  ;;  %v1760_v5 = vld [vmem:[#allocation11 + $0x78] sm:$0xff] }
 0x483   :  { %1894 = vmatpush.msrb.mxu2 %v1795_v6  ;;  %1935 = vmatpush.msrb.mxu3 %v1796_v30  ;;  %v1753_v6 = vld [vmem:[#allocation11 + $0x40] sm:$0xff]  ;;  %v1754_v30 = vld [vmem:[#allocation11 + $0x48] sm:$0xff] }
 0x484   :  { %1813 = vmatpush.msrb.mxu0 %v1789_v7  ;;  %1854 = vmatpush.msrb.mxu1 %v1790_v43  ;;  %v1755_v7 = vld [vmem:[#allocation11 + $0x50] sm:$0xff]  ;;  %v1756_v43 = vld [vmem:[#allocation11 + $0x58] sm:$0xff] }
 0x485   :  { %1895 = vmatpush.msrb.mxu2 %v1791_v22  ;;  %1936 = vmatpush.msrb.mxu3 %v1792_v21  ;;  %v1749_v22 = vld [vmem:[#allocation11 + $0x20] sm:$0xff] }
 0x486   :  { %1814 = vmatpush.msrb.mxu0 %v1785_v4  ;;  %1855 = vmatpush.msrb.mxu1 %v1786_v2  ;;  %v1745_v4 = vld [vmem:[#allocation11] sm:$0xff]  ;;  %v1746_v2 = vld [vmem:[#allocation11 + $0x8] sm:$0xff] }
 0x487   :  { %1896 = vmatpush.msrb.mxu2 %v1787_v17  ;;  %1937 = vmatpush.msrb.mxu3 %v1788_v39 }
 0x488   :  { %1815 = vmatpush.msrb.mxu0 %v1781_v63  ;;  %1856 = vmatpush.msrb.mxu1 %v1782_v51 }
 0x489   :  { %1897 = vmatpush.msrb.mxu2 %v1783_v29  ;;  %1938 = vmatpush.msrb.mxu3 %v1784_v32 }
 0x48a   :  { %1816 = vmatpush.msrb.mxu0 %v1777_v34  ;;  %1857 = vmatpush.msrb.mxu1 %v1778_v35 }
 0x48b   :  { %1898 = vmatpush.msrb.mxu2 %v1779_v60  ;;  %1939 = vmatpush.msrb.mxu3 %v1780_v36 }
 0x48c   :  { %1817 = vmatpush.msrb.mxu0 %v1773_v40  ;;  %1858 = vmatpush.msrb.mxu1 %v1774_v41 }
 0x48d   :  { %1899 = vmatpush.msrb.mxu2 %v1775_v42  ;;  %1940 = vmatpush.msrb.mxu3 %v1776_v45 }
 0x48e   :  { %1818 = vmatpush.msrb.mxu0 %v1769_v58  ;;  %1859 = vmatpush.msrb.mxu1 %v1770_v0 }
 0x48f   :  { %1900 = vmatpush.msrb.mxu2 %v1771_v50  ;;  %1941 = vmatpush.msrb.mxu3 %v1772_v55 }
 0x490   :  { %1819 = vmatpush.msrb.mxu0 %v1765_v53  ;;  %1860 = vmatpush.msrb.mxu1 %v1766_v13 }
 0x491   :  { %1901 = vmatpush.msrb.mxu2 %v1767_v8  ;;  %1942 = vmatpush.msrb.mxu3 %v1768_v59 }
 0x492   :  { %1820 = vmatpush.msrb.mxu0 %v1761_v57  ;;  %1861 = vmatpush.msrb.mxu1 %v1762_v25 }
 0x493   :  { %1902 = vmatpush.msrb.mxu2 %v1763_v14  ;;  %1943 = vmatpush.msrb.mxu3 %v1764_v10 }
 0x494   :  { %1821 = vmatpush.msrb.mxu0 %v1757_v15  ;;  %1862 = vmatpush.msrb.mxu1 %v1758_v16  ;;  %v6538_v16 = vld [vmem:[#allocation24_spill] sm:$0xff] }
 0x495   :  { %1903 = vmatpush.msrb.mxu2 %v1759_v3  ;;  %1944 = vmatpush.msrb.mxu3 %v1760_v5  ;;  %v6539_v3 = vld [vmem:[#allocation29_spill] sm:$0xff] }
 0x496   :  { %1822 = vmatpush.msrb.mxu0 %v1753_v6  ;;  %1863 = vmatpush.msrb.mxu1 %v1754_v30  ;;  %v5065_v5 = vld [vmem:[#allocation12 + $0x3e0] sm:$0xff]  ;;  %v5067_v6 = vld [vmem:[#allocation12 + $0x3e8] sm:$0xff] }
 0x497   :  { %1904 = vmatpush.msrb.mxu2 %v1755_v7  ;;  %1945 = vmatpush.msrb.mxu3 %v1756_v43  ;;  %6540 = vst [vmem:[#allocation23_spill] sm:$0xff] %v5065_v5  ;;  %v5069_v30 = vld [vmem:[#allocation12 + $0x3c0] sm:$0xff]  ;;  %v5073_v7 = vld [vmem:[#allocation12 + $0x3c8] sm:$0xff]  ;;  %v5075_v43 = vld [vmem:[#allocation12 + $0x3f8] sm:$0xff] }
 0x498   :  { %1823 = vmatpush.msrb.mxu0 %v1749_v22  ;;  %6541 = vst [vmem:[#allocation25_spill] sm:$0xff] %v5073_v7  ;;  %v5078_v22 = vld [vmem:[#allocation12 + $0x3a0] sm:$0xff] }
 0x499   :  { %1905 = vmatpush.msrb.mxu2 %v1751_v28  ;;  %v6544_v28 = vld [vmem:[#allocation55_spill] sm:$0xff] }
 0x49a   :  { %1824 = vmatpush.msrb.mxu0 %v1745_v4  ;;  %v5113_v4 = vld [vmem:[#allocation12 + $0x388] sm:$0xff] }
 0x4f7   :  { %v1449_v27 = vpop.f32.mrf.mxu0  ;;  %v1469_v24 = vpop.f32.mrf.mxu1 }
 0x4f8   :  { %v1512_v33 = vadd.f32 %v1449_v27, %v399_v20  ;;  %v1513_v61 = vadd.f32 %v1469_v24, %v400_v18  ;;  %v1750_v20 = vld [vmem:[#allocation11 + $0x28] sm:$0xff]  ;;  %v1752_v18 = vld [vmem:[#allocation11 + $0x38] sm:$0xff] }
 0x4f9   :  { %v6536_v27 = vld [vmem:[#allocation76_spill] sm:$0xff]  ;;  %1864 = vmatpush.msrb.mxu1 %v1750_v20  ;;  %1946 = vmatpush.msrb.mxu3 %v1752_v18  ;;  %v5101_v18 = vld [vmem:[#allocation12 + $0x3f0] sm:$0xff] }
 0x4fa   :  { %v3409_v26 = vmul.f32 -1.442695, %v1512_v33  ;;  %v3410_v31 = vmul.f32 -1.442695, %v1513_v61  ;;  %v401_v24 = vadd.f32 %v6532_v1, %v6536_v27  ;;  %v1747_v33 = vld [vmem:[#allocation11 + $0x10] sm:$0xff]  ;;  %v1748_v61 = vld [vmem:[#allocation11 + $0x18] sm:$0xff] }
 0x4fb   :  { %1865 = vmatpush.msrb.mxu1 %v1746_v2  ;;  %1906 = vmatpush.msrb.mxu2 %v1747_v33  ;;  %v5082_v20 = vld [vmem:[#allocation12 + $0x3d8] sm:$0xff]  ;;  %v5109_v27 = vld [vmem:[#allocation12 + $0x3b0] sm:$0xff]  ;;  %v5121_v2 = vld [vmem:[#allocation12 + $0x368] sm:$0xff] }
 0x4fc   :  { %3550 = vpow2.f32 %v3409_v26  ;;  %1947 = vmatpush.msrb.mxu3 %v1748_v61  ;;  %6543 = vst [vmem:[#allocation28_spill] sm:$0xff] %v5082_v20  ;;  %v5125_v33 = vld [vmem:[#allocation12 + $0x390] sm:$0xff]  ;;  %v5131_v61 = vld [vmem:[#allocation12 + $0x378] sm:$0xff] }
 0x4fd   :  { %3552 = vpow2.f32 %v3410_v31 }
 0x4fe   :  { %v1509_v44 = vpop.f32.mrf.mxu3  ;;  %v1489_v9 = vpop.f32.mrf.mxu2 }
 0x4ff   :  { %v1515_v47 = vadd.f32 %v1509_v44, %v402_v38  ;;  %v1514_v63 = vadd.f32 %v1489_v9, %v401_v24  ;;  %v5080_v9 = vld [vmem:[#allocation12 + $0x3a8] sm:$0xff]  ;;  %v5111_v24 = vld [vmem:[#allocation12 + $0x380] sm:$0xff] }
 0x500   :  { %6542 = vst [vmem:[#allocation26_spill] sm:$0xff] %v5080_v9 }
 0x501   :  { %v3411_v52 = vmul.f32 -1.442695, %v1515_v47  ;;  %6546 = vst [vmem:[#allocation57_spill] sm:$0xff] %v5111_v24 }
 0x502   :  { %v3551_v48 = vpop.eup %3550 }
 0x503   :  { %v3553_v11 = vpop.eup %3552  ;;  %v5033_v12 = vadd.f32 1.0, %v3551_v48  ;;  %3554 = vpow2.f32 %v3411_v52 }
 0x504   :  { %v5035_v19 = vadd.f32 1.0, %v3553_v11 }
 0x505   :  { %3556 = vrcp.f32 %v5033_v12  ;;  %v1531_v34 = vand.u32 2147483648, %v5033_v12  ;;  %v1529_v36 = vand.u32 2147483647, %v5033_v12  ;;  %vm1525_vm10 = vweird.f32 %v5033_v12 }
 0x506   :  { %3558 = vrcp.f32 %v5035_v19  ;;  %v1550_v35 = vand.u32 2147483648, %v5035_v19  ;;  %v1548_v38 = vand.u32 2147483647, %v5035_v19  ;;  %vm1544_vm11 = vweird.f32 %v5035_v19 }
 0x507   :  { %v1532_v42 = vor.u32 1.1754944e-38, %v1531_v34  ;;  %vm1530_vm14 = vcmp.eq.f32.partialorder %v1529_v36, 8.507059e+37  ;;  %v5145_v34 = vld [vmem:[#allocation12 + $0x358] sm:$0xff]  ;;  %v5149_v36 = vld [vmem:[#allocation12 + $0x350] sm:$0xff] }
 0x508   :  { %v1551_v47 = vor.u32 1.1754944e-38, %v1550_v35  ;;  %vm1549_vm15 = vcmp.eq.f32.partialorder %v1548_v38, 8.507059e+37 }
 0x509   :  { %v3555_v21 = vpop.eup %3554 }
 0x50a   :  { %v1558_v17 = vadd.f32 1.0, %v3555_v21  ;;  %v5104_v21 = vld [vmem:[#allocation12 + $0x3d0] sm:$0xff] }
 0x50b   :  { %v3557_v39 = vpop.eup %3556 }
 0x50c   :  { %v3559_v51 = vpop.eup %3558  ;;  %v1521_v29 = vmul.f32 %v3557_v39, %v5033_v12  ;;  %3560 = vrcp.f32 %v1558_v17  ;;  %vm1526_vm8 = vweird.f32 %v3557_v39  ;;  %v1570_v25 = vand.u32 2147483648, %v1558_v17 }
 0x50d   :  { %v1540_v26 = vmul.f32 %v3559_v51, %v5035_v19  ;;  %3562 = vtanh.f32 %v1514_v63  ;;  %vm1545_vm9 = vweird.f32 %v3559_v51  ;;  %vm1527_vm12 = vmor %vm1525_vm10, %vm1526_vm8  ;;  %vm1564_vm1 = vweird.f32 %v1558_v17  ;;  %v6547_v63 = vld [vmem:[#allocation72_spill] sm:$0xff] }
 0x50e   :  { %v1522_v31 = vsub.f32 1.0, %v1521_v29  ;;  %vm1546_vm13 = vmor %vm1544_vm11, %vm1545_vm9  ;;  %v1568_v11 = vand.u32 2147483647, %v1558_v17  ;;  %v1571_v14 = vor.u32 1.1754944e-38, %v1570_v25  ;;  %v6548_v29 = vld [vmem:[#allocation73_spill] sm:$0xff] }
 0x50f   :  { %v1541_v32 = vsub.f32 1.0, %v1540_v26  ;;  %v404_v26 = vadd.f32 %v6528_v56, %v6548_v29  ;;  %v5156_v56 = vld [vmem:[#allocation12 + $0x338] sm:$0xff]  ;;  %v5191_v25 = vld [vmem:[#allocation12 + $0x2a0] sm:$0xff] }
 0x510   :  { %v1523_v60 = vmul.f32 %v3557_v39, %v1522_v31  ;;  %vm1569_vm3 = vcmp.eq.f32.partialorder %v1568_v11, 8.507059e+37  ;;  %v5141_v31 = vld [vmem:[#allocation12 + $0x340] sm:$0xff]  ;;  %6551 = vst [vmem:[#allocation60_spill] sm:$0xff] %v5191_v25  ;;  %v5193_v11 = vld [vmem:[#allocation12 + $0x2a8] sm:$0xff] }
 0x511   :  { %v1542_v37 = vmul.f32 %v3559_v51, %v1541_v32  ;;  %v5143_v32 = vld [vmem:[#allocation12 + $0x348] sm:$0xff]  ;;  %6552 = vst [vmem:[#allocation59_spill] sm:$0xff] %v5193_v11 }
 0x512   :  { %v3561_v40 = vpop.eup %3560  ;;  %v1524_v41 = vadd.f32 %v3557_v39, %v1523_v60 }
 0x513   :  { %v1543_v44 = vadd.f32 %v3559_v51, %v1542_v37  ;;  %v1560_v45 = vmul.f32 %v3561_v40, %v1558_v17  ;;  %v3563_v0 = vpop.eup %3562  ;;  %vm1565_vm0 = vweird.f32 %v3561_v40  ;;  %v5123_v17 = vld [vmem:[#allocation12 + $0x398] sm:$0xff] }
 0x514   :  { %v1528_v58 = vsel %vm1527_vm12, %v3557_v39, %v1524_v41  ;;  %vm1566_vm2 = vmor %vm1564_vm1, %vm1565_vm0  ;;  %v5133_v39 = vld [vmem:[#allocation12 + $0x370] sm:$0xff] }
 0x515   :  { %v1533_v50 = vsel %vm1530_vm14, %v1532_v42, %v1528_v58  ;;  %v1547_v55 = vsel %vm1546_vm13, %v3559_v51, %v1543_v44  ;;  %v1561_v52 = vsub.f32 1.0, %v1560_v45  ;;  %v403_v51 = vadd.f32 %v6526_v49, %v6547_v63  ;;  %v5151_v49 = vld [vmem:[#allocation12 + $0x320] sm:$0xff]  ;;  %v5161_v41 = vld [vmem:[#allocation12 + $0x330] sm:$0xff] }
 0x516   :  { %v1552_v53 = vsel %vm1549_vm15, %v1551_v47, %v1547_v55  ;;  %v1575_v13 = vmul.f32 %v3563_v0, %v1533_v50  ;;  %v5163_v45 = vld [vmem:[#allocation12 + $0x300] sm:$0xff]  ;;  %v5165_v47 = vld [vmem:[#allocation12 + $0x308] sm:$0xff]  ;;  %v5175_v50 = vld [vmem:[#allocation12 + $0x318] sm:$0xff] }
 0x517   :  { %v1574_v8 = vmul.f32 %v1552_v53, %v5018_v54  ;;  %v1562_v48 = vmul.f32 %v3561_v40, %v1561_v52  ;;  %v6537_v54 = vld [vmem:[#allocation81_spill] sm:$0xff]  ;;  %v5173_v0 = vld [vmem:[#allocation12 + $0x2e8] sm:$0xff]  ;;  %v5182_v53 = vld [vmem:[#allocation12 + $0x2f8] sm:$0xff] }
 0x518   :  { %v5171_v58 = vld [vmem:[#allocation12 + $0x2e0] sm:$0xff]  ;;  %v5180_v52 = vld [vmem:[#allocation12 + $0x2c8] sm:$0xff] }
 0x519   :  { %v5050_v59 = vadd.f32 %v1575_v13, %v1574_v8  ;;  %v1563_v57 = vadd.f32 %v3561_v40, %v1562_v48  ;;  %v5178_v55 = vld [vmem:[#allocation12 + $0x2c0] sm:$0xff]  ;;  %v5188_v48 = vld [vmem:[#allocation12 + $0x2d8] sm:$0xff] }
 0x51a   :  { %v6549_v13 = vld [vmem:[#allocation77_spill] sm:$0xff]  ;;  %6550 = vst [vmem:[#allocation58_spill] sm:$0xff] %v5188_v48 }
 0x51b   :  { %3564 = vtanh.f32 %v5050_v59  ;;  %v1567_v12 = vsel %vm1566_vm2, %v3561_v40, %v1563_v57  ;;  %v5153_v40 = vld [vmem:[#allocation12 + $0x328] sm:$0xff]  ;;  %v406_v8 = vadd.f32 %v6530_v62, %v6549_v13  ;;  %v5199_v62 = vld [vmem:[#allocation12 + $0x2b8] sm:$0xff]  ;;  %v5217_v63 = vld [vmem:[#allocation12 + $0x260] sm:$0xff] }
 0x51c   :  { %v1572_v19 = vsel %vm1569_vm3, %v1571_v14, %v1567_v12  ;;  %v5195_v12 = vld [vmem:[#allocation12 + $0x310] sm:$0xff]  ;;  %6553 = vst [vmem:[#allocation61_spill] sm:$0xff] %v5199_v62  ;;  %v5245_v13 = vld [vmem:[#allocation12 + $0x220] sm:$0xff] }
 0x51d   :  { %6558 = vst [vmem:[#allocation32_spill] sm:$0xff] %v5217_v63 }
 0x51e   :  { %6565 = vst [vmem:[#allocation38_spill] sm:$0xff] %v5245_v13 }
 0x521   :  { %v3565_v10 = vpop.eup %3564 }
 0x522   :  { %v1578_v15 = vmul.f32 %v3565_v10, %v1572_v19  ;;  %v5201_v10 = vld [vmem:[#allocation12 + $0x2f0] sm:$0xff]  ;;  %v5205_v19 = vld [vmem:[#allocation12 + $0x280] sm:$0xff] }
 0x523   :  { %6554 = vst [vmem:[#allocation62_spill] sm:$0xff] %v5205_v19 }
 0x524   :  { %1602 = vmatmul.f32.vlgmr.msra.gmra.mxu0 %v1578_v15  ;;  %1622 = vmatmul.f32.vlgmr.msra.gmra.mxu1 %v1578_v15 }
 0x525   :  { %1642 = vmatmul.f32.vlgmr.msra.gmra.mxu2 %v1578_v15  ;;  %1662 = vmatmul.f32.vlgmr.msra.gmra.mxu3 %v1578_v15 }
 0x526   :  { %2121 = vmatpush.msra.mxu0 %v5065_v5  ;;  %2141 = vmatpush.msra.mxu1 %v5067_v6 }
 0x527   :  { %2181 = vmatpush.msra.mxu3 %v5075_v43  ;;  %2161 = vmatpush.msra.mxu2 %v5101_v18 }
 0x528   :  { %2122 = vmatpush.msra.mxu0 %v5069_v30  ;;  %2142 = vmatpush.msra.mxu1 %v5073_v7 }
 0x529   :  { %2182 = vmatpush.msra.mxu3 %v5082_v20  ;;  %2162 = vmatpush.msra.mxu2 %v5104_v21 }
 0x52a   :  { %2123 = vmatpush.msra.mxu0 %v5078_v22  ;;  %2143 = vmatpush.msra.mxu1 %v5080_v9 }
 0x52b   :  { %2163 = vmatpush.msra.mxu2 %v5109_v27 }
 0x52c   :  { %1825 = vmatmul.f32.vlgmr.msrb.gmra.mxu0 %v6537_v54  ;;  %1866 = vmatmul.f32.vlgmr.msrb.gmra.mxu1 %v6537_v54 }
 0x52d   :  { %1907 = vmatmul.f32.vlgmr.msrb.gmra.mxu2 %v6537_v54  ;;  %1948 = vmatmul.f32.vlgmr.msrb.gmra.mxu3 %v6537_v54 }
 0x52e   :  { %2124 = vmatpush.msra.mxu0 %v5111_v24  ;;  %2144 = vmatpush.msra.mxu1 %v5113_v4 }
 0x52f   :  { %2164 = vmatpush.msra.mxu2 %v5125_v33 }
 0x530   :  { %2145 = vmatpush.msra.mxu1 %v5121_v2 }
 0x531   :  { %2165 = vmatpush.msra.mxu2 %v5133_v39 }
 0x532   :  { %2146 = vmatpush.msra.mxu1 %v5143_v32 }
 0x533   :  { %2166 = vmatpush.msra.mxu2 %v5149_v36 }
 0x534   :  { %1828 = vmatmul.f32.gmra.mxu0 %v6538_v16  ;;  %1869 = vmatmul.f32.gmra.mxu1 %v6538_v16 }
 0x535   :  { %1910 = vmatmul.f32.gmra.mxu2 %v6538_v16  ;;  %1951 = vmatmul.f32.gmra.mxu3 %v6538_v16  ;;  %v5211_v16 = vld [vmem:[#allocation12 + $0x298] sm:$0xff] }
 0x536   :  { %2147 = vmatpush.msra.mxu1 %v5153_v40  ;;  %2167 = vmatpush.msra.mxu2 %v5161_v41  ;;  %6556 = vst [vmem:[#allocation66_spill] sm:$0xff] %v5211_v16 }
 0x538   :  { %2148 = vmatpush.msra.mxu1 %v5165_v47  ;;  %2168 = vmatpush.msra.mxu2 %v5195_v12 }
 0x53a   :  { %2149 = vmatpush.msra.mxu1 %v5173_v0  ;;  %2169 = vmatpush.msra.mxu2 %v5201_v10 }
 0x53c   :  { %1831 = vmatmul.f32.gmra.mxu0 %v6539_v3  ;;  %1872 = vmatmul.f32.gmra.mxu1 %v6539_v3 }
 0x53d   :  { %1913 = vmatmul.f32.gmra.mxu2 %v6539_v3  ;;  %1954 = vmatmul.f32.gmra.mxu3 %v6539_v3  ;;  %v5213_v3 = vld [vmem:[#allocation12 + $0x2d0] sm:$0xff] }
 0x53e   :  { %2150 = vmatpush.msra.mxu1 %v5180_v52  ;;  %6557 = vst [vmem:[#allocation30_spill] sm:$0xff] %v5213_v3  ;;  %2170 = vmatpush.msra.mxu2 %v5213_v3 }
 0x540   :  { %2151 = vmatpush.msra.mxu1 %v5193_v11 }
 0x544   :  { %1834 = vmatmul.f32.gmra.mxu0 %v6544_v28  ;;  %1875 = vmatmul.f32.gmra.mxu1 %v6544_v28 }
 0x545   :  { %1916 = vmatmul.f32.gmra.mxu2 %v6544_v28  ;;  %1957 = vmatmul.f32.gmra.mxu3 %v6544_v28 }
 0x54c   :  { %1837 = vmatmul.f32.gmra.mxu0 %v4939_v23  ;;  %1878 = vmatmul.f32.gmra.mxu1 %v4939_v23 }
 0x54d   :  { %1919 = vmatmul.f32.gmra.mxu2 %v4939_v23  ;;  %1960 = vmatmul.f32.gmra.mxu3 %v4939_v23  ;;  %v5107_v23 = vld [vmem:[#allocation12 + $0x3b8] sm:$0xff] }
 0x54e   :  { %6545 = vst [vmem:[#allocation27_spill] sm:$0xff] %v5107_v23  ;;  %2183 = vmatpush.msra.mxu3 %v5107_v23 }
 0x550   :  { %2184 = vmatpush.msra.mxu3 %v5123_v17 }
 0x552   :  { %2185 = vmatpush.msra.mxu3 %v5131_v61 }
 0x554   :  { %1840 = vmatmul.f32.gmra.mxu0 %v5021_v46  ;;  %1881 = vmatmul.f32.gmra.mxu1 %v5021_v46 }
 0x555   :  { %1922 = vmatmul.f32.gmra.mxu2 %v5021_v46  ;;  %1963 = vmatmul.f32.gmra.mxu3 %v5021_v46  ;;  %v5116_v46 = vld [vmem:[#allocation12 + $0x360] sm:$0xff] }
 0x556   :  { %2125 = vmatpush.msra.mxu0 %v5116_v46  ;;  %2186 = vmatpush.msra.mxu3 %v5145_v34 }
 0x558   :  { %2126 = vmatpush.msra.mxu0 %v5141_v31  ;;  %2187 = vmatpush.msra.mxu3 %v5156_v56 }
 0x55a   :  { %2127 = vmatpush.msra.mxu0 %v5151_v49  ;;  %2188 = vmatpush.msra.mxu3 %v5175_v50 }
 0x55c   :  { %1843 = vmatmul.f32.gmra.mxu0 %v1578_v15  ;;  %1884 = vmatmul.f32.gmra.mxu1 %v1578_v15 }
 0x55d   :  { %1925 = vmatmul.f32.gmra.mxu2 %v1578_v15  ;;  %1966 = vmatmul.f32.gmra.mxu3 %v1578_v15  ;;  %v5207_v15 = vld [vmem:[#allocation12 + $0x288] sm:$0xff] }
 0x55e   :  { %2128 = vmatpush.msra.mxu0 %v5163_v45  ;;  %2189 = vmatpush.msra.mxu3 %v5182_v53  ;;  %6555 = vst [vmem:[#allocation63_spill] sm:$0xff] %v5207_v15 }
 0x55f   :  { %2152 = vmatpush.msra.mxu1 %v5207_v15 }
 0x560   :  { %2129 = vmatpush.msra.mxu0 %v5171_v58  ;;  %2190 = vmatpush.msra.mxu3 %v5188_v48 }
 0x562   :  { %2130 = vmatpush.msra.mxu0 %v5178_v55  ;;  %2191 = vmatpush.msra.mxu3 %v5199_v62 }
 0x564   :  { %2131 = vmatpush.msra.mxu0 %v5191_v25  ;;  %2192 = vmatpush.msra.mxu3 %v5211_v16  ;;  %v5269_v16 = vld [vmem:[#allocation12 + $0x218] sm:$0xff] }
 0x565   :  { %6574 = vst [vmem:[#allocation46_spill] sm:$0xff] %v5269_v16 }
 0x566   :  { %2132 = vmatpush.msra.mxu0 %v5205_v19 }
 0x568   :  { %2133 = vmatpush.msra.mxu0 %v5217_v63 }
 0x5a1   :  { %v1603_v35 = vpop.f32.mrf.mxu0  ;;  %v1623_v60 = vpop.f32.mrf.mxu1 }
 0x5a2   :  { %v1666_v37 = vadd.f32 %v1603_v35, %v403_v51  ;;  %v1667_v38 = vadd.f32 %v1623_v60, %v404_v26  ;;  %v5219_v51 = vld [vmem:[#allocation12 + $0x268] sm:$0xff]  ;;  %v5225_v35 = vld [vmem:[#allocation12 + $0x2b0] sm:$0xff]  ;;  %v5227_v60 = vld [vmem:[#allocation12 + $0x278] sm:$0xff] }
 0x5a3   :  { %6559 = vst [vmem:[#allocation31_spill] sm:$0xff] %v5219_v51  ;;  %2153 = vmatpush.msra.mxu1 %v5219_v51  ;;  %2171 = vmatpush.msra.mxu2 %v5225_v35  ;;  %v6571_v51 = vld [vmem:[#allocation79_spill] sm:$0xff] }
 0x5a4   :  { %v3412_v42 = vmul.f32 -1.442695, %v1666_v37  ;;  %v3413_v44 = vmul.f32 -1.442695, %v1667_v38  ;;  %6560 = vst [vmem:[#allocation33_spill] sm:$0xff] %v5225_v35  ;;  %v5233_v38 = vld [vmem:[#allocation12 + $0x240] sm:$0xff]  ;;  %2193 = vmatpush.msra.mxu3 %v5227_v60  ;;  %v405_v63 = vadd.f32 %v6532_v1, %v6571_v51 }
 0x5a5   :  { %6561 = vst [vmem:[#allocation34_spill] sm:$0xff] %v5227_v60  ;;  %2134 = vmatpush.msra.mxu0 %v5233_v38  ;;  %v5277_v1 = vld [vmem:[#allocation12 + $0x230] sm:$0xff] }
 0x5a6   :  { %3566 = vpow2.f32 %v3412_v42  ;;  %6562 = vst [vmem:[#allocation36_spill] sm:$0xff] %v5233_v38  ;;  %v5235_v42 = vld [vmem:[#allocation12 + $0x248] sm:$0xff]  ;;  %v5267_v38 = vld [vmem:[#allocation12 + $0x238] sm:$0xff] }
 0x5a7   :  { %3568 = vpow2.f32 %v3413_v44  ;;  %6563 = vst [vmem:[#allocation35_spill] sm:$0xff] %v5235_v42  ;;  %v5240_v44 = vld [vmem:[#allocation12 + $0x290] sm:$0xff]  ;;  %2154 = vmatpush.msra.mxu1 %v5235_v42  ;;  %2135 = vmatpush.msra.mxu0 %v5245_v13 }
 0x5a8   :  { %v1663_v57 = vpop.f32.mrf.mxu3  ;;  %6564 = vst [vmem:[#allocation37_spill] sm:$0xff] %v5240_v44  ;;  %2172 = vmatpush.msra.mxu2 %v5240_v44  ;;  %v5265_v42 = vld [vmem:[#allocation12 + $0x250] sm:$0xff] }
 0x5a9   :  { %v1669_v14 = vadd.f32 %v1663_v57, %v406_v8  ;;  %v5247_v8 = vld [vmem:[#allocation12 + $0x228] sm:$0xff]  ;;  %v5249_v57 = vld [vmem:[#allocation12 + $0x258] sm:$0xff]  ;;  %6572 = vst [vmem:[#allocation44_spill] sm:$0xff] %v5265_v42 }
 0x5aa   :  { %6566 = vst [vmem:[#allocation40_spill] sm:$0xff] %v5247_v8  ;;  %2194 = vmatpush.msra.mxu3 %v5249_v57  ;;  %2155 = vmatpush.msra.mxu1 %v5247_v8 }
 0x5ab   :  { %v3414_v54 = vmul.f32 -1.442695, %v1669_v14  ;;  %6567 = vst [vmem:[#allocation39_spill] sm:$0xff] %v5249_v57  ;;  %v5253_v14 = vld [vmem:[#allocation12 + $0x270] sm:$0xff] }
 0x5ac   :  { %v3567_v28 = vpop.eup %3566  ;;  %6568 = vst [vmem:[#allocation41_spill] sm:$0xff] %v5253_v14  ;;  %2173 = vmatpush.msra.mxu2 %v5253_v14  ;;  %2195 = vmatpush.msra.mxu3 %v5267_v38 }
 0x5ad   :  { %v3569_v29 = vpop.eup %3568  ;;  %v5221_v26 = vadd.f32 1.0, %v3567_v28  ;;  %3570 = vpow2.f32 %v3414_v54  ;;  %v1643_v54 = vpop.f32.mrf.mxu2  ;;  %v5257_v28 = vld [vmem:[#allocation12 + $0x200] sm:$0xff]  ;;  %6573 = vst [vmem:[#allocation45_spill] sm:$0xff] %v5267_v38  ;;  %v5284_v38 = vld [vmem:[#allocation12 + $0x210] sm:$0xff] }
 0x5ae   :  { %v5229_v37 = vadd.f32 1.0, %v3569_v29  ;;  %6569 = vst [vmem:[#allocation42_spill] sm:$0xff] %v5257_v28  ;;  %v5259_v29 = vld [vmem:[#allocation12 + $0x208] sm:$0xff]  ;;  %v1668_v15 = vadd.f32 %v1643_v54, %v405_v63  ;;  %2136 = vmatpush.msra.mxu0 %v5257_v28  ;;  %2174 = vmatpush.msra.mxu2 %v5265_v42 }
 0x5af   :  { %3572 = vrcp.f32 %v5221_v26  ;;  %6570 = vst [vmem:[#allocation43_spill] sm:$0xff] %v5259_v29  ;;  %2156 = vmatpush.msra.mxu1 %v5259_v29  ;;  %2196 = vmatpush.msra.mxu3 %v5269_v16  ;;  %v1685_v29 = vand.u32 2147483648, %v5221_v26  ;;  %vm1679_vm6 = vweird.f32 %v5221_v26 }
 0x5b0   :  { %3574 = vrcp.f32 %v5229_v37  ;;  %6575 = vst [vmem:[#allocation47_spill] sm:$0xff] %v5277_v1  ;;  %2272 = vmatpush.msrb.mxu0 %v5065_v5  ;;  %2175 = vmatpush.msra.mxu2 %v5277_v1  ;;  %v1704_v16 = vand.u32 2147483648, %v5229_v37  ;;  %v1683_v5 = vand.u32 2147483647, %v5221_v26  ;;  %vm1698_vm7 = vweird.f32 %v5229_v37 }
 0x5b1   :  { %6576 = vst [vmem:[#allocation48_spill] sm:$0xff] %v5284_v38  ;;  %2292 = vmatpush.msrb.mxu1 %v5067_v6  ;;  %2332 = vmatpush.msrb.mxu3 %v5075_v43 }
 0x5b2   :  { %2273 = vmatpush.msrb.mxu0 %v5069_v30  ;;  %2176 = vmatpush.msra.mxu2 %v5284_v38  ;;  %vm1684_vm10 = vcmp.eq.f32.partialorder %v1683_v5, 8.507059e+37 }
 0x5b3   :  { %v3571_v60 = vpop.eup %3570  ;;  %2293 = vmatpush.msrb.mxu1 %v5073_v7  ;;  %2333 = vmatpush.msrb.mxu3 %v5082_v20 }
 0x5b4   :  { %v5271_v44 = vadd.f32 1.0, %v3571_v60  ;;  %2312 = vmatpush.msrb.mxu2 %v5101_v18  ;;  %2274 = vmatpush.msrb.mxu0 %v5078_v22 }
 0x5b5   :  { %v3573_v57 = vpop.eup %3572  ;;  %2294 = vmatpush.msrb.mxu1 %v5080_v9  ;;  %2334 = vmatpush.msrb.mxu3 %v5107_v23 }
 0x5b6   :  { %v3575_v51 = vpop.eup %3574  ;;  %v1675_v8 = vmul.f32 %v3573_v57, %v5221_v26  ;;  %3576 = vrcp.f32 %v5271_v44  ;;  %vm1680_vm4 = vweird.f32 %v3573_v57  ;;  %2313 = vmatpush.msrb.mxu2 %v5104_v21  ;;  %2275 = vmatpush.msrb.mxu0 %v5111_v24  ;;  %v1705_v26 = vor.u32 1.1754944e-38, %v1704_v16 }
 0x5b7   :  { %v1694_v60 = vmul.f32 %v3575_v51, %v5229_v37  ;;  %3578 = vtanh.f32 %v1668_v15  ;;  %vm1699_vm5 = vweird.f32 %v3575_v51  ;;  %vm1681_vm8 = vmor %vm1679_vm6, %vm1680_vm4  ;;  %2295 = vmatpush.msrb.mxu1 %v5113_v4  ;;  %2335 = vmatpush.msrb.mxu3 %v5123_v17  ;;  %vm1718_vm13 = vweird.f32 %v5271_v44 }
 0x5b8   :  { %v1676_v63 = vsub.f32 1.0, %v1675_v8  ;;  %vm1700_vm9 = vmor %vm1698_vm7, %vm1699_vm5  ;;  %2314 = vmatpush.msrb.mxu2 %v5109_v27  ;;  %2276 = vmatpush.msrb.mxu0 %v5116_v46 }
 0x5b9   :  { %v1695_v54 = vsub.f32 1.0, %v1694_v60  ;;  %v1702_v60 = vand.u32 2147483647, %v5229_v37  ;;  %2296 = vmatpush.msrb.mxu1 %v5121_v2  ;;  %2336 = vmatpush.msrb.mxu3 %v5131_v61 }
 0x5ba   :  { %v1677_v28 = vmul.f32 %v3573_v57, %v1676_v63  ;;  %v1686_v63 = vor.u32 1.1754944e-38, %v1685_v29  ;;  %2315 = vmatpush.msrb.mxu2 %v5125_v33  ;;  %2277 = vmatpush.msrb.mxu0 %v5141_v31 }
 0x5bb   :  { %v1696_v8 = vmul.f32 %v3575_v51, %v1695_v54  ;;  %vm1703_vm11 = vcmp.eq.f32.partialorder %v1702_v60, 8.507059e+37  ;;  %2297 = vmatpush.msrb.mxu1 %v5143_v32  ;;  %2337 = vmatpush.msrb.mxu3 %v5145_v34  ;;  %v6577_v60 = vld [vmem:[#allocation63_spill] sm:$0xff] }
 0x5bc   :  { %v5300_v15 = vpop.eup %3576  ;;  %v1678_v7 = vadd.f32 %v3573_v57, %v1677_v28  ;;  %2316 = vmatpush.msrb.mxu2 %v5133_v39  ;;  %2278 = vmatpush.msrb.mxu0 %v5151_v49 }
 0x5bd   :  { %v1697_v54 = vadd.f32 %v3575_v51, %v1696_v8  ;;  %v1714_v20 = vmul.f32 %v5300_v15, %v5271_v44  ;;  %v3579_v37 = vpop.eup %3578  ;;  %vm1719_vm12 = vweird.f32 %v5300_v15  ;;  %2298 = vmatpush.msrb.mxu1 %v5153_v40  ;;  %2338 = vmatpush.msrb.mxu3 %v5156_v56 }
 0x5be   :  { %v1682_v28 = vsel %vm1681_vm8, %v3573_v57, %v1678_v7  ;;  %2317 = vmatpush.msrb.mxu2 %v5149_v36  ;;  %2279 = vmatpush.msrb.mxu0 %v5163_v45  ;;  %vm1720_vm14 = vmor %vm1718_vm13, %vm1719_vm12 }
 0x5bf   :  { %v1687_v23 = vsel %vm1684_vm10, %v1686_v63, %v1682_v28  ;;  %v1701_v29 = vsel %vm1700_vm9, %v3575_v51, %v1697_v54  ;;  %v1715_v8 = vsub.f32 1.0, %v1714_v20  ;;  %2299 = vmatpush.msrb.mxu1 %v5165_v47  ;;  %2339 = vmatpush.msrb.mxu3 %v5175_v50  ;;  %v6579_v63 = vld [vmem:[#allocation37_spill] sm:$0xff]  ;;  %v6580_v54 = vld [vmem:[#allocation32_spill] sm:$0xff]  ;;  %v6582_v28 = vld [vmem:[#allocation34_spill] sm:$0xff] }
 0x5c0   :  { %v1706_v9 = vsel %vm1703_vm11, %v1705_v26, %v1701_v29  ;;  %v1729_v24 = vmul.f32 %v3579_v37, %v1687_v23  ;;  %2318 = vmatpush.msrb.mxu2 %v5161_v41  ;;  %2280 = vmatpush.msrb.mxu0 %v5171_v58  ;;  %v6581_v26 = vld [vmem:[#allocation31_spill] sm:$0xff]  ;;  %v6583_v37 = vld [vmem:[#allocation36_spill] sm:$0xff] }
 0x5c1   :  { %v1728_v5 = vmul.f32 %v1706_v9, %v5050_v59  ;;  %v1716_v7 = vmul.f32 %v5300_v15, %v1715_v8  ;;  %v1724_v59 = vand.u32 2147483648, %v5271_v44  ;;  %v1722_v9 = vand.u32 2147483647, %v5271_v44  ;;  %2300 = vmatpush.msrb.mxu1 %v5173_v0  ;;  %2340 = vmatpush.msrb.mxu3 %v5182_v53  ;;  %v6584_v29 = vld [vmem:[#allocation35_spill] sm:$0xff] }
 0x5c2   :  { %2319 = vmatpush.msrb.mxu2 %v5195_v12  ;;  %2281 = vmatpush.msrb.mxu0 %v5178_v55  ;;  %v6585_v8 = vld [vmem:[#allocation39_spill] sm:$0xff] }
 0x5c3   :  { %v1730_v20 = vadd.f32 %v1729_v24, %v1728_v5  ;;  %v1717_v23 = vadd.f32 %v5300_v15, %v1716_v7  ;;  %v1725_v16 = vor.u32 1.1754944e-38, %v1724_v59  ;;  %vm1723_vm15 = vcmp.eq.f32.partialorder %v1722_v9, 8.507059e+37  ;;  %2301 = vmatpush.msrb.mxu1 %v5180_v52  ;;  %2341 = vmatpush.msrb.mxu3 %v5188_v48  ;;  %v6587_v7 = vld [vmem:[#allocation40_spill] sm:$0xff]  ;;  %v6590_v59 = vld [vmem:[#allocation43_spill] sm:$0xff]  ;;  %v6591_v9 = vld [vmem:[#allocation46_spill] sm:$0xff] }
 0x5c4   :  { %2320 = vmatpush.msrb.mxu2 %v5201_v10  ;;  %2282 = vmatpush.msrb.mxu0 %v5191_v25  ;;  %v6586_v5 = vmov 0.0  }
 0x5c5   :  { %3580 = vtanh.f32 %v1730_v20  ;;  %v1721_v24 = vsel %vm1720_vm14, %v5300_v15, %v1717_v23  ;;  %2302 = vmatpush.msrb.mxu1 %v5193_v11  ;;  %2342 = vmatpush.msrb.mxu3 %v5199_v62  ;;  %v6578_v15 = vld [vmem:[#allocation66_spill] sm:$0xff]  ;;  %v6588_v20 = vld [vmem:[#allocation45_spill] sm:$0xff] }
 0x5c6   :  { %v1726_v57 = vsel %vm1723_vm15, %v1725_v16, %v1721_v24  ;;  %2321 = vmatpush.msrb.mxu2 %v5213_v3  ;;  %2283 = vmatpush.msrb.mxu0 %v5205_v19  ;;  %v6589_v23 = vld [vmem:[#allocation42_spill] sm:$0xff]  ;;  %v6592_v24 = vld [vmem:[#allocation23_spill] sm:$0xff]  ;;  %v6593_v16 = vld [vmem:[#allocation25_spill] sm:$0xff] }
 0x5c7   :  { %2303 = vmatpush.msrb.mxu1 %v6577_v60  ;;  %2343 = vmatpush.msrb.mxu3 %v6578_v15 }
 0x5c8   :  { %2322 = vmatpush.msrb.mxu2 %v5225_v35  ;;  %2284 = vmatpush.msrb.mxu0 %v6580_v54 }
 0x5c9   :  { %2304 = vmatpush.msrb.mxu1 %v6581_v26  ;;  %2344 = vmatpush.msrb.mxu3 %v6582_v28 }
 0x5ca   :  { %2323 = vmatpush.msrb.mxu2 %v6579_v63  ;;  %2285 = vmatpush.msrb.mxu0 %v6583_v37 }
 0x5cb   :  { %v3581_v44 = vpop.eup %3580  ;;  %2305 = vmatpush.msrb.mxu1 %v6584_v29  ;;  %2345 = vmatpush.msrb.mxu3 %v6585_v8 }
 0x5cc   :  { %v1732_v51 = vmul.f32 %v3581_v44, %v1726_v57  ;;  %2324 = vmatpush.msrb.mxu2 %v5253_v14  ;;  %2286 = vmatpush.msrb.mxu0 %v5245_v13  ;;  %v6594_v44 = vld [vmem:[#allocation28_spill] sm:$0xff]  ;;  %v6595_v57 = vld [vmem:[#allocation26_spill] sm:$0xff] }
 0x5cd   :  { %2306 = vmatpush.msrb.mxu1 %v6587_v7  ;;  %2346 = vmatpush.msrb.mxu3 %v6588_v20 }
 0x5ce   :  { %1846 = vmatmul.f32.gmra.mxu0 %v1732_v51  ;;  %1887 = vmatmul.f32.gmra.mxu1 %v1732_v51 }
 0x5cf   :  { %1928 = vmatmul.f32.gmra.mxu2 %v1732_v51  ;;  %1969 = vmatmul.f32.gmra.mxu3 %v1732_v51  ;;  %v6596_v51 = vld [vmem:[#allocation27_spill] sm:$0xff] }
 0x5d0   :  { %2325 = vmatpush.msrb.mxu2 %v5265_v42  ;;  %2287 = vmatpush.msrb.mxu0 %v6589_v23 }
 0x5d1   :  { %2307 = vmatpush.msrb.mxu1 %v6590_v59  ;;  %2347 = vmatpush.msrb.mxu3 %v6591_v9 }
 0x5d2   :  { %2326 = vmatpush.msrb.mxu2 %v5277_v1 }
 0x5d4   :  { %2327 = vmatpush.msrb.mxu2 %v5284_v38 }
 0x5d6   :  { %2137 = vmatmul.f32.vlgmr.msra.gmra.mxu0 %v6586_v5  ;;  %2157 = vmatmul.f32.vlgmr.msra.gmra.mxu1 %v6586_v5 }
 0x5d7   :  { %2177 = vmatmul.f32.vlgmr.msra.gmra.mxu2 %v6586_v5  ;;  %2197 = vmatmul.f32.vlgmr.msra.gmra.mxu3 %v6586_v5  ;;  %v6597_v5 = vld [vmem:[#allocation57_spill] sm:$0xff] }
 0x5d8   :  { %2423 = vmatpush.msra.mxu0 %v6592_v24  ;;  %2443 = vmatpush.msra.mxu1 %v5067_v6 }
 0x5d9   :  { %2463 = vmatpush.msra.mxu2 %v5101_v18  ;;  %2483 = vmatpush.msra.mxu3 %v5075_v43 }
 0x5da   :  { %2424 = vmatpush.msra.mxu0 %v5069_v30  ;;  %2444 = vmatpush.msra.mxu1 %v6593_v16 }
 0x5db   :  { %2464 = vmatpush.msra.mxu2 %v5104_v21  ;;  %2484 = vmatpush.msra.mxu3 %v6594_v44 }
 0x5dc   :  { %2425 = vmatpush.msra.mxu0 %v5078_v22  ;;  %2445 = vmatpush.msra.mxu1 %v6595_v57 }
 0x5dd   :  { %2465 = vmatpush.msra.mxu2 %v5109_v27  ;;  %2485 = vmatpush.msra.mxu3 %v6596_v51 }
 0x5de   :  { %2426 = vmatpush.msra.mxu0 %v6597_v5  ;;  %2446 = vmatpush.msra.mxu1 %v5113_v4 }
 0x5df   :  { %2466 = vmatpush.msra.mxu2 %v5125_v33  ;;  %2486 = vmatpush.msra.mxu3 %v5123_v17 }
 0x5e0   :  { %2427 = vmatpush.msra.mxu0 %v5116_v46  ;;  %2447 = vmatpush.msra.mxu1 %v5121_v2 }
 0x5e1   :  { %2467 = vmatpush.msra.mxu2 %v5133_v39  ;;  %2487 = vmatpush.msra.mxu3 %v5131_v61 }
 0x5e2   :  { %2428 = vmatpush.msra.mxu0 %v5141_v31  ;;  %2448 = vmatpush.msra.mxu1 %v5143_v32 }
 0x5e3   :  { %2468 = vmatpush.msra.mxu2 %v5149_v36  ;;  %2488 = vmatpush.msra.mxu3 %v5145_v34 }
 0x5e4   :  { %2429 = vmatpush.msra.mxu0 %v5151_v49  ;;  %2449 = vmatpush.msra.mxu1 %v5153_v40 }
 0x5e5   :  { %2469 = vmatpush.msra.mxu2 %v5161_v41  ;;  %2489 = vmatpush.msra.mxu3 %v5156_v56 }
 0x5e6   :  { %2430 = vmatpush.msra.mxu0 %v5163_v45  ;;  %2450 = vmatpush.msra.mxu1 %v5165_v47 }
 0x5e7   :  { %2470 = vmatpush.msra.mxu2 %v5195_v12  ;;  %2490 = vmatpush.msra.mxu3 %v5175_v50 }
 0x5e8   :  { %2431 = vmatpush.msra.mxu0 %v5171_v58  ;;  %2451 = vmatpush.msra.mxu1 %v5173_v0 }
 0x5e9   :  { %2471 = vmatpush.msra.mxu2 %v5201_v10  ;;  %2491 = vmatpush.msra.mxu3 %v5182_v53 }
 0x5ea   :  { %2432 = vmatpush.msra.mxu0 %v5178_v55  ;;  %2452 = vmatpush.msra.mxu1 %v5180_v52 }
 0x5eb   :  { %2472 = vmatpush.msra.mxu2 %v5213_v3  ;;  %2492 = vmatpush.msra.mxu3 %v5188_v48 }
 0x5ec   :  { %2433 = vmatpush.msra.mxu0 %v5191_v25  ;;  %2453 = vmatpush.msra.mxu1 %v5193_v11 }
 0x5ed   :  { %2473 = vmatpush.msra.mxu2 %v5225_v35  ;;  %2493 = vmatpush.msra.mxu3 %v5199_v62 }
 0x5ee   :  { %2434 = vmatpush.msra.mxu0 %v5205_v19  ;;  %2454 = vmatpush.msra.mxu1 %v6577_v60 }
 0x5ef   :  { %2474 = vmatpush.msra.mxu2 %v6579_v63  ;;  %2494 = vmatpush.msra.mxu3 %v6578_v15 }
 0x5f0   :  { %2435 = vmatpush.msra.mxu0 %v6580_v54  ;;  %2455 = vmatpush.msra.mxu1 %v6581_v26 }
 0x5f1   :  { %2475 = vmatpush.msra.mxu2 %v5253_v14  ;;  %2495 = vmatpush.msra.mxu3 %v6582_v28 }
 0x5f2   :  { %2436 = vmatpush.msra.mxu0 %v6583_v37  ;;  %2456 = vmatpush.msra.mxu1 %v6584_v29  ;;  %v1826_v29 = vpop.f32.mrf.mxu0  ;;  %v1949_v37 = vpop.f32.mrf.mxu3 }
 0x5f3   :  { %2476 = vmatpush.msra.mxu2 %v5265_v42  ;;  %2496 = vmatpush.msra.mxu3 %v6585_v8  ;;  %v1867_v42 = vpop.f32.mrf.mxu1 }
 0x5f4   :  { %2437 = vmatpush.msra.mxu0 %v5245_v13  ;;  %2457 = vmatpush.msra.mxu1 %v6587_v7  ;;  %v1908_v7 = vpop.f32.mrf.mxu2 }
 0x5f5   :  { %2477 = vmatpush.msra.mxu2 %v5277_v1  ;;  %2497 = vmatpush.msra.mxu3 %v6588_v20 }
 0x5f6   :  { %2438 = vmatpush.msra.mxu0 %v6589_v23  ;;  %2458 = vmatpush.msra.mxu1 %v6590_v59 }
 0x5f7   :  { %2478 = vmatpush.msra.mxu2 %v5284_v38  ;;  %2498 = vmatpush.msra.mxu3 %v6591_v9 }
 0x5fa   :  { %v5440_v8 = vpop.f32.mrf.mxu0  ;;  %v5444_v28 = vpop.f32.mrf.mxu3 }
 0x5fb   :  { %6598 = vst [vmem:[#allocation49_spill] sm:$0xff] %v5440_v8  ;;  %v5442_v13 = vpop.f32.mrf.mxu1 }
 0x5fc   :  { %6599 = vst [vmem:[#allocation50_spill] sm:$0xff] %v5442_v13  ;;  %v5450_v23 = vpop.f32.mrf.mxu2 }
 0x5fd   :  { %6600 = vst [vmem:[#allocation52_spill] sm:$0xff] %v5444_v28 }
 0x5fe   :  { %6603 = vst [vmem:[#allocation54_spill] sm:$0xff] %v5450_v23 }
 0x602   :  { %v5446_v1 = vpop.f32.mrf.mxu0  ;;  %v5452_v59 = vpop.f32.mrf.mxu3 }
 0x603   :  { %6601 = vst [vmem:[#allocation51_spill] sm:$0xff] %v5446_v1  ;;  %v5448_v20 = vpop.f32.mrf.mxu1 }
 0x604   :  { %6602 = vst [vmem:[#allocation53_spill] sm:$0xff] %v5448_v20  ;;  %v5458_v14 = vpop.f32.mrf.mxu2 }
 0x605   :  { %6604 = vst [vmem:[#allocation56_spill] sm:$0xff] %v5452_v59 }
 0x606   :  { %6607 = vst [vmem:[#allocation65_spill] sm:$0xff] %v5458_v14 }
 0x60a   :  { %v5454_v38 = vpop.f32.mrf.mxu0  ;;  %v5460_v8 = vpop.f32.mrf.mxu3 }
 0x60b   :  { %6605 = vst [vmem:[#allocation64_spill] sm:$0xff] %v5454_v38  ;;  %v5456_v9 = vpop.f32.mrf.mxu1 }
 0x60c   :  { %6606 = vst [vmem:[#allocation74_spill] sm:$0xff] %v5456_v9  ;;  %v5466_v28 = vpop.f32.mrf.mxu2 }
 0x60d   :  { %6608 = vst [vmem:[#allocation75_spill] sm:$0xff] %v5460_v8 }
 0x60e   :  { %6611 = vst [vmem:[#allocation70_spill] sm:$0xff] %v5466_v28 }
 0x612   :  { %v5462_v13 = vpop.f32.mrf.mxu0  ;;  %v5468_v1 = vpop.f32.mrf.mxu3 }
 0x613   :  { %6609 = vst [vmem:[#allocation67_spill] sm:$0xff] %v5462_v13  ;;  %v5464_v26 = vpop.f32.mrf.mxu1 }
 0x614   :  { %6610 = vst [vmem:[#allocation78_spill] sm:$0xff] %v5464_v26  ;;  %v5474_v59 = vpop.f32.mrf.mxu2  ;;  %v1974_v26 = vld [vmem:[#allocation14 + $0x4] sm:$0xf] }
 0x615   :  { %6612 = vst [vmem:[#allocation80_spill] sm:$0xff] %v5468_v1  ;;  %v5500_v63 = vperm.slane %v1974_v26, 3 }
 0x616   :  { %6615 = vst [vmem:[#allocation71_spill] sm:$0xff] %v5474_v59 }
 0x617   :  { %6627 = vst [vmem:[#allocation28_spill] sm:$0xff] %v5500_v63  ;;  %v1987_v60 = vadd.f32 %v5500_v63, %v1949_v37 }
 0x61a   :  { %v5470_v20 = vpop.f32.mrf.mxu0  ;;  %v5476_v38 = vpop.f32.mrf.mxu3 }
 0x61b   :  { %6613 = vst [vmem:[#allocation68_spill] sm:$0xff] %v5470_v20  ;;  %v5472_v23 = vpop.f32.mrf.mxu1  ;;  %v5490_v20 = vperm.slane %v1974_v26, 0 }
 0x61c   :  { %6614 = vst [vmem:[#allocation69_spill] sm:$0xff] %v5472_v23  ;;  %v5482_v8 = vpop.f32.mrf.mxu2  ;;  %v5492_v23 = vperm.slane %v1974_v26, 1 }
 0x61d   :  { %6616 = vst [vmem:[#allocation76_spill] sm:$0xff] %v5476_v38  ;;  %v1984_v59 = vadd.f32 %v5490_v20, %v1826_v29 }
 0x61e   :  { %6619 = vst [vmem:[#allocation29_spill] sm:$0xff] %v5482_v8  ;;  %v1985_v38 = vadd.f32 %v5492_v23, %v1867_v42 }
 0x61f   :  { %6623 = vst [vmem:[#allocation77_spill] sm:$0xff] %v5490_v20 }
 0x620   :  { %6624 = vst [vmem:[#allocation79_spill] sm:$0xff] %v5492_v23 }
 0x622   :  { %v5478_v9 = vpop.f32.mrf.mxu0  ;;  %v5484_v13 = vpop.f32.mrf.mxu3 }
 0x623   :  { %6617 = vst [vmem:[#allocation81_spill] sm:$0xff] %v5478_v9  ;;  %v5480_v14 = vpop.f32.mrf.mxu1 }
 0x624   :  { %6618 = vst [vmem:[#allocation24_spill] sm:$0xff] %v5480_v14  ;;  %v5496_v9 = vpop.f32.mrf.mxu2 }
 0x625   :  { %6620 = vst [vmem:[#allocation55_spill] sm:$0xff] %v5484_v13 }
 0x626   :  { %6625 = vst [vmem:[#allocation23_spill] sm:$0xff] %v5496_v9 }
 0x64b   :  { %v5486_v28 = vpop.f32.mrf.mxu0  ;;  %v5488_v1 = vpop.f32.mrf.mxu1 }
 0x64c   :  { %6621 = vst [vmem:[#allocation72_spill] sm:$0xff] %v5486_v28 }
 0x64d   :  { %6622 = vst [vmem:[#allocation73_spill] sm:$0xff] %v5488_v1 }
 0x652   :  { %v5498_v14 = vpop.f32.mrf.mxu3  ;;  %v5503_v19 = vpop.f32.mrf.mxu2 }
 0x653   :  { %6626 = vst [vmem:[#allocation25_spill] sm:$0xff] %v5498_v14  ;;  %v2138_v8 = vpop.f32.mrf.mxu0  ;;  %v2158_v54 = vpop.f32.mrf.mxu1 }
 0x654   :  { %v2201_v13 = vadd.f32 %v2138_v8, %v1984_v59  ;;  %v2202_v15 = vadd.f32 %v2158_v54, %v1985_v38  ;;  %6628 = vst [vmem:[#allocation26_spill] sm:$0xff] %v5503_v19  ;;  %v5505_v8 = vperm.slane %v1974_v26, 2 }
 0x656   :  { %v3415_v28 = vmul.f32 -1.442695, %v2201_v13  ;;  %v3416_v1 = vmul.f32 -1.442695, %v2202_v15  ;;  %6629 = vst [vmem:[#allocation27_spill] sm:$0xff] %v5505_v8  ;;  %v1986_v15 = vadd.f32 %v5505_v8, %v1908_v7 }
 0x658   :  { %3582 = vpow2.f32 %v3415_v28 }
 0x659   :  { %3584 = vpow2.f32 %v3416_v1 }
 0x65a   :  { %v2198_v29 = vpop.f32.mrf.mxu3  ;;  %v2178_v38 = vpop.f32.mrf.mxu2 }
 0x65b   :  { %v2204_v42 = vadd.f32 %v2198_v29, %v1987_v60  ;;  %v2203_v28 = vadd.f32 %v2178_v38, %v1986_v15 }
 0x65d   :  { %v3417_v23 = vmul.f32 -1.442695, %v2204_v42 }
 0x65e   :  { %v3583_v9 = vpop.eup %3582 }
 0x65f   :  { %v3585_v20 = vpop.eup %3584  ;;  %v2208_v14 = vadd.f32 1.0, %v3583_v9  ;;  %3586 = vpow2.f32 %v3417_v23 }
 0x660   :  { %v2227_v62 = vadd.f32 1.0, %v3585_v20 }
 0x661   :  { %3588 = vrcp.f32 %v2208_v14  ;;  %v2220_v9 = vand.u32 2147483648, %v2208_v14  ;;  %v2218_v23 = vand.u32 2147483647, %v2208_v14  ;;  %vm2214_vm2 = vweird.f32 %v2208_v14 }
 0x662   :  { %3590 = vrcp.f32 %v2227_v62  ;;  %v2239_v20 = vand.u32 2147483648, %v2227_v62  ;;  %v2237_v63 = vand.u32 2147483647, %v2227_v62  ;;  %vm2233_vm3 = vweird.f32 %v2227_v62 }
 0x663   :  { %v2221_v38 = vor.u32 1.1754944e-38, %v2220_v9  ;;  %vm2219_vm5 = vcmp.eq.f32.partialorder %v2218_v23, 8.507059e+37 }
 0x664   :  { %v2240_v8 = vor.u32 1.1754944e-38, %v2239_v20  ;;  %vm2238_vm7 = vcmp.eq.f32.partialorder %v2237_v63, 8.507059e+37 }
 0x665   :  { %v3587_v13 = vpop.eup %3586 }
 0x666   :  { %v2247_v54 = vadd.f32 1.0, %v3587_v13 }
 0x667   :  { %v3589_v1 = vpop.eup %3588 }
 0x668   :  { %v3591_v37 = vpop.eup %3590  ;;  %v2210_v59 = vmul.f32 %v3589_v1, %v2208_v14  ;;  %3592 = vrcp.f32 %v2247_v54  ;;  %vm2215_vm0 = vweird.f32 %v3589_v1  ;;  %vm2253_vm9 = vweird.f32 %v2247_v54 }
 0x669   :  { %v2229_v60 = vmul.f32 %v3591_v37, %v2227_v62  ;;  %3594 = vtanh.f32 %v2203_v28  ;;  %vm2234_vm1 = vweird.f32 %v3591_v37  ;;  %vm2216_vm4 = vmor %vm2214_vm2, %vm2215_vm0  ;;  %v2257_v14 = vand.u32 2147483647, %v2247_v54 }
 0x66a   :  { %v2211_v29 = vsub.f32 1.0, %v2210_v59  ;;  %vm2235_vm6 = vmor %vm2233_vm3, %vm2234_vm1 }
 0x66b   :  { %v2230_v42 = vsub.f32 1.0, %v2229_v60  ;;  %vm2258_vm11 = vcmp.eq.f32.partialorder %v2257_v14, 8.507059e+37 }
 0x66c   :  { %v2212_v26 = vmul.f32 %v3589_v1, %v2211_v29 }
 0x66d   :  { %v2231_v19 = vmul.f32 %v3591_v37, %v2230_v42 }
 0x66e   :  { %v3593_v35 = vpop.eup %3592  ;;  %v2213_v7 = vadd.f32 %v3589_v1, %v2212_v26 }
 0x66f   :  { %v2232_v13 = vadd.f32 %v3591_v37, %v2231_v19  ;;  %v2249_v15 = vmul.f32 %v3593_v35, %v2247_v54  ;;  %v3595_v28 = vpop.eup %3594  ;;  %vm2254_vm8 = vweird.f32 %v3593_v35  ;;  %v2259_v19 = vand.u32 2147483648, %v2247_v54 }
 0x670   :  { %v2217_v59 = vsel %vm2216_vm4, %v3589_v1, %v2213_v7  ;;  %vm2255_vm10 = vmor %vm2253_vm9, %vm2254_vm8 }
 0x671   :  { %v2222_v60 = vsel %vm2219_vm5, %v2221_v38, %v2217_v59  ;;  %v2236_v29 = vsel %vm2235_vm6, %v3591_v37, %v2232_v13  ;;  %v2250_v11 = vsub.f32 1.0, %v2249_v15  ;;  %v2260_v9 = vor.u32 1.1754944e-38, %v2259_v19  ;;  %v6662_v59 = vld [vmem:[#allocation54_spill] sm:$0xff] }
 0x672   :  { %v2241_v42 = vsel %vm2238_vm7, %v2240_v8, %v2236_v29  ;;  %v2264_v25 = vmul.f32 %v3595_v28, %v2222_v60  ;;  %v6663_v28 = vld [vmem:[#allocation27_spill] sm:$0xff] }
 0x673   :  { %v2263_v48 = vmul.f32 0.0, %v2241_v42  ;;  %v2251_v3 = vmul.f32 %v3593_v35, %v2250_v11  ;;  %v1990_v60 = vadd.f32 %v6663_v28, %v6662_v59  ;;  %v5644_v59 = vld [vmem:[#allocation12 + $0x378] sm:$0xff] }
 0x675   :  { %v5508_v26 = vadd.f32 %v2264_v25, %v2263_v48  ;;  %v2252_v62 = vadd.f32 %v3593_v35, %v2251_v3  ;;  %v6659_v48 = vld [vmem:[#allocation79_spill] sm:$0xff] }
 0x677   :  { %3596 = vtanh.f32 %v5508_v26  ;;  %v2256_v1 = vsel %vm2255_vm10, %v3593_v35, %v2252_v62 }
 0x678   :  { %v2261_v63 = vsel %vm2258_vm11, %v2260_v9, %v2256_v1 }
 0x67d   :  { %v3597_v37 = vpop.eup %3596 }
 0x67e   :  { %v2267_v20 = vmul.f32 %v3597_v37, %v2261_v63 }
 0x680   :  { %2288 = vmatmul.f32.vlgmr.msrb.gmra.mxu0 %v2267_v20  ;;  %2308 = vmatmul.f32.vlgmr.msrb.gmra.mxu1 %v2267_v20 }
 0x681   :  { %2328 = vmatmul.f32.vlgmr.msrb.gmra.mxu2 %v2267_v20  ;;  %2348 = vmatmul.f32.vlgmr.msrb.gmra.mxu3 %v2267_v20 }
 0x682   :  { %2574 = vmatpush.msrb.mxu0 %v6592_v24  ;;  %2594 = vmatpush.msrb.mxu1 %v5067_v6  ;;  %v6630_v6 = vld [vmem:[#allocation30_spill] sm:$0xff] }
 0x683   :  { %2614 = vmatpush.msrb.mxu2 %v5101_v18  ;;  %2634 = vmatpush.msrb.mxu3 %v5075_v43  ;;  %v6632_v43 = vld [vmem:[#allocation60_spill] sm:$0xff]  ;;  %v6634_v18 = vld [vmem:[#allocation33_spill] sm:$0xff] }
 0x684   :  { %2575 = vmatpush.msrb.mxu0 %v5069_v30  ;;  %2595 = vmatpush.msrb.mxu1 %v6593_v16  ;;  %v6631_v30 = vld [vmem:[#allocation58_spill] sm:$0xff]  ;;  %v6660_v16 = vld [vmem:[#allocation52_spill] sm:$0xff] }
 0x685   :  { %2615 = vmatpush.msrb.mxu2 %v5104_v21  ;;  %2635 = vmatpush.msrb.mxu3 %v6594_v44  ;;  %v6635_v21 = vld [vmem:[#allocation61_spill] sm:$0xff]  ;;  %v6661_v44 = vld [vmem:[#allocation28_spill] sm:$0xff] }
 0x686   :  { %2576 = vmatpush.msrb.mxu0 %v5078_v22  ;;  %2596 = vmatpush.msrb.mxu1 %v6595_v57  ;;  %v6633_v22 = vld [vmem:[#allocation59_spill] sm:$0xff]  ;;  %v1991_v57 = vadd.f32 %v6661_v44, %v6660_v16  ;;  %v5611_v16 = vld [vmem:[#allocation12 + $0x3a0] sm:$0xff] }
 0x687   :  { %2616 = vmatpush.msrb.mxu2 %v5109_v27  ;;  %2636 = vmatpush.msrb.mxu3 %v6596_v51  ;;  %v6636_v27 = vld [vmem:[#allocation62_spill] sm:$0xff] }
 0x688   :  { %2577 = vmatpush.msrb.mxu0 %v6597_v5  ;;  %2597 = vmatpush.msrb.mxu1 %v5113_v4  ;;  %v6637_v4 = vld [vmem:[#allocation63_spill] sm:$0xff] }
 0x689   :  { %2617 = vmatpush.msrb.mxu2 %v5125_v33  ;;  %2637 = vmatpush.msrb.mxu3 %v5123_v17  ;;  %v6640_v17 = vld [vmem:[#allocation32_spill] sm:$0xff]  ;;  %v6641_v33 = vld [vmem:[#allocation31_spill] sm:$0xff] }
 0x68a   :  { %2578 = vmatpush.msrb.mxu0 %v5116_v46  ;;  %2598 = vmatpush.msrb.mxu1 %v5121_v2  ;;  %v6638_v46 = vld [vmem:[#allocation37_spill] sm:$0xff]  ;;  %v6639_v2 = vld [vmem:[#allocation66_spill] sm:$0xff] }
 0x68b   :  { %2618 = vmatpush.msrb.mxu2 %v5133_v39  ;;  %2638 = vmatpush.msrb.mxu3 %v5131_v61  ;;  %v6642_v61 = vld [vmem:[#allocation41_spill] sm:$0xff]  ;;  %v6643_v39 = vld [vmem:[#allocation34_spill] sm:$0xff] }
 0x68c   :  { %2579 = vmatpush.msrb.mxu0 %v5141_v31  ;;  %2599 = vmatpush.msrb.mxu1 %v5143_v32  ;;  %v6644_v31 = vld [vmem:[#allocation36_spill] sm:$0xff]  ;;  %v6645_v32 = vld [vmem:[#allocation35_spill] sm:$0xff] }
 0x68d   :  { %2619 = vmatpush.msrb.mxu2 %v5149_v36  ;;  %2639 = vmatpush.msrb.mxu3 %v5145_v34  ;;  %v6646_v34 = vld [vmem:[#allocation44_spill] sm:$0xff]  ;;  %v6647_v36 = vld [vmem:[#allocation39_spill] sm:$0xff] }
 0x68e   :  { %2580 = vmatpush.msrb.mxu0 %v5151_v49  ;;  %2600 = vmatpush.msrb.mxu1 %v5153_v40  ;;  %v6648_v49 = vld [vmem:[#allocation38_spill] sm:$0xff]  ;;  %v6649_v40 = vld [vmem:[#allocation40_spill] sm:$0xff] }
 0x68f   :  { %2620 = vmatpush.msrb.mxu2 %v5161_v41  ;;  %2640 = vmatpush.msrb.mxu3 %v5156_v56  ;;  %v6650_v56 = vld [vmem:[#allocation47_spill] sm:$0xff]  ;;  %v6651_v41 = vld [vmem:[#allocation45_spill] sm:$0xff] }
 0x690   :  { %2581 = vmatpush.msrb.mxu0 %v5163_v45  ;;  %2601 = vmatpush.msrb.mxu1 %v5165_v47  ;;  %v6652_v45 = vld [vmem:[#allocation42_spill] sm:$0xff]  ;;  %v6653_v47 = vld [vmem:[#allocation43_spill] sm:$0xff] }
 0x691   :  { %2621 = vmatpush.msrb.mxu2 %v5195_v12  ;;  %2641 = vmatpush.msrb.mxu3 %v5175_v50  ;;  %v6656_v50 = vld [vmem:[#allocation49_spill] sm:$0xff] }
 0x692   :  { %2582 = vmatpush.msrb.mxu0 %v5171_v58  ;;  %2602 = vmatpush.msrb.mxu1 %v5173_v0  ;;  %v6654_v58 = vld [vmem:[#allocation48_spill] sm:$0xff]  ;;  %v6655_v0 = vld [vmem:[#allocation46_spill] sm:$0xff] }
 0x693   :  { %2622 = vmatpush.msrb.mxu2 %v5201_v10  ;;  %2642 = vmatpush.msrb.mxu3 %v5182_v53  ;;  %v6658_v53 = vld [vmem:[#allocation50_spill] sm:$0xff] }
 0x694   :  { %2583 = vmatpush.msrb.mxu0 %v5178_v55  ;;  %2603 = vmatpush.msrb.mxu1 %v5180_v52  ;;  %v6657_v55 = vld [vmem:[#allocation77_spill] sm:$0xff]  ;;  %v1989_v25 = vadd.f32 %v6659_v48, %v6658_v53 }
 0x695   :  { %2623 = vmatpush.msrb.mxu2 %v6630_v6  ;;  %2643 = vmatpush.msrb.mxu3 %v6631_v30  ;;  %v1988_v52 = vadd.f32 %v6657_v55, %v6656_v50 }
 0x696   :  { %2584 = vmatpush.msrb.mxu0 %v6632_v43  ;;  %2604 = vmatpush.msrb.mxu1 %v6633_v22 }
 0x697   :  { %2624 = vmatpush.msrb.mxu2 %v6634_v18  ;;  %2644 = vmatpush.msrb.mxu3 %v6635_v21 }
 0x698   :  { %2585 = vmatpush.msrb.mxu0 %v6636_v27  ;;  %2605 = vmatpush.msrb.mxu1 %v6637_v4 }
 0x699   :  { %2625 = vmatpush.msrb.mxu2 %v6638_v46  ;;  %2645 = vmatpush.msrb.mxu3 %v6639_v2 }
 0x69a   :  { %2586 = vmatpush.msrb.mxu0 %v6640_v17  ;;  %2606 = vmatpush.msrb.mxu1 %v6641_v33 }
 0x69b   :  { %2626 = vmatpush.msrb.mxu2 %v6642_v61  ;;  %2646 = vmatpush.msrb.mxu3 %v6643_v39 }
 0x69c   :  { %2587 = vmatpush.msrb.mxu0 %v6644_v31  ;;  %2607 = vmatpush.msrb.mxu1 %v6645_v32 }
 0x69d   :  { %2627 = vmatpush.msrb.mxu2 %v6646_v34  ;;  %2647 = vmatpush.msrb.mxu3 %v6647_v36 }
 0x69e   :  { %2588 = vmatpush.msrb.mxu0 %v6648_v49  ;;  %2608 = vmatpush.msrb.mxu1 %v6649_v40 }
 0x69f   :  { %2628 = vmatpush.msrb.mxu2 %v6650_v56  ;;  %2648 = vmatpush.msrb.mxu3 %v6651_v41 }
 0x6a0   :  { %2589 = vmatpush.msrb.mxu0 %v6652_v45  ;;  %2609 = vmatpush.msrb.mxu1 %v6653_v47 }
 0x6a1   :  { %2629 = vmatpush.msrb.mxu2 %v6654_v58  ;;  %2649 = vmatpush.msrb.mxu3 %v6655_v0 }
 0x6fd   :  { %v2289_v11 = vpop.f32.mrf.mxu0  ;;  %v2309_v12 = vpop.f32.mrf.mxu1 }
 0x6fe   :  { %v2352_v10 = vadd.f32 %v2289_v11, %v1988_v52  ;;  %v2353_v3 = vadd.f32 %v2309_v12, %v1989_v25  ;;  %v5590_v25 = vld [vmem:[#allocation12 + $0x3e8] sm:$0xff]  ;;  %v5593_v11 = vld [vmem:[#allocation12 + $0x3f0] sm:$0xff]  ;;  %v5596_v12 = vld [vmem:[#allocation12 + $0x3f8] sm:$0xff] }
 0x700   :  { %v3418_v35 = vmul.f32 -1.442695, %v2352_v10  ;;  %v3419_v24 = vmul.f32 -1.442695, %v2353_v3  ;;  %v5599_v10 = vld [vmem:[#allocation12 + $0x3c0] sm:$0xff]  ;;  %v5602_v3 = vld [vmem:[#allocation12 + $0x3c8] sm:$0xff] }
 0x702   :  { %3598 = vpow2.f32 %v3418_v35  ;;  %v5605_v35 = vld [vmem:[#allocation12 + $0x3d0] sm:$0xff] }
 0x703   :  { %3600 = vpow2.f32 %v3419_v24  ;;  %v5608_v24 = vld [vmem:[#allocation12 + $0x3d8] sm:$0xff] }
 0x704   :  { %v2349_v51 = vpop.f32.mrf.mxu3  ;;  %v2329_v13 = vpop.f32.mrf.mxu2 }
 0x705   :  { %v2355_v5 = vadd.f32 %v2349_v51, %v1991_v57  ;;  %v2354_v62 = vadd.f32 %v2329_v13, %v1990_v60  ;;  %v5614_v57 = vld [vmem:[#allocation12 + $0x3a8] sm:$0xff]  ;;  %v5617_v51 = vld [vmem:[#allocation12 + $0x3b0] sm:$0xff]  ;;  %v5647_v60 = vld [vmem:[#allocation12 + $0x340] sm:$0xff] }
 0x706   :  { %v5638_v13 = vld [vmem:[#allocation12 + $0x368] sm:$0xff] }
 0x707   :  { %v3420_v8 = vmul.f32 -1.442695, %v2355_v5  ;;  %v5620_v5 = vld [vmem:[#allocation12 + $0x3b8] sm:$0xff] }
 0x708   :  { %v3599_v54 = vpop.eup %3598 }
 0x709   :  { %v3601_v23 = vpop.eup %3600  ;;  %v2359_v7 = vadd.f32 1.0, %v3599_v54  ;;  %3602 = vpow2.f32 %v3420_v8  ;;  %v5623_v8 = vld [vmem:[#allocation12 + $0x380] sm:$0xff]  ;;  %v5626_v54 = vld [vmem:[#allocation12 + $0x388] sm:$0xff] }
 0x70a   :  { %v2378_v38 = vadd.f32 1.0, %v3601_v23  ;;  %v5629_v23 = vld [vmem:[#allocation12 + $0x390] sm:$0xff] }
 0x70b   :  { %3604 = vrcp.f32 %v2359_v7  ;;  %v2371_v63 = vand.u32 2147483648, %v2359_v7  ;;  %v2369_v30 = vand.u32 2147483647, %v2359_v7  ;;  %vm2365_vm14 = vweird.f32 %v2359_v7 }
 0x70c   :  { %3606 = vrcp.f32 %v2378_v38  ;;  %v2390_v20 = vand.u32 2147483648, %v2378_v38  ;;  %v2388_v22 = vand.u32 2147483647, %v2378_v38  ;;  %vm2384_vm15 = vweird.f32 %v2378_v38 }
 0x70d   :  { %v2372_v27 = vor.u32 1.1754944e-38, %v2371_v63  ;;  %vm2370_vm2 = vcmp.eq.f32.partialorder %v2369_v30, 8.507059e+37  ;;  %v5674_v63 = vld [vmem:[#allocation12 + $0x308] sm:$0xff]  ;;  %v5683_v30 = vld [vmem:[#allocation12 + $0x2e0] sm:$0xff] }
 0x70e   :  { %v2391_v2 = vor.u32 1.1754944e-38, %v2390_v20  ;;  %vm2389_vm3 = vcmp.eq.f32.partialorder %v2388_v22, 8.507059e+37  ;;  %v5677_v20 = vld [vmem:[#allocation12 + $0x310] sm:$0xff] }
 0x70f   :  { %v3603_v15 = vpop.eup %3602  ;;  %v5689_v22 = vld [vmem:[#allocation12 + $0x2f0] sm:$0xff] }
 0x710   :  { %v2398_v29 = vadd.f32 1.0, %v3603_v15  ;;  %v5641_v15 = vld [vmem:[#allocation12 + $0x370] sm:$0xff] }
 0x711   :  { %v3605_v42 = vpop.eup %3604 }
 0x712   :  { %v3607_v19 = vpop.eup %3606  ;;  %v2361_v14 = vmul.f32 %v3605_v42, %v2359_v7  ;;  %3608 = vrcp.f32 %v2398_v29  ;;  %vm2366_vm12 = vweird.f32 %v3605_v42  ;;  %v2410_v41 = vand.u32 2147483648, %v2398_v29  ;;  %v5632_v7 = vld [vmem:[#allocation12 + $0x398] sm:$0xff] }
 0x713   :  { %v2380_v1 = vmul.f32 %v3607_v19, %v2378_v38  ;;  %3610 = vtanh.f32 %v2354_v62  ;;  %vm2385_vm13 = vweird.f32 %v3607_v19  ;;  %vm2367_vm0 = vmor %vm2365_vm14, %vm2366_vm12  ;;  %vm2404_vm5 = vweird.f32 %v2398_v29  ;;  %v5635_v38 = vld [vmem:[#allocation12 + $0x360] sm:$0xff]  ;;  %v5656_v62 = vld [vmem:[#allocation12 + $0x358] sm:$0xff] }
 0x714   :  { %v2362_v9 = vsub.f32 1.0, %v2361_v14  ;;  %vm2386_vm1 = vmor %vm2384_vm15, %vm2385_vm13  ;;  %v2408_v45 = vand.u32 2147483647, %v2398_v29  ;;  %v2411_v0 = vor.u32 1.1754944e-38, %v2410_v41  ;;  %v5662_v14 = vld [vmem:[#allocation12 + $0x328] sm:$0xff]  ;;  %v5740_v41 = vld [vmem:[#allocation12 + $0x278] sm:$0xff] }
 0x715   :  { %v2381_v37 = vsub.f32 1.0, %v2380_v1  ;;  %v5665_v1 = vld [vmem:[#allocation12 + $0x330] sm:$0xff]  ;;  %6677 = vst [vmem:[#allocation41_spill] sm:$0xff] %v5740_v41 }
 0x716   :  { %v2363_v6 = vmul.f32 %v3605_v42, %v2362_v9  ;;  %vm2409_vm7 = vcmp.eq.f32.partialorder %v2408_v45, 8.507059e+37  ;;  %v5668_v9 = vld [vmem:[#allocation12 + $0x338] sm:$0xff]  ;;  %v5743_v45 = vld [vmem:[#allocation12 + $0x240] sm:$0xff] }
 0x717   :  { %v2382_v43 = vmul.f32 %v3607_v19, %v2381_v37  ;;  %v5671_v37 = vld [vmem:[#allocation12 + $0x300] sm:$0xff]  ;;  %6678 = vst [vmem:[#allocation34_spill] sm:$0xff] %v5743_v45 }
 0x718   :  { %v3609_v18 = vpop.eup %3608  ;;  %v2364_v21 = vadd.f32 %v3605_v42, %v2363_v6  ;;  %v5680_v6 = vld [vmem:[#allocation12 + $0x318] sm:$0xff] }
 0x719   :  { %v2383_v4 = vadd.f32 %v3607_v19, %v2382_v43  ;;  %v2400_v46 = vmul.f32 %v3609_v18, %v2398_v29  ;;  %v3611_v33 = vpop.eup %3610  ;;  %vm2405_vm4 = vweird.f32 %v3609_v18  ;;  %v5650_v29 = vld [vmem:[#allocation12 + $0x348] sm:$0xff] }
 0x71a   :  { %v2368_v17 = vsel %vm2367_vm0, %v3605_v42, %v2364_v21  ;;  %vm2406_vm6 = vmor %vm2404_vm5, %vm2405_vm4  ;;  %v5653_v42 = vld [vmem:[#allocation12 + $0x350] sm:$0xff]  ;;  %v5686_v43 = vld [vmem:[#allocation12 + $0x2e8] sm:$0xff] }
 0x71b   :  { %v2373_v61 = vsel %vm2370_vm2, %v2372_v27, %v2368_v17  ;;  %v2387_v39 = vsel %vm2386_vm1, %v3607_v19, %v2383_v4  ;;  %v2401_v31 = vsub.f32 1.0, %v2400_v46  ;;  %v5659_v19 = vld [vmem:[#allocation12 + $0x320] sm:$0xff]  ;;  %v5698_v27 = vld [vmem:[#allocation12 + $0x2c8] sm:$0xff]  ;;  %v5701_v4 = vld [vmem:[#allocation12 + $0x2d0] sm:$0xff] }
 0x71c   :  { %v2392_v32 = vsel %vm2389_vm3, %v2391_v2, %v2387_v39  ;;  %v2415_v34 = vmul.f32 %v3611_v33, %v2373_v61  ;;  %v5695_v21 = vld [vmem:[#allocation12 + $0x2c0] sm:$0xff]  ;;  %6664 = vst [vmem:[#allocation57_spill] sm:$0xff] %v5701_v4  ;;  %v5704_v46 = vld [vmem:[#allocation12 + $0x2d8] sm:$0xff]  ;;  %v5710_v17 = vld [vmem:[#allocation12 + $0x2a8] sm:$0xff] }
 0x71d   :  { %v2414_v36 = vmul.f32 %v2392_v32, %v5508_v26  ;;  %v2402_v49 = vmul.f32 %v3609_v18, %v2401_v31  ;;  %v5587_v26 = vld [vmem:[#allocation12 + $0x3e0] sm:$0xff]  ;;  %6665 = vst [vmem:[#allocation30_spill] sm:$0xff] %v5704_v46  ;;  %v5713_v33 = vld [vmem:[#allocation12 + $0x2b0] sm:$0xff]  ;;  %v5716_v61 = vld [vmem:[#allocation12 + $0x2b8] sm:$0xff] }
 0x71e   :  { %v5707_v2 = vld [vmem:[#allocation12 + $0x2a0] sm:$0xff]  ;;  %6667 = vst [vmem:[#allocation60_spill] sm:$0xff] %v5710_v17  ;;  %v5722_v31 = vld [vmem:[#allocation12 + $0x288] sm:$0xff]  ;;  %v5725_v32 = vld [vmem:[#allocation12 + $0x290] sm:$0xff] }
 0x71f   :  { %v5584_v40 = vadd.f32 %v2415_v34, %v2414_v36  ;;  %v2403_v56 = vadd.f32 %v3609_v18, %v2402_v49  ;;  %6666 = vst [vmem:[#allocation58_spill] sm:$0xff] %v5707_v2  ;;  %v5719_v39 = vld [vmem:[#allocation12 + $0x280] sm:$0xff]  ;;  %v5728_v34 = vld [vmem:[#allocation12 + $0x298] sm:$0xff]  ;;  %v5734_v49 = vld [vmem:[#allocation12 + $0x268] sm:$0xff] }
 0x720   :  { %6668 = vst [vmem:[#allocation59_spill] sm:$0xff] %v5713_v33  ;;  %v5731_v36 = vld [vmem:[#allocation12 + $0x260] sm:$0xff] }
 0x721   :  { %3612 = vtanh.f32 %v5584_v40  ;;  %v2407_v47 = vsel %vm2406_vm6, %v3609_v18, %v2403_v56  ;;  %v5692_v18 = vld [vmem:[#allocation12 + $0x2f8] sm:$0xff]  ;;  %6669 = vst [vmem:[#allocation33_spill] sm:$0xff] %v5716_v61  ;;  %v5737_v56 = vld [vmem:[#allocation12 + $0x270] sm:$0xff] }
 0x722   :  { %v2412_v52 = vsel %vm2409_vm7, %v2411_v0, %v2407_v47  ;;  %6670 = vst [vmem:[#allocation61_spill] sm:$0xff] %v5719_v39  ;;  %v5746_v47 = vld [vmem:[#allocation12 + $0x248] sm:$0xff]  ;;  %v5749_v0 = vld [vmem:[#allocation12 + $0x250] sm:$0xff] }
 0x723   :  { %6671 = vst [vmem:[#allocation62_spill] sm:$0xff] %v5722_v31 }
 0x724   :  { %6672 = vst [vmem:[#allocation63_spill] sm:$0xff] %v5725_v32 }
 0x725   :  { %6673 = vst [vmem:[#allocation37_spill] sm:$0xff] %v5728_v34 }
 0x726   :  { %6674 = vst [vmem:[#allocation66_spill] sm:$0xff] %v5731_v36 }
 0x727   :  { %v3613_v50 = vpop.eup %3612  ;;  %6675 = vst [vmem:[#allocation32_spill] sm:$0xff] %v5734_v49 }
 0x728   :  { %v2418_v53 = vmul.f32 %v3613_v50, %v2412_v52  ;;  %6676 = vst [vmem:[#allocation31_spill] sm:$0xff] %v5737_v56  ;;  %v5752_v50 = vld [vmem:[#allocation12 + $0x258] sm:$0xff]  ;;  %v5755_v52 = vld [vmem:[#allocation12 + $0x220] sm:$0xff] }
 0x729   :  { %6679 = vst [vmem:[#allocation36_spill] sm:$0xff] %v5746_v47 }
 0x72a   :  { %2439 = vmatmul.f32.vlgmr.msra.gmra.mxu0 %v2418_v53  ;;  %2459 = vmatmul.f32.vlgmr.msra.gmra.mxu1 %v2418_v53  ;;  %6680 = vst [vmem:[#allocation35_spill] sm:$0xff] %v5749_v0 }
 0x72b   :  { %2479 = vmatmul.f32.vlgmr.msra.gmra.mxu2 %v2418_v53  ;;  %2499 = vmatmul.f32.vlgmr.msra.gmra.mxu3 %v2418_v53  ;;  %6681 = vst [vmem:[#allocation44_spill] sm:$0xff] %v5752_v50  ;;  %v5758_v53 = vld [vmem:[#allocation12 + $0x228] sm:$0xff] }
 0x72c   :  { %2725 = vmatpush.msra.mxu0 %v5587_v26  ;;  %2745 = vmatpush.msra.mxu1 %v5590_v25  ;;  %6682 = vst [vmem:[#allocation39_spill] sm:$0xff] %v5755_v52 }
 0x72d   :  { %2765 = vmatpush.msra.mxu2 %v5593_v11  ;;  %2785 = vmatpush.msra.mxu3 %v5596_v12  ;;  %6683 = vst [vmem:[#allocation38_spill] sm:$0xff] %v5758_v53 }
 0x72e   :  { %2726 = vmatpush.msra.mxu0 %v5599_v10  ;;  %2746 = vmatpush.msra.mxu1 %v5602_v3 }
 0x72f   :  { %2766 = vmatpush.msra.mxu2 %v5605_v35  ;;  %2786 = vmatpush.msra.mxu3 %v5608_v24 }
 0x730   :  { %2727 = vmatpush.msra.mxu0 %v5611_v16  ;;  %2747 = vmatpush.msra.mxu1 %v5614_v57 }
 0x731   :  { %2767 = vmatpush.msra.mxu2 %v5617_v51  ;;  %2787 = vmatpush.msra.mxu3 %v5620_v5 }
 0x732   :  { %2728 = vmatpush.msra.mxu0 %v5623_v8  ;;  %2748 = vmatpush.msra.mxu1 %v5626_v54 }
 0x733   :  { %2768 = vmatpush.msra.mxu2 %v5629_v23  ;;  %2788 = vmatpush.msra.mxu3 %v5632_v7 }
 0x734   :  { %2729 = vmatpush.msra.mxu0 %v5635_v38  ;;  %2749 = vmatpush.msra.mxu1 %v5638_v13 }
 0x735   :  { %2769 = vmatpush.msra.mxu2 %v5641_v15  ;;  %2789 = vmatpush.msra.mxu3 %v5644_v59 }
 0x736   :  { %2730 = vmatpush.msra.mxu0 %v5647_v60  ;;  %2750 = vmatpush.msra.mxu1 %v5650_v29 }
 0x737   :  { %2770 = vmatpush.msra.mxu2 %v5653_v42  ;;  %2790 = vmatpush.msra.mxu3 %v5656_v62 }
 0x738   :  { %2731 = vmatpush.msra.mxu0 %v5659_v19  ;;  %2751 = vmatpush.msra.mxu1 %v5662_v14 }
 0x739   :  { %2771 = vmatpush.msra.mxu2 %v5665_v1  ;;  %2791 = vmatpush.msra.mxu3 %v5668_v9 }
 0x73a   :  { %2732 = vmatpush.msra.mxu0 %v5671_v37  ;;  %2752 = vmatpush.msra.mxu1 %v5674_v63 }
 0x73b   :  { %2772 = vmatpush.msra.mxu2 %v5677_v20  ;;  %2792 = vmatpush.msra.mxu3 %v5680_v6 }
 0x73c   :  { %2733 = vmatpush.msra.mxu0 %v5683_v30  ;;  %2753 = vmatpush.msra.mxu1 %v5686_v43 }
 0x73d   :  { %2773 = vmatpush.msra.mxu2 %v5689_v22  ;;  %2793 = vmatpush.msra.mxu3 %v5692_v18 }
 0x73e   :  { %2734 = vmatpush.msra.mxu0 %v5695_v21  ;;  %2754 = vmatpush.msra.mxu1 %v5698_v27 }
 0x73f   :  { %2774 = vmatpush.msra.mxu2 %v5701_v4  ;;  %2794 = vmatpush.msra.mxu3 %v5704_v46 }
 0x740   :  { %2735 = vmatpush.msra.mxu0 %v5707_v2  ;;  %2755 = vmatpush.msra.mxu1 %v5710_v17 }
 0x741   :  { %2775 = vmatpush.msra.mxu2 %v5713_v33  ;;  %2795 = vmatpush.msra.mxu3 %v5716_v61 }
 0x742   :  { %2736 = vmatpush.msra.mxu0 %v5719_v39  ;;  %2756 = vmatpush.msra.mxu1 %v5722_v31 }
 0x743   :  { %2776 = vmatpush.msra.mxu2 %v5725_v32  ;;  %2796 = vmatpush.msra.mxu3 %v5728_v34 }
 0x744   :  { %2737 = vmatpush.msra.mxu0 %v5731_v36  ;;  %2757 = vmatpush.msra.mxu1 %v5734_v49 }
 0x745   :  { %2777 = vmatpush.msra.mxu2 %v5737_v56  ;;  %2797 = vmatpush.msra.mxu3 %v5740_v41  ;;  %v6690_v41 = vld [vmem:[#allocation53_spill] sm:$0xff] }
 0x746   :  { %2738 = vmatpush.msra.mxu0 %v5743_v45  ;;  %2758 = vmatpush.msra.mxu1 %v5746_v47  ;;  %v5761_v45 = vld [vmem:[#allocation12 + $0x230] sm:$0xff]  ;;  %v5764_v47 = vld [vmem:[#allocation12 + $0x238] sm:$0xff] }
 0x747   :  { %2778 = vmatpush.msra.mxu2 %v5749_v0  ;;  %2798 = vmatpush.msra.mxu3 %v5752_v50  ;;  %6684 = vst [vmem:[#allocation40_spill] sm:$0xff] %v5761_v45  ;;  %v5767_v0 = vld [vmem:[#allocation12 + $0x200] sm:$0xff]  ;;  %v5770_v50 = vld [vmem:[#allocation12 + $0x208] sm:$0xff] }
 0x748   :  { %2739 = vmatpush.msra.mxu0 %v5755_v52  ;;  %2759 = vmatpush.msra.mxu1 %v5758_v53  ;;  %6685 = vst [vmem:[#allocation47_spill] sm:$0xff] %v5764_v47  ;;  %v5774_v52 = vld [vmem:[#allocation12 + $0x218] sm:$0xff]  ;;  %v6689_v53 = vld [vmem:[#allocation51_spill] sm:$0xff] }
 0x749   :  { %2779 = vmatpush.msra.mxu2 %v5761_v45  ;;  %2799 = vmatpush.msra.mxu3 %v5764_v47  ;;  %6686 = vst [vmem:[#allocation45_spill] sm:$0xff] %v5767_v0  ;;  %v1992_v45 = vadd.f32 %v6657_v55, %v6689_v53  ;;  %v1993_v47 = vadd.f32 %v6659_v48, %v6690_v41 }
 0x74a   :  { %2740 = vmatpush.msra.mxu0 %v5767_v0  ;;  %6687 = vst [vmem:[#allocation42_spill] sm:$0xff] %v5770_v50  ;;  %2760 = vmatpush.msra.mxu1 %v5770_v50  ;;  %v6691_v50 = vld [vmem:[#allocation56_spill] sm:$0xff] }
 0x74b   :  { %2780 = vmatpush.msra.mxu2 %v6654_v58  ;;  %6688 = vst [vmem:[#allocation43_spill] sm:$0xff] %v5774_v52  ;;  %2800 = vmatpush.msra.mxu3 %v5774_v52  ;;  %v1995_v58 = vadd.f32 %v6661_v44, %v6691_v50 }
 0x7a7   :  { %v2440_v56 = vpop.f32.mrf.mxu0  ;;  %v2460_v49 = vpop.f32.mrf.mxu1 }
 0x7a8   :  { %v2503_v36 = vadd.f32 %v2440_v56, %v1992_v45  ;;  %v2504_v0 = vadd.f32 %v2460_v49, %v1993_v47  ;;  %v6692_v49 = vld [vmem:[#allocation65_spill] sm:$0xff] }
 0x7aa   :  { %v3421_v34 = vmul.f32 -1.442695, %v2503_v36  ;;  %v3422_v32 = vmul.f32 -1.442695, %v2504_v0  ;;  %v1994_v36 = vadd.f32 %v6663_v28, %v6692_v49 }
 0x7ac   :  { %3614 = vpow2.f32 %v3421_v34 }
 0x7ad   :  { %3616 = vpow2.f32 %v3422_v32 }
 0x7ae   :  { %v2500_v31 = vpop.f32.mrf.mxu3  ;;  %v2480_v41 = vpop.f32.mrf.mxu2 }
 0x7af   :  { %v2506_v39 = vadd.f32 %v2500_v31, %v1995_v58  ;;  %v2505_v47 = vadd.f32 %v2480_v41, %v1994_v36 }
 0x7b1   :  { %v3423_v52 = vmul.f32 -1.442695, %v2506_v39 }
 0x7b2   :  { %v3615_v61 = vpop.eup %3614 }
 0x7b3   :  { %v3617_v33 = vpop.eup %3616  ;;  %v2510_v53 = vadd.f32 1.0, %v3615_v61  ;;  %3618 = vpow2.f32 %v3423_v52 }
 0x7b4   :  { %v2529_v55 = vadd.f32 1.0, %v3617_v33 }
 0x7b5   :  { %3620 = vrcp.f32 %v2510_v53  ;;  %v2522_v58 = vand.u32 2147483648, %v2510_v53  ;;  %v2520_v52 = vand.u32 2147483647, %v2510_v53  ;;  %vm2516_vm10 = vweird.f32 %v2510_v53 }
 0x7b6   :  { %3622 = vrcp.f32 %v2529_v55  ;;  %v2541_v61 = vand.u32 2147483648, %v2529_v55  ;;  %v2539_v48 = vand.u32 2147483647, %v2529_v55  ;;  %vm2535_vm11 = vweird.f32 %v2529_v55 }
 0x7b7   :  { %v2523_v41 = vor.u32 1.1754944e-38, %v2522_v58  ;;  %vm2521_vm14 = vcmp.eq.f32.partialorder %v2520_v52, 8.507059e+37 }
 0x7b8   :  { %vm2540_vm15 = vcmp.eq.f32.partialorder %v2539_v48, 8.507059e+37 }
 0x7b9   :  { %v3619_v56 = vpop.eup %3618 }
 0x7ba   :  { %v2549_v34 = vadd.f32 1.0, %v3619_v56 }
 0x7bb   :  { %v3621_v45 = vpop.eup %3620 }
 0x7bc   :  { %v3623_v0 = vpop.eup %3622  ;;  %v2512_v32 = vmul.f32 %v3621_v45, %v2510_v53  ;;  %3624 = vrcp.f32 %v2549_v34  ;;  %vm2517_vm8 = vweird.f32 %v3621_v45  ;;  %vm2555_vm1 = vweird.f32 %v2549_v34 }
 0x7bd   :  { %v2531_v31 = vmul.f32 %v3623_v0, %v2529_v55  ;;  %3626 = vtanh.f32 %v2505_v47  ;;  %vm2536_vm9 = vweird.f32 %v3623_v0  ;;  %vm2518_vm12 = vmor %vm2516_vm10, %vm2517_vm8 }
 0x7be   :  { %v2513_v39 = vsub.f32 1.0, %v2512_v32  ;;  %vm2537_vm13 = vmor %vm2535_vm11, %vm2536_vm9  ;;  %v2542_v32 = vor.u32 1.1754944e-38, %v2541_v61 }
 0x7bf   :  { %v2532_v50 = vsub.f32 1.0, %v2531_v31 }
 0x7c0   :  { %v2514_v33 = vmul.f32 %v3621_v45, %v2513_v39 }
 0x7c1   :  { %v2533_v44 = vmul.f32 %v3623_v0, %v2532_v50 }
 0x7c2   :  { %v3625_v17 = vpop.eup %3624  ;;  %v2515_v49 = vadd.f32 %v3621_v45, %v2514_v33 }
 0x7c3   :  { %v2534_v56 = vadd.f32 %v3623_v0, %v2533_v44  ;;  %v2551_v36 = vmul.f32 %v3625_v17, %v2549_v34  ;;  %v3627_v47 = vpop.eup %3626  ;;  %vm2556_vm0 = vweird.f32 %v3625_v17  ;;  %v2561_v44 = vand.u32 2147483648, %v2549_v34 }
 0x7c4   :  { %v2519_v31 = vsel %vm2518_vm12, %v3621_v45, %v2515_v49  ;;  %v2559_v45 = vand.u32 2147483647, %v2549_v34  ;;  %vm2557_vm2 = vmor %vm2555_vm1, %vm2556_vm0  ;;  %v6699_v34 = vld [vmem:[#allocation61_spill] sm:$0xff]  ;;  %v6700_v49 = vld [vmem:[#allocation62_spill] sm:$0xff] }
 0x7c5   :  { %v2524_v28 = vsel %vm2521_vm14, %v2523_v41, %v2519_v31  ;;  %v2538_v39 = vsel %vm2537_vm13, %v3623_v0, %v2534_v56  ;;  %v2552_v2 = vsub.f32 1.0, %v2551_v36  ;;  %v2562_v61 = vor.u32 1.1754944e-38, %v2561_v44  ;;  %v6701_v41 = vld [vmem:[#allocation63_spill] sm:$0xff]  ;;  %v6702_v56 = vld [vmem:[#allocation37_spill] sm:$0xff]  ;;  %v6703_v36 = vld [vmem:[#allocation66_spill] sm:$0xff] }
 0x7c6   :  { %v2543_v50 = vsel %vm2540_vm15, %v2542_v32, %v2538_v39  ;;  %v2566_v46 = vmul.f32 %v3627_v47, %v2524_v28  ;;  %vm2560_vm3 = vcmp.eq.f32.partialorder %v2559_v45, 8.507059e+37  ;;  %v6693_v28 = vld [vmem:[#allocation57_spill] sm:$0xff]  ;;  %v6704_v32 = vld [vmem:[#allocation32_spill] sm:$0xff]  ;;  %v6705_v31 = vld [vmem:[#allocation31_spill] sm:$0xff] }
 0x7c7   :  { %v2565_v4 = vmul.f32 %v2543_v50, %v5584_v40  ;;  %v2553_v33 = vmul.f32 %v3625_v17, %v2552_v2  ;;  %v6694_v40 = vld [vmem:[#allocation30_spill] sm:$0xff]  ;;  %v6697_v2 = vld [vmem:[#allocation59_spill] sm:$0xff]  ;;  %v6706_v47 = vld [vmem:[#allocation41_spill] sm:$0xff] }
 0x7c8   :  { %v6707_v39 = vld [vmem:[#allocation34_spill] sm:$0xff]  ;;  %v6708_v50 = vld [vmem:[#allocation36_spill] sm:$0xff]  ;;  %v6711_v44 = vld [vmem:[#allocation39_spill] sm:$0xff] }
 0x7c9   :  { %v5786_v53 = vadd.f32 %v2566_v46, %v2565_v4  ;;  %v2554_v55 = vadd.f32 %v3625_v17, %v2553_v33  ;;  %v6695_v4 = vld [vmem:[#allocation58_spill] sm:$0xff]  ;;  %v6696_v46 = vld [vmem:[#allocation60_spill] sm:$0xff]  ;;  %v6709_v33 = vld [vmem:[#allocation35_spill] sm:$0xff] }
 0x7ca   :  { %v6712_v45 = vld [vmem:[#allocation38_spill] sm:$0xff] }
 0x7cb   :  { %3628 = vtanh.f32 %v5786_v53  ;;  %v2558_v58 = vsel %vm2557_vm2, %v3625_v17, %v2554_v55  ;;  %v6698_v17 = vld [vmem:[#allocation33_spill] sm:$0xff]  ;;  %v6710_v55 = vld [vmem:[#allocation44_spill] sm:$0xff] }
 0x7cc   :  { %v2563_v0 = vsel %vm2560_vm3, %v2562_v61, %v2558_v58  ;;  %v6713_v58 = vld [vmem:[#allocation40_spill] sm:$0xff]  ;;  %v6714_v61 = vld [vmem:[#allocation47_spill] sm:$0xff] }
 0x7d1   :  { %v3629_v48 = vpop.eup %3628 }
 0x7d2   :  { %v2569_v52 = vmul.f32 %v3629_v48, %v2563_v0  ;;  %v6715_v48 = vld [vmem:[#allocation45_spill] sm:$0xff]  ;;  %v6716_v0 = vld [vmem:[#allocation42_spill] sm:$0xff] }
 0x7d4   :  { %2590 = vmatmul.f32.vlgmr.msrb.gmra.mxu0 %v2569_v52  ;;  %2610 = vmatmul.f32.vlgmr.msrb.gmra.mxu1 %v2569_v52 }
 0x7d5   :  { %2630 = vmatmul.f32.vlgmr.msrb.gmra.mxu2 %v2569_v52  ;;  %2650 = vmatmul.f32.vlgmr.msrb.gmra.mxu3 %v2569_v52  ;;  %v5851_v52 = vld [vmem:[#allocation12 + $0x210] sm:$0xff] }
 0x7d6   :  { %2876 = vmatpush.msrb.mxu0 %v5587_v26  ;;  %2896 = vmatpush.msrb.mxu1 %v5590_v25  ;;  %6717 = vst [vmem:[#allocation48_spill] sm:$0xff] %v5851_v52 }
 0x7d7   :  { %2916 = vmatpush.msrb.mxu2 %v5593_v11  ;;  %2936 = vmatpush.msrb.mxu3 %v5596_v12 }
 0x7d8   :  { %2877 = vmatpush.msrb.mxu0 %v5599_v10  ;;  %2897 = vmatpush.msrb.mxu1 %v5602_v3 }
 0x7d9   :  { %2917 = vmatpush.msrb.mxu2 %v5605_v35  ;;  %2937 = vmatpush.msrb.mxu3 %v5608_v24 }
 0x7da   :  { %2878 = vmatpush.msrb.mxu0 %v5611_v16  ;;  %2898 = vmatpush.msrb.mxu1 %v5614_v57 }
 0x7db   :  { %2918 = vmatpush.msrb.mxu2 %v5617_v51  ;;  %2938 = vmatpush.msrb.mxu3 %v5620_v5 }
 0x7dc   :  { %2879 = vmatpush.msrb.mxu0 %v5623_v8  ;;  %2899 = vmatpush.msrb.mxu1 %v5626_v54 }
 0x7dd   :  { %2919 = vmatpush.msrb.mxu2 %v5629_v23  ;;  %2939 = vmatpush.msrb.mxu3 %v5632_v7 }
 0x7de   :  { %2880 = vmatpush.msrb.mxu0 %v5635_v38  ;;  %2900 = vmatpush.msrb.mxu1 %v5638_v13 }
 0x7df   :  { %2920 = vmatpush.msrb.mxu2 %v5641_v15  ;;  %2940 = vmatpush.msrb.mxu3 %v5644_v59 }
 0x7e0   :  { %2881 = vmatpush.msrb.mxu0 %v5647_v60  ;;  %2901 = vmatpush.msrb.mxu1 %v5650_v29 }
 0x7e1   :  { %2921 = vmatpush.msrb.mxu2 %v5653_v42  ;;  %2941 = vmatpush.msrb.mxu3 %v5656_v62 }
 0x7e2   :  { %2882 = vmatpush.msrb.mxu0 %v5659_v19  ;;  %2902 = vmatpush.msrb.mxu1 %v5662_v14 }
 0x7e3   :  { %2922 = vmatpush.msrb.mxu2 %v5665_v1  ;;  %2942 = vmatpush.msrb.mxu3 %v5668_v9 }
 0x7e4   :  { %2883 = vmatpush.msrb.mxu0 %v5671_v37  ;;  %2903 = vmatpush.msrb.mxu1 %v5674_v63 }
 0x7e5   :  { %2923 = vmatpush.msrb.mxu2 %v5677_v20  ;;  %2943 = vmatpush.msrb.mxu3 %v5680_v6 }
 0x7e6   :  { %2884 = vmatpush.msrb.mxu0 %v5683_v30  ;;  %2904 = vmatpush.msrb.mxu1 %v5686_v43 }
 0x7e7   :  { %2924 = vmatpush.msrb.mxu2 %v5689_v22  ;;  %2944 = vmatpush.msrb.mxu3 %v5692_v18 }
 0x7e8   :  { %2885 = vmatpush.msrb.mxu0 %v5695_v21  ;;  %2905 = vmatpush.msrb.mxu1 %v5698_v27 }
 0x7e9   :  { %2925 = vmatpush.msrb.mxu2 %v6693_v28  ;;  %2945 = vmatpush.msrb.mxu3 %v6694_v40 }
 0x7ea   :  { %2886 = vmatpush.msrb.mxu0 %v6695_v4  ;;  %2906 = vmatpush.msrb.mxu1 %v6696_v46 }
 0x7eb   :  { %2926 = vmatpush.msrb.mxu2 %v6697_v2  ;;  %2946 = vmatpush.msrb.mxu3 %v6698_v17 }
 0x7ec   :  { %2887 = vmatpush.msrb.mxu0 %v6699_v34  ;;  %2907 = vmatpush.msrb.mxu1 %v6700_v49 }
 0x7ed   :  { %2927 = vmatpush.msrb.mxu2 %v6701_v41  ;;  %2947 = vmatpush.msrb.mxu3 %v6702_v56  ;;  %v6724_v56 = vld [vmem:[#allocation28_spill] sm:$0xff] }
 0x7ee   :  { %2888 = vmatpush.msrb.mxu0 %v6703_v36  ;;  %2908 = vmatpush.msrb.mxu1 %v6704_v32 }
 0x7ef   :  { %2928 = vmatpush.msrb.mxu2 %v6705_v31  ;;  %2948 = vmatpush.msrb.mxu3 %v6706_v47  ;;  %v6722_v47 = vld [vmem:[#allocation79_spill] sm:$0xff] }
 0x7f0   :  { %2889 = vmatpush.msrb.mxu0 %v6707_v39  ;;  %2909 = vmatpush.msrb.mxu1 %v6708_v50  ;;  %v6718_v50 = vld [vmem:[#allocation43_spill] sm:$0xff] }
 0x7f1   :  { %2929 = vmatpush.msrb.mxu2 %v6709_v33  ;;  %2949 = vmatpush.msrb.mxu3 %v6710_v55  ;;  %v6719_v33 = vld [vmem:[#allocation64_spill] sm:$0xff]  ;;  %v6720_v55 = vld [vmem:[#allocation77_spill] sm:$0xff] }
 0x7f2   :  { %2890 = vmatpush.msrb.mxu0 %v6711_v44  ;;  %2910 = vmatpush.msrb.mxu1 %v6712_v45  ;;  %v1996_v39 = vadd.f32 %v6720_v55, %v6719_v33  ;;  %v6721_v44 = vld [vmem:[#allocation74_spill] sm:$0xff] }
 0x7f3   :  { %2930 = vmatpush.msrb.mxu2 %v6713_v58  ;;  %2950 = vmatpush.msrb.mxu3 %v6714_v61  ;;  %v1997_v45 = vadd.f32 %v6722_v47, %v6721_v44 }
 0x7f4   :  { %2891 = vmatpush.msrb.mxu0 %v6715_v48  ;;  %2911 = vmatpush.msrb.mxu1 %v6716_v0  ;;  %v6723_v0 = vld [vmem:[#allocation75_spill] sm:$0xff] }
 0x7f5   :  { %2931 = vmatpush.msrb.mxu2 %v5851_v52  ;;  %2951 = vmatpush.msrb.mxu3 %v6718_v50  ;;  %v1999_v41 = vadd.f32 %v6724_v56, %v6723_v0 }
 0x851   :  { %v2591_v31 = vpop.f32.mrf.mxu0  ;;  %v2611_v58 = vpop.f32.mrf.mxu1 }
 0x852   :  { %v2654_v32 = vadd.f32 %v2591_v31, %v1996_v39  ;;  %v2655_v61 = vadd.f32 %v2611_v58, %v1997_v45  ;;  %v6725_v39 = vld [vmem:[#allocation70_spill] sm:$0xff] }
 0x854   :  { %v3424_v36 = vmul.f32 -1.442695, %v2654_v32  ;;  %v3425_v48 = vmul.f32 -1.442695, %v2655_v61  ;;  %v6726_v32 = vld [vmem:[#allocation27_spill] sm:$0xff] }
 0x855   :  { %v1998_v45 = vadd.f32 %v6726_v32, %v6725_v39 }
 0x856   :  { %3630 = vpow2.f32 %v3424_v36 }
 0x857   :  { %3632 = vpow2.f32 %v3425_v48 }
 0x858   :  { %v2651_v52 = vpop.f32.mrf.mxu3  ;;  %v2631_v44 = vpop.f32.mrf.mxu2 }
 0x859   :  { %v2657_v49 = vadd.f32 %v2651_v52, %v1999_v41  ;;  %v2656_v61 = vadd.f32 %v2631_v44, %v1998_v45 }
 0x85b   :  { %v3426_v50 = vmul.f32 -1.442695, %v2657_v49 }
 0x85c   :  { %v3631_v34 = vpop.eup %3630 }
 0x85d   :  { %v3633_v17 = vpop.eup %3632  ;;  %v2661_v33 = vadd.f32 1.0, %v3631_v34  ;;  %3634 = vpow2.f32 %v3426_v50 }
 0x85e   :  { %v2680_v55 = vadd.f32 1.0, %v3633_v17 }
 0x85f   :  { %3636 = vrcp.f32 %v2661_v33  ;;  %v2673_v56 = vand.u32 2147483648, %v2661_v33  ;;  %v2671_v50 = vand.u32 2147483647, %v2661_v33  ;;  %vm2667_vm6 = vweird.f32 %v2661_v33 }
 0x860   :  { %3638 = vrcp.f32 %v2680_v55  ;;  %v2692_v34 = vand.u32 2147483648, %v2680_v55  ;;  %v2690_v2 = vand.u32 2147483647, %v2680_v55  ;;  %vm2686_vm7 = vweird.f32 %v2680_v55 }
 0x861   :  { %v2674_v44 = vor.u32 1.1754944e-38, %v2673_v56  ;;  %vm2672_vm10 = vcmp.eq.f32.partialorder %v2671_v50, 8.507059e+37 }
 0x862   :  { %vm2691_vm11 = vcmp.eq.f32.partialorder %v2690_v2, 8.507059e+37 }
 0x863   :  { %v3635_v31 = vpop.eup %3634 }
 0x864   :  { %v2700_v36 = vadd.f32 1.0, %v3635_v31 }
 0x865   :  { %v3637_v58 = vpop.eup %3636 }
 0x866   :  { %v3639_v0 = vpop.eup %3638  ;;  %v2663_v48 = vmul.f32 %v3637_v58, %v2661_v33  ;;  %3640 = vrcp.f32 %v2700_v36  ;;  %vm2668_vm4 = vweird.f32 %v3637_v58  ;;  %vm2706_vm13 = vweird.f32 %v2700_v36 }
 0x867   :  { %v2682_v41 = vmul.f32 %v3639_v0, %v2680_v55  ;;  %3642 = vtanh.f32 %v2656_v61  ;;  %vm2687_vm5 = vweird.f32 %v3639_v0  ;;  %vm2669_vm8 = vmor %vm2667_vm6, %vm2668_vm4  ;;  %v2710_v55 = vand.u32 2147483647, %v2700_v36 }
 0x868   :  { %v2664_v49 = vsub.f32 1.0, %v2663_v48  ;;  %vm2688_vm9 = vmor %vm2686_vm7, %vm2687_vm5  ;;  %v2693_v48 = vor.u32 1.1754944e-38, %v2692_v34 }
 0x869   :  { %v2683_v52 = vsub.f32 1.0, %v2682_v41  ;;  %vm2711_vm15 = vcmp.eq.f32.partialorder %v2710_v55, 8.507059e+37  ;;  %v6746_v55 = vld [vmem:[#allocation38_spill] sm:$0xff] }
 0x86a   :  { %v2665_v17 = vmul.f32 %v3637_v58, %v2664_v49 }
 0x86b   :  { %v2684_v47 = vmul.f32 %v3639_v0, %v2683_v52 }
 0x86c   :  { %v3641_v46 = vpop.eup %3640  ;;  %v2666_v39 = vadd.f32 %v3637_v58, %v2665_v17 }
 0x86d   :  { %v2685_v31 = vadd.f32 %v3639_v0, %v2684_v47  ;;  %v2702_v45 = vmul.f32 %v3641_v46, %v2700_v36  ;;  %v3643_v61 = vpop.eup %3642  ;;  %vm2707_vm12 = vweird.f32 %v3641_v46  ;;  %v2712_v47 = vand.u32 2147483648, %v2700_v36  ;;  %v6733_v36 = vld [vmem:[#allocation61_spill] sm:$0xff] }
 0x86e   :  { %v2670_v41 = vsel %vm2669_vm8, %v3637_v58, %v2666_v39  ;;  %vm2708_vm14 = vmor %vm2706_vm13, %vm2707_vm12  ;;  %v6734_v39 = vld [vmem:[#allocation62_spill] sm:$0xff] }
 0x86f   :  { %v2675_v32 = vsel %vm2672_vm10, %v2674_v44, %v2670_v41  ;;  %v2689_v49 = vsel %vm2688_vm9, %v3639_v0, %v2685_v31  ;;  %v2703_v4 = vsub.f32 1.0, %v2702_v45  ;;  %v2713_v34 = vor.u32 1.1754944e-38, %v2712_v47  ;;  %v6735_v44 = vld [vmem:[#allocation63_spill] sm:$0xff]  ;;  %v6736_v31 = vld [vmem:[#allocation37_spill] sm:$0xff]  ;;  %v6737_v45 = vld [vmem:[#allocation66_spill] sm:$0xff] }
 0x870   :  { %v2694_v52 = vsel %vm2691_vm11, %v2693_v48, %v2689_v49  ;;  %v2717_v40 = vmul.f32 %v3643_v61, %v2675_v32  ;;  %v6732_v32 = vld [vmem:[#allocation33_spill] sm:$0xff]  ;;  %v6738_v48 = vld [vmem:[#allocation32_spill] sm:$0xff]  ;;  %v6739_v41 = vld [vmem:[#allocation31_spill] sm:$0xff] }
 0x871   :  { %v2716_v28 = vmul.f32 %v2694_v52, %v5786_v53  ;;  %v2704_v17 = vmul.f32 %v3641_v46, %v2703_v4  ;;  %v6727_v53 = vld [vmem:[#allocation57_spill] sm:$0xff]  ;;  %v6730_v4 = vld [vmem:[#allocation60_spill] sm:$0xff]  ;;  %v6741_v49 = vld [vmem:[#allocation34_spill] sm:$0xff] }
 0x872   :  { %v6740_v61 = vld [vmem:[#allocation41_spill] sm:$0xff]  ;;  %v6742_v52 = vld [vmem:[#allocation36_spill] sm:$0xff]  ;;  %v6745_v47 = vld [vmem:[#allocation39_spill] sm:$0xff] }
 0x873   :  { %v5864_v33 = vadd.f32 %v2717_v40, %v2716_v28  ;;  %v2705_v56 = vadd.f32 %v3641_v46, %v2704_v17  ;;  %v6728_v28 = vld [vmem:[#allocation30_spill] sm:$0xff]  ;;  %v6743_v17 = vld [vmem:[#allocation35_spill] sm:$0xff] }
 0x874   :  { %v6729_v40 = vld [vmem:[#allocation58_spill] sm:$0xff] }
 0x875   :  { %3644 = vtanh.f32 %v5864_v33  ;;  %v2709_v58 = vsel %vm2708_vm14, %v3641_v46, %v2705_v56  ;;  %v6731_v46 = vld [vmem:[#allocation59_spill] sm:$0xff]  ;;  %v6744_v56 = vld [vmem:[#allocation44_spill] sm:$0xff] }
 0x876   :  { %v2714_v0 = vsel %vm2711_vm15, %v2713_v34, %v2709_v58  ;;  %v6747_v58 = vld [vmem:[#allocation40_spill] sm:$0xff]  ;;  %v6748_v34 = vld [vmem:[#allocation47_spill] sm:$0xff] }
 0x87b   :  { %v3645_v2 = vpop.eup %3644 }
 0x87c   :  { %v2720_v50 = vmul.f32 %v3645_v2, %v2714_v0  ;;  %v6749_v2 = vld [vmem:[#allocation45_spill] sm:$0xff]  ;;  %v6750_v0 = vld [vmem:[#allocation42_spill] sm:$0xff] }
 0x87e   :  { %2741 = vmatmul.f32.vlgmr.msra.gmra.mxu0 %v2720_v50  ;;  %2761 = vmatmul.f32.vlgmr.msra.gmra.mxu1 %v2720_v50 }
 0x87f   :  { %2781 = vmatmul.f32.vlgmr.msra.gmra.mxu2 %v2720_v50  ;;  %2801 = vmatmul.f32.vlgmr.msra.gmra.mxu3 %v2720_v50  ;;  %v6751_v50 = vld [vmem:[#allocation48_spill] sm:$0xff] }
 0x880   :  { %3027 = vmatpush.msra.mxu0 %v5587_v26  ;;  %3047 = vmatpush.msra.mxu1 %v5590_v25 }
 0x881   :  { %3067 = vmatpush.msra.mxu2 %v5593_v11  ;;  %3087 = vmatpush.msra.mxu3 %v5596_v12 }
 0x882   :  { %3028 = vmatpush.msra.mxu0 %v5599_v10  ;;  %3048 = vmatpush.msra.mxu1 %v5602_v3 }
 0x883   :  { %3068 = vmatpush.msra.mxu2 %v5605_v35  ;;  %3088 = vmatpush.msra.mxu3 %v5608_v24 }
 0x884   :  { %3029 = vmatpush.msra.mxu0 %v5611_v16  ;;  %3049 = vmatpush.msra.mxu1 %v5614_v57 }
 0x885   :  { %3069 = vmatpush.msra.mxu2 %v5617_v51  ;;  %3089 = vmatpush.msra.mxu3 %v5620_v5 }
 0x886   :  { %3030 = vmatpush.msra.mxu0 %v5623_v8  ;;  %3050 = vmatpush.msra.mxu1 %v5626_v54 }
 0x887   :  { %3070 = vmatpush.msra.mxu2 %v5629_v23  ;;  %3090 = vmatpush.msra.mxu3 %v5632_v7 }
 0x888   :  { %3031 = vmatpush.msra.mxu0 %v5635_v38  ;;  %3051 = vmatpush.msra.mxu1 %v5638_v13 }
 0x889   :  { %3071 = vmatpush.msra.mxu2 %v5641_v15  ;;  %3091 = vmatpush.msra.mxu3 %v5644_v59 }
 0x88a   :  { %3032 = vmatpush.msra.mxu0 %v5647_v60  ;;  %3052 = vmatpush.msra.mxu1 %v5650_v29 }
 0x88b   :  { %3072 = vmatpush.msra.mxu2 %v5653_v42  ;;  %3092 = vmatpush.msra.mxu3 %v5656_v62 }
 0x88c   :  { %3033 = vmatpush.msra.mxu0 %v5659_v19  ;;  %3053 = vmatpush.msra.mxu1 %v5662_v14 }
 0x88d   :  { %3073 = vmatpush.msra.mxu2 %v5665_v1  ;;  %3093 = vmatpush.msra.mxu3 %v5668_v9 }
 0x88e   :  { %3034 = vmatpush.msra.mxu0 %v5671_v37  ;;  %3054 = vmatpush.msra.mxu1 %v5674_v63 }
 0x88f   :  { %3074 = vmatpush.msra.mxu2 %v5677_v20  ;;  %3094 = vmatpush.msra.mxu3 %v5680_v6 }
 0x890   :  { %3035 = vmatpush.msra.mxu0 %v5683_v30  ;;  %3055 = vmatpush.msra.mxu1 %v5686_v43 }
 0x891   :  { %3075 = vmatpush.msra.mxu2 %v5689_v22  ;;  %3095 = vmatpush.msra.mxu3 %v5692_v18 }
 0x892   :  { %3036 = vmatpush.msra.mxu0 %v5695_v21  ;;  %3056 = vmatpush.msra.mxu1 %v5698_v27 }
 0x893   :  { %3076 = vmatpush.msra.mxu2 %v6727_v53  ;;  %3096 = vmatpush.msra.mxu3 %v6728_v28 }
 0x894   :  { %3037 = vmatpush.msra.mxu0 %v6729_v40  ;;  %3057 = vmatpush.msra.mxu1 %v6730_v4 }
 0x895   :  { %3077 = vmatpush.msra.mxu2 %v6731_v46  ;;  %3097 = vmatpush.msra.mxu3 %v6732_v32 }
 0x896   :  { %3038 = vmatpush.msra.mxu0 %v6733_v36  ;;  %3058 = vmatpush.msra.mxu1 %v6734_v39 }
 0x897   :  { %3078 = vmatpush.msra.mxu2 %v6735_v44  ;;  %3098 = vmatpush.msra.mxu3 %v6736_v31  ;;  %v6758_v44 = vld [vmem:[#allocation28_spill] sm:$0xff] }
 0x898   :  { %3039 = vmatpush.msra.mxu0 %v6737_v45  ;;  %3059 = vmatpush.msra.mxu1 %v6738_v48 }
 0x899   :  { %3079 = vmatpush.msra.mxu2 %v6739_v41  ;;  %3099 = vmatpush.msra.mxu3 %v6740_v61  ;;  %v6756_v41 = vld [vmem:[#allocation79_spill] sm:$0xff] }
 0x89a   :  { %3040 = vmatpush.msra.mxu0 %v6741_v49  ;;  %3060 = vmatpush.msra.mxu1 %v6742_v52  ;;  %v6752_v49 = vld [vmem:[#allocation43_spill] sm:$0xff] }
 0x89b   :  { %3080 = vmatpush.msra.mxu2 %v6743_v17  ;;  %3100 = vmatpush.msra.mxu3 %v6744_v56  ;;  %v6753_v52 = vld [vmem:[#allocation67_spill] sm:$0xff]  ;;  %v6754_v17 = vld [vmem:[#allocation77_spill] sm:$0xff]  ;;  %v6755_v56 = vld [vmem:[#allocation78_spill] sm:$0xff] }
 0x89c   :  { %3041 = vmatpush.msra.mxu0 %v6745_v47  ;;  %3061 = vmatpush.msra.mxu1 %v6746_v55  ;;  %v2000_v61 = vadd.f32 %v6754_v17, %v6753_v52  ;;  %v2001_v47 = vadd.f32 %v6756_v41, %v6755_v56 }
 0x89d   :  { %3081 = vmatpush.msra.mxu2 %v6747_v58  ;;  %3101 = vmatpush.msra.mxu3 %v6748_v34 }
 0x89e   :  { %3042 = vmatpush.msra.mxu0 %v6749_v2  ;;  %3062 = vmatpush.msra.mxu1 %v6750_v0  ;;  %v6757_v2 = vld [vmem:[#allocation80_spill] sm:$0xff] }
 0x89f   :  { %3082 = vmatpush.msra.mxu2 %v6751_v50  ;;  %3102 = vmatpush.msra.mxu3 %v6752_v49  ;;  %v2003_v0 = vadd.f32 %v6758_v44, %v6757_v2 }
 0x8fb   :  { %v2742_v48 = vpop.f32.mrf.mxu0  ;;  %v2762_v55 = vpop.f32.mrf.mxu1 }
 0x8fc   :  { %v2805_v45 = vadd.f32 %v2742_v48, %v2000_v61  ;;  %v2806_v58 = vadd.f32 %v2762_v55, %v2001_v47  ;;  %v6759_v61 = vld [vmem:[#allocation71_spill] sm:$0xff] }
 0x8fe   :  { %v3427_v31 = vmul.f32 -1.442695, %v2805_v45  ;;  %v3428_v34 = vmul.f32 -1.442695, %v2806_v58  ;;  %v6760_v45 = vld [vmem:[#allocation27_spill] sm:$0xff] }
 0x8ff   :  { %v2002_v47 = vadd.f32 %v6760_v45, %v6759_v61 }
 0x900   :  { %3646 = vpow2.f32 %v3427_v31 }
 0x901   :  { %3648 = vpow2.f32 %v3428_v34 }
 0x902   :  { %v2802_v50 = vpop.f32.mrf.mxu3  ;;  %v2782_v56 = vpop.f32.mrf.mxu2 }
 0x903   :  { %v2808_v39 = vadd.f32 %v2802_v50, %v2003_v0  ;;  %v2807_v58 = vadd.f32 %v2782_v56, %v2002_v47 }
 0x905   :  { %v3429_v49 = vmul.f32 -1.442695, %v2808_v39 }
 0x906   :  { %v3647_v36 = vpop.eup %3646 }
 0x907   :  { %v3649_v32 = vpop.eup %3648  ;;  %v2812_v52 = vadd.f32 1.0, %v3647_v36  ;;  %3650 = vpow2.f32 %v3429_v49 }
 0x908   :  { %v2831_v17 = vadd.f32 1.0, %v3649_v32 }
 0x909   :  { %3652 = vrcp.f32 %v2812_v52  ;;  %v2824_v44 = vand.u32 2147483648, %v2812_v52  ;;  %v2822_v49 = vand.u32 2147483647, %v2812_v52  ;;  %vm2818_vm2 = vweird.f32 %v2812_v52 }
 0x90a   :  { %3654 = vrcp.f32 %v2831_v17  ;;  %v2843_v36 = vand.u32 2147483648, %v2831_v17  ;;  %v2841_v46 = vand.u32 2147483647, %v2831_v17  ;;  %vm2837_vm3 = vweird.f32 %v2831_v17 }
 0x90b   :  { %v2825_v56 = vor.u32 1.1754944e-38, %v2824_v44  ;;  %vm2823_vm6 = vcmp.eq.f32.partialorder %v2822_v49, 8.507059e+37 }
 0x90c   :  { %vm2842_vm7 = vcmp.eq.f32.partialorder %v2841_v46, 8.507059e+37 }
 0x90d   :  { %v3651_v48 = vpop.eup %3650 }
 0x90e   :  { %v2851_v31 = vadd.f32 1.0, %v3651_v48 }
 0x90f   :  { %v3653_v55 = vpop.eup %3652 }
 0x910   :  { %v3655_v2 = vpop.eup %3654  ;;  %v2814_v34 = vmul.f32 %v3653_v55, %v2812_v52  ;;  %3656 = vrcp.f32 %v2851_v31  ;;  %vm2819_vm0 = vweird.f32 %v3653_v55  ;;  %vm2857_vm9 = vweird.f32 %v2851_v31 }
 0x911   :  { %v2833_v0 = vmul.f32 %v3655_v2, %v2831_v17  ;;  %3658 = vtanh.f32 %v2807_v58  ;;  %vm2838_vm1 = vweird.f32 %v3655_v2  ;;  %vm2820_vm4 = vmor %vm2818_vm2, %vm2819_vm0  ;;  %v2861_v17 = vand.u32 2147483647, %v2851_v31 }
 0x912   :  { %v2815_v39 = vsub.f32 1.0, %v2814_v34  ;;  %vm2839_vm5 = vmor %vm2837_vm3, %vm2838_vm1  ;;  %v2844_v34 = vor.u32 1.1754944e-38, %v2843_v36 }
 0x913   :  { %v2834_v50 = vsub.f32 1.0, %v2833_v0  ;;  %vm2862_vm11 = vcmp.eq.f32.partialorder %v2861_v17, 8.507059e+37 }
 0x914   :  { %v2816_v32 = vmul.f32 %v3653_v55, %v2815_v39 }
 0x915   :  { %v2835_v41 = vmul.f32 %v3655_v2, %v2834_v50 }
 0x916   :  { %v3657_v4 = vpop.eup %3656  ;;  %v2817_v61 = vadd.f32 %v3653_v55, %v2816_v32 }
 0x917   :  { %v2836_v48 = vadd.f32 %v3655_v2, %v2835_v41  ;;  %v2853_v47 = vmul.f32 %v3657_v4, %v2851_v31  ;;  %v3659_v58 = vpop.eup %3658  ;;  %vm2858_vm8 = vweird.f32 %v3657_v4  ;;  %v2863_v41 = vand.u32 2147483648, %v2851_v31 }
 0x918   :  { %v2821_v0 = vsel %vm2820_vm4, %v3653_v55, %v2817_v61  ;;  %vm2859_vm10 = vmor %vm2857_vm9, %vm2858_vm8 }
 0x919   :  { %v2826_v45 = vsel %vm2823_vm6, %v2825_v56, %v2821_v0  ;;  %v2840_v39 = vsel %vm2839_vm5, %v3655_v2, %v2836_v48  ;;  %v2854_v40 = vsub.f32 1.0, %v2853_v47  ;;  %v2864_v36 = vor.u32 1.1754944e-38, %v2863_v41  ;;  %v6793_v0 = vld [vmem:[#allocation29_spill] sm:$0xff] }
 0x91a   :  { %v2845_v50 = vsel %vm2842_vm7, %v2844_v34, %v2840_v39  ;;  %v2868_v28 = vmul.f32 %v3659_v58, %v2826_v45  ;;  %v6794_v58 = vld [vmem:[#allocation27_spill] sm:$0xff] }
 0x91b   :  { %v2867_v53 = vmul.f32 %v2845_v50, %v5864_v33  ;;  %v2855_v32 = vmul.f32 %v3657_v4, %v2854_v40  ;;  %v6791_v33 = vld [vmem:[#allocation76_spill] sm:$0xff]  ;;  %v2006_v39 = vadd.f32 %v6794_v58, %v6793_v0 }
 0x91d   :  { %v5940_v52 = vadd.f32 %v2868_v28, %v2867_v53  ;;  %v2856_v44 = vadd.f32 %v3657_v4, %v2855_v32  ;;  %v6792_v53 = vld [vmem:[#allocation28_spill] sm:$0xff] }
 0x91e   :  { %v2007_v28 = vadd.f32 %v6792_v53, %v6791_v33 }
 0x91f   :  { %3660 = vtanh.f32 %v5940_v52  ;;  %v2860_v55 = vsel %vm2859_vm10, %v3657_v4, %v2856_v44 }
 0x920   :  { %v2865_v2 = vsel %vm2862_vm11, %v2864_v36, %v2860_v55 }
 0x925   :  { %v3661_v46 = vpop.eup %3660 }
 0x926   :  { %v2871_v49 = vmul.f32 %v3661_v46, %v2865_v2 }
 0x928   :  { %2892 = vmatmul.f32.vlgmr.msrb.gmra.mxu0 %v2871_v49  ;;  %2912 = vmatmul.f32.vlgmr.msrb.gmra.mxu1 %v2871_v49 }
 0x929   :  { %2932 = vmatmul.f32.vlgmr.msrb.gmra.mxu2 %v2871_v49  ;;  %2952 = vmatmul.f32.vlgmr.msrb.gmra.mxu3 %v2871_v49 }
 0x92a   :  { %3178 = vmatpush.msrb.mxu0 %v5587_v26  ;;  %3198 = vmatpush.msrb.mxu1 %v5590_v25  ;;  %v6761_v26 = vld [vmem:[#allocation57_spill] sm:$0xff]  ;;  %v6762_v25 = vld [vmem:[#allocation30_spill] sm:$0xff] }
 0x92b   :  { %3218 = vmatpush.msrb.mxu2 %v5593_v11  ;;  %3238 = vmatpush.msrb.mxu3 %v5596_v12  ;;  %v6763_v11 = vld [vmem:[#allocation58_spill] sm:$0xff]  ;;  %v6764_v12 = vld [vmem:[#allocation60_spill] sm:$0xff] }
 0x92c   :  { %3179 = vmatpush.msrb.mxu0 %v5599_v10  ;;  %3199 = vmatpush.msrb.mxu1 %v5602_v3  ;;  %v6765_v10 = vld [vmem:[#allocation59_spill] sm:$0xff]  ;;  %v6766_v3 = vld [vmem:[#allocation33_spill] sm:$0xff] }
 0x92d   :  { %3219 = vmatpush.msrb.mxu2 %v5605_v35  ;;  %3239 = vmatpush.msrb.mxu3 %v5608_v24  ;;  %v6767_v35 = vld [vmem:[#allocation61_spill] sm:$0xff]  ;;  %v6768_v24 = vld [vmem:[#allocation62_spill] sm:$0xff] }
 0x92e   :  { %3180 = vmatpush.msrb.mxu0 %v5611_v16  ;;  %3200 = vmatpush.msrb.mxu1 %v5614_v57  ;;  %v6769_v16 = vld [vmem:[#allocation63_spill] sm:$0xff]  ;;  %v6770_v57 = vld [vmem:[#allocation37_spill] sm:$0xff] }
 0x92f   :  { %3220 = vmatpush.msrb.mxu2 %v5617_v51  ;;  %3240 = vmatpush.msrb.mxu3 %v5620_v5  ;;  %v6771_v51 = vld [vmem:[#allocation66_spill] sm:$0xff]  ;;  %v6772_v5 = vld [vmem:[#allocation32_spill] sm:$0xff] }
 0x930   :  { %3181 = vmatpush.msrb.mxu0 %v5623_v8  ;;  %3201 = vmatpush.msrb.mxu1 %v5626_v54  ;;  %v6773_v8 = vld [vmem:[#allocation31_spill] sm:$0xff]  ;;  %v6774_v54 = vld [vmem:[#allocation41_spill] sm:$0xff] }
 0x931   :  { %3221 = vmatpush.msrb.mxu2 %v5629_v23  ;;  %3241 = vmatpush.msrb.mxu3 %v5632_v7  ;;  %v6775_v23 = vld [vmem:[#allocation34_spill] sm:$0xff]  ;;  %v6776_v7 = vld [vmem:[#allocation36_spill] sm:$0xff] }
 0x932   :  { %3182 = vmatpush.msrb.mxu0 %v5635_v38  ;;  %3202 = vmatpush.msrb.mxu1 %v5638_v13  ;;  %v6777_v38 = vld [vmem:[#allocation35_spill] sm:$0xff]  ;;  %v6778_v13 = vld [vmem:[#allocation44_spill] sm:$0xff] }
 0x933   :  { %3222 = vmatpush.msrb.mxu2 %v5641_v15  ;;  %3242 = vmatpush.msrb.mxu3 %v5644_v59  ;;  %v6779_v15 = vld [vmem:[#allocation39_spill] sm:$0xff]  ;;  %v6780_v59 = vld [vmem:[#allocation38_spill] sm:$0xff] }
 0x934   :  { %3183 = vmatpush.msrb.mxu0 %v5647_v60  ;;  %3203 = vmatpush.msrb.mxu1 %v5650_v29  ;;  %v6781_v60 = vld [vmem:[#allocation40_spill] sm:$0xff]  ;;  %v6782_v29 = vld [vmem:[#allocation47_spill] sm:$0xff] }
 0x935   :  { %3223 = vmatpush.msrb.mxu2 %v5653_v42  ;;  %3243 = vmatpush.msrb.mxu3 %v5656_v62  ;;  %v6783_v42 = vld [vmem:[#allocation45_spill] sm:$0xff]  ;;  %v6784_v62 = vld [vmem:[#allocation42_spill] sm:$0xff] }
 0x936   :  { %3184 = vmatpush.msrb.mxu0 %v5659_v19  ;;  %3204 = vmatpush.msrb.mxu1 %v5662_v14  ;;  %v6785_v19 = vld [vmem:[#allocation48_spill] sm:$0xff]  ;;  %v6786_v14 = vld [vmem:[#allocation43_spill] sm:$0xff] }
 0x937   :  { %3224 = vmatpush.msrb.mxu2 %v5665_v1  ;;  %3244 = vmatpush.msrb.mxu3 %v5668_v9  ;;  %v6787_v1 = vld [vmem:[#allocation68_spill] sm:$0xff]  ;;  %v6788_v9 = vld [vmem:[#allocation77_spill] sm:$0xff] }
 0x938   :  { %3185 = vmatpush.msrb.mxu0 %v5671_v37  ;;  %3205 = vmatpush.msrb.mxu1 %v5674_v63  ;;  %v2004_v37 = vadd.f32 %v6788_v9, %v6787_v1  ;;  %v6789_v63 = vld [vmem:[#allocation69_spill] sm:$0xff] }
 0x939   :  { %3225 = vmatpush.msrb.mxu2 %v5677_v20  ;;  %3245 = vmatpush.msrb.mxu3 %v5680_v6  ;;  %v6790_v20 = vld [vmem:[#allocation79_spill] sm:$0xff] }
 0x93a   :  { %3186 = vmatpush.msrb.mxu0 %v5683_v30  ;;  %3206 = vmatpush.msrb.mxu1 %v5686_v43  ;;  %v2005_v6 = vadd.f32 %v6790_v20, %v6789_v63 }
 0x93b   :  { %3226 = vmatpush.msrb.mxu2 %v5689_v22  ;;  %3246 = vmatpush.msrb.mxu3 %v5692_v18 }
 0x93c   :  { %3187 = vmatpush.msrb.mxu0 %v5695_v21  ;;  %3207 = vmatpush.msrb.mxu1 %v5698_v27 }
 0x93d   :  { %3227 = vmatpush.msrb.mxu2 %v6761_v26  ;;  %3247 = vmatpush.msrb.mxu3 %v6762_v25 }
 0x93e   :  { %3188 = vmatpush.msrb.mxu0 %v6763_v11  ;;  %3208 = vmatpush.msrb.mxu1 %v6764_v12 }
 0x93f   :  { %3228 = vmatpush.msrb.mxu2 %v6765_v10  ;;  %3248 = vmatpush.msrb.mxu3 %v6766_v3 }
 0x940   :  { %3189 = vmatpush.msrb.mxu0 %v6767_v35  ;;  %3209 = vmatpush.msrb.mxu1 %v6768_v24 }
 0x941   :  { %3229 = vmatpush.msrb.mxu2 %v6769_v16  ;;  %3249 = vmatpush.msrb.mxu3 %v6770_v57 }
 0x942   :  { %3190 = vmatpush.msrb.mxu0 %v6771_v51  ;;  %3210 = vmatpush.msrb.mxu1 %v6772_v5 }
 0x943   :  { %3230 = vmatpush.msrb.mxu2 %v6773_v8  ;;  %3250 = vmatpush.msrb.mxu3 %v6774_v54 }
 0x944   :  { %3191 = vmatpush.msrb.mxu0 %v6775_v23  ;;  %3211 = vmatpush.msrb.mxu1 %v6776_v7 }
 0x945   :  { %3231 = vmatpush.msrb.mxu2 %v6777_v38  ;;  %3251 = vmatpush.msrb.mxu3 %v6778_v13 }
 0x946   :  { %3192 = vmatpush.msrb.mxu0 %v6779_v15  ;;  %3212 = vmatpush.msrb.mxu1 %v6780_v59 }
 0x947   :  { %3232 = vmatpush.msrb.mxu2 %v6781_v60  ;;  %3252 = vmatpush.msrb.mxu3 %v6782_v29 }
 0x948   :  { %3193 = vmatpush.msrb.mxu0 %v6783_v42  ;;  %3213 = vmatpush.msrb.mxu1 %v6784_v62 }
 0x949   :  { %3233 = vmatpush.msrb.mxu2 %v6785_v19  ;;  %3253 = vmatpush.msrb.mxu3 %v6786_v14 }
 0x9a5   :  { %v2893_v30 = vpop.f32.mrf.mxu0  ;;  %v2913_v43 = vpop.f32.mrf.mxu1 }
 0x9a6   :  { %v2956_v22 = vadd.f32 %v2893_v30, %v2004_v37  ;;  %v2957_v18 = vadd.f32 %v2913_v43, %v2005_v6  ;;  %v6796_v6 = vld [vmem:[#allocation24_spill] sm:$0xff] }
 0x9a7   :  { %v2009_v30 = vadd.f32 %v6790_v20, %v6796_v6  ;;  %v3344_v6 = vld [vmem:[#allocation15 + $0x70] sm:$0xff] }
 0x9a8   :  { %v3430_v21 = vmul.f32 -1.442695, %v2956_v22  ;;  %v3431_v27 = vmul.f32 -1.442695, %v2957_v18 }
 0x9aa   :  { %3662 = vpow2.f32 %v3430_v21 }
 0x9ab   :  { %3664 = vpow2.f32 %v3431_v27 }
 0x9ac   :  { %v2953_v40 = vpop.f32.mrf.mxu3  ;;  %v2933_v47 = vpop.f32.mrf.mxu2 }
 0x9ad   :  { %v2959_v4 = vadd.f32 %v2953_v40, %v2007_v28  ;;  %v2958_v44 = vadd.f32 %v2933_v47, %v2006_v39  ;;  %v6797_v28 = vld [vmem:[#allocation55_spill] sm:$0xff] }
 0x9ae   :  { %v2011_v40 = vadd.f32 %v6792_v53, %v6797_v28  ;;  %v6798_v39 = vld [vmem:[#allocation23_spill] sm:$0xff]  ;;  %v6799_v28 = vld [vmem:[#allocation72_spill] sm:$0xff] }
 0x9af   :  { %v3432_v45 = vmul.f32 -1.442695, %v2959_v4 }
 0x9b0   :  { %v3663_v31 = vpop.eup %3662 }
 0x9b1   :  { %v3665_v61 = vpop.eup %3664  ;;  %v2963_v56 = vadd.f32 1.0, %v3663_v31  ;;  %3666 = vpow2.f32 %v3432_v45 }
 0x9b2   :  { %v2982_v48 = vadd.f32 1.0, %v3665_v61 }
 0x9b3   :  { %3668 = vrcp.f32 %v2963_v56  ;;  %v2975_v2 = vand.u32 2147483648, %v2963_v56  ;;  %v2973_v25 = vand.u32 2147483647, %v2963_v56  ;;  %vm2969_vm14 = vweird.f32 %v2963_v56 }
 0x9b4   :  { %3670 = vrcp.f32 %v2982_v48  ;;  %v2994_v49 = vand.u32 2147483648, %v2982_v48  ;;  %v2992_v12 = vand.u32 2147483647, %v2982_v48  ;;  %vm2988_vm15 = vweird.f32 %v2982_v48 }
 0x9b5   :  { %v2976_v35 = vor.u32 1.1754944e-38, %v2975_v2  ;;  %vm2974_vm2 = vcmp.eq.f32.partialorder %v2973_v25, 8.507059e+37 }
 0x9b6   :  { %v2995_v57 = vor.u32 1.1754944e-38, %v2994_v49  ;;  %vm2993_vm3 = vcmp.eq.f32.partialorder %v2992_v12, 8.507059e+37 }
 0x9b7   :  { %v3667_v34 = vpop.eup %3666 }
 0x9b8   :  { %v3002_v50 = vadd.f32 1.0, %v3667_v34 }
 0x9b9   :  { %v3669_v32 = vpop.eup %3668 }
 0x9ba   :  { %v3671_v41 = vpop.eup %3670  ;;  %v2965_v17 = vmul.f32 %v3669_v32, %v2963_v56  ;;  %3672 = vrcp.f32 %v3002_v50  ;;  %vm2970_vm12 = vweird.f32 %v3669_v32  ;;  %v3014_v29 = vand.u32 2147483648, %v3002_v50 }
 0x9bb   :  { %v2984_v55 = vmul.f32 %v3671_v41, %v2982_v48  ;;  %3674 = vtanh.f32 %v2958_v44  ;;  %vm2989_vm13 = vweird.f32 %v3671_v41  ;;  %vm2971_vm0 = vmor %vm2969_vm14, %vm2970_vm12  ;;  %vm3008_vm5 = vweird.f32 %v3002_v50 }
 0x9bc   :  { %v2966_v36 = vsub.f32 1.0, %v2965_v17  ;;  %vm2990_vm1 = vmor %vm2988_vm15, %vm2989_vm13  ;;  %v3012_v42 = vand.u32 2147483647, %v3002_v50  ;;  %v3015_v19 = vor.u32 1.1754944e-38, %v3014_v29 }
 0x9bd   :  { %v2985_v46 = vsub.f32 1.0, %v2984_v55 }
 0x9be   :  { %v2967_v26 = vmul.f32 %v3669_v32, %v2966_v36  ;;  %vm3013_vm7 = vcmp.eq.f32.partialorder %v3012_v42, 8.507059e+37 }
 0x9bf   :  { %v2986_v11 = vmul.f32 %v3671_v41, %v2985_v46 }
 0x9c0   :  { %v3673_v10 = vpop.eup %3672  ;;  %v2968_v3 = vadd.f32 %v3669_v32, %v2967_v26 }
 0x9c1   :  { %v2987_v24 = vadd.f32 %v3671_v41, %v2986_v11  ;;  %v3004_v16 = vmul.f32 %v3673_v10, %v3002_v50  ;;  %v3675_v5 = vpop.eup %3674  ;;  %vm3009_vm4 = vweird.f32 %v3673_v10  ;;  %v2010_v50 = vadd.f32 %v6794_v58, %v6798_v39 }
 0x9c2   :  { %v2972_v51 = vsel %vm2971_vm0, %v3669_v32, %v2968_v3  ;;  %vm3010_vm6 = vmor %vm3008_vm5, %vm3009_vm4 }
 0x9c3   :  { %v2977_v8 = vsel %vm2974_vm2, %v2976_v35, %v2972_v51  ;;  %v2991_v54 = vsel %vm2990_vm1, %v3671_v41, %v2987_v24  ;;  %v3005_v23 = vsub.f32 1.0, %v3004_v16 }
 0x9c4   :  { %v2996_v7 = vsel %vm2993_vm3, %v2995_v57, %v2991_v54  ;;  %v3019_v38 = vmul.f32 %v3675_v5, %v2977_v8 }
 0x9c5   :  { %v3018_v13 = vmul.f32 %v2996_v7, %v5940_v52  ;;  %v3006_v15 = vmul.f32 %v3673_v10, %v3005_v23  ;;  %v6795_v52 = vld [vmem:[#allocation81_spill] sm:$0xff] }
 0x9c6   :  { %v2008_v63 = vadd.f32 %v6788_v9, %v6795_v52 }
 0x9c7   :  { %v6016_v59 = vadd.f32 %v3019_v38, %v3018_v13  ;;  %v3007_v60 = vadd.f32 %v3673_v10, %v3006_v15 }
 0x9c9   :  { %3676 = vtanh.f32 %v6016_v59  ;;  %v3011_v62 = vsel %vm3010_vm6, %v3673_v10, %v3007_v60 }
 0x9ca   :  { %v3016_v1 = vsel %vm3013_vm7, %v3015_v19, %v3011_v62 }
 0x9cf   :  { %v3677_v14 = vpop.eup %3676 }
 0x9d0   :  { %v3022_v37 = vmul.f32 %v3677_v14, %v3016_v1 }
 0x9d2   :  { %3043 = vmatmul.f32.vlgmr.msra.gmra.mxu0 %v3022_v37  ;;  %3063 = vmatmul.f32.vlgmr.msra.gmra.mxu1 %v3022_v37 }
 0x9d3   :  { %3083 = vmatmul.f32.vlgmr.msra.gmra.mxu2 %v3022_v37  ;;  %3103 = vmatmul.f32.vlgmr.msra.gmra.mxu3 %v3022_v37 }
 0xa4f   :  { %v3044_v43 = vpop.f32.mrf.mxu0  ;;  %v3064_v22 = vpop.f32.mrf.mxu1 }
 0xa50   :  { %v3107_v18 = vadd.f32 %v3044_v43, %v2008_v63  ;;  %v3108_v21 = vadd.f32 %v3064_v22, %v2009_v30  ;;  %v3343_v30 = vld [vmem:[#allocation15 + $0x68] sm:$0xff]  ;;  %v3342_v43 = vld [vmem:[#allocation15 + $0x60] sm:$0xff]  ;;  %v3341_v22 = vld [vmem:[#allocation15 + $0x58] sm:$0xff] }
 0xa52   :  { %v3433_v27 = vmul.f32 -1.442695, %v3107_v18  ;;  %v3434_v33 = vmul.f32 -1.442695, %v3108_v21  ;;  %v3340_v18 = vld [vmem:[#allocation15 + $0x50] sm:$0xff]  ;;  %v3339_v21 = vld [vmem:[#allocation15 + $0x48] sm:$0xff] }
 0xa54   :  { %3678 = vpow2.f32 %v3433_v27  ;;  %v3338_v27 = vld [vmem:[#allocation15 + $0x40] sm:$0xff] }
 0xa55   :  { %3680 = vpow2.f32 %v3434_v33  ;;  %v3337_v33 = vld [vmem:[#allocation15 + $0x38] sm:$0xff] }
 0xa56   :  { %v3104_v4 = vpop.f32.mrf.mxu3  ;;  %v3084_v34 = vpop.f32.mrf.mxu2 }
 0xa57   :  { %v3110_v45 = vadd.f32 %v3104_v4, %v2011_v40  ;;  %v3109_v41 = vadd.f32 %v3084_v34, %v2010_v50  ;;  %v2012_v40 = vadd.f32 %v6788_v9, %v6799_v28  ;;  %v6800_v4 = vld [vmem:[#allocation73_spill] sm:$0xff]  ;;  %v3335_v34 = vld [vmem:[#allocation15 + $0x28] sm:$0xff]  ;;  %v3334_v50 = vld [vmem:[#allocation15 + $0x20] sm:$0xff] }
 0xa59   :  { %v3435_v31 = vmul.f32 -1.442695, %v3110_v45  ;;  %v2013_v45 = vadd.f32 %v6790_v20, %v6800_v4  ;;  %v3332_v20 = vld [vmem:[#allocation15 + $0x10] sm:$0xff] }
 0xa5a   :  { %v3679_v61 = vpop.eup %3678 }
 0xa5b   :  { %v3681_v56 = vpop.eup %3680  ;;  %v3114_v48 = vadd.f32 1.0, %v3679_v61  ;;  %3682 = vpow2.f32 %v3435_v31 }
 0xa5c   :  { %v3133_v47 = vadd.f32 1.0, %v3681_v56  ;;  %v3336_v56 = vld [vmem:[#allocation15 + $0x30] sm:$0xff] }
 0xa5d   :  { %3684 = vrcp.f32 %v3114_v48  ;;  %v3126_v49 = vand.u32 2147483648, %v3114_v48  ;;  %v3124_v11 = vand.u32 2147483647, %v3114_v48  ;;  %vm3120_vm10 = vweird.f32 %v3114_v48 }
 0xa5e   :  { %3686 = vrcp.f32 %v3133_v47  ;;  %v3145_v26 = vand.u32 2147483648, %v3133_v47  ;;  %v3143_v10 = vand.u32 2147483647, %v3133_v47  ;;  %vm3139_vm11 = vweird.f32 %v3133_v47 }
 0xa5f   :  { %v3127_v24 = vor.u32 1.1754944e-38, %v3126_v49  ;;  %vm3125_vm14 = vcmp.eq.f32.partialorder %v3124_v11, 8.507059e+37 }
 0xa60   :  { %v3146_v51 = vor.u32 1.1754944e-38, %v3145_v26  ;;  %vm3144_vm15 = vcmp.eq.f32.partialorder %v3143_v10, 8.507059e+37 }
 0xa61   :  { %v3683_v0 = vpop.eup %3682 }
 0xa62   :  { %v3153_v32 = vadd.f32 1.0, %v3683_v0 }
 0xa63   :  { %v3685_v44 = vpop.eup %3684 }
 0xa64   :  { %v3687_v17 = vpop.eup %3686  ;;  %v3116_v55 = vmul.f32 %v3685_v44, %v3114_v48  ;;  %3688 = vrcp.f32 %v3153_v32  ;;  %vm3121_vm8 = vweird.f32 %v3685_v44  ;;  %v3165_v62 = vand.u32 2147483648, %v3153_v32 }
 0xa65   :  { %v3135_v36 = vmul.f32 %v3687_v17, %v3133_v47  ;;  %3690 = vtanh.f32 %v3109_v41  ;;  %vm3140_vm9 = vweird.f32 %v3687_v17  ;;  %vm3122_vm12 = vmor %vm3120_vm10, %vm3121_vm8  ;;  %vm3159_vm1 = vweird.f32 %v3153_v32 }
 0xa66   :  { %v3117_v46 = vsub.f32 1.0, %v3116_v55  ;;  %vm3141_vm13 = vmor %vm3139_vm11, %vm3140_vm9  ;;  %v3163_v19 = vand.u32 2147483647, %v3153_v32  ;;  %v3166_v1 = vor.u32 1.1754944e-38, %v3165_v62  ;;  %v3331_v55 = vld [vmem:[#allocation15 + $0x8] sm:$0xff] }
 0xa67   :  { %v3136_v2 = vsub.f32 1.0, %v3135_v36 }
 0xa68   :  { %v3118_v25 = vmul.f32 %v3685_v44, %v3117_v46  ;;  %vm3164_vm3 = vcmp.eq.f32.partialorder %v3163_v19, 8.507059e+37  ;;  %v3330_v46 = vld [vmem:[#allocation15] sm:$0xff] }
 0xa69   :  { %v3137_v12 = vmul.f32 %v3687_v17, %v3136_v2 }
 0xa6a   :  { %v3689_v3 = vpop.eup %3688  ;;  %v3119_v35 = vadd.f32 %v3685_v44, %v3118_v25 }
 0xa6b   :  { %v3138_v16 = vadd.f32 %v3687_v17, %v3137_v12  ;;  %v3155_v57 = vmul.f32 %v3689_v3, %v3153_v32  ;;  %v3691_v8 = vpop.eup %3690  ;;  %vm3160_vm0 = vweird.f32 %v3689_v3  ;;  %v3333_v32 = vld [vmem:[#allocation15 + $0x18] sm:$0xff]  ;;  %v6802_v12 = vld [vmem:[#allocation26_spill] sm:$0xff] }
 0xa6c   :  { %v3123_v5 = vsel %vm3122_vm12, %v3685_v44, %v3119_v35  ;;  %vm3161_vm2 = vmor %vm3159_vm1, %vm3160_vm0  ;;  %v6801_v44 = vld [vmem:[#allocation25_spill] sm:$0xff]  ;;  %v2014_v10 = vadd.f32 %v6794_v58, %v6802_v12 }
 0xa6d   :  { %v3128_v54 = vsel %vm3125_vm14, %v3127_v24, %v3123_v5  ;;  %v3142_v23 = vsel %vm3141_vm13, %v3687_v17, %v3138_v16  ;;  %v3156_v7 = vsub.f32 1.0, %v3155_v57  ;;  %v2015_v9 = vadd.f32 %v6792_v53, %v6801_v44 }
 0xa6e   :  { %v3147_v38 = vsel %vm3144_vm15, %v3146_v51, %v3142_v23  ;;  %v3170_v13 = vmul.f32 %v3691_v8, %v3128_v54 }
 0xa6f   :  { %v3169_v15 = vmul.f32 %v3147_v38, %v6016_v59  ;;  %v3157_v60 = vmul.f32 %v3689_v3, %v3156_v7  ;;  %v3345_v59 = vld [vmem:[#allocation15 + $0x78] sm:$0xff] }
 0xa70   :  { %3350 = vmatpush.msra.mxu0 %v3345_v59 }
 0xa71   :  { %v6028_v29 = vadd.f32 %v3170_v13, %v3169_v15  ;;  %v3158_v42 = vadd.f32 %v3689_v3, %v3157_v60 }
 0xa72   :  { %3351 = vmatpush.msra.mxu0 %v3344_v6 }
 0xa73   :  { %3692 = vtanh.f32 %v6028_v29  ;;  %v3162_v14 = vsel %vm3161_vm2, %v3689_v3, %v3158_v42 }
 0xa74   :  { %v3167_v52 = vsel %vm3164_vm3, %v3166_v1, %v3162_v14  ;;  %3352 = vmatpush.msra.mxu0 %v3343_v30 }
 0xa76   :  { %3353 = vmatpush.msra.mxu0 %v3342_v43 }
 0xa78   :  { %3354 = vmatpush.msra.mxu0 %v3341_v22 }
 0xa79   :  { %v3693_v37 = vpop.eup %3692 }
 0xa7a   :  { %v3173_v63 = vmul.f32 %v3693_v37, %v3167_v52  ;;  %3355 = vmatpush.msra.mxu0 %v3340_v18 }
 0xa7c   :  { %3194 = vmatmul.f32.vlgmr.msrb.gmra.mxu0 %v3173_v63  ;;  %3214 = vmatmul.f32.vlgmr.msrb.gmra.mxu1 %v3173_v63 }
 0xa7d   :  { %3234 = vmatmul.f32.vlgmr.msrb.gmra.mxu2 %v3173_v63  ;;  %3254 = vmatmul.f32.vlgmr.msrb.gmra.mxu3 %v3173_v63 }
 0xa7e   :  { %3356 = vmatpush.msra.mxu0 %v3339_v21 }
 0xa80   :  { %3357 = vmatpush.msra.mxu0 %v3338_v27 }
 0xa82   :  { %3358 = vmatpush.msra.mxu0 %v3337_v33 }
 0xa84   :  { %3359 = vmatpush.msra.mxu0 %v3336_v56 }
 0xa86   :  { %3360 = vmatpush.msra.mxu0 %v3335_v34 }
 0xa88   :  { %3361 = vmatpush.msra.mxu0 %v3334_v50 }
 0xa8a   :  { %3362 = vmatpush.msra.mxu0 %v3333_v32 }
 0xa8c   :  { %3363 = vmatpush.msra.mxu0 %v3332_v20 }
 0xa8e   :  { %3364 = vmatpush.msra.mxu0 %v3331_v55 }
 0xa90   :  { %3365 = vmatpush.msra.mxu0 %v3330_v46 }
 0xaf9   :  { %v3195_v31 = vpop.f32.mrf.mxu0  ;;  %v3215_v61 = vpop.f32.mrf.mxu1 }
 0xafa   :  { %v3258_v48 = vadd.f32 %v3195_v31, %v2012_v40  ;;  %v3259_v47 = vadd.f32 %v3215_v61, %v2013_v45 }
 0xafc   :  { %v3436_v0 = vmul.f32 -1.442695, %v3258_v48  ;;  %v3437_v39 = vmul.f32 -1.442695, %v3259_v47 }
 0xafe   :  { %3694 = vpow2.f32 %v3436_v0 }
 0xaff   :  { %3696 = vpow2.f32 %v3437_v39 }
 0xb00   :  { %v3255_v41 = vpop.f32.mrf.mxu3  ;;  %v3235_v11 = vpop.f32.mrf.mxu2 }
 0xb01   :  { %v3261_v17 = vadd.f32 %v3255_v41, %v2015_v9  ;;  %v3260_v24 = vadd.f32 %v3235_v11, %v2014_v10 }
 0xb03   :  { %v3438_v36 = vmul.f32 -1.442695, %v3261_v17 }
 0xb04   :  { %v3695_v2 = vpop.eup %3694 }
 0xb05   :  { %v3697_v49 = vpop.eup %3696  ;;  %v3265_v26 = vadd.f32 1.0, %v3695_v2  ;;  %3698 = vpow2.f32 %v3438_v36 }
 0xb06   :  { %v3284_v25 = vadd.f32 1.0, %v3697_v49 }
 0xb07   :  { %3700 = vrcp.f32 %v3265_v26  ;;  %v3277_v54 = vand.u32 2147483648, %v3265_v26  ;;  %v3275_v38 = vand.u32 2147483647, %v3265_v26  ;;  %vm3271_vm6 = vweird.f32 %v3265_v26 }
 0xb08   :  { %3702 = vrcp.f32 %v3284_v25  ;;  %v3296_v23 = vand.u32 2147483648, %v3284_v25  ;;  %v3294_v15 = vand.u32 2147483647, %v3284_v25  ;;  %vm3290_vm7 = vweird.f32 %v3284_v25 }
 0xb09   :  { %v3278_v42 = vor.u32 1.1754944e-38, %v3277_v54  ;;  %vm3276_vm10 = vcmp.eq.f32.partialorder %v3275_v38, 8.507059e+37 }
 0xb0a   :  { %v3297_v14 = vor.u32 1.1754944e-38, %v3296_v23  ;;  %vm3295_vm11 = vcmp.eq.f32.partialorder %v3294_v15, 8.507059e+37 }
 0xb0b   :  { %v3699_v53 = vpop.eup %3698 }
 0xb0c   :  { %v3304_v3 = vadd.f32 1.0, %v3699_v53 }
 0xb0d   :  { %v3701_v35 = vpop.eup %3700 }
 0xb0e   :  { %v3703_v16 = vpop.eup %3702  ;;  %v3267_v57 = vmul.f32 %v3701_v35, %v3265_v26  ;;  %3704 = vrcp.f32 %v3304_v3  ;;  %vm3272_vm4 = vweird.f32 %v3701_v35  ;;  %v3316_v27 = vand.u32 2147483648, %v3304_v3 }
 0xb0f   :  { %v3286_v51 = vmul.f32 %v3703_v16, %v3284_v25  ;;  %3706 = vtanh.f32 %v3260_v24  ;;  %vm3291_vm5 = vweird.f32 %v3703_v16  ;;  %vm3273_vm8 = vmor %vm3271_vm6, %vm3272_vm4  ;;  %vm3310_vm13 = vweird.f32 %v3304_v3 }
 0xb10   :  { %v3268_v5 = vsub.f32 1.0, %v3267_v57  ;;  %vm3292_vm9 = vmor %vm3290_vm7, %vm3291_vm5  ;;  %v3314_v33 = vand.u32 2147483647, %v3304_v3  ;;  %v3317_v40 = vor.u32 1.1754944e-38, %v3316_v27 }
 0xb11   :  { %v3287_v8 = vsub.f32 1.0, %v3286_v51 }
 0xb12   :  { %v3269_v7 = vmul.f32 %v3701_v35, %v3268_v5  ;;  %vm3315_vm15 = vcmp.eq.f32.partialorder %v3314_v33, 8.507059e+37 }
 0xb13   :  { %v3288_v13 = vmul.f32 %v3703_v16, %v3287_v8 }
 0xb14   :  { %v3705_v60 = vpop.eup %3704  ;;  %v3270_v58 = vadd.f32 %v3701_v35, %v3269_v7 }
 0xb15   :  { %v3289_v62 = vadd.f32 %v3703_v16, %v3288_v13  ;;  %v3306_v19 = vmul.f32 %v3705_v60, %v3304_v3  ;;  %v3707_v37 = vpop.eup %3706  ;;  %vm3311_vm12 = vweird.f32 %v3705_v60 }
 0xb16   :  { %v3274_v1 = vsel %vm3273_vm8, %v3701_v35, %v3270_v58  ;;  %vm3312_vm14 = vmor %vm3310_vm13, %vm3311_vm12 }
 0xb17   :  { %v3279_v52 = vsel %vm3276_vm10, %v3278_v42, %v3274_v1  ;;  %v3293_v63 = vsel %vm3292_vm9, %v3703_v16, %v3289_v62  ;;  %v3307_v59 = vsub.f32 1.0, %v3306_v19 }
 0xb18   :  { %v3298_v6 = vsel %vm3295_vm11, %v3297_v14, %v3293_v63  ;;  %v3321_v30 = vmul.f32 %v3707_v37, %v3279_v52 }
 0xb19   :  { %v3320_v43 = vmul.f32 %v3298_v6, %v6028_v29  ;;  %v3308_v22 = vmul.f32 %v3705_v60, %v3307_v59  ;;  %v3453_v29 = vld [vmem:[%s6052_s6] ss:$0 sm:$0xff] }
 0xb1b   :  { %v3322_v18 = vadd.f32 %v3321_v30, %v3320_v43  ;;  %v3309_v21 = vadd.f32 %v3705_v60, %v3308_v22 }
 0xb1d   :  { %3708 = vtanh.f32 %v3322_v18  ;;  %v3313_v28 = vsel %vm3312_vm14, %v3705_v60, %v3309_v21 }
 0xb1e   :  { %v3318_v45 = vsel %vm3315_vm15, %v3317_v40, %v3313_v28 }
 0xb23   :  { %v3709_v4 = vpop.eup %3708 }
 0xb24   :  { %v3324_v31 = vmul.f32 %v3709_v4, %v3318_v45 }
 0xb26   :  { %3366 = vmatmul.f32.vlgmr.msra.gmra.mxu0 %v3324_v31 }
 0xba3   :  { %v3367_v61 = vpop.f32.mrf.mxu0 }
 0xba4   :  { %v3368_v56 = vadd.f32 %v3453_v29, %v3367_v61 }
 0xba6   :  { %3370 = vst [vmem:[#allocation17] sm:$0xff] %v3368_v56 }
 0xba7   :  { %3381 = dma.vmem_to_hbm [thread:$0]  %s3377_s10, 128, %s3379_s14, [#allocation8]  }
 0xba8   :  { %4014 = dma.done.wait [#allocation8], 128  }
 0xba9   :  { %4015 = vsyncadd [#allocation8], 4294967168 }
 0xbaa   :  { %3386 = vsyncpa [#allocation7], 1 }
 0xbab   :  { %3387 = vsyncpa [#allocation10], 1 }
 0xbac   :  { %3388 = vsyncpa [#allocation13], 1 }
 0xbad   :  { %3389 = vsyncpa [#allocation16], 1 }
 0xbae   :  { %3390 = vsyncpa [#allocation8], 1 }

</bundles_post_ra>
